<compile_context>
chip_gen: v7x
topology: tpu7x:2x2x1
jax: 0.10.0
libtpu: 0.0.40
codegen_flags: <defaults>
</compile_context>

<pallas_src>
import functools
import math

import jax
import jax.numpy as jnp
from jax.experimental import pallas as pl
from jax.experimental.pallas import tpu as pltpu

LANE = 128  # TPU lane width


# ------------------------------ Pallas kernel -------------------------------

def _vattn_kernel(xp_ref, wqkv_ref, wout_ref, o_ref, apad_ref, *,
                  v_sz, t_sz, lane, add_input):
    """One batch element of vAttn in (T, V, C) layout.

    xp_ref:   (1, T+2, V+2, LANE)  halo(1)-padded, channel-padded input (f32)
    wqkv_ref: (9*LANE, 3*LANE)     im2col weights, output blocks [q|0][k|0][v|0] (bf16)
    wout_ref: (9*LANE, LANE)       im2col weights of attn_value conv, pre-scaled by sigma (bf16)
    o_ref:    (1, T, V, LANE)      output (f32); lanes >= C are zero
    apad_ref: (T+2, V+2, LANE)     bf16 VMEM scratch: padded attention output
    """
    xp = xp_ref[0]                                     # (T+2, V+2, LANE) f32 (residual)
    xpb = xp.astype(jnp.bfloat16)                      # cast ONCE: im2col moves 2 B/elem

    def im2col(img):                                   # bf16 image -> (T*V, 9*LANE) bf16
        cols = []
        for kh in range(3):          # taps along T (first spatial dim)
            for kw in range(3):      # taps along V (second spatial dim)
                win = img[kh:kh + t_sz, kw:kw + v_sz, :]
                cols.append(win.reshape(t_sz * v_sz, lane))
        return jnp.concatenate(cols, axis=-1)

    # ---- q / k / v 3x3 convs as ONE big-K matmul (M=T*V, K=9*128, N=3*128) ----
    qkv = jnp.dot(im2col(xpb), wqkv_ref[...],
                  preferred_element_type=jnp.float32)  # (T*V, 3*LANE) f32
    qkv = qkv.reshape(t_sz, v_sz, 3 * lane)

    # padded lanes stay exactly 0 (zero weight columns, tanh(0)=0)
    q = jnp.tanh(qkv[:, :, 0 * lane:1 * lane]).astype(jnp.bfloat16)   # (T, V, LANE)
    k = jnp.tanh(qkv[:, :, 1 * lane:2 * lane]).astype(jnp.bfloat16)   # (T, V, LANE)
    val = qkv[:, :, 2 * lane:3 * lane].astype(jnp.bfloat16)           # (T, V, LANE)

    # ---- attention over the V axis, batched over the leading T axis ----
    # scores[t,i,j] = sum_c q[t,i,c] * k[t,j,c]  (padded lanes contribute exact 0)
    scores = jnp.einsum('tic,tjc->tij', q, k,
                        preferred_element_type=jnp.float32)           # (T, V, V) f32
    scores = scores - jnp.max(scores, axis=-1, keepdims=True)
    e = jnp.exp(scores)
    attn = e * pl.reciprocal(jnp.sum(e, axis=-1, keepdims=True), approx=True)
    ctx = jnp.einsum('tij,tjc->tic', attn.astype(jnp.bfloat16), val,
                     preferred_element_type=jnp.float32)              # (T, V, LANE) f32

    # ---- attn_value 3x3 conv (sigma folded into wout) ----
    # Zero ONLY the 1-px halo ring; the interior (incl. padded lanes, which are
    # exactly 0 in ctx) is fully overwritten below.
    zrow = jnp.zeros((1, v_sz + 2, lane), jnp.bfloat16)
    apad_ref[pl.ds(0, 1), :, :] = zrow
    apad_ref[pl.ds(t_sz + 1, 1), :, :] = zrow
    zcol = jnp.zeros((t_sz, 1, lane), jnp.bfloat16)
    apad_ref[pl.ds(1, t_sz), pl.ds(0, 1), :] = zcol
    apad_ref[pl.ds(1, t_sz), pl.ds(v_sz + 1, 1), :] = zcol
    apad_ref[pl.ds(1, t_sz), pl.ds(1, v_sz), :] = ctx.astype(jnp.bfloat16)

    av = jnp.dot(im2col(apad_ref[...]), wout_ref[...],
                 preferred_element_type=jnp.float32)                  # (T*V, LANE) f32
    av = av.reshape(t_sz, v_sz, lane)

    # ---- residual: out = x + sigma * attn_value ----
    if add_input:
        o_ref[0] = xp[1:1 + t_sz, 1:1 + v_sz, :] + av
    else:
        o_ref[0] = av


# ------------------------------ public wrapper -------------------------------

def vattn_forward(x, params, add_input=True):
    """x: (B, C, V, T), same layout as the PyTorch module. Returns (B, C, V, T)."""
    B, C, V, T = x.shape
    cq = params["w_q"].shape[-1]
    cv = params["w_v"].shape[-1]
    assert C <= LANE and cq <= LANE and cv <= LANE, \
        "this kernel assumes every channel dim fits one 128-lane block"

    # NCHW -> (B, T, V, C): T-major so the attention matmuls are batched over
    # the leading T axis (no relayouts). Halo-pad spatial by 1, pad channels to 128.
    xh = jnp.transpose(x, (0, 3, 2, 1)).astype(jnp.float32)           # (B, T, V, C)
    xp = jnp.pad(xh, ((0, 0), (1, 1), (1, 1), (0, LANE - C)))
    Tp, Vp = T + 2, V + 2

    # Fused, lane-padded im2col weights [q | k | v]; original HWIO weights are
    # indexed [kv, kt, cin, cout] — swap the two tap axes to match the (T, V)
    # spatial order used inside the kernel.
    wqkv = jnp.zeros((3, 3, LANE, 3 * LANE), jnp.float32)             # [kv, kt, cin, cout]
    wqkv = wqkv.at[:, :, :C, 0 * LANE:0 * LANE + cq].set(params["w_q"])
    wqkv = wqkv.at[:, :, :C, 1 * LANE:1 * LANE + cq].set(params["w_k"])
    wqkv = wqkv.at[:, :, :C, 2 * LANE:2 * LANE + cv].set(params["w_v"])
    wqkv = jnp.transpose(wqkv, (1, 0, 2, 3)).reshape(9 * LANE, 3 * LANE)
    wqkv = wqkv.astype(jnp.bfloat16)

    # sigma folded into the output-conv weights (saves a full-tile VPU multiply).
    wout = jnp.zeros((3, 3, LANE, LANE), jnp.float32)
    wout = wout.at[:, :, :cv, :C].set(params["sigma"][0] * params["w_o"])
    wout = jnp.transpose(wout, (1, 0, 2, 3)).reshape(9 * LANE, LANE)
    wout = wout.astype(jnp.bfloat16)

    kernel = functools.partial(_vattn_kernel, v_sz=V, t_sz=T, lane=LANE,
                               add_input=add_input)
    out = pl.pallas_call(
        kernel,
        out_shape=jax.ShapeDtypeStruct((B, T, V, LANE), jnp.float32),
        grid=(B,),
        in_specs=[
            pl.BlockSpec((1, Tp, Vp, LANE), lambda b: (b, 0, 0, 0)),
            pl.BlockSpec((9 * LANE, 3 * LANE), lambda b: (0, 0)),
            pl.BlockSpec((9 * LANE, LANE), lambda b: (0, 0)),
        ],
        out_specs=pl.BlockSpec((1, T, V, LANE), lambda b: (b, 0, 0, 0)),
        scratch_shapes=[pltpu.VMEM((Tp, Vp, LANE), jnp.bfloat16)],
        compiler_params=pltpu.CompilerParams(
            dimension_semantics=("parallel",),
            vmem_limit_bytes=32 * 1024 * 1024),
    )(xp, wqkv, wout)

    # (B, T, V, LANE) -> drop padded lanes -> (B, C, V, T)
    return jnp.transpose(out[:, :, :, :C], (0, 3, 2, 1))


# --------------------------- params & JAX reference --------------------------

def init_vattn_params(key, in_channels):
    """Conv weights in HWIO layout (3,3,Cin,Cout); init matches nn.Conv2d defaults."""
    cq = in_channels // 8
    cv = in_channels // 2

    def conv_w(k, cin, cout):
        bound = 1.0 / math.sqrt(cin * 9)
        return jax.random.uniform(k, (3, 3, cin, cout), dtype=jnp.float32,
                                  minval=-bound, maxval=bound)

    kq, kk, kv, ko = jax.random.split(key, 4)
    return dict(
        w_q=conv_w(kq, in_channels, cq),
        w_k=conv_w(kk, in_channels, cq),
        w_v=conv_w(kv, in_channels, cv),
        w_o=conv_w(ko, cv, in_channels),
        sigma=jnp.zeros((1,), jnp.float32),   # PyTorch: nn.Parameter(torch.zeros(1))
    )


def vattn_reference(x, params, add_input=True):
    """Pure-JAX f32 (highest precision) reference of the PyTorch vAttn forward."""
    hp = jax.lax.Precision.HIGHEST

    def conv3x3(inp, w):
        return jax.lax.conv_general_dilated(
            inp, w, window_strides=(1, 1), padding=((1, 1), (1, 1)),
            dimension_numbers=("NCHW", "HWIO", "NCHW"), precision=hp)

    q = jnp.tanh(conv3x3(x, params["w_q"]))            # (B, Cq, V, T)
    k = jnp.tanh(conv3x3(x, params["w_k"]))
    v = conv3x3(x, params["w_v"])                      # (B, Cv, V, T)
    scores = jnp.einsum("bcit,bcjt->btij", q, k, precision=hp)
    attn = jax.nn.softmax(scores, axis=-1)
    ctx = jnp.einsum("btij,bcjt->bcit", attn, v, precision=hp)
    av = conv3x3(ctx, params["w_o"])                   # (B, C, V, T)
    out = params["sigma"] * av
    return x + out if add_input else out


# ---------------------------------- main -------------------------------------

if __name__ == "__main__":
    B, C, V, T = 2, 32, 16, 16            # in_channels=32 -> Cq=4, Cv=16
    key = jax.random.PRNGKey(0)
    key, xkey = jax.random.split(key)
    x = jax.random.normal(xkey, (B, C, V, T), dtype=jnp.float32)

    params = init_vattn_params(key, C)
    # PyTorch initializes sigma to 0 (output would equal x exactly); use a
    # nonzero value so the attention path is actually exercised by the check.
    params["sigma"] = jnp.array([0.5], jnp.float32)

    fwd = jax.jit(vattn_forward, static_argnames=("add_input",))
    out = jax.block_until_ready(fwd(x, params))
    assert out.shape == (B, C, V, T), out.shape

    ref = vattn_reference(x, params)
    err = float(jnp.max(jnp.abs(out - ref)))
    # bf16 MXU operands throughout (f32 accumulation) -> slightly looser bound.
    assert err < 8e-2, f"kernel vs reference max abs err {err}"
    print("KERNEL_OK")
</pallas_src>

<mosaic_0001>
module attributes {stable_mosaic.version = 11 : i64} {
  func.func @_vattn_kernel(%arg0: i32, %arg1: memref<1x18x18x128xf32, #tpu.memory_space<vmem>>, %arg2: memref<1152x384xbf16, #tpu.memory_space<vmem>>, %arg3: memref<1152x128xbf16, #tpu.memory_space<vmem>>, %arg4: memref<1x16x16x128xf32, #tpu.memory_space<vmem>>, %arg5: memref<18x18x128xbf16, #tpu.memory_space<vmem>>) attributes {dimension_semantics = [#tpu.dimension_semantics<parallel>], iteration_bounds = array<i64: 2>, scalar_prefetch = 0 : i64, scratch_operands = 1 : i64, tpu.core_type = #tpu.core_type<tc>, window_params = [{transform_indices = @transform_0, window_bounds = array<i64: 1, 18, 18, 128>}, {pipeline_mode = #tpu.pipeline_mode<synchronous>, transform_indices = @transform_1, window_bounds = array<i64: 1152, 384>}, {pipeline_mode = #tpu.pipeline_mode<synchronous>, transform_indices = @transform_2, window_bounds = array<i64: 1152, 128>}, {transform_indices = @transform_3, window_bounds = array<i64: 1, 16, 16, 128>}]} {
    %c0 = arith.constant 0 : index
    %c0_0 = arith.constant 0 : index
    %c0_1 = arith.constant 0 : index
    %c0_2 = arith.constant 0 : index
    %0 = vector.load %arg1[%c0, %c0_0, %c0_1, %c0_2] : memref<1x18x18x128xf32, #tpu.memory_space<vmem>>, vector<1x18x18x128xf32>
    %1 = vector.shape_cast %0 : vector<1x18x18x128xf32> to vector<18x18x128xf32>
    %2 = arith.truncf %1 : vector<18x18x128xf32> to vector<18x18x128xbf16>
    %3 = vector.extract_strided_slice %2 {offsets = [0, 0, 0], sizes = [16, 16, 128], strides = [1, 1, 1]} : vector<18x18x128xbf16> to vector<16x16x128xbf16>
    %4 = vector.shape_cast %3 : vector<16x16x128xbf16> to vector<256x128xbf16>
    %5 = vector.extract_strided_slice %2 {offsets = [0, 1, 0], sizes = [16, 16, 128], strides = [1, 1, 1]} : vector<18x18x128xbf16> to vector<16x16x128xbf16>
    %6 = vector.shape_cast %5 : vector<16x16x128xbf16> to vector<256x128xbf16>
    %7 = vector.extract_strided_slice %2 {offsets = [0, 2, 0], sizes = [16, 16, 128], strides = [1, 1, 1]} : vector<18x18x128xbf16> to vector<16x16x128xbf16>
    %8 = vector.shape_cast %7 : vector<16x16x128xbf16> to vector<256x128xbf16>
    %9 = vector.extract_strided_slice %2 {offsets = [1, 0, 0], sizes = [16, 16, 128], strides = [1, 1, 1]} : vector<18x18x128xbf16> to vector<16x16x128xbf16>
    %10 = vector.shape_cast %9 : vector<16x16x128xbf16> to vector<256x128xbf16>
    %11 = vector.extract_strided_slice %2 {offsets = [1, 1, 0], sizes = [16, 16, 128], strides = [1, 1, 1]} : vector<18x18x128xbf16> to vector<16x16x128xbf16>
    %12 = vector.shape_cast %11 : vector<16x16x128xbf16> to vector<256x128xbf16>
    %13 = vector.extract_strided_slice %2 {offsets = [1, 2, 0], sizes = [16, 16, 128], strides = [1, 1, 1]} : vector<18x18x128xbf16> to vector<16x16x128xbf16>
    %14 = vector.shape_cast %13 : vector<16x16x128xbf16> to vector<256x128xbf16>
    %15 = vector.extract_strided_slice %2 {offsets = [2, 0, 0], sizes = [16, 16, 128], strides = [1, 1, 1]} : vector<18x18x128xbf16> to vector<16x16x128xbf16>
    %16 = vector.shape_cast %15 : vector<16x16x128xbf16> to vector<256x128xbf16>
    %17 = vector.extract_strided_slice %2 {offsets = [2, 1, 0], sizes = [16, 16, 128], strides = [1, 1, 1]} : vector<18x18x128xbf16> to vector<16x16x128xbf16>
    %18 = vector.shape_cast %17 : vector<16x16x128xbf16> to vector<256x128xbf16>
    %19 = vector.extract_strided_slice %2 {offsets = [2, 2, 0], sizes = [16, 16, 128], strides = [1, 1, 1]} : vector<18x18x128xbf16> to vector<16x16x128xbf16>
    %20 = vector.shape_cast %19 : vector<16x16x128xbf16> to vector<256x128xbf16>
    %21 = tpu.concatenate %4, %6, %8, %10, %12, %14, %16, %18, %20 in 1 : vector<256x128xbf16>, vector<256x128xbf16>, vector<256x128xbf16>, vector<256x128xbf16>, vector<256x128xbf16>, vector<256x128xbf16>, vector<256x128xbf16>, vector<256x128xbf16>, vector<256x128xbf16> -> vector<256x1152xbf16>
    %c0_3 = arith.constant 0 : index
    %c0_4 = arith.constant 0 : index
    %22 = vector.load %arg2[%c0_3, %c0_4] : memref<1152x384xbf16, #tpu.memory_space<vmem>>, vector<1152x384xbf16>
    %cst = arith.constant dense<0.000000e+00> : vector<256x384xf32>
    %23 = tpu.matmul %21, %22, %cst {dimension_numbers = #tpu.dot_dimension_numbers<[1], [0], [0], [1], [0, 0, 1, 1], [], []>} : vector<256x1152xbf16>, vector<1152x384xbf16>, vector<256x384xf32> -> vector<256x384xf32>
    %24 = vector.shape_cast %23 : vector<256x384xf32> to vector<16x16x384xf32>
    %25 = vector.extract_strided_slice %24 {offsets = [0, 0, 0], sizes = [16, 16, 128], strides = [1, 1, 1]} : vector<16x16x384xf32> to vector<16x16x128xf32>
    %26 = math.tanh %25 : vector<16x16x128xf32>
    %27 = arith.truncf %26 : vector<16x16x128xf32> to vector<16x16x128xbf16>
    %28 = vector.extract_strided_slice %24 {offsets = [0, 0, 128], sizes = [16, 16, 128], strides = [1, 1, 1]} : vector<16x16x384xf32> to vector<16x16x128xf32>
    %29 = math.tanh %28 : vector<16x16x128xf32>
    %30 = arith.truncf %29 : vector<16x16x128xf32> to vector<16x16x128xbf16>
    %31 = vector.extract_strided_slice %24 {offsets = [0, 0, 256], sizes = [16, 16, 128], strides = [1, 1, 1]} : vector<16x16x384xf32> to vector<16x16x128xf32>
    %32 = arith.truncf %31 : vector<16x16x128xf32> to vector<16x16x128xbf16>
    "tpu.trace_start"() <{level = 10 : i32, message = "tic,tjc->tij"}> : () -> ()
    %cst_5 = arith.constant dense<0.000000e+00> : vector<16x16x16xf32>
    %33 = tpu.matmul %27, %30, %cst_5 {dimension_numbers = #tpu.dot_dimension_numbers<[2], [2], [1], [1], [0, 0, 0, 1, 1, 1], [0], [0]>} : vector<16x16x128xbf16>, vector<16x16x128xbf16>, vector<16x16x16xf32> -> vector<16x16x16xf32>
    "tpu.trace_stop"() : () -> ()
    %cst_6 = arith.constant dense<0xFF800000> : vector<16x16xf32>
    %34 = vector.multi_reduction <maximumf>, %33, %cst_6 [2] : vector<16x16x16xf32> to vector<16x16xf32>
    %35 = vector.shape_cast %34 : vector<16x16xf32> to vector<16x16x1xf32>
    %36 = vector.broadcast %35 : vector<16x16x1xf32> to vector<16x16x16xf32>
    %37 = arith.subf %33, %36 : vector<16x16x16xf32>
    %38 = math.exp %37 : vector<16x16x16xf32>
    %cst_7 = arith.constant dense<0.000000e+00> : vector<16x16xf32>
    %39 = vector.multi_reduction <add>, %38, %cst_7 [2] : vector<16x16x16xf32> to vector<16x16xf32>
    %40 = vector.shape_cast %39 : vector<16x16xf32> to vector<16x16x1xf32>
    %41 = tpu.reciprocal %40 {approx = true} : vector<16x16x1xf32> -> vector<16x16x1xf32>
    %42 = vector.broadcast %41 : vector<16x16x1xf32> to vector<16x16x16xf32>
    %43 = arith.mulf %38, %42 : vector<16x16x16xf32>
    %44 = arith.truncf %43 : vector<16x16x16xf32> to vector<16x16x16xbf16>
    "tpu.trace_start"() <{level = 10 : i32, message = "tij,tjc->tic"}> : () -> ()
    %cst_8 = arith.constant dense<0.000000e+00> : vector<16x16x128xf32>
    %45 = tpu.matmul %44, %32, %cst_8 {dimension_numbers = #tpu.dot_dimension_numbers<[2], [1], [1], [2], [0, 0, 0, 1, 1, 2], [0], [0]>} : vector<16x16x16xbf16>, vector<16x16x128xbf16>, vector<16x16x128xf32> -> vector<16x16x128xf32>
    %cst_9 = arith.constant 0.000000e+00 : bf16
    "tpu.trace_stop"() : () -> ()
    %46 = vector.broadcast %cst_9 : bf16 to vector<1x18x128xbf16>
    %c0_10 = arith.constant 0 : index
    %c0_11 = arith.constant 0 : index
    %c0_12 = arith.constant 0 : index
    %47 = vector.load %arg5[%c0_10, %c0_11, %c0_12] : memref<18x18x128xbf16, #tpu.memory_space<vmem>>, vector<1x18x128xbf16>
    tpu.vector_store %arg5[%c0_10, %c0_11, %c0_12], %46 {strides = array<i32>} : memref<18x18x128xbf16, #tpu.memory_space<vmem>>, vector<1x18x128xbf16>,
    %c17 = arith.constant 17 : index
    %c0_13 = arith.constant 0 : index
    %c0_14 = arith.constant 0 : index
    %48 = vector.load %arg5[%c17, %c0_13, %c0_14] : memref<18x18x128xbf16, #tpu.memory_space<vmem>>, vector<1x18x128xbf16>
    tpu.vector_store %arg5[%c17, %c0_13, %c0_14], %46 {strides = array<i32>} : memref<18x18x128xbf16, #tpu.memory_space<vmem>>, vector<1x18x128xbf16>,
    %cst_15 = arith.constant 0.000000e+00 : bf16
    %49 = vector.broadcast %cst_15 : bf16 to vector<16x1x128xbf16>
    %c1 = arith.constant 1 : index
    %c0_16 = arith.constant 0 : index
    %c0_17 = arith.constant 0 : index
    %50 = vector.load %arg5[%c1, %c0_16, %c0_17] : memref<18x18x128xbf16, #tpu.memory_space<vmem>>, vector<16x1x128xbf16>
    tpu.vector_store %arg5[%c1, %c0_16, %c0_17], %49 {strides = array<i32>} : memref<18x18x128xbf16, #tpu.memory_space<vmem>>, vector<16x1x128xbf16>,
    %c1_18 = arith.constant 1 : index
    %c17_19 = arith.constant 17 : index
    %c0_20 = arith.constant 0 : index
    %51 = vector.load %arg5[%c1_18, %c17_19, %c0_20] : memref<18x18x128xbf16, #tpu.memory_space<vmem>>, vector<16x1x128xbf16>
    tpu.vector_store %arg5[%c1_18, %c17_19, %c0_20], %49 {strides = array<i32>} : memref<18x18x128xbf16, #tpu.memory_space<vmem>>, vector<16x1x128xbf16>,
    %52 = arith.truncf %45 : vector<16x16x128xf32> to vector<16x16x128xbf16>
    %c1_21 = arith.constant 1 : index
    %c1_22 = arith.constant 1 : index
    %c0_23 = arith.constant 0 : index
    %53 = vector.load %arg5[%c1_21, %c1_22, %c0_23] : memref<18x18x128xbf16, #tpu.memory_space<vmem>>, vector<16x16x128xbf16>
    tpu.vector_store %arg5[%c1_21, %c1_22, %c0_23], %52 {strides = array<i32>} : memref<18x18x128xbf16, #tpu.memory_space<vmem>>, vector<16x16x128xbf16>,
    %c0_24 = arith.constant 0 : index
    %c0_25 = arith.constant 0 : index
    %c0_26 = arith.constant 0 : index
    %54 = vector.load %arg5[%c0_24, %c0_25, %c0_26] : memref<18x18x128xbf16, #tpu.memory_space<vmem>>, vector<18x18x128xbf16>
    %55 = vector.extract_strided_slice %54 {offsets = [0, 0, 0], sizes = [16, 16, 128], strides = [1, 1, 1]} : vector<18x18x128xbf16> to vector<16x16x128xbf16>
    %56 = vector.shape_cast %55 : vector<16x16x128xbf16> to vector<256x128xbf16>
    %57 = vector.extract_strided_slice %54 {offsets = [0, 1, 0], sizes = [16, 16, 128], strides = [1, 1, 1]} : vector<18x18x128xbf16> to vector<16x16x128xbf16>
    %58 = vector.shape_cast %57 : vector<16x16x128xbf16> to vector<256x128xbf16>
    %59 = vector.extract_strided_slice %54 {offsets = [0, 2, 0], sizes = [16, 16, 128], strides = [1, 1, 1]} : vector<18x18x128xbf16> to vector<16x16x128xbf16>
    %60 = vector.shape_cast %59 : vector<16x16x128xbf16> to vector<256x128xbf16>
    %61 = vector.extract_strided_slice %54 {offsets = [1, 0, 0], sizes = [16, 16, 128], strides = [1, 1, 1]} : vector<18x18x128xbf16> to vector<16x16x128xbf16>
    %62 = vector.shape_cast %61 : vector<16x16x128xbf16> to vector<256x128xbf16>
    %63 = vector.extract_strided_slice %54 {offsets = [1, 1, 0], sizes = [16, 16, 128], strides = [1, 1, 1]} : vector<18x18x128xbf16> to vector<16x16x128xbf16>
    %64 = vector.shape_cast %63 : vector<16x16x128xbf16> to vector<256x128xbf16>
    %65 = vector.extract_strided_slice %54 {offsets = [1, 2, 0], sizes = [16, 16, 128], strides = [1, 1, 1]} : vector<18x18x128xbf16> to vector<16x16x128xbf16>
    %66 = vector.shape_cast %65 : vector<16x16x128xbf16> to vector<256x128xbf16>
    %67 = vector.extract_strided_slice %54 {offsets = [2, 0, 0], sizes = [16, 16, 128], strides = [1, 1, 1]} : vector<18x18x128xbf16> to vector<16x16x128xbf16>
    %68 = vector.shape_cast %67 : vector<16x16x128xbf16> to vector<256x128xbf16>
    %69 = vector.extract_strided_slice %54 {offsets = [2, 1, 0], sizes = [16, 16, 128], strides = [1, 1, 1]} : vector<18x18x128xbf16> to vector<16x16x128xbf16>
    %70 = vector.shape_cast %69 : vector<16x16x128xbf16> to vector<256x128xbf16>
    %71 = vector.extract_strided_slice %54 {offsets = [2, 2, 0], sizes = [16, 16, 128], strides = [1, 1, 1]} : vector<18x18x128xbf16> to vector<16x16x128xbf16>
    %72 = vector.shape_cast %71 : vector<16x16x128xbf16> to vector<256x128xbf16>
    %73 = tpu.concatenate %56, %58, %60, %62, %64, %66, %68, %70, %72 in 1 : vector<256x128xbf16>, vector<256x128xbf16>, vector<256x128xbf16>, vector<256x128xbf16>, vector<256x128xbf16>, vector<256x128xbf16>, vector<256x128xbf16>, vector<256x128xbf16>, vector<256x128xbf16> -> vector<256x1152xbf16>
    %c0_27 = arith.constant 0 : index
    %c0_28 = arith.constant 0 : index
    %74 = vector.load %arg3[%c0_27, %c0_28] : memref<1152x128xbf16, #tpu.memory_space<vmem>>, vector<1152x128xbf16>
    %cst_29 = arith.constant dense<0.000000e+00> : vector<256x128xf32>
    %75 = tpu.matmul %73, %74, %cst_29 {dimension_numbers = #tpu.dot_dimension_numbers<[1], [0], [0], [1], [0, 0, 1, 1], [], []>} : vector<256x1152xbf16>, vector<1152x128xbf16>, vector<256x128xf32> -> vector<256x128xf32>
    %76 = vector.shape_cast %75 : vector<256x128xf32> to vector<16x16x128xf32>
    %77 = vector.extract_strided_slice %1 {offsets = [1, 1, 0], sizes = [16, 16, 128], strides = [1, 1, 1]} : vector<18x18x128xf32> to vector<16x16x128xf32>
    %78 = arith.addf %77, %76 : vector<16x16x128xf32>
    %c0_30 = arith.constant 0 : index
    %c0_31 = arith.constant 0 : index
    %c0_32 = arith.constant 0 : index
    %c0_33 = arith.constant 0 : index
    %79 = vector.load %arg4[%c0_30, %c0_31, %c0_32, %c0_33] : memref<1x16x16x128xf32, #tpu.memory_space<vmem>>, vector<1x16x16x128xf32>
    %80 = vector.shape_cast %79 : vector<1x16x16x128xf32> to vector<16x16x128xf32>
    %81 = vector.shape_cast %78 : vector<16x16x128xf32> to vector<1x16x16x128xf32>
    tpu.vector_store %arg4[%c0_30, %c0_31, %c0_32, %c0_33], %81 {strides = array<i32>} : memref<1x16x16x128xf32, #tpu.memory_space<vmem>>, vector<1x16x16x128xf32>,
    return
  }
  func.func @transform_0(%arg0: i32) -> (i32, i32, i32, i32) {
    %c0_i32 = arith.constant 0 : i32
    %c0_i32_0 = arith.constant 0 : i32
    %c0_i32_1 = arith.constant 0 : i32
    %c0_i32_2 = arith.constant 0 : i32
    return %arg0, %c0_i32, %c0_i32_0, %c0_i32_1 : i32, i32, i32, i32
  }
  func.func @transform_1(%arg0: i32) -> (i32, i32) {
    %c0_i32 = arith.constant 0 : i32
    %c0_i32_0 = arith.constant 0 : i32
    %c0_i32_1 = arith.constant 0 : i32
    return %c0_i32, %c0_i32_0 : i32, i32
  }
  func.func @transform_2(%arg0: i32) -> (i32, i32) {
    %c0_i32 = arith.constant 0 : i32
    %c0_i32_0 = arith.constant 0 : i32
    %c0_i32_1 = arith.constant 0 : i32
    return %c0_i32, %c0_i32_0 : i32, i32
  }
  func.func @transform_3(%arg0: i32) -> (i32, i32, i32, i32) {
    %c0_i32 = arith.constant 0 : i32
    %c0_i32_0 = arith.constant 0 : i32
    %c0_i32_1 = arith.constant 0 : i32
    %c0_i32_2 = arith.constant 0 : i32
    return %arg0, %c0_i32, %c0_i32_0, %c0_i32_1 : i32, i32, i32, i32
  }
}

</mosaic_0001>

<bundles_post_ra>
// kernel: vattn_forward.1
= control target key start
LH: loop header
LB: loop body
LE: loop exit
PB: predicated region body
PF: predicated region fallthrough
CT: control target
= control target key end

     0   :  { %s11607_s12 = smov 0   ;;  %s15551_s0 = inlined_call_operand.vmem [shape: f32[2,18,18,128], index: 0, kind: input, shape index: {}]   ;;  %s15552_s1 = inlined_call_operand.vmem [shape: bf16[1152,384], index: 1, kind: input, shape index: {}]   ;;  %s15553_s2 = inlined_call_operand.vmem [shape: bf16[1152,128], index: 2, kind: input, shape index: {}]   ;;  %s15554_s3 = inlined_call_operand.vmem [shape: f32[2,16,16,128], index: 3, kind: output, shape index: {}]  }
   0x1 LB: > { %s8847_s13 = sadd.s32 4294967295, %s11582_s12   ;;  %p8851_p0 = scmp.ge.s32.totalorder %s11582_s12, 1  ;;  %s11582_s12 = sphi %s11607_s12, %s13_s12  }
   0x2   : > { %p137_p1 = scmp.lt.s32.totalorder %s11582_s12, 3 }
   0x4   : > { %p138_p2 = pnand %p8851_p0, %p137_p1 }
   0x6   : > { %141 = sbr.rel (%p138_p2) target bundleno = 2197 (0x895), region = 32 }
   0xd   : > { %v10878_v0 = vld [vmem:[%s15552_s1 + $0x4] ss:$12 sps:$4 sm:$0xff]   ;;  %v15555_v2 = vmov 0   ;;  %v10882_v3 = vld [vmem:[%s15552_s1] ss:$12 sps:$4 sm:$0xff]   ;;  %p161_p3 = scmp.lt.s32.totalorder %s8847_s13, 1 }
   0xe   : > { %v10880_v1 = vld [vmem:[%s15552_s1 + $0x604] ss:$12 sps:$4 sm:$0xff]   ;;  %2970 = vmatprep.mubr.bf16.mxu1 %v15555_v2  ;;  %5657 = vst [vmem:[#allocation2] sm:$0xf] %v15555_v2  ;;  %5658 = vst [vmem:[#allocation2 + $0x4] sm:$0xf] %v15555_v2  ;;  %2046 = vmatprep.subr.bf16.mxu0 %v10878_v0 }
   0xf   : > { %5659 = vst [vmem:[#allocation2 + $0x8] sm:$0x1] %v15555_v2  ;;  %5661 = vst [vmem:[#allocation2 + $0xcc] sm:$0xf] %v15555_v2  ;;  %v10883_v4 = vld [vmem:[%s15552_s1 + $0x600] ss:$12 sps:$4 sm:$0xff]   ;;  %10594 = vmatprep.subr.bf16.mxu1 %v10880_v1  ;;  %2047 = vmatpush1.bf16.msra.mxu0 %v10882_v3 }
  0x10   : > { %5662 = vst [vmem:[#allocation2 + $0xd0] sm:$0xf] %v15555_v2  ;;  %5663 = vst [vmem:[#allocation2 + $0xd4] sm:$0x1] %v15555_v2  ;;  %v10884_v5 = vld [vmem:[%s15552_s1 + $0x1c] ss:$12 sps:$4 sm:$0xff]   ;;  %10602 = vmatpush1.bf16.msra.mxu1 %v10883_v4 }
  0x11   : > { %v10886_v6 = vld [vmem:[%s15552_s1 + $0x61c] ss:$12 sps:$4 sm:$0xff]   ;;  %v10888_v7 = vld [vmem:[%s15552_s1 + $0x18] ss:$12 sps:$4 sm:$0xff]   ;;  %2048 = vmatprep.subr.bf16.mxu0 %v10884_v5  ;;  %v10890_v9 = vld [vmem:[%s15552_s1 + $0x34] ss:$12 sps:$4 sm:$0xff]  }
  0x12   : > { %v10889_v8 = vld [vmem:[%s15552_s1 + $0x618] ss:$12 sps:$4 sm:$0xff]   ;;  %10595 = vmatprep.subr.bf16.mxu1 %v10886_v6  ;;  %v10892_v10 = vld [vmem:[%s15552_s1 + $0x634] ss:$12 sps:$4 sm:$0xff]   ;;  %v10894_v11 = vld [vmem:[%s15552_s1 + $0x30] ss:$12 sps:$4 sm:$0xff]  }
  0x13   : > { %v10895_v12 = vld [vmem:[%s15552_s1 + $0x630] ss:$12 sps:$4 sm:$0xff]   ;;  %2049 = vmatpush1.bf16.msra.mxu0 %v10888_v7  ;;  %v10896_v13 = vld [vmem:[%s15552_s1 + $0x4c] ss:$12 sps:$4 sm:$0xff]   ;;  %v10900_v15 = vld [vmem:[%s15552_s1 + $0x48] ss:$12 sps:$4 sm:$0xff]  }
  0x14   : > { %10603 = vmatpush1.bf16.msra.mxu1 %v10889_v8  ;;  %2050 = vmatprep.subr.bf16.mxu0 %v10890_v9  ;;  %v10898_v14 = vld [vmem:[%s15552_s1 + $0x64c] ss:$12 sps:$4 sm:$0xff]   ;;  %s15795_s13 = smov (!%p161_p3, %s8847_s13), 1  ;;  %v10901_v16 = vld [vmem:[%s15552_s1 + $0x648] ss:$12 sps:$4 sm:$0xff]   ;;  %vm503_vm0 = vcmask 1046528  }
  0x15   : > { %10596 = vmatprep.subr.bf16.mxu1 %v10892_v10  ;;  %v10902_v17 = vld [vmem:[%s15552_s1 + $0x64] ss:$12 sps:$4 sm:$0xff]   ;;  %v10906_v19 = vld [vmem:[%s15552_s1 + $0x60] ss:$12 sps:$4 sm:$0xff]   ;;  %s10866_s29 = smul.u32 432, %s15795_s13  ;;  %vm11586_vm2 = vmmov 0  }
  0x16   : > { %v10904_v18 = vld [vmem:[%s15552_s1 + $0x664] ss:$12 sps:$4 sm:$0xff]   ;;  %v10907_v20 = vld [vmem:[%s15552_s1 + $0x660] ss:$12 sps:$4 sm:$0xff]   ;;  %v10908_v21 = vld [vmem:[%s15552_s1 + $0x7c] ss:$12 sps:$4 sm:$0xff]  }
  0x17   : > { %2051 = vmatpush1.bf16.msra.mxu0 %v10894_v11  ;;  %v10910_v22 = vld [vmem:[%s15552_s1 + $0x67c] ss:$12 sps:$4 sm:$0xff]   ;;  %v10912_v23 = vld [vmem:[%s15552_s1 + $0x78] ss:$12 sps:$4 sm:$0xff]   ;;  %s11701_s11 = scalar_lea.vmem %s15551_s0, %s10866_s29  ;;  %v10914_v25 = vld [vmem:[%s15552_s1 + $0x94] ss:$12 sps:$4 sm:$0xff]  }
  0x18   : > { %10604 = vmatpush1.bf16.msra.mxu1 %v10895_v12  ;;  %2052 = vmatprep.subr.bf16.mxu0 %v10896_v13  ;;  %v10913_v24 = vld [vmem:[%s15552_s1 + $0x678] ss:$12 sps:$4 sm:$0xff]   ;;  %v10916_v26 = vld [vmem:[%s15552_s1 + $0x694] ss:$12 sps:$4 sm:$0xff]   ;;  %v10918_v27 = vld [vmem:[%s15552_s1 + $0x90] ss:$12 sps:$4 sm:$0xff]  }
  0x19   : > { %10597 = vmatprep.subr.bf16.mxu1 %v10898_v14  ;;  %v214_v28 = vld [vmem:[%s11701_s11 + $0x150] sm:$0xff]  ;;  %v215_v29 = vld [vmem:[%s11701_s11 + $0x158] sm:$0xff]  ;;  %v216_v30 = vld [vmem:[%s11701_s11 + $0x160] sm:$0x3]  ;;  %vm262_vm1 = vsmask.f32 7424 }
  0x1a   : > { %v10919_v31 = vld [vmem:[%s15552_s1 + $0x690] ss:$12 sps:$4 sm:$0xff]   ;;  %v10920_v32 = vld [vmem:[%s15552_s1 + $0xac] ss:$12 sps:$4 sm:$0xff]   ;;  %v11724_v33 = vpack.c.bf16 %v215_v29, %v214_v28  ;;  %v11726_v34 = vpack.c.bf16 %v216_v30, %v216_v30  ;;  %v10924_v36 = vld [vmem:[%s15552_s1 + $0xa8] ss:$12 sps:$4 sm:$0xff]  }
  0x1b   : > { %2053 = vmatpush1.bf16.msra.mxu0 %v10900_v15  ;;  %v10922_v35 = vld [vmem:[%s15552_s1 + $0x6ac] ss:$12 sps:$4 sm:$0xff]   ;;  %v10925_v37 = vld [vmem:[%s15552_s1 + $0x6a8] ss:$12 sps:$4 sm:$0xff]   ;;  %v10926_v38 = vld [vmem:[%s15552_s1 + $0xc4] ss:$12 sps:$4 sm:$0xff]  }
  0x1c   : > { %10605 = vmatpush1.bf16.msra.mxu1 %v10901_v16  ;;  %2054 = vmatprep.subr.bf16.mxu0 %v10902_v17  ;;  %15620 = vst [vmem:[#allocation3_spill] sm:$0xff] %v11724_v33  ;;  %v546_v39 = vrot.slane %v11724_v33, 1  ;;  %v547_v40 = vrot.slane %v11726_v34, 1  ;;  %v10928_v41 = vld [vmem:[%s15552_s1 + $0xc8] ss:$12 sps:$4 sm:$0xff]   ;;  %v220_v58 = vld [vmem:[%s11701_s11 + $0x180] sm:$0xff] }
  0x1d   : > { %10598 = vmatprep.subr.bf16.mxu1 %v10904_v18  ;;  %v10929_v42 = vld [vmem:[%s15552_s1 + $0xc0] ss:$12 sps:$4 sm:$0xff]   ;;  %v218_v44 = vld [vmem:[%s11701_s11 + $0x170] sm:$0xff]  ;;  %v219_v45 = vld [vmem:[%s11701_s11 + $0x178] sm:$0x3]  ;;  %vm4584_vm3 = vcmask 130048  }
  0x1e   : > { %v217_v43 = vld [vmem:[%s11701_s11 + $0x168] sm:$0xff]  ;;  %v11755_v47 = vsel %vm503_vm0, %v546_v39, %v547_v40  ;;  %v11762_v50 = vpack.c.bf16 %v219_v45, %v219_v45  ;;  %v10934_v52 = vld [vmem:[%s15552_s1 + $0xd8] ss:$12 sps:$4 sm:$0xff]   ;;  %v10936_v54 = vld [vmem:[%s15552_s1 + $0xf4] ss:$12 sps:$4 sm:$0xff]   ;;  %vm5665_vm4 = vcmask 1040384  }
  0x1f   : > { %2055 = vmatpush1.bf16.msra.mxu0 %v10906_v19  ;;  %v10930_v46 = vld [vmem:[%s15552_s1 + $0x8] ss:$12 sps:$4 sm:$0xff]   ;;  %15621 = vst [vmem:[#allocation4_spill] sm:$0xff] %v11755_v47  ;;  %v11760_v49 = vpack.c.bf16 %v218_v44, %v217_v43  ;;  %v10933_v51 = vld [vmem:[%s15552_s1 + $0xe0] ss:$12 sps:$4 sm:$0xff]   ;;  %v223_v11 = vld [vmem:[%s11701_s11 + $0x198] sm:$0xff] }
  0x20   : > { %10606 = vmatpush1.bf16.msra.mxu1 %v10907_v20  ;;  %2056 = vmatprep.subr.bf16.mxu0 %v10908_v21  ;;  %v10931_v48 = vld [vmem:[%s15552_s1 + $0xdc] ss:$12 sps:$4 sm:$0xff]   ;;  %v10935_v53 = vld [vmem:[%s15552_s1 + $0x20] ss:$12 sps:$4 sm:$0xff]   ;;  %v550_v56 = vrot.slane %v11762_v50, 1  ;;  %v178_v40 = vld [vmem:[%s11701_s11 + $0x30] sm:$0xff] }
  0x21   : > { %10599 = vmatprep.subr.bf16.mxu1 %v10910_v22  ;;  %15622 = vst [vmem:[#allocation5_spill] sm:$0xff] %v11760_v49  ;;  %v549_v55 = vrot.slane %v11760_v49, 1  ;;  %v10938_v57 = vld [vmem:[%s15552_s1 + $0xf8] ss:$12 sps:$4 sm:$0xff]   ;;  %v221_v59 = vld [vmem:[%s11701_s11 + $0x188] sm:$0xff]  ;;  %vm6787_vm9 = vcmask 1042432  }
  0x22   : > { %v222_v60 = vld [vmem:[%s11701_s11 + $0x190] sm:$0x3]  ;;  %v10940_v62 = vld [vmem:[%s15552_s1 + $0x38] ss:$12 sps:$4 sm:$0xff]   ;;  %v11798_v1 = vpack.c.bf16 %v221_v59, %v220_v58  ;;  %v10944_v5 = vld [vmem:[%s15552_s1 + $0x108] ss:$12 sps:$4 sm:$0xff]  }
  0x23   : > { %2057 = vmatpush1.bf16.msra.mxu0 %v10912_v23  ;;  %v10939_v61 = vld [vmem:[%s15552_s1 + $0xf0] ss:$12 sps:$4 sm:$0xff]   ;;  %v11793_v63 = vsel %vm503_vm0, %v549_v55, %v550_v56  ;;  %v10941_v0 = vld [vmem:[%s15552_s1 + $0x10c] ss:$12 sps:$4 sm:$0xff]   ;;  %v11800_v3 = vpack.c.bf16 %v222_v60, %v222_v60  ;;  %v10948_v10 = vld [vmem:[%s15552_s1 + $0x128] ss:$12 sps:$4 sm:$0xff]  }
  0x24   : > { %10607 = vmatpush1.bf16.msra.mxu1 %v10913_v24  ;;  %2058 = vmatprep.subr.bf16.mxu0 %v10914_v25  ;;  %15623 = vst [vmem:[#allocation6_spill] sm:$0xff] %v11793_v63  ;;  %v10943_v4 = vld [vmem:[%s15552_s1 + $0x110] ss:$12 sps:$4 sm:$0xff]   ;;  %v583_v8 = vrot.slane %v11798_v1, 1  ;;  %v224_v12 = vld [vmem:[%s11701_s11 + $0x1a0] sm:$0xff]  ;;  %v173_v28 = vld [vmem:[%s11701_s11 + $0x8] sm:$0xff] }
  0x25   : > { %10600 = vmatprep.subr.bf16.mxu1 %v10916_v26  ;;  %v10945_v6 = vld [vmem:[%s15552_s1 + $0x50] ss:$12 sps:$4 sm:$0xff]   ;;  %v584_v9 = vrot.slane %v11800_v3, 1  ;;  %v225_v13 = vld [vmem:[%s11701_s11 + $0x1a8] sm:$0x3]  ;;  %v11836_v18 = vpack.c.bf16 %v224_v12, %v223_v11  ;;  %vm6788_vm10 = vcmask 1046532  }
  0x26   : > { %v10946_v7 = vld [vmem:[%s15552_s1 + $0x124] ss:$12 sps:$4 sm:$0xff]   ;;  %v10949_v14 = vld [vmem:[%s15552_s1 + $0x120] ss:$12 sps:$4 sm:$0xff]   ;;  %v10950_v15 = vld [vmem:[%s15552_s1 + $0x68] ss:$12 sps:$4 sm:$0xff]   ;;  %v11838_v19 = vpack.c.bf16 %v225_v13, %v225_v13 }
  0x27   : > { %2059 = vmatpush1.bf16.msra.mxu0 %v10918_v27  ;;  %v11831_v16 = vsel %vm503_vm0, %v583_v8, %v584_v9  ;;  %v10951_v17 = vld [vmem:[%s15552_s1 + $0x13c] ss:$12 sps:$4 sm:$0xff]   ;;  %15624 = vst [vmem:[#allocation7_spill] sm:$0xff] %v11836_v18  ;;  %v10953_v20 = vld [vmem:[%s15552_s1 + $0x140] ss:$12 sps:$4 sm:$0xff]   ;;  %v602_v25 = vrot.slane %v11836_v18, 1  ;;  %vm14013_vm11 = vmor %vm6787_vm9, %vm6788_vm10 }
  0x28   : > { %10608 = vmatpush1.bf16.msra.mxu1 %v10919_v31  ;;  %2060 = vmatprep.subr.bf16.mxu0 %v10920_v32  ;;  %15625 = vst [vmem:[#allocation8_spill] sm:$0xff] %v11838_v19  ;;  %v10954_v21 = vld [vmem:[%s15552_s1 + $0x138] ss:$12 sps:$4 sm:$0xff]   ;;  %v10955_v22 = vld [vmem:[%s15552_s1 + $0x80] ss:$12 sps:$4 sm:$0xff]   ;;  %v603_v26 = vrot.slane %v11838_v19, 1 }
  0x29   : > { %10601 = vmatprep.subr.bf16.mxu1 %v10922_v35  ;;  %v10956_v23 = vld [vmem:[%s15552_s1 + $0x154] ss:$12 sps:$4 sm:$0xff]   ;;  %v10958_v24 = vld [vmem:[%s15552_s1 + $0x158] ss:$12 sps:$4 sm:$0xff]   ;;  %v174_v29 = vld [vmem:[%s11701_s11 + $0x10] sm:$0x3] }
  0x2a   : > { %v172_v27 = vld [vmem:[%s11701_s11] sm:$0xff]  ;;  %v11863_v31 = vpack.c.bf16 %v174_v29, %v174_v29  ;;  %v175_v32 = vld [vmem:[%s11701_s11 + $0x18] sm:$0xff]  ;;  %v181_v8 = vld [vmem:[%s11701_s11 + $0x48] sm:$0xff]  ;;  %vm5666_vm5 = vsmask.f32 256  ;;  %vm6184_vm15 = vcmask 1043456  }
  0x2b   : > { %2061 = vmatpush1.bf16.msra.mxu0 %v10924_v36  ;;  %v11861_v30 = vpack.c.bf16 %v173_v28, %v172_v27  ;;  %v176_v35 = vld [vmem:[%s11701_s11 + $0x20] sm:$0xff]  ;;  %v177_v36 = vld [vmem:[%s11701_s11 + $0x28] sm:$0x3]  ;;  %v182_v9 = vld [vmem:[%s11701_s11 + $0x50] sm:$0xff]  ;;  %vm5716_vm7 = vsmask.f32 7938 }
  0x2c   : > { %10609 = vmatpush1.bf16.msra.mxu1 %v10925_v37  ;;  %2062 = vmatprep.subr.bf16.mxu0 %v10926_v38  ;;  %v10959_v37 = vld [vmem:[%s15552_s1 + $0x150] ss:$12 sps:$4 sm:$0xff]   ;;  %v11872_v38 = vpack.c.bf16 %v176_v35, %v175_v32  ;;  %v11874_v39 = vpack.c.bf16 %v177_v36, %v177_v36  ;;  %v271_v45 = vshll.u32 %v11863_v31, 16  ;;  %v11915_v11 = vpack.c.bf16 %v182_v9, %v181_v8  ;;  %v184_v27 = vld [vmem:[%s11701_s11 + $0x60] sm:$0xff]  ;;  %v185_v28 = vld [vmem:[%s11701_s11 + $0x68] sm:$0xff]  ;;  %s9265_s24 = sshll.u32 %s15795_s13, 8 }
  0x2d   : > { %9298 = vmatprep.subr.bf16.mxu1 %v10928_v41  ;;  %v179_v41 = vld [vmem:[%s11701_s11 + $0x38] sm:$0xff]  ;;  %v264_v43 = vshrl.u32 %v11861_v30, 16  ;;  %v266_v44 = vshll.u32 %v11861_v30, 16  ;;  %v10974_v29 = vld [vmem:[%s15552_s1 + $0x1b4] ss:$12 sps:$4 sm:$0xff]   ;;  %v505_v9 = vrot.slane %v11863_v31, 1  ;;  %vm13961_vm6 = vmand %vm5665_vm4, %vm5666_vm5  ;;  %s15381_s27 = scalar_lea.vmem %s15554_s3, %s9265_s24 }
  0x2e   : > { %v273_v55 = vrot.slane %v271_v45, 1  ;;  %v283_v56 = vshll.u32 %v11874_v39, 16  ;;  %v11897_v58 = vpack.c.bf16 %v179_v41, %v178_v40  ;;  %v300_v32 = vshrl.u32 %v11915_v11, 16  ;;  %v10972_v41 = vld [vmem:[%s15552_s1 + $0x1b0] ss:$12 sps:$4 sm:$0xff]   ;;  %vm13969_vm8 = vmand %vm5665_vm4, %vm5716_vm7 }
  0x2f   : > { %2971 = vmatmul.mubr.bf16.vlgmr.msra.gmra.mrb[0].mxu1 %v11755_v47  ;;  %2063 = vmatpush1.bf16.msra.mxu0 %v10929_v42  ;;  %v10960_v42 = vld [vmem:[%s15552_s1 + $0x98] ss:$12 sps:$4 sm:$0xff]   ;;  %v11949_v40 = vpack.c.bf16 %v185_v28, %v184_v27  ;;  %v10993_v8 = vld [vmem:[%s15552_s1 + $0x248] ss:$12 sps:$4 sm:$0xff]   ;;  %v504_v28 = vrot.slane %v11861_v30, 1 }
  0x30   : > { %9299 = vmatpush3.bf16.msra.mxu1 %v10930_v46  ;;  %2064 = vmatprep.subr.bf16.mxu0 %v10931_v48  ;;  %v11885_v46 = vsel %vm503_vm0, %v602_v25, %v603_v26  ;;  %v10961_v48 = vld [vmem:[%s15552_s1 + $0x16c] ss:$12 sps:$4 sm:$0xff]   ;;  %v288_v13 = vshrl.u32 %v11897_v58, 16  ;;  %v302_v25 = vshll.u32 %v11915_v11, 16  ;;  %vm6352_vm12 = vsmask.f32 3328 }
  0x31   : > { %9300 = vmatprep.subr.bf16.mxu1 %v10933_v51  ;;  %2980 = vmatprep.mubr.bf16.mxu1 %v15555_v2  ;;  %15626 = vst [vmem:[#allocation9_spill] sm:$0xff] %v11885_v46  ;;  %v10963_v51 = vld [vmem:[%s15552_s1 + $0x170] ss:$12 sps:$4 sm:$0xff]   ;;  %v10969_v26 = vld [vmem:[%s15552_s1 + $0x198] ss:$12 sps:$4 sm:$0xff]  }
  0x32   : > { %v304_v36 = vrot.slane %v302_v25, 1  ;;  %v10981_v31 = vld [vmem:[%s15552_s1 + $0x1f8] ss:$12 sps:$4 sm:$0xff]   ;;  %vm6353_vm13 = vsmask.f32 7440 }
  0x33   : > { %2065 = vmatpush1.bf16.msra.mxu0 %v10934_v52  ;;  %v276_v52 = vshrl.u32 %v11872_v38, 16  ;;  %vm14066_vm14 = vmor %vm6352_vm12, %vm6353_vm13 }
  0x34   : > { %9301 = vmatpush3.bf16.msra.mxu1 %v10935_v53  ;;  %2066 = vmatprep.subr.bf16.mxu0 %v10936_v54  ;;  %v278_v53 = vshll.u32 %v11872_v38, 16  ;;  %v268_v54 = vrot.slane %v266_v44, 1  ;;  %v305_v44 = vor.u32 %v304_v36, %v300_v32 }
  0x35   : > { %9302 = vmatprep.subr.bf16.mxu1 %v10938_v57  ;;  %v180_v57 = vld [vmem:[%s11701_s11 + $0x40] sm:$0x3] }
  0x36   : > { %v280_v59 = vrot.slane %v278_v53, 1  ;;  %v269_v60 = vor.u32 %v268_v54, %v264_v43  ;;  %v10977_v43 = vld [vmem:[%s15552_s1 + $0x1cc] ss:$12 sps:$4 sm:$0xff]   ;;  %v10975_v53 = vld [vmem:[%s15552_s1 + $0x1c8] ss:$12 sps:$4 sm:$0xff]   ;;  %v188_v54 = vld [vmem:[%s11701_s11 + $0x80] sm:$0xff] }
  0x37   : > { %2981 = vmatmul.mubr.bf16.gmra.mrb[4].mxu1 %v11793_v63  ;;  %2067 = vmatpush1.bf16.msra.mxu0 %v10939_v61  ;;  %v10964_v61 = vld [vmem:[%s15552_s1 + $0x168] ss:$12 sps:$4 sm:$0xff]  }
  0x38   : > { %9303 = vmatpush3.bf16.msra.mxu1 %v10940_v62  ;;  %2068 = vmatprep.subr.bf16.mxu0 %v10941_v0  ;;  %v10965_v62 = vld [vmem:[%s15552_s1 + $0xb0] ss:$12 sps:$4 sm:$0xff]   ;;  %v11906_v0 = vpack.c.bf16 %v180_v57, %v180_v57 }
  0x39   : > { %9304 = vmatprep.subr.bf16.mxu1 %v10943_v4  ;;  %2990 = vmatprep.mubr.bf16.mxu1 %v15555_v2  ;;  %v274_v4 = vsel %vm262_vm1, %v269_v60, %v273_v55  ;;  %v10980_v55 = vld [vmem:[%s15552_s1 + $0x1e4] ss:$12 sps:$4 sm:$0xff]  }
  0x3a   : > { %2078 = vmatprep.mubr.bf16.mxu0 %v274_v4 }
  0x3b   : > { %2069 = vmatpush1.bf16.msra.mxu0 %v10944_v5  ;;  %v281_v5 = vor.u32 %v280_v59, %v276_v52  ;;  %v187_v52 = vld [vmem:[%s11701_s11 + $0x78] sm:$0xff] }
  0x3c   : > { %9305 = vmatpush3.bf16.msra.mxu1 %v10945_v6  ;;  %2070 = vmatprep.subr.bf16.mxu0 %v10946_v7  ;;  %v285_v6 = vrot.slane %v283_v56, 1  ;;  %v290_v7 = vshll.u32 %v11897_v58, 16  ;;  %v312_v56 = vshrl.u32 %v11949_v40, 16 }
  0x3d   : > { %9306 = vmatprep.subr.bf16.mxu1 %v10948_v10  ;;  %v10968_v10 = vld [vmem:[%s15552_s1 + $0x184] ss:$12 sps:$4 sm:$0xff]  }
  0x3e   : > { %v11918_v12 = vsel %vm262_vm1, %v281_v5, %v285_v6  ;;  %v10983_v5 = vld [vmem:[%s15552_s1 + $0x1fc] ss:$12 sps:$4 sm:$0xff]   ;;  %v190_v6 = vld [vmem:[%s11701_s11 + $0x90] sm:$0xff] }
  0x3f   : > { %2991 = vmatmul.mubr.bf16.gmra.mrb[8].mxu1 %v11831_v16  ;;  %2071 = vmatpush1.bf16.msra.mxu0 %v10949_v14  ;;  %v292_v14 = vrot.slane %v290_v7, 1  ;;  %v191_v7 = vld [vmem:[%s11701_s11 + $0x98] sm:$0xff] }
  0x40   : > { %9307 = vmatpush3.bf16.msra.mxu1 %v10950_v15  ;;  %2072 = vmatprep.subr.bf16.mxu0 %v10951_v17  ;;  %v295_v15 = vshll.u32 %v11906_v0, 16  ;;  %v10966_v17 = vld [vmem:[%s15552_s1 + $0x180] ss:$12 sps:$4 sm:$0xff]   ;;  %v12018_v27 = vpack.c.bf16 %v191_v7, %v190_v6 }
  0x41   : > { %9308 = vmatprep.subr.bf16.mxu1 %v10953_v20  ;;  %3000 = vmatprep.mubr.bf16.mxu1 %v15555_v2  ;;  %v183_v20 = vld [vmem:[%s11701_s11 + $0x58] sm:$0x3]  ;;  %v10990_v7 = vld [vmem:[%s15552_s1 + $0x240] ss:$12 sps:$4 sm:$0xff]  }
  0x42   : > { %v11038_v2 = vld [vmem:[%s15552_s1 + $0x334] ss:$12 sps:$4 sm:$0xff]  }
  0x43   : > { %2073 = vmatpush1.bf16.msra.mxu0 %v10954_v21  ;;  %v10971_v21 = vld [vmem:[%s15552_s1 + $0x19c] ss:$12 sps:$4 sm:$0xff]  }
  0x44   : > { %9309 = vmatpush3.bf16.msra.mxu1 %v10955_v22  ;;  %2074 = vmatprep.subr.bf16.mxu0 %v10956_v23  ;;  %v293_v22 = vor.u32 %v292_v14, %v288_v13  ;;  %v297_v23 = vrot.slane %v295_v15, 1  ;;  %v192_v13 = vld [vmem:[%s11701_s11 + $0xa0] sm:$0x3]  ;;  %v10994_v14 = vld [vmem:[%s15552_s1 + $0x188] ss:$12 sps:$4 sm:$0xff]  }
  0x45   : > { %9310 = vmatprep.subr.bf16.mxu1 %v10958_v24  ;;  %v11933_v24 = vpack.c.bf16 %v183_v20, %v183_v20  ;;  %v12024_v36 = vpack.c.bf16 %v192_v13, %v192_v13  ;;  %v11013_v13 = vld [vmem:[%s15552_s1 + $0x2a8] ss:$12 sps:$4 sm:$0xff]  }
  0x46   : > { %v11946_v35 = vsel %vm262_vm1, %v293_v22, %v297_v23  ;;  %v10998_v22 = vld [vmem:[%s15552_s1 + $0x260] ss:$12 sps:$4 sm:$0xff]  }
  0x47   : > { %3001 = vmatmul.mubr.bf16.gmra.mrb[12].mxu1 %v11885_v46  ;;  %2075 = vmatpush1.bf16.msra.mxu0 %v10959_v37  ;;  %v307_v37 = vshll.u32 %v11933_v24, 16  ;;  %v10999_v23 = vld [vmem:[%s15552_s1 + $0x1a0] ss:$12 sps:$4 sm:$0xff]  }
  0x48   : > { %9311 = vmatpush3.bf16.msra.mxu1 %v10960_v42  ;;  %2076 = vmatprep.subr.bf16.mxu0 %v10961_v48  ;;  %v186_v42 = vld [vmem:[%s11701_s11 + $0x70] sm:$0x3] }
  0x49   : > { %9312 = vmatprep.subr.bf16.mxu1 %v10963_v51  ;;  %3043 = vmatprep.mubr.bf16.mxu1 %v274_v4  ;;  %v309_v45 = vrot.slane %v307_v37, 1  ;;  %v11962_v48 = vpack.c.bf16 %v186_v42, %v186_v42  ;;  %v314_v51 = vshll.u32 %v11949_v40, 16  ;;  %v10978_v4 = vld [vmem:[%s15552_s1 + $0x1e0] ss:$12 sps:$4 sm:$0xff]   ;;  %v10984_v37 = vld [vmem:[%s15552_s1 + $0x210] ss:$12 sps:$4 sm:$0xff]  }
  0x4a   : > { %v193_v42 = vld [vmem:[%s11701_s11 + $0xa8] sm:$0xff] }
  0x4b   : > { %2077 = vmatpush1.bf16.msra.mxu0 %v10964_v61  ;;  %v11975_v57 = vsel %vm262_vm1, %v305_v44, %v309_v45  ;;  %v316_v59 = vrot.slane %v314_v51, 1  ;;  %v319_v60 = vshll.u32 %v11962_v48, 16  ;;  %v189_v61 = vld [vmem:[%s11701_s11 + $0x88] sm:$0x3]  ;;  %v194_v44 = vld [vmem:[%s11701_s11 + $0xb0] sm:$0xff]  ;;  %v338_v45 = vshll.u32 %v12018_v27, 16 }
  0x4c   : > { %9313 = vmatpush3.bf16.msra.mxu1 %v10965_v62  ;;  %2239 = vmatprep.subr.bf16.mxu0 %v10968_v10  ;;  %v11979_v62 = vpack.c.bf16 %v188_v54, %v187_v52  ;;  %v11997_v10 = vpack.c.bf16 %v189_v61, %v189_v61  ;;  %v11004_v51 = vld [vmem:[%s15552_s1 + $0x1b8] ss:$12 sps:$4 sm:$0xff]   ;;  %v343_v54 = vshll.u32 %v12024_v36, 16  ;;  %v12059_v61 = vpack.c.bf16 %v194_v44, %v193_v42  ;;  %v11000_v42 = vld [vmem:[%s15552_s1 + $0x270] ss:$12 sps:$4 sm:$0xff]  }
  0x4d   : > { %v317_v15 = vor.u32 %v316_v59, %v312_v56  ;;  %9410 = vmatprep.subr.bf16.mxu1 %v10993_v8  ;;  %v10992_v56 = vld [vmem:[%s15552_s1 + $0x244] ss:$12 sps:$4 sm:$0xff]   ;;  %v195_v59 = vld [vmem:[%s11701_s11 + $0xb8] sm:$0x3]  ;;  %v340_v6 = vrot.slane %v338_v45, 1 }
  0x4e   : > { %2079 = vmatmul.mubr.bf16.vlgmr.msra.gmra.mrb[0].mxu0 %v11861_v30  ;;  %v326_v20 = vshll.u32 %v11979_v62, 16  ;;  %v324_v25 = vshrl.u32 %v11979_v62, 16  ;;  %v11007_v44 = vld [vmem:[%s15552_s1 + $0x28c] ss:$12 sps:$4 sm:$0xff]  }
  0x4f   : > { %3044 = vmatmul.mubr.bf16.vlgmr.msra.gmra.mrb[16].mxu1 %v11861_v30  ;;  %2088 = vmatprep.mubr.bf16.mxu0 %v11918_v12  ;;  %v11003_v30 = vld [vmem:[%s15552_s1 + $0x278] ss:$12 sps:$4 sm:$0xff]  }
  0x50   : > { %3051 = vmatprep.mubr.bf16.mxu1 %v11918_v12  ;;  %2240 = vmatpush1.bf16.msra.mxu0 %v10966_v17  ;;  %v321_v17 = vrot.slane %v319_v60, 1  ;;  %v328_v32 = vrot.slane %v326_v20, 1  ;;  %v11008_v60 = vld [vmem:[%s15552_s1 + $0x290] ss:$12 sps:$4 sm:$0xff]   ;;  %v11014_v20 = vld [vmem:[%s15552_s1 + $0x1e8] ss:$12 sps:$4 sm:$0xff]  }
  0x51   : > { %2241 = vmatprep.subr.bf16.mxu0 %v10971_v21  ;;  %v10986_v21 = vld [vmem:[%s15552_s1 + $0x214] ss:$12 sps:$4 sm:$0xff]   ;;  %9411 = vmatpush3.bf16.msra.mxu1 %v10994_v14  ;;  %v345_v14 = vrot.slane %v343_v54, 1  ;;  %v199_v54 = vld [vmem:[%s11701_s11 + $0xd8] sm:$0xff] }
  0x52   : > { %9412 = vmatprep.subr.bf16.mxu1 %v10998_v22  ;;  %v329_v52 = vor.u32 %v328_v32, %v324_v25  ;;  %v10995_v22 = vld [vmem:[%s15552_s1 + $0x258] ss:$12 sps:$4 sm:$0xff]   ;;  %v348_v32 = vshrl.u32 %v12059_v61, 16 }
  0x54   : > { %2242 = vmatpush1.bf16.msra.mxu0 %v10969_v26  ;;  %v331_v26 = vshll.u32 %v11997_v10, 16 }
  0x55   : > { %2243 = vmatprep.subr.bf16.mxu0 %v10974_v29  ;;  %v12022_v29 = vsel %vm262_vm1, %v317_v15, %v321_v17  ;;  %9413 = vmatpush3.bf16.msra.mxu1 %v10999_v23  ;;  %v12079_v15 = vpack.c.bf16 %v195_v59, %v195_v59  ;;  %v350_v17 = vshll.u32 %v12059_v61, 16  ;;  %v11002_v23 = vld [vmem:[%s15552_s1 + $0x274] ss:$12 sps:$4 sm:$0xff]   ;;  %v11012_v59 = vld [vmem:[%s15552_s1 + $0x2a4] ss:$12 sps:$4 sm:$0xff]  }
  0x56   : > { %2089 = vmatmul.mubr.bf16.gmra.mrb[4].mxu0 %v11872_v38  ;;  %9414 = vmatprep.subr.bf16.mxu1 %v11003_v30  ;;  %v198_v30 = vld [vmem:[%s11701_s11 + $0xd0] sm:$0x3] }
  0x57   : > { %3052 = vmatmul.mubr.bf16.gmra.mrb[20].mxu1 %v11872_v38  ;;  %2098 = vmatprep.mubr.bf16.mxu0 %v11946_v35 }
  0x58   : > { %3059 = vmatprep.mubr.bf16.mxu1 %v11946_v35  ;;  %2244 = vmatpush1.bf16.msra.mxu0 %v10972_v41  ;;  %v10989_v41 = vld [vmem:[%s15552_s1 + $0x22c] ss:$12 sps:$4 sm:$0xff]  }
  0x59   : > { %2245 = vmatprep.subr.bf16.mxu0 %v10977_v43  ;;  %v12037_v43 = vsel %vm503_vm0, %v504_v28, %v505_v9  ;;  %9415 = vmatpush3.bf16.msra.mxu1 %v11004_v51  ;;  %v10997_v9 = vld [vmem:[%s15552_s1 + $0x25c] ss:$12 sps:$4 sm:$0xff]   ;;  %v11019_v28 = vld [vmem:[%s15552_s1 + $0x200] ss:$12 sps:$4 sm:$0xff]  }
  0x5a   : > { %9416 = vmatprep.subr.bf16.mxu1 %v11008_v60  ;;  %v11028_v60 = vld [vmem:[%s15552_s1 + $0x2f0] ss:$12 sps:$4 sm:$0xff]  }
  0x5c   : > { %2246 = vmatpush1.bf16.msra.mxu0 %v10975_v53  ;;  %v333_v53 = vrot.slane %v331_v26, 1  ;;  %v11018_v26 = vld [vmem:[%s15552_s1 + $0x2c0] ss:$12 sps:$4 sm:$0xff]  }
  0x5d   : > { %2247 = vmatprep.subr.bf16.mxu0 %v10980_v55  ;;  %v10987_v55 = vld [vmem:[%s15552_s1 + $0x228] ss:$12 sps:$4 sm:$0xff]  }
  0x5e   : > { %2099 = vmatmul.mubr.bf16.gmra.mrb[8].mxu0 %v11897_v58  ;;  %v12069_v8 = vsel %vm262_vm1, %v329_v52, %v333_v53  ;;  %v11023_v52 = vld [vmem:[%s15552_s1 + $0x2d8] ss:$12 sps:$4 sm:$0xff]  }
  0x5f   : > { %3060 = vmatmul.mubr.bf16.gmra.mrb[24].mxu1 %v11897_v58  ;;  %2108 = vmatprep.mubr.bf16.mxu0 %v11975_v57  ;;  %v11024_v53 = vld [vmem:[%s15552_s1 + $0x218] ss:$12 sps:$4 sm:$0xff]  }
  0x60   : > { %3067 = vmatprep.mubr.bf16.mxu1 %v11975_v57  ;;  %2248 = vmatpush1.bf16.msra.mxu0 %v10978_v4  ;;  %v11009_v4 = vld [vmem:[%s15552_s1 + $0x1d0] ss:$12 sps:$4 sm:$0xff]  }
  0x61   : > { %2249 = vmatprep.subr.bf16.mxu0 %v10983_v5  ;;  %v336_v5 = vshrl.u32 %v12018_v27, 16  ;;  %9417 = vmatpush3.bf16.msra.mxu1 %v11009_v4 }
  0x62   : > { %9418 = vmatprep.subr.bf16.mxu1 %v11013_v13  ;;  %v201_v13 = vld [vmem:[%s11701_s11 + $0xe8] sm:$0x3] }
  0x63   : > { %v341_v25 = vor.u32 %v340_v6, %v336_v5  ;;  %v12136_v6 = vpack.c.bf16 %v198_v30, %v198_v30 }
  0x64   : > { %2250 = vmatpush1.bf16.msra.mxu0 %v10981_v31  ;;  %v196_v31 = vld [vmem:[%s11701_s11 + $0xc0] sm:$0xff] }
  0x65   : > { %2251 = vmatprep.subr.bf16.mxu0 %v10986_v21  ;;  %v197_v21 = vld [vmem:[%s11701_s11 + $0xc8] sm:$0xff]  ;;  %9419 = vmatpush3.bf16.msra.mxu1 %v11014_v20  ;;  %v12111_v45 = vsel %vm262_vm1, %v341_v25, %v345_v14  ;;  %v12158_v25 = vpack.c.bf16 %v201_v13, %v201_v13 }
  0x66   : > { %2109 = vmatmul.mubr.bf16.gmra.mrb[12].mxu0 %v11915_v11  ;;  %9420 = vmatprep.subr.bf16.mxu1 %v11018_v26  ;;  %v12113_v51 = vpack.c.bf16 %v197_v21, %v196_v31  ;;  %v11010_v14 = vld [vmem:[%s15552_s1 + $0x2a0] ss:$12 sps:$4 sm:$0xff]   ;;  %v11017_v20 = vld [vmem:[%s15552_s1 + $0x2bc] ss:$12 sps:$4 sm:$0xff]   ;;  %v202_v26 = vld [vmem:[%s11701_s11 + $0xf0] sm:$0xff] }
  0x67   : > { %3068 = vmatmul.mubr.bf16.gmra.mrb[28].mxu1 %v11915_v11  ;;  %2118 = vmatprep.mubr.bf16.mxu0 %v12022_v29  ;;  %v205_v13 = vld [vmem:[%s11701_s11 + $0x108] sm:$0xff] }
  0x68   : > { %3075 = vmatprep.mubr.bf16.mxu1 %v12022_v29  ;;  %2252 = vmatpush1.bf16.msra.mxu0 %v10984_v37  ;;  %v352_v37 = vrot.slane %v350_v17, 1  ;;  %v360_v21 = vshrl.u32 %v12113_v51, 16 }
  0x69   : > { %2253 = vmatprep.subr.bf16.mxu0 %v10989_v41  ;;  %v355_v41 = vshll.u32 %v12079_v15, 16  ;;  %9421 = vmatpush3.bf16.msra.mxu1 %v11019_v28  ;;  %v203_v28 = vld [vmem:[%s11701_s11 + $0xf8] sm:$0xff] }
  0x6a   : > { %v353_v4 = vor.u32 %v352_v37, %v348_v32  ;;  %9422 = vmatprep.subr.bf16.mxu1 %v11023_v52  ;;  %v11015_v32 = vld [vmem:[%s15552_s1 + $0x2b8] ss:$12 sps:$4 sm:$0xff]   ;;  %v11022_v37 = vld [vmem:[%s15552_s1 + $0x2d4] ss:$12 sps:$4 sm:$0xff]  }
  0x6b   : > { %v357_v5 = vrot.slane %v355_v41, 1  ;;  %v204_v52 = vld [vmem:[%s11701_s11 + $0x100] sm:$0x3] }
  0x6c   : > { %2254 = vmatpush1.bf16.msra.mxu0 %v10987_v55  ;;  %v200_v55 = vld [vmem:[%s11701_s11 + $0xe0] sm:$0xff] }
  0x6d   : > { %2255 = vmatprep.subr.bf16.mxu0 %v10992_v56  ;;  %v11005_v56 = vld [vmem:[%s15552_s1 + $0x288] ss:$12 sps:$4 sm:$0xff]   ;;  %9423 = vmatpush3.bf16.msra.mxu1 %v11024_v53  ;;  %v12146_v17 = vpack.c.bf16 %v200_v55, %v199_v54  ;;  %v12152_v31 = vsel %vm262_vm1, %v353_v4, %v357_v5  ;;  %v11020_v53 = vld [vmem:[%s15552_s1 + $0x2d0] ss:$12 sps:$4 sm:$0xff]   ;;  %v12176_v54 = vpack.c.bf16 %v203_v28, %v202_v26  ;;  %v11027_v55 = vld [vmem:[%s15552_s1 + $0x2ec] ss:$12 sps:$4 sm:$0xff]  }
  0x6e   : > { %2119 = vmatmul.mubr.bf16.gmra.mrb[16].mxu0 %v11949_v40  ;;  %9424 = vmatprep.subr.bf16.mxu1 %v11028_v60  ;;  %v11025_v4 = vld [vmem:[%s15552_s1 + $0x2e8] ss:$12 sps:$4 sm:$0xff]   ;;  %v207_v26 = vld [vmem:[%s11701_s11 + $0x118] sm:$0x3] }
  0x6f   : > { %3076 = vmatmul.mubr.bf16.gmra.mrb[32].mxu1 %v11949_v40  ;;  %2128 = vmatprep.mubr.bf16.mxu0 %v12069_v8  ;;  %15627 = vst [vmem:[#allocation10_spill] sm:$0xff] %v12146_v17  ;;  %v374_v30 = vshll.u32 %v12146_v17, 16  ;;  %15628 = vst [vmem:[#allocation11_spill] sm:$0xff] %v12176_v54 }
  0x70   : > { %3083 = vmatprep.mubr.bf16.mxu1 %v12069_v8  ;;  %2256 = vmatpush1.bf16.msra.mxu0 %v10990_v7  ;;  %v362_v7 = vshll.u32 %v12113_v51, 16 }
  0x71   : > { %2257 = vmatprep.subr.bf16.mxu0 %v10997_v9  ;;  %v11029_v9 = vld [vmem:[%s15552_s1 + $0x230] ss:$12 sps:$4 sm:$0xff]   ;;  %v376_v60 = vrot.slane %v374_v30, 1 }
  0x72   : > { %9425 = vmatpush3.bf16.msra.mxu1 %v11029_v9  ;;  %v386_v9 = vshll.u32 %v12176_v54, 16 }
  0x74   : > { %2258 = vmatpush1.bf16.msra.mxu0 %v10995_v22  ;;  %v364_v22 = vrot.slane %v362_v7, 1  ;;  %v12192_v7 = vpack.c.bf16 %v204_v52, %v204_v52  ;;  %v12214_v52 = vpack.c.bf16 %v207_v26, %v207_v26  ;;  %v213_v26 = vld [vmem:[%s11701_s11 + $0x148] sm:$0x3] }
  0x75   : > { %2259 = vmatprep.subr.bf16.mxu0 %v11002_v23  ;;  %v367_v23 = vshll.u32 %v12136_v6, 16 }
  0x76   : > { %2129 = vmatmul.mubr.bf16.gmra.mrb[20].mxu0 %v11979_v62  ;;  %v365_v41 = vor.u32 %v364_v22, %v360_v21  ;;  %v384_v22 = vshrl.u32 %v12176_v54, 16 }
  0x77   : > { %3084 = vmatmul.mubr.bf16.gmra.mrb[36].mxu1 %v11979_v62  ;;  %2138 = vmatprep.mubr.bf16.mxu0 %v12111_v45 }
  0x78   : > { %3091 = vmatprep.mubr.bf16.mxu1 %v12111_v45  ;;  %2260 = vmatpush1.bf16.msra.mxu0 %v11000_v42  ;;  %v369_v42 = vrot.slane %v367_v23, 1  ;;  %v391_v23 = vshll.u32 %v12192_v7, 16 }
  0x79   : > { %2261 = vmatprep.subr.bf16.mxu0 %v11007_v44  ;;  %v379_v44 = vshll.u32 %v12158_v25, 16 }
  0x7b   : > { %v381_v5 = vrot.slane %v379_v44, 1  ;;  %v393_v44 = vrot.slane %v391_v23, 1 }
  0x7c   : > { %2262 = vmatpush1.bf16.msra.mxu0 %v11005_v56  ;;  %v12182_v56 = vsel %vm262_vm1, %v365_v41, %v369_v42  ;;  %v208_v41 = vld [vmem:[%s11701_s11 + $0x120] sm:$0xff]  ;;  %v209_v42 = vld [vmem:[%s11701_s11 + $0x128] sm:$0xff] }
  0x7d   : > { %2263 = vmatprep.subr.bf16.mxu0 %v11012_v59  ;;  %v372_v59 = vshrl.u32 %v12146_v17, 16 }
  0x7e   : > { %2139 = vmatmul.mubr.bf16.gmra.mrb[24].mxu0 %v12018_v27 }
  0x7f   : > { %3092 = vmatmul.mubr.bf16.gmra.mrb[40].mxu1 %v12018_v27  ;;  %2148 = vmatprep.mubr.bf16.mxu0 %v12152_v31  ;;  %v377_v21 = vor.u32 %v376_v60, %v372_v59 }
  0x80   : > { %3099 = vmatprep.mubr.bf16.mxu1 %v12152_v31  ;;  %2264 = vmatpush1.bf16.msra.mxu0 %v11010_v14  ;;  %v206_v14 = vld [vmem:[%s11701_s11 + $0x110] sm:$0xff] }
  0x81   : > { %2265 = vmatprep.subr.bf16.mxu0 %v11017_v20  ;;  %v11032_v20 = vld [vmem:[%s15552_s1 + $0x304] ss:$12 sps:$4 sm:$0xff]   ;;  %v12204_v28 = vsel %vm262_vm1, %v377_v21, %v381_v5  ;;  %v12222_v5 = vpack.c.bf16 %v209_v42, %v208_v41 }
  0x83   : > { %15630 = vst [vmem:[#allocation13_spill] sm:$0xff] %v12222_v5  ;;  %v410_v23 = vshll.u32 %v12222_v5, 16 }
  0x84   : > { %2266 = vmatpush1.bf16.msra.mxu0 %v11015_v32  ;;  %v388_v32 = vrot.slane %v386_v9, 1  ;;  %v210_v9 = vld [vmem:[%s11701_s11 + $0x130] sm:$0x3] }
  0x85   : > { %2267 = vmatprep.subr.bf16.mxu0 %v11022_v37  ;;  %v12206_v37 = vpack.c.bf16 %v206_v14, %v205_v13  ;;  %v211_v13 = vld [vmem:[%s11701_s11 + $0x138] sm:$0xff]  ;;  %v212_v14 = vld [vmem:[%s11701_s11 + $0x140] sm:$0xff]  ;;  %v412_v42 = vrot.slane %v410_v23, 1 }
  0x86   : > { %2149 = vmatmul.mubr.bf16.gmra.mrb[28].mxu0 %v12059_v61  ;;  %v389_v30 = vor.u32 %v388_v32, %v384_v22  ;;  %v12231_v22 = vpack.c.bf16 %v210_v9, %v210_v9  ;;  %v408_v32 = vshrl.u32 %v12222_v5, 16 }
  0x87   : > { %3100 = vmatmul.mubr.bf16.gmra.mrb[44].mxu1 %v12059_v61  ;;  %2158 = vmatprep.mubr.bf16.mxu0 %v12182_v56  ;;  %15629 = vst [vmem:[#allocation12_spill] sm:$0xff] %v12206_v37 }
  0x88   : > { %3107 = vmatprep.mubr.bf16.mxu1 %v12182_v56  ;;  %2268 = vmatpush1.bf16.msra.mxu0 %v11020_v53  ;;  %v398_v53 = vshll.u32 %v12206_v37, 16  ;;  %v12219_v59 = vsel %vm262_vm1, %v389_v30, %v393_v44  ;;  %v415_v30 = vshll.u32 %v12231_v22, 16  ;;  %v12240_v44 = vpack.c.bf16 %v212_v14, %v211_v13 }
  0x89   : > { %2269 = vmatprep.subr.bf16.mxu0 %v11027_v55  ;;  %v396_v55 = vshrl.u32 %v12206_v37, 16 }
  0x8a   : > { %v400_v60 = vrot.slane %v398_v53, 1  ;;  %15631 = vst [vmem:[#allocation14_spill] sm:$0xff] %v12240_v44  ;;  %v12244_v53 = vpack.c.bf16 %v213_v26, %v213_v26  ;;  %v420_v13 = vshrl.u32 %v12240_v44, 16  ;;  %v439_v26 = vshll.u32 %v11726_v34, 16 }
  0x8c   : > { %2270 = vmatpush1.bf16.msra.mxu0 %v11025_v4  ;;  %v403_v4 = vshll.u32 %v12214_v52, 16  ;;  %v427_v9 = vshll.u32 %v12244_v53, 16  ;;  %v441_v34 = vrot.slane %v439_v26, 1 }
  0x8d   : > { %2432 = vmatprep.subr.bf16.mxu0 %v11032_v20  ;;  %v401_v20 = vor.u32 %v400_v60, %v396_v55  ;;  %v413_v55 = vor.u32 %v412_v42, %v408_v32  ;;  %v417_v60 = vrot.slane %v415_v30, 1  ;;  %v432_v30 = vshrl.u32 %v11724_v33, 16 }
  0x8e   : > { %2159 = vmatmul.mubr.bf16.gmra.mrb[32].mxu0 %v12113_v51  ;;  %v405_v21 = vrot.slane %v403_v4, 1  ;;  %v422_v4 = vshll.u32 %v12240_v44, 16  ;;  %v429_v23 = vrot.slane %v427_v9, 1  ;;  %v451_v9 = vshll.u32 %v11762_v50, 16 }
  0x8f   : > { %3108 = vmatmul.mubr.bf16.gmra.mrb[48].mxu1 %v12113_v51  ;;  %2168 = vmatprep.mubr.bf16.mxu0 %v12204_v28 }
  0x90   : > { %3115 = vmatprep.mubr.bf16.mxu1 %v12204_v28  ;;  %v12237_v41 = vsel %vm262_vm1, %v401_v20, %v405_v21  ;;  %v12251_v20 = vsel %vm262_vm1, %v413_v55, %v417_v60  ;;  %v424_v14 = vrot.slane %v422_v4, 1  ;;  %v434_v21 = vshll.u32 %v11724_v33, 16  ;;  %v11057_v60 = vld [vmem:[%s15552_s1 + $0x3c8] ss:$12 sps:$4 sm:$0xff]  }
  0x91   : > { %v446_v4 = vshll.u32 %v11760_v49, 16  ;;  %9522 = vmatprep.subr.bf16.mxu1 %v11057_v60  ;;  %v453_v26 = vrot.slane %v451_v9, 1  ;;  %v510_v60 = vrot.slane %v11897_v58, 1  ;;  %v11041_v9 = vld [vmem:[%s15552_s1 + $0x34c] ss:$12 sps:$4 sm:$0xff]  }
  0x92   : > { %v425_v32 = vor.u32 %v424_v14, %v420_v13  ;;  %v436_v55 = vrot.slane %v434_v21, 1  ;;  %v444_v21 = vshrl.u32 %v11760_v49, 16 }
  0x94   : > { %v12261_v42 = vsel %vm262_vm1, %v425_v32, %v429_v23  ;;  %v437_v13 = vor.u32 %v436_v55, %v432_v30  ;;  %v448_v23 = vrot.slane %v446_v4, 1  ;;  %v507_v30 = vrot.slane %v11872_v38, 1 }
  0x95   : > { %v508_v55 = vrot.slane %v11874_v39, 1  ;;  %v11068_v39 = vld [vmem:[%s15552_s1 + $0x338] ss:$12 sps:$4 sm:$0xff]  }
  0x96   : > { %2169 = vmatmul.mubr.bf16.gmra.mrb[36].mxu0 %v12146_v17  ;;  %v12274_v14 = vsel %vm262_vm1, %v437_v13, %v441_v34  ;;  %v449_v32 = vor.u32 %v448_v23, %v444_v21  ;;  %v511_v34 = vrot.slane %v11906_v0, 1  ;;  %v11030_v21 = vld [vmem:[%s15552_s1 + $0x300] ss:$12 sps:$4 sm:$0xff]   ;;  %v11058_v0 = vld [vmem:[%s15552_s1 + $0x308] ss:$12 sps:$4 sm:$0xff]  }
  0x97   : > { %3116 = vmatmul.mubr.bf16.gmra.mrb[52].mxu1 %v12146_v17  ;;  %2178 = vmatprep.mubr.bf16.mxu0 %v12219_v59  ;;  %v11035_v23 = vld [vmem:[%s15552_s1 + $0x31c] ss:$12 sps:$4 sm:$0xff]   ;;  %v12335_v4 = vsel %vm503_vm0, %v507_v30, %v508_v55 }
  0x98   : > { %3123 = vmatprep.mubr.bf16.mxu1 %v12219_v59  ;;  %v12282_v50 = vsel %vm262_vm1, %v449_v32, %v453_v26  ;;  %v11033_v26 = vld [vmem:[%s15552_s1 + $0x318] ss:$12 sps:$4 sm:$0xff]   ;;  %v11063_v32 = vld [vmem:[%s15552_s1 + $0x320] ss:$12 sps:$4 sm:$0xff]   ;;  %v11036_v13 = vld [vmem:[%s15552_s1 + $0x330] ss:$12 sps:$4 sm:$0xff]  }
  0x99   : > { %v11039_v30 = vld [vmem:[%s15552_s1 + $0x348] ss:$12 sps:$4 sm:$0xff]   ;;  %v11073_v55 = vld [vmem:[%s15552_s1 + $0x350] ss:$12 sps:$4 sm:$0xff]  }
  0x9e   : > { %2179 = vmatmul.mubr.bf16.gmra.mrb[40].mxu0 %v12176_v54 }
  0x9f   : > { %3124 = vmatmul.mubr.bf16.gmra.mrb[56].mxu1 %v12176_v54  ;;  %2188 = vmatprep.mubr.bf16.mxu0 %v12237_v41 }
  0xa0   : > { %3131 = vmatprep.mubr.bf16.mxu1 %v12237_v41 }
  0xa6   : > { %2189 = vmatmul.mubr.bf16.gmra.mrb[44].mxu0 %v12206_v37 }
  0xa7   : > { %3132 = vmatmul.mubr.bf16.gmra.mrb[60].mxu1 %v12206_v37  ;;  %2198 = vmatprep.mubr.bf16.mxu0 %v12251_v20 }
  0xa8   : > { %3139 = vmatprep.mubr.bf16.mxu1 %v12251_v20 }
  0xae   : > { %2199 = vmatmul.mubr.bf16.gmra.mrb[48].mxu0 %v12222_v5 }
  0xaf   : > { %3140 = vmatmul.mubr.bf16.gmra.mrb[64].mxu1 %v12222_v5  ;;  %2208 = vmatprep.mubr.bf16.mxu0 %v12261_v42 }
  0xb0   : > { %3147 = vmatprep.mubr.bf16.mxu1 %v12261_v42 }
  0xb6   : > { %2209 = vmatmul.mubr.bf16.gmra.mrb[52].mxu0 %v12240_v44 }
  0xb7   : > { %3148 = vmatmul.mubr.bf16.gmra.mrb[68].mxu1 %v12240_v44  ;;  %2218 = vmatprep.mubr.bf16.mxu0 %v12274_v14 }
  0xb8   : > { %3155 = vmatprep.mubr.bf16.mxu1 %v12274_v14 }
  0xbe   : > { %2219 = vmatmul.mubr.bf16.gmra.mrb[56].mxu0 %v11724_v33 }
  0xbf   : > { %3156 = vmatmul.mubr.bf16.gmra.mrb[72].mxu1 %v11724_v33  ;;  %2228 = vmatprep.mubr.bf16.mxu0 %v12282_v50 }
  0xc0   : > { %3163 = vmatprep.mubr.bf16.mxu1 %v12282_v50 }
  0xc6   : > { %2229 = vmatmul.mubr.bf16.gmra.mrb[60].mxu0 %v11760_v49 }
  0xc7   : > { %3164 = vmatmul.mubr.bf16.gmra.mrb[76].mxu1 %v11760_v49  ;;  %2271 = vmatprep.mubr.bf16.mxu0 %v11872_v38 }
  0xc8   : > { %3204 = vmatprep.mubr.bf16.mxu1 %v11872_v38  ;;  %v11062_v38 = vld [vmem:[%s15552_s1 + $0x3e0] ss:$12 sps:$4 sm:$0xff]  }
  0xce   : > { %2272 = vmatmul.mubr.bf16.vlgmr.msra.gmra.mrb[0].mxu0 %v12037_v43 }
  0xcf   : > { %3205 = vmatmul.mubr.bf16.vlgmr.msra.gmra.mrb[80].mxu1 %v12037_v43  ;;  %2281 = vmatprep.mubr.bf16.mxu0 %v11897_v58  ;;  %v11067_v43 = vld [vmem:[%s15552_s1 + $0x3f8] ss:$12 sps:$4 sm:$0xff]  }
  0xd0   : > { %3212 = vmatprep.mubr.bf16.mxu1 %v11897_v58  ;;  %2433 = vmatpush1.bf16.msra.mxu0 %v11030_v21  ;;  %v11072_v21 = vld [vmem:[%s15552_s1 + $0x410] ss:$12 sps:$4 sm:$0xff]  }
  0xd1   : > { %9523 = vmatpush3.bf16.msra.mxu1 %v11058_v0  ;;  %2434 = vmatprep.subr.bf16.mxu0 %v11035_v23  ;;  %v11077_v0 = vld [vmem:[%s15552_s1 + $0x428] ss:$12 sps:$4 sm:$0xff]   ;;  %v11042_v23 = vld [vmem:[%s15552_s1 + $0x360] ss:$12 sps:$4 sm:$0xff]  }
  0xd2   : > { %9524 = vmatprep.subr.bf16.mxu1 %v11062_v38  ;;  %v11078_v38 = vld [vmem:[%s15552_s1 + $0x368] ss:$12 sps:$4 sm:$0xff]  }
  0xd4   : > { %2435 = vmatpush1.bf16.msra.mxu0 %v11033_v26  ;;  %v12366_v26 = vsel %vm503_vm0, %v510_v60, %v511_v34  ;;  %v11045_v60 = vld [vmem:[%s15552_s1 + $0x378] ss:$12 sps:$4 sm:$0xff]   ;;  %v11083_v34 = vld [vmem:[%s15552_s1 + $0x380] ss:$12 sps:$4 sm:$0xff]  }
  0xd5   : > { %9525 = vmatpush3.bf16.msra.mxu1 %v11063_v32  ;;  %2436 = vmatprep.subr.bf16.mxu0 %v11038_v2  ;;  %v11044_v2 = vld [vmem:[%s15552_s1 + $0x364] ss:$12 sps:$4 sm:$0xff]   ;;  %15632 = vst [vmem:[#allocation15_spill] sm:$0xff] %v12366_v26  ;;  %v11047_v32 = vld [vmem:[%s15552_s1 + $0x37c] ss:$12 sps:$4 sm:$0xff]  }
  0xd6   : > { %9526 = vmatprep.subr.bf16.mxu1 %v11067_v43  ;;  %2282 = vmatmul.mubr.bf16.gmra.mrb[4].mxu0 %v12335_v4  ;;  %v11048_v43 = vld [vmem:[%s15552_s1 + $0x390] ss:$12 sps:$4 sm:$0xff]  }
  0xd7   : > { %3213 = vmatmul.mubr.bf16.gmra.mrb[84].mxu1 %v12335_v4  ;;  %2291 = vmatprep.mubr.bf16.mxu0 %v11915_v11 }
  0xd8   : > { %3220 = vmatprep.mubr.bf16.mxu1 %v11915_v11  ;;  %2437 = vmatpush1.bf16.msra.mxu0 %v11036_v13  ;;  %v11050_v13 = vld [vmem:[%s15552_s1 + $0x394] ss:$12 sps:$4 sm:$0xff]  }
  0xd9   : > { %9527 = vmatpush3.bf16.msra.mxu1 %v11068_v39  ;;  %2438 = vmatprep.subr.bf16.mxu0 %v11041_v9  ;;  %v11082_v9 = vld [vmem:[%s15552_s1 + $0x440] ss:$12 sps:$4 sm:$0xff]   ;;  %v11087_v39 = vld [vmem:[%s15552_s1 + $0x458] ss:$12 sps:$4 sm:$0xff]  }
  0xda   : > { %9528 = vmatprep.subr.bf16.mxu1 %v11072_v21  ;;  %v11088_v21 = vld [vmem:[%s15552_s1 + $0x398] ss:$12 sps:$4 sm:$0xff]  }
  0xdc   : > { %2439 = vmatpush1.bf16.msra.mxu0 %v11039_v30  ;;  %v15633_v30 = vrot.slane %v11933_v24, 1  ;;  %v11051_v24 = vld [vmem:[%s15552_s1 + $0x3a8] ss:$12 sps:$4 sm:$0xff]  }
  0xdd   : > { %9529 = vmatpush3.bf16.msra.mxu1 %v11073_v55  ;;  %2440 = vmatprep.subr.bf16.mxu0 %v11044_v2  ;;  %v15634_v55 = vrot.slane %v11915_v11, 1 }
  0xde   : > { %9530 = vmatprep.subr.bf16.mxu1 %v11077_v0  ;;  %2292 = vmatmul.mubr.bf16.gmra.mrb[8].mxu0 %v12366_v26  ;;  %v11053_v0 = vld [vmem:[%s15552_s1 + $0x3ac] ss:$12 sps:$4 sm:$0xff]  }
  0xdf   : > { %3221 = vmatmul.mubr.bf16.gmra.mrb[88].mxu1 %v12366_v26  ;;  %2301 = vmatprep.mubr.bf16.mxu0 %v11949_v40  ;;  %v12401_v2 = vsel %vm503_vm0, %v15634_v55, %v15633_v30  ;;  %v11066_v30 = vld [vmem:[%s15552_s1 + $0x3f4] ss:$12 sps:$4 sm:$0xff]  }
  0xe0   : > { %3228 = vmatprep.mubr.bf16.mxu1 %v11949_v40  ;;  %2441 = vmatpush1.bf16.msra.mxu0 %v11042_v23  ;;  %15635 = vst [vmem:[#allocation16_spill] sm:$0xff] %v12401_v2  ;;  %v11092_v23 = vld [vmem:[%s15552_s1 + $0x470] ss:$12 sps:$4 sm:$0xff]  }
  0xe1   : > { %9531 = vmatpush3.bf16.msra.mxu1 %v11078_v38  ;;  %2442 = vmatprep.subr.bf16.mxu0 %v11047_v32  ;;  %v11093_v38 = vld [vmem:[%s15552_s1 + $0x3b0] ss:$12 sps:$4 sm:$0xff]  }
  0xe2   : > { %9532 = vmatprep.subr.bf16.mxu1 %v11082_v9  ;;  %v11056_v32 = vld [vmem:[%s15552_s1 + $0x3c4] ss:$12 sps:$4 sm:$0xff]   ;;  %v15636_v9 = vrot.slane %v11962_v48, 1  ;;  %v519_v48 = vrot.slane %v11979_v62, 1 }
  0xe4   : > { %2443 = vmatpush1.bf16.msra.mxu0 %v11045_v60  ;;  %v15637_v60 = vrot.slane %v11949_v40, 1 }
  0xe5   : > { %9533 = vmatpush3.bf16.msra.mxu1 %v11083_v34  ;;  %2444 = vmatprep.subr.bf16.mxu0 %v11050_v13  ;;  %v11054_v13 = vld [vmem:[%s15552_s1 + $0x3c0] ss:$12 sps:$4 sm:$0xff]  }
  0xe6   : > { %9534 = vmatprep.subr.bf16.mxu1 %v11087_v39  ;;  %2302 = vmatmul.mubr.bf16.gmra.mrb[12].mxu0 %v12401_v2  ;;  %v12427_v34 = vsel %vm503_vm0, %v15637_v60, %v15636_v9  ;;  %v11061_v39 = vld [vmem:[%s15552_s1 + $0x3dc] ss:$12 sps:$4 sm:$0xff]   ;;  %v11074_v60 = vld [vmem:[%s15552_s1 + $0x420] ss:$12 sps:$4 sm:$0xff]  }
  0xe7   : > { %3229 = vmatmul.mubr.bf16.gmra.mrb[92].mxu1 %v12401_v2  ;;  %2311 = vmatprep.mubr.bf16.mxu0 %v11979_v62  ;;  %15638 = vst [vmem:[#allocation17_spill] sm:$0xff] %v12427_v34 }
  0xe8   : > { %3236 = vmatprep.mubr.bf16.mxu1 %v11979_v62  ;;  %2445 = vmatpush1.bf16.msra.mxu0 %v11048_v43  ;;  %v520_v43 = vrot.slane %v11997_v10, 1  ;;  %v11071_v10 = vld [vmem:[%s15552_s1 + $0x40c] ss:$12 sps:$4 sm:$0xff]  }
  0xe9   : > { %9535 = vmatpush3.bf16.msra.mxu1 %v11088_v21  ;;  %2446 = vmatprep.subr.bf16.mxu0 %v11053_v0  ;;  %v11059_v21 = vld [vmem:[%s15552_s1 + $0x3d8] ss:$12 sps:$4 sm:$0xff]   ;;  %v11064_v0 = vld [vmem:[%s15552_s1 + $0x3f0] ss:$12 sps:$4 sm:$0xff]  }
  0xea   : > { %9536 = vmatprep.subr.bf16.mxu1 %v11092_v23  ;;  %v12448_v55 = vsel %vm503_vm0, %v519_v48, %v520_v43  ;;  %v522_v23 = vrot.slane %v12018_v27, 1  ;;  %v11079_v48 = vld [vmem:[%s15552_s1 + $0x438] ss:$12 sps:$4 sm:$0xff]   ;;  %v11086_v43 = vld [vmem:[%s15552_s1 + $0x454] ss:$12 sps:$4 sm:$0xff]  }
  0xeb   : > { %15639 = vst [vmem:[#allocation18_spill] sm:$0xff] %v12448_v55 }
  0xec   : > { %2447 = vmatpush1.bf16.msra.mxu0 %v11051_v24  ;;  %v523_v24 = vrot.slane %v12024_v36, 1  ;;  %v11081_v36 = vld [vmem:[%s15552_s1 + $0x43c] ss:$12 sps:$4 sm:$0xff]  }
  0xed   : > { %9537 = vmatpush3.bf16.msra.mxu1 %v11093_v38  ;;  %2448 = vmatprep.subr.bf16.mxu0 %v11056_v32  ;;  %v11069_v38 = vld [vmem:[%s15552_s1 + $0x408] ss:$12 sps:$4 sm:$0xff]   ;;  %v11076_v32 = vld [vmem:[%s15552_s1 + $0x424] ss:$12 sps:$4 sm:$0xff]  }
  0xee   : > { %2312 = vmatmul.mubr.bf16.gmra.mrb[16].mxu0 %v12427_v34  ;;  %v12469_v9 = vsel %vm503_vm0, %v522_v23, %v523_v24  ;;  %v11091_v24 = vld [vmem:[%s15552_s1 + $0x46c] ss:$12 sps:$4 sm:$0xff]  }
  0xef   : > { %3237 = vmatmul.mubr.bf16.gmra.mrb[96].mxu1 %v12427_v34  ;;  %2321 = vmatprep.mubr.bf16.mxu0 %v12018_v27  ;;  %15640 = vst [vmem:[#allocation19_spill] sm:$0xff] %v12469_v9 }
  0xf0   : > { %3244 = vmatprep.mubr.bf16.mxu1 %v12018_v27  ;;  %2449 = vmatpush1.bf16.msra.mxu0 %v11054_v13  ;;  %v525_v13 = vrot.slane %v12059_v61, 1 }
  0xf1   : > { %2450 = vmatprep.subr.bf16.mxu0 %v11061_v39  ;;  %v526_v39 = vrot.slane %v12079_v15, 1  ;;  %v11084_v15 = vld [vmem:[%s15552_s1 + $0x450] ss:$12 sps:$4 sm:$0xff]  }
  0xf4   : > { %2451 = vmatpush1.bf16.msra.mxu0 %v11059_v21 }
  0xf5   : > { %2452 = vmatprep.subr.bf16.mxu0 %v11066_v30 }
  0xf6   : > { %2322 = vmatmul.mubr.bf16.gmra.mrb[20].mxu0 %v12448_v55 }
  0xf7   : > { %3245 = vmatmul.mubr.bf16.gmra.mrb[100].mxu1 %v12448_v55  ;;  %2331 = vmatprep.mubr.bf16.mxu0 %v12059_v61 }
  0xf8   : > { %3252 = vmatprep.mubr.bf16.mxu1 %v12059_v61  ;;  %2453 = vmatpush1.bf16.msra.mxu0 %v11064_v0  ;;  %v12494_v0 = vsel %vm503_vm0, %v525_v13, %v526_v39 }
  0xf9   : > { %2454 = vmatprep.subr.bf16.mxu0 %v11071_v10  ;;  %15643 = vst [vmem:[#allocation22_spill] sm:$0xff] %v12494_v0 }
  0xfc   : > { %2455 = vmatpush1.bf16.msra.mxu0 %v11069_v38  ;;  %v528_v38 = vrot.slane %v12113_v51, 1 }
  0xfd   : > { %2456 = vmatprep.subr.bf16.mxu0 %v11076_v32  ;;  %v529_v32 = vrot.slane %v12136_v6, 1 }
  0xfe   : > { %2332 = vmatmul.mubr.bf16.gmra.mrb[24].mxu0 %v12469_v9 }
  0xff   : > { %3253 = vmatmul.mubr.bf16.gmra.mrb[104].mxu1 %v12469_v9  ;;  %2341 = vmatprep.mubr.bf16.mxu0 %v12113_v51 }
 0x100   : > { %3260 = vmatprep.mubr.bf16.mxu1 %v12113_v51  ;;  %2457 = vmatpush1.bf16.msra.mxu0 %v11074_v60  ;;  %v11089_v60 = vld [vmem:[%s15552_s1 + $0x468] ss:$12 sps:$4 sm:$0xff]  }
 0x101   : > { %2458 = vmatprep.subr.bf16.mxu0 %v11081_v36  ;;  %v11096_v36 = vld [vmem:[%s15552_s1 + $0x484] ss:$12 sps:$4 sm:$0xff]  }
 0x102   : > { %v12489_v21 = vpop.f32.mrb[0].mxu1 }
 0x103   : > { %15641 = vst [vmem:[#allocation20_spill] sm:$0xff] %v12489_v21  ;;  %v12491_v30 = vpop.f32.mrb[1].mxu1 }
 0x104   : > { %15642 = vst [vmem:[#allocation21_spill] sm:$0xff] %v12491_v30  ;;  %v12496_v10 = vpop.f32.mrb[2].mxu1  ;;  %2459 = vmatpush1.bf16.msra.mxu0 %v11079_v48  ;;  %v12523_v48 = vsel %vm503_vm0, %v528_v38, %v529_v32 }
 0x105   : > { %15644 = vst [vmem:[#allocation23_spill] sm:$0xff] %v12496_v10  ;;  %v12501_v23 = vpop.f32.mrb[3].mxu1  ;;  %2460 = vmatprep.subr.bf16.mxu0 %v11086_v43  ;;  %15648 = vst [vmem:[#allocation27_spill] sm:$0xff] %v12523_v48 }
 0x106   : > { %15645 = vst [vmem:[#allocation24_spill] sm:$0xff] %v12501_v23  ;;  %2342 = vmatmul.mubr.bf16.gmra.mrb[28].mxu0 %v12494_v0  ;;  %v11121_v23 = vld [vmem:[%s15552_s1 + $0x548] ss:$12 sps:$4 sm:$0xff]  }
 0x107   : > { %3261 = vmatmul.mubr.bf16.gmra.mrb[108].mxu1 %v12494_v0  ;;  %2351 = vmatprep.mubr.bf16.mxu0 %v12146_v17 }
 0x108   : > { %3268 = vmatprep.mubr.bf16.mxu1 %v12146_v17  ;;  %2461 = vmatpush1.bf16.msra.mxu0 %v11084_v15  ;;  %v531_v15 = vrot.slane %v12146_v17, 1 }
 0x109   : > { %2462 = vmatprep.subr.bf16.mxu0 %v11091_v24  ;;  %v532_v24 = vrot.slane %v12158_v25, 1  ;;  %v534_v25 = vrot.slane %v12176_v54, 1  ;;  %9634 = vmatprep.subr.bf16.mxu1 %v11121_v23 }
 0x10a   : > { %v12518_v13 = vpop.f32.mrb[4].mxu1 }
 0x10b   : > { %15646 = vst [vmem:[#allocation25_spill] sm:$0xff] %v12518_v13  ;;  %v12520_v39 = vpop.f32.mrb[5].mxu1  ;;  %v541_v13 = vrot.slane %v12231_v22, 1  ;;  %v543_v22 = vrot.slane %v12240_v44, 1 }
 0x10c   : > { %15647 = vst [vmem:[#allocation26_spill] sm:$0xff] %v12520_v39  ;;  %v12525_v43 = vpop.f32.mrb[6].mxu1  ;;  %2463 = vmatpush1.bf16.msra.mxu0 %v11089_v60  ;;  %v12540_v60 = vsel %vm503_vm0, %v531_v15, %v532_v24 }
 0x10d   : > { %15649 = vst [vmem:[#allocation28_spill] sm:$0xff] %v12525_v43  ;;  %v12527_v6 = vpop.f32.mrb[7].mxu1  ;;  %2625 = vmatprep.subr.bf16.mxu0 %v11096_v36  ;;  %15653 = vst [vmem:[#allocation32_spill] sm:$0xff] %v12540_v60 }
 0x10e   : > { %15650 = vst [vmem:[#allocation29_spill] sm:$0xff] %v12527_v6  ;;  %2352 = vmatmul.mubr.bf16.gmra.mrb[32].mxu0 %v12523_v48 }
 0x10f   : > { %3269 = vmatmul.mubr.bf16.gmra.mrb[112].mxu1 %v12523_v48  ;;  %2361 = vmatprep.mubr.bf16.mxu0 %v12176_v54 }
 0x110   : > { %3276 = vmatprep.mubr.bf16.mxu1 %v12176_v54  ;;  %v11152_v54 = vld [vmem:[%s15552_s1 + $0x518] ss:$12 sps:$4 sm:$0xff]  }
 0x112   : > { %v12535_v38 = vpop.f32.mrb[8].mxu1 }
 0x113   : > { %15651 = vst [vmem:[#allocation30_spill] sm:$0xff] %v12535_v38  ;;  %v12537_v32 = vpop.f32.mrb[9].mxu1  ;;  %v535_v38 = vrot.slane %v12192_v7, 1  ;;  %v537_v7 = vrot.slane %v12206_v37, 1 }
 0x114   : > { %15652 = vst [vmem:[#allocation31_spill] sm:$0xff] %v12537_v32  ;;  %v12542_v36 = vpop.f32.mrb[10].mxu1 }
 0x115   : > { %15654 = vst [vmem:[#allocation33_spill] sm:$0xff] %v12542_v36  ;;  %v12544_v6 = vpop.f32.mrb[11].mxu1  ;;  %v12557_v24 = vsel %vm503_vm0, %v534_v25, %v535_v38 }
 0x116   : > { %15655 = vst [vmem:[#allocation34_spill] sm:$0xff] %v12544_v6  ;;  %2362 = vmatmul.mubr.bf16.gmra.mrb[36].mxu0 %v12540_v60  ;;  %15658 = vst [vmem:[#allocation37_spill] sm:$0xff] %v12557_v24 }
 0x117   : > { %3277 = vmatmul.mubr.bf16.gmra.mrb[116].mxu1 %v12540_v60  ;;  %2371 = vmatprep.mubr.bf16.mxu0 %v12206_v37 }
 0x118   : > { %3284 = vmatprep.mubr.bf16.mxu1 %v12206_v37  ;;  %v11111_v37 = vld [vmem:[%s15552_s1 + $0x4fc] ss:$12 sps:$4 sm:$0xff]  }
 0x11a   : > { %v12552_v32 = vpop.f32.mrb[12].mxu1 }
 0x11b   : > { %15656 = vst [vmem:[#allocation35_spill] sm:$0xff] %v12552_v32  ;;  %v12554_v15 = vpop.f32.mrb[13].mxu1  ;;  %v538_v32 = vrot.slane %v12214_v52, 1  ;;  %v540_v52 = vrot.slane %v12222_v5, 1 }
 0x11c   : > { %15657 = vst [vmem:[#allocation36_spill] sm:$0xff] %v12554_v15  ;;  %v12559_v6 = vpop.f32.mrb[14].mxu1 }
 0x11d   : > { %15659 = vst [vmem:[#allocation38_spill] sm:$0xff] %v12559_v6  ;;  %v12561_v36 = vpop.f32.mrb[15].mxu1  ;;  %v12570_v38 = vsel %vm503_vm0, %v537_v7, %v538_v32 }
 0x11e   : > { %15660 = vst [vmem:[#allocation39_spill] sm:$0xff] %v12561_v36  ;;  %2372 = vmatmul.mubr.bf16.gmra.mrb[40].mxu0 %v12557_v24  ;;  %15661 = vst [vmem:[#allocation40_spill] sm:$0xff] %v12570_v38 }
 0x11f   : > { %3285 = vmatmul.mubr.bf16.gmra.mrb[120].mxu1 %v12557_v24  ;;  %2381 = vmatprep.mubr.bf16.mxu0 %v12222_v5 }
 0x120   : > { %3292 = vmatprep.mubr.bf16.mxu1 %v12222_v5  ;;  %v11105_v5 = vld [vmem:[%s15552_s1 + $0x4cc] ss:$12 sps:$4 sm:$0xff]  }
 0x122   : > { %v9314_v15 = vpop.f32.mrb[16].mxu1 }
 0x123   : > { %v9315_v43 = vpop.f32.mrb[17].mxu1 }
 0x124   : > { %v12572_v25 = vadd.f32 %v9315_v43, %v9314_v15  ;;  %v9317_v36 = vpop.f32.mrb[18].mxu1  ;;  %v12583_v43 = vsel %vm503_vm0, %v540_v52, %v541_v13  ;;  %v544_v13 = vrot.slane %v12244_v53, 1 }
 0x125   : > { %v9318_v6 = vpop.f32.mrb[19].mxu1  ;;  %15662 = vst [vmem:[#allocation41_spill] sm:$0xff] %v12583_v43 }
 0x126   : > { %v12574_v39 = vadd.f32 %v9318_v6, %v9317_v36  ;;  %2382 = vmatmul.mubr.bf16.gmra.mrb[44].mxu0 %v12570_v38 }
 0x127   : > { %3293 = vmatmul.mubr.bf16.gmra.mrb[124].mxu1 %v12570_v38  ;;  %2391 = vmatprep.mubr.bf16.mxu0 %v12240_v44 }
 0x128   : > { %3300 = vmatprep.mubr.bf16.mxu1 %v12240_v44 }
 0x12a   : > { %v9320_v32 = vpop.f32.mrb[20].mxu1 }
 0x12b   : > { %v9321_v7 = vpop.f32.mrb[21].mxu1 }
 0x12c   : > { %v12585_v15 = vadd.f32 %v9321_v7, %v9320_v32  ;;  %v9323_v6 = vpop.f32.mrb[22].mxu1  ;;  %v12599_v7 = vsel %vm503_vm0, %v543_v22, %v544_v13  ;;  %vm5862_vm0 = vsmask.f32 4368 }
 0x12d   : > { %v9324_v36 = vpop.f32.mrb[23].mxu1  ;;  %15663 = vst [vmem:[#allocation42_spill] sm:$0xff] %v12599_v7 }
 0x12e   : > { %v12590_v10 = vadd.f32 %v9324_v36, %v9323_v6  ;;  %2392 = vmatmul.mubr.bf16.gmra.mrb[48].mxu0 %v12583_v43 }
 0x12f   : > { %3301 = vmatmul.mubr.bf16.gmra.mrb[128].mxu1 %v12583_v43  ;;  %2401 = vmatprep.mubr.bf16.mxu0 %v11724_v33 }
 0x130   : > { %3308 = vmatprep.mubr.bf16.mxu1 %v11724_v33  ;;  %v11127_v33 = vld [vmem:[%s15552_s1 + $0x4a0] ss:$12 sps:$4 sm:$0xff]  }
 0x132   : > { %v9326_v52 = vpop.f32.mrb[24].mxu1 }
 0x133   : > { %v9327_v32 = vpop.f32.mrb[25].mxu1 }
 0x134   : > { %v12601_v6 = vadd.f32 %v9327_v32, %v9326_v52  ;;  %v9329_v36 = vpop.f32.mrb[26].mxu1 }
 0x135   : > { %v9330_v30 = vpop.f32.mrb[27].mxu1 }
 0x136   : > { %v12603_v21 = vadd.f32 %v9330_v30, %v9329_v36  ;;  %2402 = vmatmul.mubr.bf16.gmra.mrb[52].mxu0 %v12599_v7 }
 0x137   : > { %3309 = vmatmul.mubr.bf16.gmra.mrb[132].mxu1 %v12599_v7  ;;  %2411 = vmatprep.mubr.bf16.mxu0 %v11760_v49 }
 0x138   : > { %3316 = vmatprep.mubr.bf16.mxu1 %v11760_v49 }
 0x13a   : > { %v9332_v53 = vpop.f32.mrb[28].mxu1 }
 0x13b   : > { %v9333_v23 = vpop.f32.mrb[29].mxu1 }
 0x13c   : > { %v12609_v46 = vadd.f32 %v9333_v23, %v9332_v53  ;;  %v9335_v22 = vpop.f32.mrb[30].mxu1 }
 0x13d   : > { %v9336_v13 = vpop.f32.mrb[31].mxu1 }
 0x13e   : > { %v12611_v52 = vadd.f32 %v9336_v13, %v9335_v22  ;;  %2412 = vmatmul.mubr.bf16.gmra.mrb[56].mxu0 %v11755_v47 }
 0x13f   : > { %3317 = vmatmul.mubr.bf16.gmra.mrb[136].mxu1 %v11755_v47  ;;  %2421 = vmatprep.mubr.bf16.mxu0 %v11798_v1 }
 0x140   : > { %3324 = vmatprep.mubr.bf16.mxu1 %v11798_v1 }
 0x142   : > { %v9338_v30 = vpop.f32.mrb[32].mxu1 }
 0x143   : > { %v9339_v32 = vpop.f32.mrb[33].mxu1 }
 0x144   : > { %v12617_v36 = vadd.f32 %v9339_v32, %v9338_v30  ;;  %v9341_v49 = vpop.f32.mrb[34].mxu1  ;;  %v11094_v30 = vld [vmem:[%s15552_s1 + $0x480] ss:$12 sps:$4 sm:$0xff]   ;;  %v11099_v32 = vld [vmem:[%s15552_s1 + $0x49c] ss:$12 sps:$4 sm:$0xff]  }
 0x145   : > { %v9342_v19 = vpop.f32.mrb[35].mxu1 }
 0x146   : > { %v12619_v53 = vadd.f32 %v9342_v19, %v9341_v49  ;;  %2422 = vmatmul.mubr.bf16.gmra.mrb[60].mxu0 %v11793_v63  ;;  %v11122_v49 = vld [vmem:[%s15552_s1 + $0x488] ss:$12 sps:$4 sm:$0xff]  }
 0x147   : > { %3325 = vmatmul.mubr.bf16.gmra.mrb[140].mxu1 %v11793_v63  ;;  %2464 = vmatprep.mubr.bf16.mxu0 %v12335_v4 }
 0x148   : > { %3365 = vmatprep.mubr.bf16.mxu1 %v12335_v4  ;;  %v11126_v4 = vld [vmem:[%s15552_s1 + $0x560] ss:$12 sps:$4 sm:$0xff]  }
 0x14a   : > { %v9344_v23 = vpop.f32.mrb[36].mxu1 }
 0x14b   : > { %v9345_v22 = vpop.f32.mrb[37].mxu1 }
 0x14c   : > { %v12625_v13 = vadd.f32 %v9345_v22, %v9344_v23  ;;  %v9347_v18 = vpop.f32.mrb[38].mxu1  ;;  %v11097_v22 = vld [vmem:[%s15552_s1 + $0x498] ss:$12 sps:$4 sm:$0xff]  }
 0x14d   : > { %v9348_v19 = vpop.f32.mrb[39].mxu1 }
 0x14e   : > { %v12639_v23 = vadd.f32 %v9348_v19, %v9347_v18  ;;  %2465 = vmatmul.mubr.bf16.vlgmr.msra.gmra.mrb[0].mxu0 %v11918_v12  ;;  %v11102_v18 = vld [vmem:[%s15552_s1 + $0x4b4] ss:$12 sps:$4 sm:$0xff]  }
 0x14f   : > { %3366 = vmatmul.mubr.bf16.vlgmr.msra.gmra.mrb[144].mxu1 %v11918_v12  ;;  %2474 = vmatprep.mubr.bf16.mxu0 %v12366_v26  ;;  %v11131_v12 = vld [vmem:[%s15552_s1 + $0x578] ss:$12 sps:$4 sm:$0xff]  }
 0x150   : > { %3373 = vmatprep.mubr.bf16.mxu1 %v12366_v26  ;;  %2626 = vmatpush1.bf16.msra.mxu0 %v11094_v30 }
 0x151   : > { %9635 = vmatpush3.bf16.msra.mxu1 %v11122_v49  ;;  %2627 = vmatprep.subr.bf16.mxu0 %v11099_v32  ;;  %v11100_v49 = vld [vmem:[%s15552_s1 + $0x4b0] ss:$12 sps:$4 sm:$0xff]   ;;  %v11132_v32 = vld [vmem:[%s15552_s1 + $0x4b8] ss:$12 sps:$4 sm:$0xff]  }
 0x152   : > { %9636 = vmatprep.subr.bf16.mxu1 %v11126_v4  ;;  %v9350_v30 = vpop.f32.mrb[40].mxu1 }
 0x153   : > { %v9351_v19 = vpop.f32.mrb[41].mxu1 }
 0x154   : > { %v12657_v26 = vadd.f32 %v9351_v19, %v9350_v30  ;;  %v9353_v44 = vpop.f32.mrb[42].mxu1  ;;  %2628 = vmatpush1.bf16.msra.mxu0 %v11097_v22  ;;  %v11136_v22 = vld [vmem:[%s15552_s1 + $0x590] ss:$12 sps:$4 sm:$0xff]   ;;  %v11141_v19 = vld [vmem:[%s15552_s1 + $0x5a8] ss:$12 sps:$4 sm:$0xff]  }
 0x155   : > { %9637 = vmatpush3.bf16.msra.mxu1 %v11127_v33  ;;  %v9354_v4 = vpop.f32.mrb[43].mxu1  ;;  %2629 = vmatprep.subr.bf16.mxu0 %v11102_v18  ;;  %v11103_v33 = vld [vmem:[%s15552_s1 + $0x4c8] ss:$12 sps:$4 sm:$0xff]   ;;  %v11137_v18 = vld [vmem:[%s15552_s1 + $0x4d0] ss:$12 sps:$4 sm:$0xff]  }
 0x156   : > { %9638 = vmatprep.subr.bf16.mxu1 %v11131_v12  ;;  %v12671_v30 = vadd.f32 %v9354_v4, %v9353_v44  ;;  %2475 = vmatmul.mubr.bf16.gmra.mrb[4].mxu0 %v11946_v35  ;;  %v11108_v44 = vld [vmem:[%s15552_s1 + $0x4e4] ss:$12 sps:$4 sm:$0xff]  }
 0x157   : > { %3374 = vmatmul.mubr.bf16.gmra.mrb[148].mxu1 %v11946_v35  ;;  %2484 = vmatprep.mubr.bf16.mxu0 %v12401_v2 }
 0x158   : > { %3381 = vmatprep.mubr.bf16.mxu1 %v12401_v2  ;;  %2630 = vmatpush1.bf16.msra.mxu0 %v11100_v49 }
 0x159   : > { %9639 = vmatpush3.bf16.msra.mxu1 %v11132_v32  ;;  %2631 = vmatprep.subr.bf16.mxu0 %v11105_v5  ;;  %v11106_v32 = vld [vmem:[%s15552_s1 + $0x4e0] ss:$12 sps:$4 sm:$0xff]   ;;  %v11142_v5 = vld [vmem:[%s15552_s1 + $0x4e8] ss:$12 sps:$4 sm:$0xff]  }
 0x15a   : > { %9640 = vmatprep.subr.bf16.mxu1 %v11136_v22  ;;  %v9356_v12 = vpop.f32.mrb[44].mxu1 }
 0x15b   : > { %v9357_v49 = vpop.f32.mrb[45].mxu1 }
 0x15c   : > { %v12689_v4 = vadd.f32 %v9357_v49, %v9356_v12  ;;  %v9359_v2 = vpop.f32.mrb[46].mxu1  ;;  %2632 = vmatpush1.bf16.msra.mxu0 %v11103_v33  ;;  %v11146_v33 = vld [vmem:[%s15552_s1 + $0x5c0] ss:$12 sps:$4 sm:$0xff]   ;;  %v11151_v49 = vld [vmem:[%s15552_s1 + $0x5d8] ss:$12 sps:$4 sm:$0xff]  }
 0x15d   : > { %9641 = vmatpush3.bf16.msra.mxu1 %v11137_v18  ;;  %v9360_v22 = vpop.f32.mrb[47].mxu1  ;;  %2633 = vmatprep.subr.bf16.mxu0 %v11108_v44  ;;  %v11109_v18 = vld [vmem:[%s15552_s1 + $0x4f8] ss:$12 sps:$4 sm:$0xff]   ;;  %v11114_v44 = vld [vmem:[%s15552_s1 + $0x514] ss:$12 sps:$4 sm:$0xff]  }
 0x15e   : > { %9642 = vmatprep.subr.bf16.mxu1 %v11141_v19  ;;  %v12700_v12 = vadd.f32 %v9360_v22, %v9359_v2  ;;  %2485 = vmatmul.mubr.bf16.gmra.mrb[8].mxu0 %v11975_v57  ;;  %v11147_v2 = vld [vmem:[%s15552_s1 + $0x500] ss:$12 sps:$4 sm:$0xff]  }
 0x15f   : > { %3382 = vmatmul.mubr.bf16.gmra.mrb[152].mxu1 %v11975_v57  ;;  %2494 = vmatprep.mubr.bf16.mxu0 %v12427_v34 }
 0x160   : > { %3389 = vmatprep.mubr.bf16.mxu1 %v12427_v34  ;;  %2634 = vmatpush1.bf16.msra.mxu0 %v11106_v32 }
 0x161   : > { %9643 = vmatpush3.bf16.msra.mxu1 %v11142_v5  ;;  %2635 = vmatprep.subr.bf16.mxu0 %v11111_v37  ;;  %v11112_v5 = vld [vmem:[%s15552_s1 + $0x510] ss:$12 sps:$4 sm:$0xff]  }
 0x162   : > { %v9362_v19 = vpop.f32.mrb[48].mxu1  ;;  %9644 = vmatprep.subr.bf16.mxu1 %v11146_v33  ;;  %v11117_v33 = vld [vmem:[%s15552_s1 + $0x52c] ss:$12 sps:$4 sm:$0xff]  }
 0x163   : > { %v9363_v32 = vpop.f32.mrb[49].mxu1 }
 0x164   : > { %v12721_v22 = vadd.f32 %v9363_v32, %v9362_v19  ;;  %v9365_v34 = vpop.f32.mrb[50].mxu1  ;;  %2636 = vmatpush1.bf16.msra.mxu0 %v11109_v18  ;;  %v11156_v18 = vld [vmem:[%s15552_s1 + $0x5f0] ss:$12 sps:$4 sm:$0xff]  }
 0x165   : > { %9645 = vmatpush3.bf16.msra.mxu1 %v11147_v2  ;;  %v9366_v37 = vpop.f32.mrb[51].mxu1  ;;  %2637 = vmatprep.subr.bf16.mxu0 %v11114_v44  ;;  %v11115_v2 = vld [vmem:[%s15552_s1 + $0x528] ss:$12 sps:$4 sm:$0xff]   ;;  %v11120_v44 = vld [vmem:[%s15552_s1 + $0x544] ss:$12 sps:$4 sm:$0xff]  }
 0x166   : > { %v12732_v17 = vadd.f32 %v9366_v37, %v9365_v34  ;;  %9646 = vmatprep.subr.bf16.mxu1 %v11151_v49  ;;  %2495 = vmatmul.mubr.bf16.gmra.mrb[12].mxu0 %v12022_v29  ;;  %v11157_v34 = vld [vmem:[%s15552_s1 + $0x530] ss:$12 sps:$4 sm:$0xff]  }
 0x167   : > { %3390 = vmatmul.mubr.bf16.gmra.mrb[156].mxu1 %v12022_v29  ;;  %2504 = vmatprep.mubr.bf16.mxu0 %v12448_v55 }
 0x168   : > { %3397 = vmatprep.mubr.bf16.mxu1 %v12448_v55  ;;  %2638 = vmatpush1.bf16.msra.mxu0 %v11112_v5 }
 0x169   : > { %9647 = vmatpush3.bf16.msra.mxu1 %v11152_v54  ;;  %2639 = vmatprep.subr.bf16.mxu0 %v11117_v33  ;;  %v11118_v54 = vld [vmem:[%s15552_s1 + $0x540] ss:$12 sps:$4 sm:$0xff]   ;;  %v11125_v33 = vld [vmem:[%s15552_s1 + $0x55c] ss:$12 sps:$4 sm:$0xff]  }
 0x16a   : > { %v9368_v19 = vpop.f32.mrb[52].mxu1  ;;  %9648 = vmatprep.subr.bf16.mxu1 %v11156_v18  ;;  %v11123_v18 = vld [vmem:[%s15552_s1 + $0x558] ss:$12 sps:$4 sm:$0xff]  }
 0x16b   : > { %v9369_v49 = vpop.f32.mrb[53].mxu1 }
 0x16c   : > { %v12750_v32 = vadd.f32 %v9369_v49, %v9368_v19  ;;  %v9371_v5 = vpop.f32.mrb[54].mxu1  ;;  %2640 = vmatpush1.bf16.msra.mxu0 %v11115_v2  ;;  %v11130_v2 = vld [vmem:[%s15552_s1 + $0x574] ss:$12 sps:$4 sm:$0xff]  }
 0x16d   : > { %v9372_v37 = vpop.f32.mrb[55].mxu1  ;;  %9649 = vmatpush3.bf16.msra.mxu1 %v11157_v34  ;;  %2641 = vmatprep.subr.bf16.mxu0 %v11120_v44 }
 0x16e   : > { %v12758_v55 = vadd.f32 %v9372_v37, %v9371_v5  ;;  %2505 = vmatmul.mubr.bf16.gmra.mrb[16].mxu0 %v12069_v8  ;;  %v11128_v5 = vld [vmem:[%s15552_s1 + $0x570] ss:$12 sps:$4 sm:$0xff]   ;;  %v11135_v37 = vld [vmem:[%s15552_s1 + $0x58c] ss:$12 sps:$4 sm:$0xff]  }
 0x16f   : > { %3398 = vmatmul.mubr.bf16.gmra.mrb[160].mxu1 %v12069_v8  ;;  %2514 = vmatprep.mubr.bf16.mxu0 %v12469_v9 }
 0x170   : > { %3405 = vmatprep.mubr.bf16.mxu1 %v12469_v9  ;;  %2642 = vmatpush1.bf16.msra.mxu0 %v11118_v54 }
 0x171   : > { %2643 = vmatprep.subr.bf16.mxu0 %v11125_v33 }
 0x172   : > { %v9374_v34 = vpop.f32.mrb[56].mxu1 }
 0x173   : > { %v9375_v44 = vpop.f32.mrb[57].mxu1 }
 0x174   : > { %v12770_v19 = vadd.f32 %v9375_v44, %v9374_v34  ;;  %v9377_v49 = vpop.f32.mrb[58].mxu1  ;;  %2644 = vmatpush1.bf16.msra.mxu0 %v11123_v18  ;;  %v11133_v18 = vld [vmem:[%s15552_s1 + $0x588] ss:$12 sps:$4 sm:$0xff]  }
 0x175   : > { %v9378_v54 = vpop.f32.mrb[59].mxu1  ;;  %2645 = vmatprep.subr.bf16.mxu0 %v11130_v2  ;;  %v11140_v2 = vld [vmem:[%s15552_s1 + $0x5a4] ss:$12 sps:$4 sm:$0xff]  }
 0x176   : > { %v12778_v33 = vadd.f32 %v9378_v54, %v9377_v49  ;;  %2515 = vmatmul.mubr.bf16.gmra.mrb[20].mxu0 %v12111_v45 }
 0x177   : > { %3406 = vmatmul.mubr.bf16.gmra.mrb[164].mxu1 %v12111_v45  ;;  %2524 = vmatprep.mubr.bf16.mxu0 %v12494_v0 }
 0x178   : > { %3413 = vmatprep.mubr.bf16.mxu1 %v12494_v0  ;;  %2646 = vmatpush1.bf16.msra.mxu0 %v11128_v5  ;;  %v11138_v0 = vld [vmem:[%s15552_s1 + $0x5a0] ss:$12 sps:$4 sm:$0xff]  }
 0x179   : > { %2647 = vmatprep.subr.bf16.mxu0 %v11135_v37  ;;  %v11145_v37 = vld [vmem:[%s15552_s1 + $0x5bc] ss:$12 sps:$4 sm:$0xff]  }
 0x17a   : > { %v9380_v34 = vpop.f32.mrb[60].mxu1 }
 0x17b   : > { %v9381_v44 = vpop.f32.mrb[61].mxu1 }
 0x17c   : > { %v12790_v49 = vadd.f32 %v9381_v44, %v9380_v34  ;;  %v9383_v54 = vpop.f32.mrb[62].mxu1  ;;  %2648 = vmatpush1.bf16.msra.mxu0 %v11133_v18  ;;  %v11143_v18 = vld [vmem:[%s15552_s1 + $0x5b8] ss:$12 sps:$4 sm:$0xff]  }
 0x17d   : > { %v9384_v5 = vpop.f32.mrb[63].mxu1  ;;  %2649 = vmatprep.subr.bf16.mxu0 %v11140_v2  ;;  %v11150_v2 = vld [vmem:[%s15552_s1 + $0x5d4] ss:$12 sps:$4 sm:$0xff]  }
 0x17e   : > { %v12798_v9 = vadd.f32 %v9384_v5, %v9383_v54  ;;  %2525 = vmatmul.mubr.bf16.gmra.mrb[24].mxu0 %v12152_v31 }
 0x17f   : > { %3414 = vmatmul.mubr.bf16.gmra.mrb[168].mxu1 %v12152_v31  ;;  %2534 = vmatprep.mubr.bf16.mxu0 %v12523_v48 }
 0x180   : > { %15664 = vst [vmem:[#allocation43_spill] sm:$0xff] %v12798_v9  ;;  %3421 = vmatprep.mubr.bf16.mxu1 %v12523_v48  ;;  %2650 = vmatpush1.bf16.msra.mxu0 %v11138_v0  ;;  %v11148_v48 = vld [vmem:[%s15552_s1 + $0x5d0] ss:$12 sps:$4 sm:$0xff]  }
 0x181   : > { %2651 = vmatprep.subr.bf16.mxu0 %v11145_v37  ;;  %v11155_v37 = vld [vmem:[%s15552_s1 + $0x5ec] ss:$12 sps:$4 sm:$0xff]  }
 0x182   : > { %v9386_v34 = vpop.f32.mrb[64].mxu1 }
 0x183   : > { %v9387_v44 = vpop.f32.mrb[65].mxu1 }
 0x184   : > { %v12810_v54 = vadd.f32 %v9387_v44, %v9386_v34  ;;  %v9389_v5 = vpop.f32.mrb[66].mxu1  ;;  %2652 = vmatpush1.bf16.msra.mxu0 %v11143_v18  ;;  %v11153_v18 = vld [vmem:[%s15552_s1 + $0x5e8] ss:$12 sps:$4 sm:$0xff]  }
 0x185   : > { %v9390_v0 = vpop.f32.mrb[67].mxu1  ;;  %2653 = vmatprep.subr.bf16.mxu0 %v11150_v2 }
 0x186   : > { %15665 = vst [vmem:[#allocation44_spill] sm:$0xff] %v12810_v54  ;;  %v12818_v9 = vadd.f32 %v9390_v0, %v9389_v5  ;;  %2535 = vmatmul.mubr.bf16.gmra.mrb[28].mxu0 %v12182_v56  ;;  %v11512_v54 = vld [vmem:[%s15552_s1 + $0x604] ss:$12 sps:$4 sm:$0xff]  }
 0x187   : > { %3422 = vmatmul.mubr.bf16.gmra.mrb[172].mxu1 %v12182_v56  ;;  %2544 = vmatprep.mubr.bf16.mxu0 %v12540_v60 }
 0x188   : > { %15666 = vst [vmem:[#allocation45_spill] sm:$0xff] %v12818_v9  ;;  %3429 = vmatprep.mubr.bf16.mxu1 %v12540_v60  ;;  %2654 = vmatpush1.bf16.msra.mxu0 %v11148_v48 }
 0x189   : > { %2655 = vmatprep.subr.bf16.mxu0 %v11155_v37 }
 0x18a   : > { %v9392_v2 = vpop.f32.mrb[68].mxu1 }
 0x18b   : > { %v9393_v34 = vpop.f32.mrb[69].mxu1 }
 0x18c   : > { %v12827_v44 = vadd.f32 %v9393_v34, %v9392_v2  ;;  %v9395_v5 = vpop.f32.mrb[70].mxu1  ;;  %2656 = vmatpush1.bf16.msra.mxu0 %v11153_v18 }
 0x18d   : > { %v9396_v0 = vpop.f32.mrb[71].mxu1  ;;  %2818 = vmatprep.subr.bf16.mxu0 %v11512_v54 }
 0x18e   : > { %v12829_v9 = vadd.f32 %v9396_v0, %v9395_v5  ;;  %2545 = vmatmul.mubr.bf16.gmra.mrb[32].mxu0 %v12204_v28 }
 0x18f   : > { %3430 = vmatmul.mubr.bf16.gmra.mrb[176].mxu1 %v12204_v28  ;;  %2554 = vmatprep.mubr.bf16.mxu0 %v12557_v24 }
 0x190   : > { %15667 = vst [vmem:[#allocation46_spill] sm:$0xff] %v12829_v9  ;;  %3437 = vmatprep.mubr.bf16.mxu1 %v12557_v24 }
 0x192   : > { %v9398_v48 = vpop.f32.mrb[72].mxu1 }
 0x193   : > { %v9399_v37 = vpop.f32.mrb[73].mxu1 }
 0x194   : > { %v12838_v2 = vadd.f32 %v9399_v37, %v9398_v48  ;;  %v9401_v18 = vpop.f32.mrb[74].mxu1 }
 0x195   : > { %v9402_v34 = vpop.f32.mrb[75].mxu1 }
 0x196   : > { %v12840_v5 = vadd.f32 %v9402_v34, %v9401_v18  ;;  %2555 = vmatmul.mubr.bf16.gmra.mrb[36].mxu0 %v12219_v59 }
 0x197   : > { %3438 = vmatmul.mubr.bf16.gmra.mrb[180].mxu1 %v12219_v59  ;;  %2564 = vmatprep.mubr.bf16.mxu0 %v12570_v38 }
 0x198   : > { %15668 = vst [vmem:[#allocation47_spill] sm:$0xff] %v12840_v5  ;;  %3445 = vmatprep.mubr.bf16.mxu1 %v12570_v38 }
 0x19a   : > { %v9404_v54 = vpop.f32.mrb[76].mxu1 }
 0x19b   : > { %v9405_v0 = vpop.f32.mrb[77].mxu1 }
 0x19c   : > { %v12846_v60 = vadd.f32 %v9405_v0, %v9404_v54  ;;  %v9407_v24 = vpop.f32.mrb[78].mxu1 }
 0x19d   : > { %v9408_v9 = vpop.f32.mrb[79].mxu1 }
 0x19e   : > { %v12848_v48 = vadd.f32 %v9408_v9, %v9407_v24  ;;  %2565 = vmatmul.mubr.bf16.gmra.mrb[40].mxu0 %v12237_v41 }
 0x19f   : > { %3446 = vmatmul.mubr.bf16.gmra.mrb[184].mxu1 %v12237_v41  ;;  %2574 = vmatprep.mubr.bf16.mxu0 %v12583_v43 }
 0x1a0   : > { %15669 = vst [vmem:[#allocation48_spill] sm:$0xff] %v12848_v48  ;;  %3453 = vmatprep.mubr.bf16.mxu1 %v12583_v43 }
 0x1a2   : > { %v9426_v37 = vpop.f32.mrb[80].mxu1 }
 0x1a3   : > { %v9427_v18 = vpop.f32.mrb[81].mxu1 }
 0x1a4   : > { %v9428_v34 = vadd.f32 %v9427_v18, %v9426_v37  ;;  %v9429_v38 = vpop.f32.mrb[82].mxu1 }
 0x1a5   : > { %v9430_v5 = vpop.f32.mrb[83].mxu1 }
 0x1a6   : > { %v12855_v54 = vadd.f32 %v9428_v34, %v12572_v25  ;;  %v9431_v0 = vadd.f32 %v9430_v5, %v9429_v38  ;;  %2575 = vmatmul.mubr.bf16.gmra.mrb[44].mxu0 %v12251_v20  ;;  %v12867_v38 = vld [vmem:[%s15552_s1 + $0x608] ss:$12 sps:$4 sm:$0xff]  }
 0x1a7   : > { %3454 = vmatmul.mubr.bf16.gmra.mrb[188].mxu1 %v12251_v20  ;;  %2584 = vmatprep.mubr.bf16.mxu0 %v12599_v7 }
 0x1a8   : > { %3461 = vmatprep.mubr.bf16.mxu1 %v12599_v7  ;;  %v12862_v9 = vadd.f32 %v9431_v0, %v12574_v39  ;;  %10306 = vmatprep.subr.bf16.mxu1 %v12867_v38 }
 0x1aa   : > { %v9432_v24 = vpop.f32.mrb[84].mxu1 }
 0x1ab   : > { %v9433_v43 = vpop.f32.mrb[85].mxu1 }
 0x1ac   : > { %v9434_v37 = vadd.f32 %v9433_v43, %v9432_v24  ;;  %v9435_v18 = vpop.f32.mrb[86].mxu1 }
 0x1ad   : > { %v9436_v48 = vpop.f32.mrb[87].mxu1 }
 0x1ae   : > { %v12870_v25 = vadd.f32 %v9434_v37, %v12585_v15  ;;  %v9437_v5 = vadd.f32 %v9436_v48, %v9435_v18  ;;  %2585 = vmatmul.mubr.bf16.gmra.mrb[48].mxu0 %v12261_v42 }
 0x1af   : > { %3462 = vmatmul.mubr.bf16.gmra.mrb[192].mxu1 %v12261_v42  ;;  %2594 = vmatprep.mubr.bf16.mxu0 %v11755_v47 }
 0x1b0   : > { %3469 = vmatprep.mubr.bf16.mxu1 %v11755_v47  ;;  %v12877_v39 = vadd.f32 %v9437_v5, %v12590_v10  ;;  %v571_v10 = vshll.u32 %v11798_v1, 16 }
 0x1b2   : > { %v9438_v43 = vpop.f32.mrb[88].mxu1 }
 0x1b3   : > { %v9439_v34 = vpop.f32.mrb[89].mxu1 }
 0x1b4   : > { %v9440_v0 = vadd.f32 %v9439_v34, %v9438_v43  ;;  %v9441_v24 = vpop.f32.mrb[90].mxu1  ;;  %v569_v34 = vshrl.u32 %v11798_v1, 16 }
 0x1b5   : > { %v9442_v15 = vpop.f32.mrb[91].mxu1 }
 0x1b6   : > { %v12881_v48 = vadd.f32 %v9440_v0, %v12601_v6  ;;  %v9443_v37 = vadd.f32 %v9442_v15, %v9441_v24  ;;  %2595 = vmatmul.mubr.bf16.gmra.mrb[52].mxu0 %v12274_v14  ;;  %v573_v6 = vrot.slane %v571_v10, 1  ;;  %v576_v0 = vshll.u32 %v11800_v3, 16 }
 0x1b7   : > { %3470 = vmatmul.mubr.bf16.gmra.mrb[196].mxu1 %v12274_v14  ;;  %2604 = vmatprep.mubr.bf16.mxu0 %v11793_v63 }
 0x1b8   : > { %15670 = vst [vmem:[#allocation49_spill] sm:$0xff] %v12881_v48  ;;  %3477 = vmatprep.mubr.bf16.mxu1 %v11793_v63  ;;  %v12889_v18 = vadd.f32 %v9443_v37, %v12603_v21  ;;  %v574_v21 = vor.u32 %v573_v6, %v569_v34  ;;  %v578_v37 = vrot.slane %v576_v0, 1 }
 0x1ba   : > { %v9444_v5 = vpop.f32.mrb[92].mxu1 }
 0x1bb   : > { %v9445_v43 = vpop.f32.mrb[93].mxu1 }
 0x1bc   : > { %v9446_v24 = vadd.f32 %v9445_v43, %v9444_v5  ;;  %v9447_v15 = vpop.f32.mrb[94].mxu1  ;;  %v12904_v43 = vsel %vm262_vm1, %v574_v21, %v578_v37 }
 0x1bd   : > { %v9448_v47 = vpop.f32.mrb[95].mxu1 }
 0x1be   : > { %v12894_v7 = vadd.f32 %v9446_v24, %v12609_v46  ;;  %v9449_v48 = vadd.f32 %v9448_v47, %v9447_v15  ;;  %2605 = vmatmul.mubr.bf16.gmra.mrb[56].mxu0 %v12282_v50 }
 0x1bf   : > { %3478 = vmatmul.mubr.bf16.gmra.mrb[200].mxu1 %v12282_v50  ;;  %2614 = vmatprep.mubr.bf16.mxu0 %v11831_v16 }
 0x1c0   : > { %3485 = vmatprep.mubr.bf16.mxu1 %v11831_v16  ;;  %v12901_v10 = vadd.f32 %v9449_v48, %v12611_v52 }
 0x1c2   : > { %v9450_v3 = vpop.f32.mrb[96].mxu1 }
 0x1c3   : > { %v9451_v5 = vpop.f32.mrb[97].mxu1 }
 0x1c4   : > { %v9452_v46 = vadd.f32 %v9451_v5, %v9450_v3  ;;  %v9453_v47 = vpop.f32.mrb[98].mxu1  ;;  %v11159_v3 = vld [vmem:[%s15552_s1 + $0x620] ss:$12 sps:$4 sm:$0xff]  }
 0x1c5   : > { %v9454_v24 = vpop.f32.mrb[99].mxu1 }
 0x1c6   : > { %v12907_v15 = vadd.f32 %v9452_v46, %v12617_v36  ;;  %v9455_v63 = vadd.f32 %v9454_v24, %v9453_v47  ;;  %2615 = vmatmul.mubr.bf16.gmra.mrb[60].mxu0 %v12904_v43  ;;  %v11515_v47 = vld [vmem:[%s15552_s1 + $0x618] ss:$12 sps:$4 sm:$0xff]  }
 0x1c7   : > { %3486 = vmatmul.mubr.bf16.gmra.mrb[204].mxu1 %v12904_v43  ;;  %2657 = vmatprep.mubr.bf16.mxu0 %v11946_v35 }
 0x1c8   : > { %3526 = vmatprep.mubr.bf16.mxu1 %v11946_v35  ;;  %v12914_v52 = vadd.f32 %v9455_v63, %v12619_v53  ;;  %v11513_v35 = vld [vmem:[%s15552_s1 + $0x600] ss:$12 sps:$4 sm:$0xff]  }
 0x1ca   : > { %v9456_v48 = vpop.f32.mrb[100].mxu1 }
 0x1cb   : > { %v9457_v34 = vpop.f32.mrb[101].mxu1 }
 0x1cc   : > { %v9458_v6 = vadd.f32 %v9457_v34, %v9456_v48  ;;  %v9459_v0 = vpop.f32.mrb[102].mxu1  ;;  %v11516_v48 = vld [vmem:[%s15552_s1 + $0x634] ss:$12 sps:$4 sm:$0xff]   ;;  %v11161_v34 = vld [vmem:[%s15552_s1 + $0x650] ss:$12 sps:$4 sm:$0xff]  }
 0x1cd   : > { %v9460_v21 = vpop.f32.mrb[103].mxu1 }
 0x1ce   : > { %v12917_v36 = vadd.f32 %v9458_v6, %v12625_v13  ;;  %v9461_v37 = vadd.f32 %v9460_v21, %v9459_v0  ;;  %2658 = vmatmul.mubr.bf16.vlgmr.msra.gmra.mrb[0].mxu0 %v11897_v58  ;;  %v11514_v13 = vld [vmem:[%s15552_s1 + $0x61c] ss:$12 sps:$4 sm:$0xff]   ;;  %v11518_v21 = vld [vmem:[%s15552_s1 + $0x64c] ss:$12 sps:$4 sm:$0xff]  }
 0x1cf   : > { %3527 = vmatmul.mubr.bf16.vlgmr.msra.gmra.mrb[208].mxu1 %v11897_v58  ;;  %2667 = vmatprep.mubr.bf16.mxu0 %v11975_v57  ;;  %v11160_v58 = vld [vmem:[%s15552_s1 + $0x638] ss:$12 sps:$4 sm:$0xff]   ;;  %v11517_v6 = vld [vmem:[%s15552_s1 + $0x630] ss:$12 sps:$4 sm:$0xff]  }
 0x1d0   : > { %3534 = vmatprep.mubr.bf16.mxu1 %v11975_v57  ;;  %v12927_v63 = vadd.f32 %v9461_v37, %v12639_v23  ;;  %2819 = vmatpush1.bf16.msra.mxu0 %v11513_v35  ;;  %v11519_v35 = vld [vmem:[%s15552_s1 + $0x648] ss:$12 sps:$4 sm:$0xff]  }
 0x1d1   : > { %10307 = vmatpush3.bf16.msra.mxu1 %v12867_v38  ;;  %2820 = vmatprep.subr.bf16.mxu0 %v11514_v13 }
 0x1d2   : > { %v9462_v53 = vpop.f32.mrb[104].mxu1  ;;  %10308 = vmatprep.subr.bf16.mxu1 %v11159_v3 }
 0x1d3   : > { %v9463_v57 = vpop.f32.mrb[105].mxu1 }
 0x1d4   : > { %v9464_v23 = vadd.f32 %v9463_v57, %v9462_v53  ;;  %v9465_v5 = vpop.f32.mrb[106].mxu1  ;;  %2821 = vmatpush1.bf16.msra.mxu0 %v11515_v47  ;;  %v11163_v57 = vld [vmem:[%s15552_s1 + $0x680] ss:$12 sps:$4 sm:$0xff]  }
 0x1d5   : > { %v9466_v46 = vpop.f32.mrb[107].mxu1  ;;  %10309 = vmatpush3.bf16.msra.mxu1 %v11159_v3  ;;  %2822 = vmatprep.subr.bf16.mxu0 %v11516_v48  ;;  %v11523_v48 = vld [vmem:[%s15552_s1 + $0x678] ss:$12 sps:$4 sm:$0xff]  }
 0x1d6   : > { %v12943_v38 = vadd.f32 %v9464_v23, %v12657_v26  ;;  %v9467_v24 = vadd.f32 %v9466_v46, %v9465_v5  ;;  %10310 = vmatprep.subr.bf16.mxu1 %v11160_v58  ;;  %2668 = vmatmul.mubr.bf16.gmra.mrb[4].mxu0 %v11915_v11  ;;  %v11521_v23 = vld [vmem:[%s15552_s1 + $0x660] ss:$12 sps:$4 sm:$0xff]   ;;  %v11522_v46 = vld [vmem:[%s15552_s1 + $0x67c] ss:$12 sps:$4 sm:$0xff]  }
 0x1d7   : > { %3535 = vmatmul.mubr.bf16.gmra.mrb[212].mxu1 %v11915_v11  ;;  %2677 = vmatprep.mubr.bf16.mxu0 %v12022_v29  ;;  %v11162_v11 = vld [vmem:[%s15552_s1 + $0x668] ss:$12 sps:$4 sm:$0xff]  }
 0x1d8   : > { %3542 = vmatprep.mubr.bf16.mxu1 %v12022_v29  ;;  %v12956_v26 = vadd.f32 %v9467_v24, %v12671_v30  ;;  %2823 = vmatpush1.bf16.msra.mxu0 %v11517_v6 }
 0x1d9   : > { %10311 = vmatpush3.bf16.msra.mxu1 %v11160_v58  ;;  %2824 = vmatprep.subr.bf16.mxu0 %v11518_v21  ;;  %v11520_v58 = vld [vmem:[%s15552_s1 + $0x664] ss:$12 sps:$4 sm:$0xff]  }
 0x1da   : > { %v9468_v0 = vpop.f32.mrb[108].mxu1  ;;  %10312 = vmatprep.subr.bf16.mxu1 %v11161_v34  ;;  %v11165_v21 = vld [vmem:[%s15552_s1 + $0x6b0] ss:$12 sps:$4 sm:$0xff]  }
 0x1db   : > { %v9469_v29 = vpop.f32.mrb[109].mxu1 }
 0x1dc   : > { %v9470_v30 = vadd.f32 %v9469_v29, %v9468_v0  ;;  %v9471_v37 = vpop.f32.mrb[110].mxu1  ;;  %2825 = vmatpush1.bf16.msra.mxu0 %v11519_v35  ;;  %v11524_v0 = vld [vmem:[%s15552_s1 + $0x694] ss:$12 sps:$4 sm:$0xff]  }
 0x1dd   : > { %v9472_v3 = vpop.f32.mrb[111].mxu1  ;;  %10313 = vmatpush3.bf16.msra.mxu1 %v11161_v34  ;;  %2826 = vmatprep.subr.bf16.mxu0 %v11520_v58 }
 0x1de   : > { %v12971_v53 = vadd.f32 %v9470_v30, %v12689_v4  ;;  %v9473_v13 = vadd.f32 %v9472_v3, %v9471_v37  ;;  %10314 = vmatprep.subr.bf16.mxu1 %v11162_v11  ;;  %2678 = vmatmul.mubr.bf16.gmra.mrb[8].mxu0 %v11949_v40  ;;  %v11526_v30 = vld [vmem:[%s15552_s1 + $0x6ac] ss:$12 sps:$4 sm:$0xff]  }
 0x1df   : > { %3543 = vmatmul.mubr.bf16.gmra.mrb[216].mxu1 %v11949_v40  ;;  %2687 = vmatprep.mubr.bf16.mxu0 %v12069_v8  ;;  %v11164_v40 = vld [vmem:[%s15552_s1 + $0x698] ss:$12 sps:$4 sm:$0xff]  }
 0x1e0   : > { %3550 = vmatprep.mubr.bf16.mxu1 %v12069_v8  ;;  %v12984_v4 = vadd.f32 %v9473_v13, %v12700_v12  ;;  %2827 = vmatpush1.bf16.msra.mxu0 %v11521_v23 }
 0x1e1   : > { %10315 = vmatpush3.bf16.msra.mxu1 %v11162_v11  ;;  %2828 = vmatprep.subr.bf16.mxu0 %v11522_v46  ;;  %v11525_v11 = vld [vmem:[%s15552_s1 + $0x690] ss:$12 sps:$4 sm:$0xff]  }
 0x1e2   : > { %v9474_v5 = vpop.f32.mrb[112].mxu1  ;;  %10316 = vmatprep.subr.bf16.mxu1 %v11163_v57 }
 0x1e3   : > { %v9475_v8 = vpop.f32.mrb[113].mxu1 }
 0x1e4   : > { %v9476_v12 = vadd.f32 %v9475_v8, %v9474_v5  ;;  %v9477_v47 = vpop.f32.mrb[114].mxu1  ;;  %2829 = vmatpush1.bf16.msra.mxu0 %v11523_v48 }
 0x1e5   : > { %v9478_v24 = vpop.f32.mrb[115].mxu1  ;;  %10317 = vmatpush3.bf16.msra.mxu1 %v11163_v57  ;;  %2830 = vmatprep.subr.bf16.mxu0 %v11524_v0 }
 0x1e6   : > { %v12999_v34 = vadd.f32 %v9476_v12, %v12721_v22  ;;  %v9479_v6 = vadd.f32 %v9478_v24, %v9477_v47  ;;  %10318 = vmatprep.subr.bf16.mxu1 %v11164_v40  ;;  %2688 = vmatmul.mubr.bf16.gmra.mrb[12].mxu0 %v11979_v62 }
 0x1e7   : > { %3551 = vmatmul.mubr.bf16.gmra.mrb[220].mxu1 %v11979_v62  ;;  %2697 = vmatprep.mubr.bf16.mxu0 %v12111_v45 }
 0x1e8   : > { %3558 = vmatprep.mubr.bf16.mxu1 %v12111_v45  ;;  %v13012_v22 = vadd.f32 %v9479_v6, %v12732_v17  ;;  %2831 = vmatpush1.bf16.msra.mxu0 %v11525_v11  ;;  %v11527_v17 = vld [vmem:[%s15552_s1 + $0x6a8] ss:$12 sps:$4 sm:$0xff]  }
 0x1e9   : > { %10319 = vmatpush3.bf16.msra.mxu1 %v11164_v40  ;;  %2832 = vmatprep.subr.bf16.mxu0 %v11526_v30 }
 0x1ea   : > { %v9480_v29 = vpop.f32.mrb[116].mxu1  ;;  %10320 = vmatprep.subr.bf16.mxu1 %v11165_v21 }
 0x1eb   : > { %v9481_v62 = vpop.f32.mrb[117].mxu1 }
 0x1ec   : > { %v9482_v37 = vadd.f32 %v9481_v62, %v9480_v29  ;;  %v9483_v3 = vpop.f32.mrb[118].mxu1  ;;  %2833 = vmatpush1.bf16.msra.mxu0 %v11527_v17  ;;  %v15672_v29 = vld [vmem:[#allocation44_spill] sm:$0xff]  ;;  %v15673_v62 = vld [vmem:[#allocation10_spill] sm:$0xff] }
 0x1ed   : > { %v9484_v45 = vpop.f32.mrb[119].mxu1  ;;  %10321 = vmatpush3.bf16.msra.mxu1 %v11165_v21 }
 0x1ee   : > { %v13024_v35 = vadd.f32 %v9482_v37, %v12750_v32  ;;  %v9485_v13 = vadd.f32 %v9484_v45, %v9483_v3  ;;  %2698 = vmatmul.mubr.bf16.gmra.mrb[16].mxu0 %v12018_v27 }
 0x1ef   : > { %3559 = vmatmul.mubr.bf16.gmra.mrb[224].mxu1 %v12018_v27  ;;  %2707 = vmatprep.mubr.bf16.mxu0 %v12152_v31 }
 0x1f0   : > { %3566 = vmatprep.mubr.bf16.mxu1 %v12152_v31  ;;  %v13031_v58 = vadd.f32 %v9485_v13, %v12758_v55 }
 0x1f2   : > { %v9486_v57 = vpop.f32.mrb[120].mxu1 }
 0x1f3   : > { %v9487_v23 = vpop.f32.mrb[121].mxu1 }
 0x1f4   : > { %v9488_v5 = vadd.f32 %v9487_v23, %v9486_v57  ;;  %v9489_v46 = vpop.f32.mrb[122].mxu1 }
 0x1f5   : > { %v9490_v40 = vpop.f32.mrb[123].mxu1 }
 0x1f6   : > { %v13034_v32 = vadd.f32 %v9488_v5, %v12770_v19  ;;  %v9491_v8 = vadd.f32 %v9490_v40, %v9489_v46  ;;  %2708 = vmatmul.mubr.bf16.gmra.mrb[20].mxu0 %v12059_v61  ;;  %v15675_v5 = vld [vmem:[#allocation11_spill] sm:$0xff] }
 0x1f7   : > { %3567 = vmatmul.mubr.bf16.gmra.mrb[228].mxu1 %v12059_v61  ;;  %2717 = vmatprep.mubr.bf16.mxu0 %v12182_v56  ;;  %v15671_v61 = vld [vmem:[#allocation43_spill] sm:$0xff] }
 0x1f8   : > { %3574 = vmatprep.mubr.bf16.mxu1 %v12182_v56  ;;  %v13041_v27 = vadd.f32 %v9491_v8, %v12778_v33 }
 0x1fa   : > { %v9492_v31 = vpop.f32.mrb[124].mxu1 }
 0x1fb   : > { %v9493_v55 = vpop.f32.mrb[125].mxu1 }
 0x1fc   : > { %v9494_v12 = vadd.f32 %v9493_v55, %v9492_v31  ;;  %v9495_v47 = vpop.f32.mrb[126].mxu1 }
 0x1fd   : > { %v9496_v24 = vpop.f32.mrb[127].mxu1 }
 0x1fe   : > { %v13044_v19 = vadd.f32 %v9494_v12, %v12790_v49  ;;  %v9497_v48 = vadd.f32 %v9496_v24, %v9495_v47  ;;  %2718 = vmatmul.mubr.bf16.gmra.mrb[24].mxu0 %v12113_v51  ;;  %v15677_v24 = vld [vmem:[#allocation12_spill] sm:$0xff] }
 0x1ff   : > { %3575 = vmatmul.mubr.bf16.gmra.mrb[232].mxu1 %v12113_v51  ;;  %2727 = vmatprep.mubr.bf16.mxu0 %v12204_v28  ;;  %v15674_v51 = vld [vmem:[#allocation45_spill] sm:$0xff] }
 0x200   : > { %3582 = vmatprep.mubr.bf16.mxu1 %v12204_v28  ;;  %v13051_v56 = vadd.f32 %v9497_v48, %v15671_v61  ;;  %v15678_v48 = vld [vmem:[#allocation47_spill] sm:$0xff] }
 0x202   : > { %v9498_v33 = vpop.f32.mrb[128].mxu1 }
 0x203   : > { %v9499_v6 = vpop.f32.mrb[129].mxu1 }
 0x204   : > { %v9500_v0 = vadd.f32 %v9499_v6, %v9498_v33  ;;  %v9501_v21 = vpop.f32.mrb[130].mxu1 }
 0x205   : > { %v9502_v11 = vpop.f32.mrb[131].mxu1 }
 0x206   : > { %v13054_v49 = vadd.f32 %v9500_v0, %v15672_v29  ;;  %v9503_v30 = vadd.f32 %v9502_v11, %v9501_v21  ;;  %2728 = vmatmul.mubr.bf16.gmra.mrb[28].mxu0 %v15673_v62  ;;  %v15679_v29 = vld [vmem:[#allocation13_spill] sm:$0xff] }
 0x207   : > { %3583 = vmatmul.mubr.bf16.gmra.mrb[236].mxu1 %v15673_v62  ;;  %2737 = vmatprep.mubr.bf16.mxu0 %v12219_v59 }
 0x208   : > { %3590 = vmatprep.mubr.bf16.mxu1 %v12219_v59  ;;  %v13061_v28 = vadd.f32 %v9503_v30, %v15674_v51  ;;  %v15676_v59 = vld [vmem:[#allocation46_spill] sm:$0xff]  ;;  %v15680_v30 = vld [vmem:[#allocation48_spill] sm:$0xff] }
 0x20a   : > { %v9504_v37 = vpop.f32.mrb[132].mxu1 }
 0x20b   : > { %v9505_v3 = vpop.f32.mrb[133].mxu1 }
 0x20c   : > { %v9506_v45 = vadd.f32 %v9505_v3, %v9504_v37  ;;  %v9507_v17 = vpop.f32.mrb[134].mxu1 }
 0x20d   : > { %v9508_v13 = vpop.f32.mrb[135].mxu1 }
 0x20e   : > { %v13064_v57 = vadd.f32 %v9506_v45, %v12827_v44  ;;  %v9509_v23 = vadd.f32 %v9508_v13, %v9507_v17  ;;  %2738 = vmatmul.mubr.bf16.gmra.mrb[32].mxu0 %v15675_v5  ;;  %v15681_v13 = vld [vmem:[#allocation14_spill] sm:$0xff] }
 0x20f   : > { %3591 = vmatmul.mubr.bf16.gmra.mrb[240].mxu1 %v15675_v5  ;;  %2747 = vmatprep.mubr.bf16.mxu0 %v12237_v41 }
 0x210   : > { %3598 = vmatprep.mubr.bf16.mxu1 %v12237_v41  ;;  %v13071_v46 = vadd.f32 %v9509_v23, %v15676_v59 }
 0x212   : > { %v9510_v40 = vpop.f32.mrb[136].mxu1 }
 0x213   : > { %v9511_v8 = vpop.f32.mrb[137].mxu1 }
 0x214   : > { %v9512_v31 = vadd.f32 %v9511_v8, %v9510_v40  ;;  %v9513_v55 = vpop.f32.mrb[138].mxu1 }
 0x215   : > { %v9514_v12 = vpop.f32.mrb[139].mxu1 }
 0x216   : > { %v13074_v44 = vadd.f32 %v9512_v31, %v12838_v2  ;;  %v9515_v47 = vadd.f32 %v9514_v12, %v9513_v55  ;;  %2748 = vmatmul.mubr.bf16.gmra.mrb[36].mxu0 %v15677_v24  ;;  %v15682_v55 = vld [vmem:[#allocation3_spill] sm:$0xff] }
 0x217   : > { %3599 = vmatmul.mubr.bf16.gmra.mrb[244].mxu1 %v15677_v24  ;;  %2757 = vmatprep.mubr.bf16.mxu0 %v12251_v20 }
 0x218   : > { %v13079_v61 = vadd.f32 %v9515_v47, %v15678_v48  ;;  %3606 = vmatprep.mubr.bf16.mxu1 %v12251_v20 }
 0x21a   : > { %v9516_v41 = vpop.f32.mrb[140].mxu1 }
 0x21b   : > { %v9517_v33 = vpop.f32.mrb[141].mxu1 }
 0x21c   : > { %v9518_v6 = vadd.f32 %v9517_v33, %v9516_v41  ;;  %v9519_v0 = vpop.f32.mrb[142].mxu1 }
 0x21d   : > { %v9520_v21 = vpop.f32.mrb[143].mxu1 }
 0x21e   : > { %v13084_v2 = vadd.f32 %v9518_v6, %v12846_v60  ;;  %v9521_v11 = vadd.f32 %v9520_v21, %v9519_v0  ;;  %2758 = vmatmul.mubr.bf16.gmra.mrb[40].mxu0 %v15679_v29  ;;  %v15684_v0 = vld [vmem:[#allocation8_spill] sm:$0xff] }
 0x21f   : > { %3607 = vmatmul.mubr.bf16.gmra.mrb[248].mxu1 %v15679_v29  ;;  %2767 = vmatprep.mubr.bf16.mxu0 %v12261_v42  ;;  %v595_v21 = vshll.u32 %v15684_v0, 16  ;;  %v15685_v29 = vld [vmem:[#allocation49_spill] sm:$0xff]  ;;  %v15689_v0 = vld [vmem:[#allocation16_spill] sm:$0xff] }
 0x220   : > { %v13089_v62 = vadd.f32 %v9521_v11, %v15680_v30  ;;  %3614 = vmatprep.mubr.bf16.mxu1 %v12261_v42 }
 0x222   : > { %v9538_v20 = vpop.f32.mrb[144].mxu1 }
 0x223   : > { %v9539_v51 = vpop.f32.mrb[145].mxu1 }
 0x224   : > { %v9540_v37 = vadd.f32 %v9539_v51, %v9538_v20  ;;  %v9541_v3 = vpop.f32.mrb[146].mxu1  ;;  %v597_v51 = vrot.slane %v595_v21, 1 }
 0x225   : > { %v9542_v45 = vpop.f32.mrb[147].mxu1 }
 0x226   : > { %v9543_v17 = vadd.f32 %v9542_v45, %v9541_v3  ;;  %v13094_v60 = vadd.f32 %v9540_v37, %v12855_v54  ;;  %2768 = vmatmul.mubr.bf16.gmra.mrb[44].mxu0 %v15681_v13 }
 0x227   : > { %3615 = vmatmul.mubr.bf16.gmra.mrb[252].mxu1 %v15681_v13  ;;  %2777 = vmatprep.mubr.bf16.mxu0 %v12274_v14 }
 0x228   : > { %3622 = vmatprep.mubr.bf16.mxu1 %v12274_v14  ;;  %v13101_v23 = vadd.f32 %v9543_v17, %v12862_v9  ;;  %v15683_v9 = vld [vmem:[#allocation7_spill] sm:$0xff] }
 0x229   : > { %v590_v12 = vshll.u32 %v15683_v9, 16 }
 0x22a   : > { %v9544_v42 = vpop.f32.mrb[148].mxu1 }
 0x22b   : > { %v9545_v5 = vpop.f32.mrb[149].mxu1  ;;  %v592_v6 = vrot.slane %v590_v12, 1 }
 0x22c   : > { %v9546_v59 = vadd.f32 %v9545_v5, %v9544_v42  ;;  %v9547_v40 = vpop.f32.mrb[150].mxu1 }
 0x22d   : > { %v9548_v8 = vpop.f32.mrb[151].mxu1 }
 0x22e   : > { %v9549_v31 = vadd.f32 %v9548_v8, %v9547_v40  ;;  %v13104_v54 = vadd.f32 %v9546_v59, %v12870_v25  ;;  %2778 = vmatmul.mubr.bf16.gmra.mrb[48].mxu0 %v15682_v55  ;;  %v588_v25 = vshrl.u32 %v15683_v9, 16 }
 0x22f   : > { %3623 = vmatmul.mubr.bf16.gmra.mrb[0].mxu1 %v15682_v55  ;;  %2787 = vmatprep.mubr.bf16.mxu0 %v12282_v50 }
 0x230   : > { %3630 = vmatprep.mubr.bf16.mxu1 %v12282_v50  ;;  %v13111_v14 = vadd.f32 %v9549_v31, %v12877_v39  ;;  %v15686_v50 = vld [vmem:[#allocation5_spill] sm:$0xff]  ;;  %v593_v20 = vor.u32 %v592_v6, %v588_v25 }
 0x232   : > { %v9550_v47 = vpop.f32.mrb[152].mxu1  ;;  %v598_v42 = vsel %vm262_vm1, %v593_v20, %v597_v51  ;;  %vm14143_vm1 = vmand %vm6184_vm15, %vm5716_vm7 }
 0x233   : > { %v9551_v24 = vpop.f32.mrb[153].mxu1 }
 0x234   : > { %v9552_v48 = vadd.f32 %v9551_v24, %v9550_v47  ;;  %v9553_v41 = vpop.f32.mrb[154].mxu1 }
 0x235   : > { %v9554_v33 = vpop.f32.mrb[155].mxu1 }
 0x236   : > { %v9555_v11 = vadd.f32 %v9554_v33, %v9553_v41  ;;  %v13117_v30 = vadd.f32 %v9552_v48, %v15685_v29  ;;  %2788 = vmatmul.mubr.bf16.gmra.mrb[52].mxu0 %v15686_v50 }
 0x237   : > { %3631 = vmatmul.mubr.bf16.gmra.mrb[4].mxu1 %v15686_v50  ;;  %2797 = vmatprep.mubr.bf16.mxu0 %v12904_v43 }
 0x238   : > { %3638 = vmatprep.mubr.bf16.mxu1 %v12904_v43  ;;  %v13124_v39 = vadd.f32 %v9555_v11, %v12889_v18 }
 0x23a   : > { %v9556_v37 = vpop.f32.mrb[156].mxu1 }
 0x23b   : > { %v9557_v3 = vpop.f32.mrb[157].mxu1 }
 0x23c   : > { %v9558_v45 = vadd.f32 %v9557_v3, %v9556_v37  ;;  %v9559_v17 = vpop.f32.mrb[158].mxu1  ;;  %v15691_v37 = vld [vmem:[#allocation18_spill] sm:$0xff]  ;;  %v15692_v3 = vld [vmem:[#allocation19_spill] sm:$0xff] }
 0x23d   : > { %v9560_v13 = vpop.f32.mrb[159].mxu1 }
 0x23e   : > { %v9561_v5 = vadd.f32 %v9560_v13, %v9559_v17  ;;  %v13128_v59 = vadd.f32 %v9558_v45, %v12894_v7  ;;  %2798 = vmatmul.mubr.bf16.gmra.mrb[56].mxu0 %v11798_v1  ;;  %v15687_v7 = vmov 0  }
 0x23f   : > { %3639 = vmatmul.mubr.bf16.gmra.mrb[8].mxu1 %v11798_v1  ;;  %2807 = vmatprep.mubr.bf16.mxu0 %v598_v42  ;;  %v15688_v1 = vld [vmem:[#allocation15_spill] sm:$0xff] }
 0x240   : > { %3646 = vmatprep.mubr.bf16.mxu1 %v598_v42  ;;  %v13133_v18 = vadd.f32 %v9561_v5, %v12901_v10 }
 0x242   : > { %v9562_v43 = vpop.f32.mrb[160].mxu1 }
 0x243   : > { %v9563_v40 = vpop.f32.mrb[161].mxu1 }
 0x244   : > { %v9564_v8 = vadd.f32 %v9563_v40, %v9562_v43  ;;  %v9565_v31 = vpop.f32.mrb[162].mxu1  ;;  %v15693_v40 = vld [vmem:[#allocation22_spill] sm:$0xff] }
 0x245   : > { %v9566_v55 = vpop.f32.mrb[163].mxu1 }
 0x246   : > { %v9567_v12 = vadd.f32 %v9566_v55, %v9565_v31  ;;  %v13136_v47 = vadd.f32 %v9564_v8, %v12907_v15  ;;  %2808 = vmatmul.mubr.bf16.gmra.mrb[60].mxu0 %v15683_v9  ;;  %v15694_v8 = vld [vmem:[#allocation27_spill] sm:$0xff] }
 0x247   : > { %3647 = vmatmul.mubr.bf16.gmra.mrb[12].mxu1 %v15683_v9  ;;  %2850 = vmatprep.mubr.bf16.mxu0 %v15687_v7  ;;  %v15690_v9 = vld [vmem:[#allocation17_spill] sm:$0xff] }
 0x248   : > { %10322 = vmatprep.mubr.bf16.mxu1 %v15688_v1  ;;  %v13143_v10 = vadd.f32 %v9567_v12, %v12914_v52 }
 0x24a   : > { %v9568_v24 = vpop.f32.mrb[164].mxu1 }
 0x24b   : > { %v9569_v48 = vpop.f32.mrb[165].mxu1 }
 0x24c   : > { %v9570_v41 = vadd.f32 %v9569_v48, %v9568_v24  ;;  %v9571_v33 = vpop.f32.mrb[166].mxu1 }
 0x24d   : > { %v9572_v25 = vpop.f32.mrb[167].mxu1 }
 0x24e   : > { %v9573_v6 = vadd.f32 %v9572_v25, %v9571_v33  ;;  %v13146_v15 = vadd.f32 %v9570_v41, %v12917_v36  ;;  %2851 = vmatmul.mubr.bf16.vlgmr.msra.gmra.mrb[0].mxu0 %v15688_v1  ;;  %v15695_v41 = vld [vmem:[#allocation32_spill] sm:$0xff]  ;;  %v15696_v33 = vld [vmem:[#allocation37_spill] sm:$0xff] }
 0x24f   : > { %10323 = vmatmul.mubr.bf16.vlgmr.msra.gmra.mrb[16].mxu1 %v15689_v0  ;;  %2860 = vmatprep.mubr.bf16.mxu0 %v15687_v7 }
 0x250   : > { %10326 = vmatprep.mubr.bf16.mxu1 %v15690_v9  ;;  %v13153_v52 = vadd.f32 %v9573_v6, %v12927_v63 }
 0x252   : > { %v9574_v21 = vpop.f32.mrb[168].mxu1 }
 0x253   : > { %v9575_v11 = vpop.f32.mrb[169].mxu1 }
 0x254   : > { %v9576_v29 = vadd.f32 %v9575_v11, %v9574_v21  ;;  %v9577_v50 = vpop.f32.mrb[170].mxu1 }
 0x255   : > { %v9578_v20 = vpop.f32.mrb[171].mxu1 }
 0x256   : > { %v9579_v51 = vadd.f32 %v9578_v20, %v9577_v50  ;;  %v13156_v36 = vadd.f32 %v9576_v29, %v12943_v38  ;;  %2861 = vmatmul.mubr.bf16.gmra.mrb[4].mxu0 %v15689_v0  ;;  %v15697_v29 = vld [vmem:[#allocation40_spill] sm:$0xff]  ;;  %v15698_v50 = vld [vmem:[#allocation41_spill] sm:$0xff] }
 0x257   : > { %10327 = vmatmul.mubr.bf16.gmra.mrb[20].mxu1 %v15691_v37  ;;  %2870 = vmatprep.mubr.bf16.mxu0 %v15687_v7 }
 0x258   : > { %10330 = vmatprep.mubr.bf16.mxu1 %v15692_v3  ;;  %v13163_v63 = vadd.f32 %v9579_v51, %v12956_v26 }
 0x25a   : > { %v9580_v45 = vpop.f32.mrb[172].mxu1 }
 0x25b   : > { %v9581_v17 = vpop.f32.mrb[173].mxu1 }
 0x25c   : > { %v9582_v13 = vadd.f32 %v9581_v17, %v9580_v45  ;;  %v9583_v42 = vpop.f32.mrb[174].mxu1 }
 0x25d   : > { %v9584_v5 = vpop.f32.mrb[175].mxu1 }
 0x25e   : > { %v9585_v43 = vadd.f32 %v9584_v5, %v9583_v42  ;;  %v13166_v38 = vadd.f32 %v9582_v13, %v12971_v53  ;;  %2871 = vmatmul.mubr.bf16.gmra.mrb[8].mxu0 %v15690_v9  ;;  %v15700_v42 = vld [vmem:[#allocation4_spill] sm:$0xff] }
 0x25f   : > { %10331 = vmatmul.mubr.bf16.gmra.mrb[24].mxu1 %v15693_v40  ;;  %2880 = vmatprep.mubr.bf16.mxu0 %v15687_v7 }
 0x260   : > { %10334 = vmatprep.mubr.bf16.mxu1 %v15694_v8  ;;  %v13173_v26 = vadd.f32 %v9585_v43, %v12984_v4 }
 0x262   : > { %v9586_v31 = vpop.f32.mrb[176].mxu1 }
 0x263   : > { %v9587_v55 = vpop.f32.mrb[177].mxu1 }
 0x264   : > { %v9588_v12 = vadd.f32 %v9587_v55, %v9586_v31  ;;  %v9589_v1 = vpop.f32.mrb[178].mxu1 }
 0x265   : > { %v9590_v24 = vpop.f32.mrb[179].mxu1 }
 0x266   : > { %v9591_v48 = vadd.f32 %v9590_v24, %v9589_v1  ;;  %v13176_v53 = vadd.f32 %v9588_v12, %v12999_v34  ;;  %2881 = vmatmul.mubr.bf16.gmra.mrb[12].mxu0 %v15691_v37 }
 0x267   : > { %10335 = vmatmul.mubr.bf16.gmra.mrb[28].mxu1 %v15695_v41  ;;  %2890 = vmatprep.mubr.bf16.mxu0 %v15687_v7 }
 0x268   : > { %10338 = vmatprep.mubr.bf16.mxu1 %v15696_v33  ;;  %v13183_v4 = vadd.f32 %v9591_v48, %v13012_v22 }
 0x26a   : > { %v9592_v25 = vpop.f32.mrb[180].mxu1 }
 0x26b   : > { %v9593_v6 = vpop.f32.mrb[181].mxu1 }
 0x26c   : > { %v9594_v0 = vadd.f32 %v9593_v6, %v9592_v25  ;;  %v9595_v9 = vpop.f32.mrb[182].mxu1 }
 0x26d   : > { %v9596_v21 = vpop.f32.mrb[183].mxu1 }
 0x26e   : > { %v9597_v11 = vadd.f32 %v9596_v21, %v9595_v9  ;;  %v13186_v34 = vadd.f32 %v9594_v0, %v13024_v35  ;;  %2891 = vmatmul.mubr.bf16.gmra.mrb[16].mxu0 %v15692_v3  ;;  %v15699_v3 = vld [vmem:[#allocation42_spill] sm:$0xff] }
 0x26f   : > { %10339 = vmatmul.mubr.bf16.gmra.mrb[32].mxu1 %v15697_v29  ;;  %2900 = vmatprep.mubr.bf16.mxu0 %v15687_v7 }
 0x270   : > { %10342 = vmatprep.mubr.bf16.mxu1 %v15698_v50  ;;  %v13193_v22 = vadd.f32 %v9597_v11, %v13031_v58 }
 0x272   : > { %v9598_v20 = vpop.f32.mrb[184].mxu1 }
 0x273   : > { %v9599_v51 = vpop.f32.mrb[185].mxu1 }
 0x274   : > { %v9600_v37 = vadd.f32 %v9599_v51, %v9598_v20  ;;  %v9601_v45 = vpop.f32.mrb[186].mxu1 }
 0x275   : > { %v9602_v17 = vpop.f32.mrb[187].mxu1 }
 0x276   : > { %v9603_v13 = vadd.f32 %v9602_v17, %v9601_v45  ;;  %v13196_v35 = vadd.f32 %v9600_v37, %v13034_v32  ;;  %2901 = vmatmul.mubr.bf16.gmra.mrb[20].mxu0 %v15693_v40  ;;  %v15701_v40 = vld [vmem:[#allocation6_spill] sm:$0xff] }
 0x277   : > { %10343 = vmatmul.mubr.bf16.gmra.mrb[36].mxu1 %v15699_v3  ;;  %2910 = vmatprep.mubr.bf16.mxu0 %v15687_v7 }
 0x278   : > { %10346 = vmatprep.mubr.bf16.mxu1 %v15700_v42  ;;  %v13203_v58 = vadd.f32 %v9603_v13, %v13041_v27  ;;  %v15601_v42 = vmov 0.0  }
 0x279   : > { %10426 = vmatprep.subr.bf16.mxu0 %v15601_v42  ;;  %10354 = vmatprep.subr.bf16.mxu1 %v15601_v42 }
 0x27a   : > { %v9604_v5 = vpop.f32.mrb[188].mxu1 }
 0x27b   : > { %v9605_v43 = vpop.f32.mrb[189].mxu1 }
 0x27c   : > { %v9606_v31 = vadd.f32 %v9605_v43, %v9604_v5  ;;  %v9607_v55 = vpop.f32.mrb[190].mxu1 }
 0x27d   : > { %v9608_v12 = vpop.f32.mrb[191].mxu1 }
 0x27e   : > { %v9609_v1 = vadd.f32 %v9608_v12, %v9607_v55  ;;  %v13206_v32 = vadd.f32 %v9606_v31, %v13044_v19  ;;  %2911 = vmatmul.mubr.bf16.gmra.mrb[24].mxu0 %v15694_v8  ;;  %v15702_v8 = vld [vmem:[#allocation9_spill] sm:$0xff] }
 0x27f   : > { %10347 = vmatmul.mubr.bf16.gmra.mrb[40].mxu1 %v15701_v40  ;;  %2920 = vmatprep.mubr.bf16.mxu0 %v15687_v7 }
 0x280   : > { %10350 = vmatprep.mubr.bf16.mxu1 %v11831_v16  ;;  %v13213_v27 = vadd.f32 %v9609_v1, %v13051_v56 }
 0x282   : > { %v9610_v24 = vpop.f32.mrb[192].mxu1 }
 0x283   : > { %v9611_v48 = vpop.f32.mrb[193].mxu1 }
 0x284   : > { %v9612_v25 = vadd.f32 %v9611_v48, %v9610_v24  ;;  %v9613_v6 = vpop.f32.mrb[194].mxu1 }
 0x285   : > { %v9614_v0 = vpop.f32.mrb[195].mxu1 }
 0x286   : > { %v9615_v9 = vadd.f32 %v9614_v0, %v9613_v6  ;;  %v13216_v19 = vadd.f32 %v9612_v25, %v13054_v49  ;;  %2921 = vmatmul.mubr.bf16.gmra.mrb[28].mxu0 %v15695_v41 }
 0x287   : > { %10351 = vmatmul.mubr.bf16.gmra.mrb[44].mxu1 %v15702_v8  ;;  %2930 = vmatprep.mubr.bf16.mxu0 %v15687_v7 }
 0x288   : > { %v13222_v16 = vadd.f32 %v9615_v9, %v13061_v28  ;;  %10356 = vmatprep.mubr.msk.bf16.mxu1 %vm11586_vm2, %v15601_v42 }
 0x28a   : > { %v9616_v56 = vpop.f32.mrb[196].mxu1 }
 0x28b   : > { %v9617_v21 = vpop.f32.mrb[197].mxu1 }
 0x28c   : > { %v9618_v11 = vadd.f32 %v9617_v21, %v9616_v56  ;;  %v9619_v20 = vpop.f32.mrb[198].mxu1 }
 0x28d   : > { %v9620_v51 = vpop.f32.mrb[199].mxu1 }
 0x28e   : > { %v9621_v37 = vadd.f32 %v9620_v51, %v9619_v20  ;;  %v13225_v45 = vadd.f32 %v9618_v11, %v13064_v57  ;;  %2931 = vmatmul.mubr.bf16.gmra.mrb[32].mxu0 %v15696_v33 }
 0x28f   : > { %2940 = vmatprep.mubr.bf16.mxu0 %v15687_v7 }
 0x290   : > { %v13230_v49 = vadd.f32 %v9621_v37, %v13071_v46 }
 0x292   : > { %v9622_v41 = vpop.f32.mrb[200].mxu1 }
 0x293   : > { %v9623_v17 = vpop.f32.mrb[201].mxu1 }
 0x294   : > { %v9624_v28 = vadd.f32 %v9623_v17, %v9622_v41  ;;  %v9625_v13 = vpop.f32.mrb[202].mxu1 }
 0x295   : > { %v9626_v5 = vpop.f32.mrb[203].mxu1 }
 0x296   : > { %v9627_v43 = vadd.f32 %v9626_v5, %v9625_v13  ;;  %v13235_v57 = vadd.f32 %v9624_v28, %v13074_v44  ;;  %2941 = vmatmul.mubr.bf16.gmra.mrb[36].mxu0 %v15697_v29 }
 0x297   : > { %2950 = vmatprep.mubr.bf16.mxu0 %v15687_v7 }
 0x298   : > { %v13240_v46 = vadd.f32 %v9627_v43, %v13079_v61 }
 0x29a   : > { %v9628_v33 = vpop.f32.mrb[204].mxu1 }
 0x29b   : > { %v9629_v31 = vpop.f32.mrb[205].mxu1 }
 0x29c   : > { %v9630_v55 = vadd.f32 %v9629_v31, %v9628_v33  ;;  %v9631_v12 = vpop.f32.mrb[206].mxu1 }
 0x29d   : > { %v9632_v1 = vpop.f32.mrb[207].mxu1 }
 0x29e   : > { %v9633_v40 = vadd.f32 %v9632_v1, %v9631_v12  ;;  %v13245_v44 = vadd.f32 %v9630_v55, %v13084_v2  ;;  %2951 = vmatmul.mubr.bf16.gmra.mrb[40].mxu0 %v15698_v50 }
 0x29f   : > { %2960 = vmatprep.mubr.bf16.mxu0 %v15687_v7 }
 0x2a0   : > { %v13250_v61 = vadd.f32 %v9633_v40, %v13089_v62 }
 0x2a2   : > { %v9650_v29 = vpop.f32.mrb[208].mxu1 }
 0x2a3   : > { %v9651_v24 = vpop.f32.mrb[209].mxu1 }
 0x2a4   : > { %v9652_v48 = vadd.f32 %v9651_v24, %v9650_v29  ;;  %v9653_v25 = vpop.f32.mrb[210].mxu1 }
 0x2a5   : > { %v9654_v6 = vpop.f32.mrb[211].mxu1 }
 0x2a6   : > { %v9655_v0 = vadd.f32 %v9654_v6, %v9653_v25  ;;  %v13253_v9 = vadd.f32 %v9652_v48, %v13094_v60  ;;  %2961 = vmatmul.mubr.bf16.gmra.mrb[44].mxu0 %v15699_v3 }
 0x2a7   : > { %10428 = vmatprep.mubr.msk.bf16.mxu0 %vm11586_vm2, %v15601_v42 }
 0x2a8   : > { %v13259_v2 = vadd.f32 %v9655_v0, %v13101_v23 }
 0x2aa   : > { %v9656_v7 = vpop.f32.mrb[212].mxu1 }
 0x2ab   : > { %v9657_v62 = vpop.f32.mrb[213].mxu1 }
 0x2ac   : > { %v9658_v50 = vadd.f32 %v9657_v62, %v9656_v7  ;;  %v9659_v8 = vpop.f32.mrb[214].mxu1 }
 0x2ad   : > { %v9660_v56 = vpop.f32.mrb[215].mxu1 }
 0x2ae   : > { %v9661_v21 = vadd.f32 %v9660_v56, %v9659_v8  ;;  %v13262_v11 = vadd.f32 %v9658_v50, %v13104_v54 }
 0x2b0   : > { %v13265_v60 = vadd.f32 %v9661_v21, %v13111_v14 }
 0x2b2   : > { %v9662_v20 = vpop.f32.mrb[216].mxu1 }
 0x2b3   : > { %v9663_v3 = vpop.f32.mrb[217].mxu1 }
 0x2b4   : > { %v9664_v51 = vadd.f32 %v9663_v3, %v9662_v20  ;;  %v9665_v37 = vpop.f32.mrb[218].mxu1 }
 0x2b5   : > { %v9666_v41 = vpop.f32.mrb[219].mxu1 }
 0x2b6   : > { %v9667_v17 = vadd.f32 %v9666_v41, %v9665_v37  ;;  %v13268_v23 = vadd.f32 %v9664_v51, %v13117_v30 }
 0x2b8   : > { %v13271_v28 = vadd.f32 %v9667_v17, %v13124_v39 }
 0x2ba   : > { %v9668_v13 = vpop.f32.mrb[220].mxu1 }
 0x2bb   : > { %v9669_v5 = vpop.f32.mrb[221].mxu1 }
 0x2bc   : > { %v9670_v43 = vadd.f32 %v9669_v5, %v9668_v13  ;;  %v9671_v54 = vpop.f32.mrb[222].mxu1 }
 0x2bd   : > { %v9672_v33 = vpop.f32.mrb[223].mxu1 }
 0x2be   : > { %v9673_v31 = vadd.f32 %v9672_v33, %v9671_v54  ;;  %v13274_v14 = vadd.f32 %v9670_v43, %v13128_v59 }
 0x2c0   : > { %v13277_v55 = vadd.f32 %v9673_v31, %v13133_v18 }
 0x2c2   : > { %v9674_v12 = vpop.f32.mrb[224].mxu1 }
 0x2c3   : > { %v9675_v1 = vpop.f32.mrb[225].mxu1 }
 0x2c4   : > { %v9676_v40 = vadd.f32 %v9675_v1, %v9674_v12  ;;  %v9677_v30 = vpop.f32.mrb[226].mxu1 }
 0x2c5   : > { %v9678_v29 = vpop.f32.mrb[227].mxu1 }
 0x2c6   : > { %v9679_v24 = vadd.f32 %v9678_v29, %v9677_v30  ;;  %v13280_v39 = vadd.f32 %v9676_v40, %v13136_v47 }
 0x2c8   : > { %v13283_v48 = vadd.f32 %v9679_v24, %v13143_v10 }
 0x2ca   : > { %v9680_v25 = vpop.f32.mrb[228].mxu1 }
 0x2cb   : > { %v9681_v6 = vpop.f32.mrb[229].mxu1 }
 0x2cc   : > { %v9682_v0 = vadd.f32 %v9681_v6, %v9680_v25  ;;  %v9683_v59 = vpop.f32.mrb[230].mxu1 }
 0x2cd   : > { %v9684_v7 = vpop.f32.mrb[231].mxu1 }
 0x2ce   : > { %v9685_v62 = vadd.f32 %v9684_v7, %v9683_v59  ;;  %v13286_v18 = vadd.f32 %v9682_v0, %v13146_v15 }
 0x2d0   : > { %v13289_v50 = vadd.f32 %v9685_v62, %v13153_v52 }
 0x2d2   : > { %v9686_v8 = vpop.f32.mrb[232].mxu1 }
 0x2d3   : > { %v9687_v56 = vpop.f32.mrb[233].mxu1 }
 0x2d4   : > { %v9688_v21 = vadd.f32 %v9687_v56, %v9686_v8  ;;  %v9689_v47 = vpop.f32.mrb[234].mxu1 }
 0x2d5   : > { %v9690_v20 = vpop.f32.mrb[235].mxu1 }
 0x2d6   : > { %v9691_v3 = vadd.f32 %v9690_v20, %v9689_v47  ;;  %v13292_v10 = vadd.f32 %v9688_v21, %v13156_v36 }
 0x2d8   : > { %v13295_v51 = vadd.f32 %v9691_v3, %v13163_v63 }
 0x2da   : > { %v9692_v37 = vpop.f32.mrb[236].mxu1 }
 0x2db   : > { %v9693_v41 = vpop.f32.mrb[237].mxu1 }
 0x2dc   : > { %v9694_v17 = vadd.f32 %v9693_v41, %v9692_v37  ;;  %v9695_v15 = vpop.f32.mrb[238].mxu1 }
 0x2dd   : > { %v9696_v13 = vpop.f32.mrb[239].mxu1 }
 0x2de   : > { %v9697_v5 = vadd.f32 %v9696_v13, %v9695_v15  ;;  %v13298_v52 = vadd.f32 %v9694_v17, %v13166_v38 }
 0x2e0   : > { %v13301_v43 = vadd.f32 %v9697_v5, %v13173_v26  ;;  %v15703_v5 = vld [vmem:[#allocation20_spill] sm:$0xff] }
 0x2e2   : > { %v9698_v54 = vpop.f32.mrb[240].mxu1 }
 0x2e3   : > { %v9699_v33 = vpop.f32.mrb[241].mxu1 }
 0x2e4   : > { %v9700_v31 = vadd.f32 %v9699_v33, %v9698_v54  ;;  %v9701_v36 = vpop.f32.mrb[242].mxu1 }
 0x2e5   : > { %v9702_v12 = vpop.f32.mrb[243].mxu1 }
 0x2e6   : > { %v9703_v1 = vadd.f32 %v9702_v12, %v9701_v36  ;;  %v13304_v63 = vadd.f32 %v9700_v31, %v13176_v53 }
 0x2e8   : > { %v13307_v40 = vadd.f32 %v9703_v1, %v13183_v4 }
 0x2ea   : > { %v9704_v30 = vpop.f32.mrb[244].mxu1 }
 0x2eb   : > { %v9705_v29 = vpop.f32.mrb[245].mxu1 }
 0x2ec   : > { %v9706_v24 = vadd.f32 %v9705_v29, %v9704_v30  ;;  %v9707_v38 = vpop.f32.mrb[246].mxu1  ;;  %v15705_v30 = vld [vmem:[#allocation23_spill] sm:$0xff] }
 0x2ed   : > { %v9708_v25 = vpop.f32.mrb[247].mxu1 }
 0x2ee   : > { %v9709_v6 = vadd.f32 %v9708_v25, %v9707_v38  ;;  %v13310_v26 = vadd.f32 %v9706_v24, %v13186_v34  ;;  %v15706_v38 = vld [vmem:[#allocation24_spill] sm:$0xff] }
 0x2f0   : > { %v13313_v0 = vadd.f32 %v9709_v6, %v13193_v22 }
 0x2f2   : > { %v9710_v59 = vpop.f32.mrb[248].mxu1 }
 0x2f3   : > { %v9711_v7 = vpop.f32.mrb[249].mxu1 }
 0x2f4   : > { %v9712_v62 = vadd.f32 %v9711_v7, %v9710_v59  ;;  %v9713_v53 = vpop.f32.mrb[250].mxu1 }
 0x2f5   : > { %v9714_v8 = vpop.f32.mrb[251].mxu1 }
 0x2f6   : > { %v9715_v56 = vadd.f32 %v9714_v8, %v9713_v53  ;;  %v13316_v4 = vadd.f32 %v9712_v62, %v13196_v35  ;;  %v15707_v53 = vld [vmem:[#allocation25_spill] sm:$0xff] }
 0x2f8   : > { %v13319_v21 = vadd.f32 %v9715_v56, %v13203_v58  ;;  %v15704_v58 = vld [vmem:[#allocation21_spill] sm:$0xff] }
 0x2fa   : > { %v9716_v47 = vpop.f32.mrb[252].mxu1 }
 0x2fb   : > { %v9717_v20 = vpop.f32.mrb[253].mxu1 }
 0x2fc   : > { %v9718_v3 = vadd.f32 %v9717_v20, %v9716_v47  ;;  %v9719_v34 = vpop.f32.mrb[254].mxu1  ;;  %v15708_v20 = vld [vmem:[#allocation26_spill] sm:$0xff] }
 0x2fd   : > { %v9720_v37 = vpop.f32.mrb[255].mxu1 }
 0x2fe   : > { %v9721_v41 = vadd.f32 %v9720_v37, %v9719_v34  ;;  %v13322_v22 = vadd.f32 %v9718_v3, %v13206_v32 }
 0x300   : > { %v13325_v17 = vadd.f32 %v9721_v41, %v13213_v27 }
 0x301   : > { %v2779_v15 = vpop.f32.mrb[48].mxu0 }
 0x302   : > { %v9722_v13 = vpop.f32.mrb[0].mxu1  ;;  %v10610_v35 = vadd.f32 %v15703_v5, %v2779_v15  ;;  %v2781_v54 = vpop.f32.mrb[49].mxu0  ;;  %v15709_v15 = vld [vmem:[#allocation28_spill] sm:$0xff] }
 0x303   : > { %v9723_v33 = vpop.f32.mrb[1].mxu1  ;;  %v10611_v31 = vadd.f32 %v15704_v58, %v2781_v54  ;;  %v2783_v12 = vpop.f32.mrb[50].mxu0 }
 0x304   : > { %v9724_v36 = vadd.f32 %v9723_v33, %v9722_v13  ;;  %v9725_v1 = vpop.f32.mrb[2].mxu1  ;;  %11256 = vtanh.f32 %v10610_v35  ;;  %v10612_v29 = vadd.f32 %v15705_v30, %v2783_v12  ;;  %v2785_v24 = vpop.f32.mrb[51].mxu0  ;;  %v15710_v35 = vld [vmem:[#allocation29_spill] sm:$0xff] }
 0x305   : > { %v9726_v32 = vpop.f32.mrb[3].mxu1  ;;  %11258 = vtanh.f32 %v10611_v31  ;;  %v10613_v27 = vadd.f32 %v15706_v38, %v2785_v24 }
 0x306   : > { %v9727_v25 = vadd.f32 %v9726_v32, %v9725_v1  ;;  %v13332_v6 = vadd.f32 %v9724_v36, %v13216_v19  ;;  %11260 = vtanh.f32 %v10612_v29  ;;  %v15711_v32 = vld [vmem:[#allocation30_spill] sm:$0xff] }
 0x307   : > { %11262 = vtanh.f32 %v10613_v27 }
 0x308   : > { %v13335_v59 = vadd.f32 %v9727_v25, %v13222_v16 }
 0x309   : > { %v2789_v7 = vpop.f32.mrb[52].mxu0 }
 0x30a   : > { %v9728_v62 = vpop.f32.mrb[4].mxu1  ;;  %v10614_v8 = vadd.f32 %v15707_v53, %v2789_v7  ;;  %v2791_v56 = vpop.f32.mrb[53].mxu0 }
 0x30b   : > { %v9729_v47 = vpop.f32.mrb[5].mxu1  ;;  %v10615_v3 = vadd.f32 %v15708_v20, %v2791_v56  ;;  %v2793_v37 = vpop.f32.mrb[54].mxu0 }
 0x30c   : > { %v9730_v34 = vadd.f32 %v9729_v47, %v9728_v62  ;;  %v9731_v41 = vpop.f32.mrb[6].mxu1  ;;  %11264 = vtanh.f32 %v10614_v8  ;;  %v10616_v19 = vadd.f32 %v15709_v15, %v2793_v37  ;;  %v2795_v13 = vpop.f32.mrb[55].mxu0  ;;  %v15712_v62 = vld [vmem:[#allocation31_spill] sm:$0xff]  ;;  %v15713_v47 = vld [vmem:[#allocation33_spill] sm:$0xff] }
 0x30d   : > { %v9732_v5 = vpop.f32.mrb[7].mxu1  ;;  %11266 = vtanh.f32 %v10615_v3  ;;  %v10617_v16 = vadd.f32 %v15710_v35, %v2795_v13 }
 0x30e   : > { %v9733_v54 = vadd.f32 %v9732_v5, %v9731_v41  ;;  %v13342_v33 = vadd.f32 %v9730_v34, %v13225_v45  ;;  %v11257_v58 = vpop.eup %11256  ;;  %11268 = vtanh.f32 %v10616_v19  ;;  %v15714_v34 = vld [vmem:[#allocation34_spill] sm:$0xff] }
 0x30f   : > { %v11259_v31 = vpop.eup %11258  ;;  %11270 = vtanh.f32 %v10617_v16 }
 0x310   : > { %v13345_v36 = vadd.f32 %v9733_v54, %v13230_v49  ;;  %v11261_v12 = vpop.eup %11260 }
 0x311   : > { %v11263_v1 = vpop.eup %11262  ;;  %v2799_v30 = vpop.f32.mrb[56].mxu0  ;;  %v3860_v24 = vpack.c.bf16 %v11261_v12, %v11257_v58 }
 0x312   : > { %v9734_v29 = vpop.f32.mrb[8].mxu1  ;;  %v10618_v38 = vadd.f32 %v15711_v32, %v2799_v30  ;;  %v2801_v27 = vpop.f32.mrb[57].mxu0  ;;  %v3908_v7 = vpack.c.bf16 %v11263_v1, %v11259_v31  ;;  %v15716_v32 = vld [vmem:[#allocation36_spill] sm:$0xff] }
 0x313   : > { %v9735_v25 = vpop.f32.mrb[9].mxu1  ;;  %v10619_v45 = vadd.f32 %v15712_v62, %v2801_v27  ;;  %v2803_v8 = vpop.f32.mrb[58].mxu0 }
 0x314   : > { %v9736_v53 = vadd.f32 %v9735_v25, %v9734_v29  ;;  %v9737_v56 = vpop.f32.mrb[10].mxu1  ;;  %11272 = vtanh.f32 %v10618_v38  ;;  %v10620_v20 = vadd.f32 %v15713_v47, %v2803_v8  ;;  %v2805_v49 = vpop.f32.mrb[59].mxu0  ;;  %10427 = vmatpush3.bf16.xpose.msra.mxu0 %v3908_v7  ;;  %v15717_v7 = vld [vmem:[#allocation38_spill] sm:$0xff]  ;;  %v15718_v8 = vld [vmem:[#allocation39_spill] sm:$0xff] }
 0x315   : > { %v9738_v3 = vpop.f32.mrb[11].mxu1  ;;  %11274 = vtanh.f32 %v10619_v45  ;;  %v10621_v37 = vadd.f32 %v15714_v34, %v2805_v49  ;;  %10438 = vmatprep.subr.bf16.mxu0 %v15601_v42 }
 0x316   : > { %v9739_v41 = vadd.f32 %v9738_v3, %v9737_v56  ;;  %v13353_v15 = vadd.f32 %v9736_v53, %v13235_v57  ;;  %v13355_v19 = vpop.eup %11264  ;;  %11276 = vtanh.f32 %v10620_v20  ;;  %v15715_v57 = vld [vmem:[#allocation35_spill] sm:$0xff] }
 0x317   : > { %v13357_v13 = vpop.eup %11266  ;;  %11278 = vtanh.f32 %v10621_v37 }
 0x318   : > { %v13360_v5 = vadd.f32 %v9739_v41, %v13240_v46  ;;  %v13362_v35 = vpop.eup %11268 }
 0x319   : > { %v13364_v16 = vpop.eup %11270  ;;  %v3861_v54 = vpack.c.bf16 %v13362_v35, %v13355_v19  ;;  %v2809_v58 = vpop.f32.mrb[60].mxu0 }
 0x31a   : > { %v9740_v31 = vpop.f32.mrb[12].mxu1  ;;  %v10622_v12 = vadd.f32 %v15715_v57, %v2809_v58  ;;  %v2811_v1 = vpop.f32.mrb[61].mxu0  ;;  %v3909_v29 = vpack.c.bf16 %v13364_v16, %v13357_v13 }
 0x31b   : > { %v9741_v30 = vpop.f32.mrb[13].mxu1  ;;  %v10623_v38 = vadd.f32 %v15716_v32, %v2811_v1  ;;  %v2813_v27 = vpop.f32.mrb[62].mxu0  ;;  %10429 = vmatmul.mubr.bf16.vlgmr.msra.gmra.mrb[64].mxu0 %v3860_v24 }
 0x31c   : > { %v9742_v46 = vadd.f32 %v9741_v30, %v9740_v31  ;;  %v9743_v25 = vpop.f32.mrb[14].mxu1  ;;  %11280 = vtanh.f32 %v10622_v12  ;;  %v10624_v62 = vadd.f32 %v15717_v7, %v2813_v27  ;;  %v2815_v45 = vpop.f32.mrb[63].mxu0  ;;  %10440 = vmatprep.mubr.msk.bf16.mxu0 %vm11586_vm2, %v15601_v42 }
 0x31d   : > { %v9744_v53 = vpop.f32.mrb[15].mxu1  ;;  %11282 = vtanh.f32 %v10623_v38  ;;  %v10625_v56 = vadd.f32 %v15718_v8, %v2815_v45 }
 0x31e   : > { %v9745_v47 = vadd.f32 %v9744_v53, %v9743_v25  ;;  %v13377_v20 = vadd.f32 %v9742_v46, %v13245_v44  ;;  %v11273_v49 = vpop.eup %11272  ;;  %11284 = vtanh.f32 %v10624_v62 }
 0x31f   : > { %v11275_v3 = vpop.eup %11274  ;;  %11286 = vtanh.f32 %v10625_v56 }
 0x320   : > { %v13380_v24 = vadd.f32 %v9745_v47, %v13250_v61  ;;  %v11277_v34 = vpop.eup %11276 }
 0x321   : > { %v11279_v37 = vpop.eup %11278  ;;  %v2852_v41 = vpop.f32.mrb[0].mxu0  ;;  %v3862_v31 = vpack.c.bf16 %v11277_v34, %v11273_v49 }
 0x322   : > { %v10324_v58 = vpop.f32.mrb[16].mxu1  ;;  %11288 = vtanh.f32 %v2852_v41  ;;  %v2854_v12 = vpop.f32.mrb[1].mxu0  ;;  %v3910_v44 = vpack.c.bf16 %v11279_v37, %v11275_v3 }
 0x323   : > { %v13383_v57 = vadd.f32 %v10324_v58, %v13262_v11  ;;  %v3689_v1 = vpop.f32.mrb[17].mxu1  ;;  %11290 = vtanh.f32 %v2854_v12  ;;  %v2856_v32 = vpop.f32.mrb[2].mxu0 }
 0x324   : > { %v3690_v30 = vadd.f32 %v3689_v1, %v13253_v9  ;;  %v10325_v38 = vpop.f32.mrb[18].mxu1  ;;  %11292 = vtanh.f32 %v2856_v32  ;;  %v2858_v46 = vpop.f32.mrb[3].mxu0  ;;  %10439 = vmatpush3.bf16.xpose.msra.mxu0 %v3910_v44 }
 0x325   : > { %v13387_v61 = vadd.f32 %v10325_v38, %v13265_v60  ;;  %v3692_v27 = vpop.f32.mrb[19].mxu1  ;;  %11294 = vtanh.f32 %v2858_v46  ;;  %10450 = vmatprep.subr.bf16.mxu0 %v15601_v42 }
 0x326   : > { %v3693_v25 = vadd.f32 %v3692_v27, %v13259_v2  ;;  %v13391_v11 = vpop.eup %11280 }
 0x327   : > { %v3913_v7 = vpack.c.bf16 %v13387_v61, %v13383_v57  ;;  %v13395_v9 = vpop.eup %11282 }
 0x328   : > { %v3912_v62 = vpack.c.bf16 %v3693_v25, %v3690_v30  ;;  %v13397_v45 = vpop.eup %11284 }
 0x329   : > { %v13399_v60 = vpop.eup %11286  ;;  %v3863_v53 = vpack.c.bf16 %v13397_v45, %v13391_v11  ;;  %v2862_v8 = vpop.f32.mrb[4].mxu0 }
 0x32a   : > { %v10328_v56 = vpop.f32.mrb[20].mxu1  ;;  %11296 = vtanh.f32 %v2862_v8  ;;  %v2864_v47 = vpop.f32.mrb[5].mxu0  ;;  %v3911_v3 = vpack.c.bf16 %v13399_v60, %v13395_v9 }
 0x32b   : > { %v13404_v2 = vadd.f32 %v10328_v56, %v13274_v14  ;;  %v3705_v49 = vpop.f32.mrb[21].mxu1  ;;  %11298 = vtanh.f32 %v2864_v47  ;;  %v2866_v37 = vpop.f32.mrb[6].mxu0  ;;  %10441 = vmatmul.mubr.bf16.vlgmr.msra.gmra.mrb[68].mxu0 %v3862_v31 }
 0x32c   : > { %v13409_v34 = vadd.f32 %v3705_v49, %v13268_v23  ;;  %v10329_v41 = vpop.f32.mrb[22].mxu1  ;;  %v11289_v58 = vpop.eup %11288  ;;  %11300 = vtanh.f32 %v2866_v37  ;;  %10451 = vmatpush3.bf16.msra.mxu0 %v3912_v62  ;;  %10452 = vmatprep.mubr.msk.bf16.mxu0 %vm11586_vm2, %v15601_v42 }
 0x32d   : > { %v13412_v12 = vadd.f32 %v10329_v41, %v13277_v55  ;;  %v2868_v1 = vpop.f32.mrb[7].mxu0  ;;  %v3708_v14 = vpop.f32.mrb[23].mxu1  ;;  %10462 = vmatprep.subr.bf16.mxu0 %v15601_v42 }
 0x32e   : > { %v11291_v44 = vpop.eup %11290  ;;  %11302 = vtanh.f32 %v2868_v1  ;;  %v13417_v30 = vadd.f32 %v3708_v14, %v13271_v28 }
 0x32f   : > { %v11293_v23 = vpop.eup %11292 }
 0x330   : > { %v11295_v32 = vpop.eup %11294  ;;  %v3848_v55 = vpack.c.bf16 %v11293_v23, %v11289_v58 }
 0x331   : > { %v3896_v46 = vpack.c.bf16 %v11295_v32, %v11291_v44  ;;  %v2872_v27 = vpop.f32.mrb[8].mxu0 }
 0x332   : > { %v10332_v25 = vpop.f32.mrb[24].mxu1  ;;  %11304 = vtanh.f32 %v2872_v27  ;;  %v2874_v28 = vpop.f32.mrb[9].mxu0 }
 0x333   : > { %v13425_v62 = vadd.f32 %v10332_v25, %v13286_v18  ;;  %v3721_v8 = vpop.f32.mrb[25].mxu1  ;;  %10355 = vmatpush3.bf16.xpose.msra.mxu1 %v3896_v46  ;;  %11306 = vtanh.f32 %v2874_v28  ;;  %v2876_v47 = vpop.f32.mrb[10].mxu0 }
 0x334   : > { %v13428_v56 = vadd.f32 %v3721_v8, %v13280_v39  ;;  %v10333_v49 = vpop.f32.mrb[26].mxu1  ;;  %10360 = vmatprep.subr.bf16.mxu1 %v15601_v42  ;;  %v11297_v37 = vpop.eup %11296  ;;  %11308 = vtanh.f32 %v2876_v47 }
 0x335   : > { %v13432_v41 = vadd.f32 %v10333_v49, %v13289_v50  ;;  %v2878_v58 = vpop.f32.mrb[11].mxu0  ;;  %v3724_v1 = vpop.f32.mrb[27].mxu1 }
 0x336   : > { %v11299_v18 = vpop.eup %11298  ;;  %11310 = vtanh.f32 %v2878_v58  ;;  %v13435_v14 = vadd.f32 %v3724_v1, %v13283_v48 }
 0x337   : > { %v11301_v44 = vpop.eup %11300 }
 0x338   : > { %v11303_v23 = vpop.eup %11302  ;;  %v3849_v32 = vpack.c.bf16 %v11301_v44, %v11297_v37 }
 0x339   : > { %v3897_v27 = vpack.c.bf16 %v11303_v23, %v11299_v18  ;;  %v2882_v25 = vpop.f32.mrb[12].mxu0 }
 0x33a   : > { %v10336_v50 = vpop.f32.mrb[28].mxu1  ;;  %10357 = vmatmul.mubr.bf16.vlgmr.msra.gmra.mrb[48].mxu1 %v3848_v55  ;;  %11312 = vtanh.f32 %v2882_v25  ;;  %v2884_v8 = vpop.f32.mrb[13].mxu0 }
 0x33b   : > { %v13442_v28 = vadd.f32 %v10336_v50, %v13298_v52  ;;  %v3737_v48 = vpop.f32.mrb[29].mxu1  ;;  %10361 = vmatpush3.bf16.xpose.msra.mxu1 %v3897_v27  ;;  %10362 = vmatprep.mubr.msk.bf16.mxu1 %vm11586_vm2, %v15601_v42  ;;  %11314 = vtanh.f32 %v2884_v8  ;;  %v2886_v49 = vpop.f32.mrb[14].mxu0 }
 0x33c   : > { %v13447_v47 = vadd.f32 %v3737_v48, %v13292_v10  ;;  %v10337_v37 = vpop.f32.mrb[30].mxu1  ;;  %10366 = vmatprep.subr.bf16.mxu1 %v15601_v42  ;;  %v11305_v58 = vpop.eup %11304  ;;  %11316 = vtanh.f32 %v2886_v49 }
 0x33d   : > { %v13451_v55 = vadd.f32 %v10337_v37, %v13301_v43  ;;  %v2888_v52 = vpop.f32.mrb[15].mxu0  ;;  %v3740_v1 = vpop.f32.mrb[31].mxu1 }
 0x33e   : > { %v11307_v18 = vpop.eup %11306  ;;  %11318 = vtanh.f32 %v2888_v52  ;;  %v13454_v44 = vadd.f32 %v3740_v1, %v13295_v51 }
 0x33f   : > { %v11309_v23 = vpop.eup %11308 }
 0x340   : > { %v11311_v27 = vpop.eup %11310  ;;  %v3850_v25 = vpack.c.bf16 %v11309_v23, %v11305_v58 }
 0x341   : > { %v3898_v8 = vpack.c.bf16 %v11311_v27, %v11307_v18  ;;  %v2892_v48 = vpop.f32.mrb[16].mxu0 }
 0x342   : > { %v10340_v43 = vpop.f32.mrb[32].mxu1  ;;  %10363 = vmatmul.mubr.bf16.vlgmr.msra.gmra.mrb[52].mxu1 %v3849_v32  ;;  %11320 = vtanh.f32 %v2892_v48  ;;  %v2894_v37 = vpop.f32.mrb[17].mxu0 }
 0x343   : > { %v13461_v49 = vadd.f32 %v10340_v43, %v13310_v26  ;;  %v3753_v51 = vpop.f32.mrb[33].mxu1  ;;  %10367 = vmatpush3.bf16.xpose.msra.mxu1 %v3898_v8  ;;  %10368 = vmatprep.mubr.msk.bf16.mxu1 %vm11586_vm2, %v15601_v42  ;;  %11322 = vtanh.f32 %v2894_v37  ;;  %v2896_v52 = vpop.f32.mrb[18].mxu0 }
 0x344   : > { %v13466_v58 = vadd.f32 %v3753_v51, %v13304_v63  ;;  %v10341_v1 = vpop.f32.mrb[34].mxu1  ;;  %10372 = vmatprep.subr.bf16.mxu1 %v15601_v42  ;;  %v11313_v18 = vpop.eup %11312  ;;  %11324 = vtanh.f32 %v2896_v52 }
 0x345   : > { %v13470_v32 = vadd.f32 %v10341_v1, %v13313_v0  ;;  %v2898_v26 = vpop.f32.mrb[19].mxu0  ;;  %v3756_v23 = vpop.f32.mrb[35].mxu1 }
 0x346   : > { %v11315_v27 = vpop.eup %11314  ;;  %11326 = vtanh.f32 %v2898_v26  ;;  %v13473_v8 = vadd.f32 %v3756_v23, %v13307_v40 }
 0x347   : > { %v11317_v48 = vpop.eup %11316 }
 0x348   : > { %v11319_v43 = vpop.eup %11318  ;;  %v3851_v37 = vpack.c.bf16 %v11317_v48, %v11313_v18 }
 0x349   : > { %v3899_v52 = vpack.c.bf16 %v11319_v43, %v11315_v27  ;;  %v2902_v10 = vpop.f32.mrb[20].mxu0 }
 0x34a   : > { %v10344_v0 = vpop.f32.mrb[36].mxu1  ;;  %10369 = vmatmul.mubr.bf16.vlgmr.msra.gmra.mrb[56].mxu1 %v3850_v25  ;;  %11328 = vtanh.f32 %v2902_v10  ;;  %v2904_v26 = vpop.f32.mrb[21].mxu0 }
 0x34b   : > { %v13480_v1 = vadd.f32 %v10344_v0, %v13322_v22  ;;  %v3769_v40 = vpop.f32.mrb[37].mxu1  ;;  %10373 = vmatpush3.bf16.xpose.msra.mxu1 %v3899_v52  ;;  %10374 = vmatprep.mubr.msk.bf16.mxu1 %vm11586_vm2, %v15601_v42  ;;  %11330 = vtanh.f32 %v2904_v26  ;;  %v2906_v23 = vpop.f32.mrb[22].mxu0 }
 0x34c   : > { %v13485_v18 = vadd.f32 %v3769_v40, %v13316_v4  ;;  %v10345_v48 = vpop.f32.mrb[38].mxu1  ;;  %10378 = vmatprep.subr.bf16.mxu1 %v15601_v42  ;;  %v11321_v27 = vpop.eup %11320  ;;  %11332 = vtanh.f32 %v2906_v23 }
 0x34d   : > { %15719 = vst [vmem:[#allocation43_spill] sm:$0xff] %v13480_v1  ;;  %v13489_v10 = vadd.f32 %v10345_v48, %v13325_v17  ;;  %v2908_v22 = vpop.f32.mrb[23].mxu0  ;;  %v3772_v25 = vpop.f32.mrb[39].mxu1 }
 0x34e   : > { %v11323_v43 = vpop.eup %11322  ;;  %11334 = vtanh.f32 %v2908_v22  ;;  %v13492_v52 = vadd.f32 %v3772_v25, %v13319_v21 }
 0x34f   : > { %15720 = vst [vmem:[#allocation44_spill] sm:$0xff] %v13489_v10  ;;  %v11325_v0 = vpop.eup %11324 }
 0x350   : > { %v11327_v26 = vpop.eup %11326  ;;  %v3852_v40 = vpack.c.bf16 %v11325_v0, %v11321_v27 }
 0x351   : > { %v3900_v23 = vpack.c.bf16 %v11327_v26, %v11323_v43  ;;  %v2912_v51 = vpop.f32.mrb[24].mxu0 }
 0x352   : > { %v10348_v17 = vpop.f32.mrb[40].mxu1  ;;  %10375 = vmatmul.mubr.bf16.vlgmr.msra.gmra.mrb[60].mxu1 %v3851_v37  ;;  %11336 = vtanh.f32 %v2912_v51  ;;  %v2914_v22 = vpop.f32.mrb[25].mxu0 }
 0x353   : > { %v13499_v48 = vadd.f32 %v10348_v17, %v13342_v33  ;;  %v3785_v21 = vpop.f32.mrb[41].mxu1  ;;  %10379 = vmatpush3.bf16.xpose.msra.mxu1 %v3900_v23  ;;  %10380 = vmatprep.mubr.msk.bf16.mxu1 %vm11586_vm2, %v15601_v42  ;;  %11338 = vtanh.f32 %v2914_v22  ;;  %v2916_v25 = vpop.f32.mrb[26].mxu0 }
 0x354   : > { %v13504_v27 = vadd.f32 %v3785_v21, %v13332_v6  ;;  %v10349_v0 = vpop.f32.mrb[42].mxu1  ;;  %10384 = vmatprep.subr.bf16.mxu1 %v15601_v42  ;;  %v11329_v43 = vpop.eup %11328  ;;  %11340 = vtanh.f32 %v2916_v25 }
 0x355   : > { %15721 = vst [vmem:[#allocation10_spill] sm:$0xff] %v13499_v48  ;;  %v13508_v37 = vadd.f32 %v10349_v0, %v13345_v36  ;;  %v2918_v33 = vpop.f32.mrb[27].mxu0  ;;  %v3788_v51 = vpop.f32.mrb[43].mxu1 }
 0x356   : > { %15722 = vst [vmem:[#allocation45_spill] sm:$0xff] %v13504_v27  ;;  %v11331_v26 = vpop.eup %11330  ;;  %11342 = vtanh.f32 %v2918_v33  ;;  %v13511_v23 = vadd.f32 %v3788_v51, %v13335_v59 }
 0x357   : > { %15723 = vst [vmem:[#allocation11_spill] sm:$0xff] %v13508_v37  ;;  %v11333_v17 = vpop.eup %11332 }
 0x358   : > { %15724 = vst [vmem:[#allocation46_spill] sm:$0xff] %v13511_v23  ;;  %v11335_v22 = vpop.eup %11334  ;;  %v3853_v21 = vpack.c.bf16 %v11333_v17, %v11329_v43 }
 0x359   : > { %v3901_v25 = vpack.c.bf16 %v11335_v22, %v11331_v26  ;;  %v2922_v63 = vpop.f32.mrb[28].mxu0 }
 0x35a   : > { %v10352_v36 = vpop.f32.mrb[44].mxu1  ;;  %10381 = vmatmul.mubr.bf16.vlgmr.msra.gmra.mrb[64].mxu1 %v3852_v40  ;;  %11344 = vtanh.f32 %v2922_v63  ;;  %v2924_v33 = vpop.f32.mrb[29].mxu0 }
 0x35b   : > { %v13518_v0 = vadd.f32 %v10352_v36, %v13377_v20  ;;  %v3801_v59 = vpop.f32.mrb[45].mxu1  ;;  %10385 = vmatpush3.bf16.xpose.msra.mxu1 %v3901_v25  ;;  %10386 = vmatprep.mubr.msk.bf16.mxu1 %vm11586_vm2, %v15601_v42  ;;  %11346 = vtanh.f32 %v2924_v33  ;;  %v2926_v51 = vpop.f32.mrb[30].mxu0 }
 0x35c   : > { %v13523_v43 = vadd.f32 %v3801_v59, %v13353_v15  ;;  %v10353_v17 = vpop.f32.mrb[46].mxu1  ;;  %10390 = vmatprep.subr.bf16.mxu1 %v15601_v42  ;;  %v11337_v26 = vpop.eup %11336  ;;  %11348 = vtanh.f32 %v2926_v51 }
 0x35d   : > { %15725 = vst [vmem:[#allocation12_spill] sm:$0xff] %v13518_v0  ;;  %v13527_v63 = vadd.f32 %v10353_v17, %v13380_v24  ;;  %v2928_v20 = vpop.f32.mrb[31].mxu0  ;;  %v3804_v40 = vpop.f32.mrb[47].mxu1 }
 0x35e   : > { %15726 = vst [vmem:[#allocation47_spill] sm:$0xff] %v13523_v43  ;;  %v11339_v22 = vpop.eup %11338  ;;  %11350 = vtanh.f32 %v2928_v20  ;;  %v13530_v25 = vadd.f32 %v3804_v40, %v13360_v5 }
 0x35f   : > { %15727 = vst [vmem:[#allocation13_spill] sm:$0xff] %v13527_v63  ;;  %v11341_v36 = vpop.eup %11340 }
 0x360   : > { %15728 = vst [vmem:[#allocation48_spill] sm:$0xff] %v13530_v25  ;;  %v11343_v33 = vpop.eup %11342  ;;  %v3854_v59 = vpack.c.bf16 %v11341_v36, %v11337_v26 }
 0x361   : > { %v3902_v51 = vpack.c.bf16 %v11343_v33, %v11339_v22  ;;  %v2932_v4 = vpop.f32.mrb[32].mxu0 }
 0x362   : > { %10387 = vmatmul.mubr.bf16.vlgmr.msra.gmra.mrb[68].mxu1 %v3853_v21  ;;  %11352 = vtanh.f32 %v2932_v4  ;;  %v2934_v24 = vpop.f32.mrb[33].mxu0 }
 0x363   : > { %10391 = vmatpush3.bf16.xpose.msra.mxu1 %v3902_v51  ;;  %10392 = vmatprep.mubr.msk.bf16.mxu1 %vm11586_vm2, %v15601_v42  ;;  %11354 = vtanh.f32 %v2934_v24  ;;  %v2936_v5 = vpop.f32.mrb[34].mxu0 }
 0x364   : > { %10396 = vmatprep.subr.bf16.mxu1 %v15601_v42  ;;  %v11345_v17 = vpop.eup %11344  ;;  %11356 = vtanh.f32 %v2936_v5  ;;  %v2938_v20 = vpop.f32.mrb[35].mxu0 }
 0x365   : > { %v11347_v26 = vpop.eup %11346  ;;  %11358 = vtanh.f32 %v2938_v20 }
 0x366   : > { %v11349_v40 = vpop.eup %11348 }
 0x367   : > { %v3855_v22 = vpack.c.bf16 %v11349_v40, %v11345_v17 }
 0x368   : > { %v11351_v36 = vpop.eup %11350 }
 0x369   : > { %v3903_v33 = vpack.c.bf16 %v11351_v36, %v11347_v26  ;;  %v2942_v21 = vpop.f32.mrb[36].mxu0 }
 0x36a   : > { %10393 = vmatmul.mubr.bf16.vlgmr.msra.gmra.mrb[72].mxu1 %v3854_v59  ;;  %11360 = vtanh.f32 %v2942_v21  ;;  %v2944_v4 = vpop.f32.mrb[37].mxu0 }
 0x36b   : > { %10397 = vmatpush3.bf16.xpose.msra.mxu1 %v3903_v33  ;;  %10398 = vmatprep.mubr.msk.bf16.mxu1 %vm11586_vm2, %v15601_v42  ;;  %11362 = vtanh.f32 %v2944_v4  ;;  %v2946_v51 = vpop.f32.mrb[38].mxu0 }
 0x36c   : > { %10402 = vmatprep.subr.bf16.mxu1 %v15601_v42  ;;  %v11353_v24 = vpop.eup %11352  ;;  %11364 = vtanh.f32 %v2946_v51  ;;  %v2948_v5 = vpop.f32.mrb[39].mxu0 }
 0x36d   : > { %v11355_v20 = vpop.eup %11354  ;;  %11366 = vtanh.f32 %v2948_v5 }
 0x36e   : > { %v11357_v15 = vpop.eup %11356 }
 0x36f   : > { %v11359_v17 = vpop.eup %11358  ;;  %v3856_v26 = vpack.c.bf16 %v11357_v15, %v11353_v24 }
 0x370   : > { %v3904_v40 = vpack.c.bf16 %v11359_v17, %v11355_v20 }
 0x371   : > { %v2952_v59 = vpop.f32.mrb[40].mxu0 }
 0x372   : > { %10399 = vmatmul.mubr.bf16.vlgmr.msra.gmra.mrb[76].mxu1 %v3855_v22  ;;  %11368 = vtanh.f32 %v2952_v59  ;;  %v2954_v36 = vpop.f32.mrb[41].mxu0 }
 0x373   : > { %10403 = vmatpush3.bf16.xpose.msra.mxu1 %v3904_v40  ;;  %10404 = vmatprep.mubr.msk.bf16.mxu1 %vm11586_vm2, %v15601_v42  ;;  %11370 = vtanh.f32 %v2954_v36  ;;  %v2956_v33 = vpop.f32.mrb[42].mxu0 }
 0x374   : > { %10408 = vmatprep.subr.bf16.mxu1 %v15601_v42  ;;  %v11361_v21 = vpop.eup %11360  ;;  %11372 = vtanh.f32 %v2956_v33  ;;  %v2958_v4 = vpop.f32.mrb[43].mxu0 }
 0x375   : > { %v11363_v51 = vpop.eup %11362  ;;  %11374 = vtanh.f32 %v2958_v4 }
 0x376   : > { %v11365_v5 = vpop.eup %11364 }
 0x377   : > { %v11367_v15 = vpop.eup %11366  ;;  %v3857_v24 = vpack.c.bf16 %v11365_v5, %v11361_v21 }
 0x378   : > { %v3905_v20 = vpack.c.bf16 %v11367_v15, %v11363_v51 }
 0x379   : > { %v2962_v22 = vpop.f32.mrb[44].mxu0 }
 0x37a   : > { %10405 = vmatmul.mubr.bf16.vlgmr.msra.gmra.mrb[80].mxu1 %v3856_v26  ;;  %11376 = vtanh.f32 %v2962_v22  ;;  %v2964_v17 = vpop.f32.mrb[45].mxu0 }
 0x37b   : > { %10409 = vmatpush3.bf16.xpose.msra.mxu1 %v3905_v20  ;;  %10410 = vmatprep.mubr.msk.bf16.mxu1 %vm11586_vm2, %v15601_v42  ;;  %11378 = vtanh.f32 %v2964_v17  ;;  %v2966_v40 = vpop.f32.mrb[46].mxu0 }
 0x37c   : > { %10414 = vmatprep.subr.bf16.mxu1 %v15601_v42  ;;  %v11369_v59 = vpop.eup %11368  ;;  %11380 = vtanh.f32 %v2966_v40  ;;  %v2968_v36 = vpop.f32.mrb[47].mxu0 }
 0x37d   : > { %v11371_v33 = vpop.eup %11370  ;;  %11382 = vtanh.f32 %v2968_v36 }
 0x37e   : > { %v11373_v4 = vpop.eup %11372 }
 0x37f   : > { %v11375_v21 = vpop.eup %11374  ;;  %v3858_v51 = vpack.c.bf16 %v11373_v4, %v11369_v59 }
 0x380   : > { %v3906_v5 = vpack.c.bf16 %v11375_v21, %v11371_v33 }
 0x382   : > { %10411 = vmatmul.mubr.bf16.vlgmr.msra.gmra.mrb[84].mxu1 %v3857_v24 }
 0x383   : > { %10415 = vmatpush3.bf16.xpose.msra.mxu1 %v3906_v5  ;;  %10416 = vmatprep.mubr.msk.bf16.mxu1 %vm11586_vm2, %v15601_v42 }
 0x384   : > { %10420 = vmatprep.subr.bf16.mxu1 %v15601_v42  ;;  %v11377_v26 = vpop.eup %11376 }
 0x385   : > { %v11379_v15 = vpop.eup %11378 }
 0x386   : > { %v11381_v20 = vpop.eup %11380 }
 0x387   : > { %v11383_v22 = vpop.eup %11382  ;;  %v3859_v17 = vpack.c.bf16 %v11381_v20, %v11377_v26 }
 0x388   : > { %v3907_v40 = vpack.c.bf16 %v11383_v22, %v11379_v15 }
 0x38a   : > { %10417 = vmatmul.mubr.bf16.vlgmr.msra.gmra.mrb[88].mxu1 %v3858_v51 }
 0x38b   : > { %10421 = vmatpush3.bf16.xpose.msra.mxu1 %v3907_v40  ;;  %10422 = vmatprep.mubr.msk.bf16.mxu1 %vm11586_vm2, %v15601_v42 }
 0x38c   : > { %10432 = vmatprep.subr.bf16.mxu1 %v15601_v42 }
 0x392   : > { %10423 = vmatmul.mubr.bf16.vlgmr.msra.gmra.mrb[92].mxu1 %v3859_v17 }
 0x393   : > { %10433 = vmatpush3.bf16.xpose.msra.mxu1 %v3909_v29  ;;  %10434 = vmatprep.mubr.msk.bf16.mxu1 %vm11586_vm2, %v15601_v42 }
 0x394   : > { %10444 = vmatprep.subr.bf16.mxu1 %v15601_v42 }
 0x39a   : > { %10435 = vmatmul.mubr.bf16.vlgmr.msra.gmra.mrb[96].mxu1 %v3861_v54 }
 0x39b   : > { %10445 = vmatpush3.bf16.xpose.msra.mxu1 %v3911_v3  ;;  %10446 = vmatprep.mubr.msk.bf16.mxu1 %vm11586_vm2, %v15601_v42 }
 0x39c   : > { %10456 = vmatprep.subr.bf16.mxu1 %v15601_v42 }
 0x3a2   : > { %10447 = vmatmul.mubr.bf16.vlgmr.msra.gmra.mrb[100].mxu1 %v3863_v53 }
 0x3a3   : > { %10457 = vmatpush3.bf16.msra.mxu1 %v3913_v7  ;;  %10458 = vmatprep.mubr.msk.bf16.mxu1 %vm11586_vm2, %v15601_v42 }
 0x3a4   : > { %10468 = vmatprep.subr.bf16.mxu1 %v15601_v42 }
 0x3ee   : > { %v13578_v19 = vpop.f32.mrb[64].mxu0 }
 0x3ef   : > { %v10430_v13 = vpop.f32.mrb[65].mxu0 }
 0x3f0   : > { %v13580_v35 = vpop.f32.mrb[66].mxu0 }
 0x3f1   : > { %v10431_v16 = vpop.f32.mrb[67].mxu0 }
 0x3fe   : > { %v13582_v54 = vpop.f32.mrb[68].mxu0 }
 0x3ff   : > { %v10442_v29 = vpop.f32.mrb[69].mxu0 }
 0x400   : > { %v13584_v11 = vpop.f32.mrb[70].mxu0 }
 0x401   : > { %v10443_v9 = vpop.f32.mrb[71].mxu0 }
 0x40d   : > { %v13586_v45 = vpop.f32.mrb[48].mxu1 }
 0x40e   : > { %v10358_v57 = vpop.f32.mrb[49].mxu1  ;;  %v4585_v61 = vsel %vm4584_vm3, %v13586_v45, -inf }
 0x40f   : > { %4586 = vmax.xlane.f32.xlu0 %v4585_v61  ;;  %v13590_v7 = vpop.f32.mrb[50].mxu1 }
 0x410   : > { %v10359_v60 = vpop.f32.mrb[51].mxu1  ;;  %v4588_v53 = vsel %vm4584_vm3, %v13590_v7, -inf }
 0x413   : > { %4589 = vmax.xlane.f32.xlu0 %v4588_v53 }
 0x415   : > { %v13594_v3 = vpop.f32.mrb[52].mxu1 }
 0x416   : > { %v10364_v24 = vpop.f32.mrb[53].mxu1  ;;  %v4591_v59 = vsel %vm4584_vm3, %v13594_v3, -inf }
 0x417   : > { %4592 = vmax.xlane.f32.xlu1 %v4591_v59  ;;  %v13598_v36 = vpop.f32.mrb[54].mxu1 }
 0x418   : > { %v10365_v33 = vpop.f32.mrb[55].mxu1  ;;  %v4594_v4 = vsel %vm4584_vm3, %v13598_v36, -inf }
 0x41b   : > { %4595 = vmax.xlane.f32.xlu1 %v4594_v4 }
 0x41d   : > { %v13602_v21 = vpop.f32.mrb[56].mxu1 }
 0x41e   : > { %v10370_v51 = vpop.f32.mrb[57].mxu1  ;;  %v4597_v5 = vsel %vm4584_vm3, %v13602_v21, -inf }
 0x41f   : > { %4598 = vmax.xlane.f32.xlu0 %v4597_v5  ;;  %v13606_v26 = vpop.f32.mrb[58].mxu1 }
 0x420   : > { %v10371_v15 = vpop.f32.mrb[59].mxu1  ;;  %v4600_v20 = vsel %vm4584_vm3, %v13606_v26, -inf }
 0x421   : > { %4601 = vmax.xlane.f32.xlu1 %v4600_v20 }
 0x425   : > { %v13610_v22 = vpop.f32.mrb[60].mxu1 }
 0x426   : > { %v10376_v17 = vpop.f32.mrb[61].mxu1  ;;  %v4603_v40 = vsel %vm4584_vm3, %v13610_v22, -inf }
 0x427   : > { %4604 = vmax.xlane.f32.xlu0 %v4603_v40  ;;  %v13614_v13 = vpop.f32.mrb[62].mxu1 }
 0x428   : > { %v10377_v16 = vpop.f32.mrb[63].mxu1  ;;  %v4606_v29 = vsel %vm4584_vm3, %v13614_v13, -inf }
 0x429   : > { %4607 = vmax.xlane.f32.xlu1 %v4606_v29 }
 0x42d   : > { %v13618_v9 = vpop.f32.mrb[64].mxu1 }
 0x42e   : > { %v10382_v57 = vpop.f32.mrb[65].mxu1  ;;  %v4609_v61 = vsel %vm4584_vm3, %v13618_v9, -inf }
 0x42f   : > { %4610 = vmax.xlane.f32.xlu0 %v4609_v61  ;;  %v13622_v60 = vpop.f32.mrb[66].mxu1 }
 0x430   : > { %v10383_v53 = vpop.f32.mrb[67].mxu1  ;;  %v4612_v24 = vsel %vm4584_vm3, %v13622_v60, -inf }
 0x431   : > { %4613 = vmax.xlane.f32.xlu1 %v4612_v24 }
 0x435   : > { %v13626_v59 = vpop.f32.mrb[68].mxu1 }
 0x436   : > { %v10388_v33 = vpop.f32.mrb[69].mxu1  ;;  %v4615_v4 = vsel %vm4584_vm3, %v13626_v59, -inf }
 0x437   : > { %4616 = vmax.xlane.f32.xlu0 %v4615_v4  ;;  %v13630_v51 = vpop.f32.mrb[70].mxu1 }
 0x438   : > { %v10389_v5 = vpop.f32.mrb[71].mxu1  ;;  %v4618_v15 = vsel %vm4584_vm3, %v13630_v51, -inf }
 0x439   : > { %4619 = vmax.xlane.f32.xlu1 %v4618_v15 }
 0x43d   : > { %v13634_v20 = vpop.f32.mrb[72].mxu1 }
 0x43e   : > { %v10394_v17 = vpop.f32.mrb[73].mxu1  ;;  %v4621_v40 = vsel %vm4584_vm3, %v13634_v20, -inf }
 0x43f   : > { %4622 = vmax.xlane.f32.xlu0 %v4621_v40  ;;  %v13638_v16 = vpop.f32.mrb[74].mxu1 }
 0x440   : > { %v10395_v29 = vpop.f32.mrb[75].mxu1  ;;  %v4624_v57 = vsel %vm4584_vm3, %v13638_v16, -inf }
 0x441   : > { %4625 = vmax.xlane.f32.xlu1 %v4624_v57 }
 0x445   : > { %v13642_v61 = vpop.f32.mrb[76].mxu1 }
 0x446   : > { %v10400_v53 = vpop.f32.mrb[77].mxu1  ;;  %v4627_v24 = vsel %vm4584_vm3, %v13642_v61, -inf }
 0x447   : > { %4628 = vmax.xlane.f32.xlu0 %v4627_v24  ;;  %v13646_v33 = vpop.f32.mrb[78].mxu1 }
 0x448   : > { %v10401_v4 = vpop.f32.mrb[79].mxu1  ;;  %v4630_v5 = vsel %vm4584_vm3, %v13646_v33, -inf }
 0x449   : > { %4631 = vmax.xlane.f32.xlu1 %v4630_v5 }
 0x44d   : > { %v13650_v15 = vpop.f32.mrb[80].mxu1 }
 0x44e   : > { %v10406_v17 = vpop.f32.mrb[81].mxu1  ;;  %v4633_v40 = vsel %vm4584_vm3, %v13650_v15, -inf }
 0x44f   : > { %4634 = vmax.xlane.f32.xlu0 %v4633_v40  ;;  %v13654_v29 = vpop.f32.mrb[82].mxu1 }
 0x450   : > { %v10407_v57 = vpop.f32.mrb[83].mxu1  ;;  %v4636_v53 = vsel %vm4584_vm3, %v13654_v29, -inf }
 0x451   : > { %4637 = vmax.xlane.f32.xlu1 %v4636_v53 }
 0x455   : > { %v13658_v24 = vpop.f32.mrb[84].mxu1 }
 0x456   : > { %v10412_v4 = vpop.f32.mrb[85].mxu1  ;;  %v4639_v5 = vsel %vm4584_vm3, %v13658_v24, -inf }
 0x457   : > { %4640 = vmax.xlane.f32.xlu0 %v4639_v5  ;;  %v13662_v6 = vpop.f32.mrb[86].mxu1 }
 0x458   : > { %v10413_v17 = vpop.f32.mrb[87].mxu1  ;;  %v4642_v40 = vsel %vm4584_vm3, %v13662_v6, -inf }
 0x459   : > { %4643 = vmax.xlane.f32.xlu1 %v4642_v40 }
 0x45d   : > { %v13666_v50 = vpop.f32.mrb[88].mxu1 }
 0x45e   : > { %v10418_v57 = vpop.f32.mrb[89].mxu1  ;;  %v4645_v53 = vsel %vm4584_vm3, %v13666_v50, -inf }
 0x45f   : > { %4646 = vmax.xlane.f32.xlu0 %v4645_v53  ;;  %v13670_v39 = vpop.f32.mrb[90].mxu1 }
 0x460   : > { %v10419_v4 = vpop.f32.mrb[91].mxu1  ;;  %v4648_v5 = vsel %vm4584_vm3, %v13670_v39, -inf }
 0x461   : > { %4649 = vmax.xlane.f32.xlu1 %v4648_v5 }
 0x465   : > { %v13674_v46 = vpop.f32.mrb[92].mxu1 }
 0x466   : > { %v10424_v17 = vpop.f32.mrb[93].mxu1  ;;  %v4651_v40 = vsel %vm4584_vm3, %v13674_v46, -inf }
 0x467   : > { %4652 = vmax.xlane.f32.xlu0 %v4651_v40  ;;  %v13678_v31 = vpop.f32.mrb[94].mxu1 }
 0x468   : > { %v10425_v57 = vpop.f32.mrb[95].mxu1  ;;  %v4654_v53 = vsel %vm4584_vm3, %v13678_v31, -inf }
 0x469   : > { %4655 = vmax.xlane.f32.xlu1 %v4654_v53 }
 0x46d   : > { %v13682_v42 = vpop.f32.mrb[96].mxu1 }
 0x46e   : > { %v10436_v4 = vpop.f32.mrb[97].mxu1 }
 0x46f   : > { %v13684_v38 = vpop.f32.mrb[98].mxu1 }
 0x470   : > { %v10437_v5 = vpop.f32.mrb[99].mxu1 }
 0x475   : > { %v13686_v0 = vpop.f32.mrb[100].mxu1 }
 0x476   : > { %v10448_v17 = vpop.f32.mrb[101].mxu1 }
 0x477   : > { %v13688_v63 = vpop.f32.mrb[102].mxu1 }
 0x478   : > { %v10449_v43 = vpop.f32.mrb[103].mxu1 }
 0x49c   : > { %v4587_v40 = vpop.xlane.xlu0 %4586 }
 0x49d   : > { %v4681_v25 = vsub.f32 %v13586_v45, %v4587_v40 }
 0x49f   : > { %v4713_v57 = vmul.f32 1.442695, %v4681_v25 }
 0x4a0   : > { %v4590_v48 = vpop.xlane.xlu0 %4589 }
 0x4a1   : > { %11384 = vpow2.f32 %v4713_v57  ;;  %v4682_v53 = vsub.f32 %v13590_v7, %v4590_v48 }
 0x4a3   : > { %v4715_v37 = vmul.f32 1.442695, %v4682_v53 }
 0x4a4   : > { %v4593_v27 = vpop.xlane.xlu1 %4592 }
 0x4a5   : > { %11386 = vpow2.f32 %v4715_v37  ;;  %v4683_v4 = vsub.f32 %v13594_v3, %v4593_v27 }
 0x4a7   : > { %v4717_v5 = vmul.f32 1.442695, %v4683_v4 }
 0x4a8   : > { %v4596_v23 = vpop.xlane.xlu1 %4595 }
 0x4a9   : > { %11388 = vpow2.f32 %v4717_v5  ;;  %v4684_v17 = vsub.f32 %v13598_v36, %v4596_v23  ;;  %v4657_v23 = vsel %vm4584_vm3, %v13578_v19, -inf }
 0x4ab   : > { %v13694_v1 = vpop.eup %11384  ;;  %v4719_v43 = vmul.f32 1.442695, %v4684_v17 }
 0x4ac   : > { %v4599_v10 = vpop.xlane.xlu0 %4598  ;;  %v4777_v25 = vsel %vm4584_vm3, %v13694_v1, 0.0 }
 0x4ad   : > { %11390 = vpow2.f32 %v4719_v43  ;;  %v4685_v48 = vsub.f32 %v13602_v21, %v4599_v10  ;;  %4778 = vadd.xlane.f32.xlu0 %v4777_v25  ;;  %v4663_v25 = vsel %vm4584_vm3, %v13682_v42, -inf }
 0x4ae   : > { %v4602_v45 = vpop.xlane.xlu1 %4601 }
 0x4af   : > { %v13699_v37 = vpop.eup %11386  ;;  %v4721_v27 = vmul.f32 1.442695, %v4685_v48  ;;  %v4686_v7 = vsub.f32 %v13606_v26, %v4602_v45  ;;  %v4660_v26 = vsel %vm4584_vm3, %v13580_v35, -inf }
 0x4b0   : > { %v4780_v3 = vsel %vm4584_vm3, %v13699_v37, 0.0 }
 0x4b1   : > { %11392 = vpow2.f32 %v4721_v27  ;;  %v4723_v36 = vmul.f32 1.442695, %v4686_v7  ;;  %4658 = vmax.xlane.f32.xlu0 %v4657_v23  ;;  %4781 = vadd.xlane.f32.xlu1 %v4780_v3 }
 0x4b3   : > { %v13706_v40 = vpop.eup %11388  ;;  %11394 = vpow2.f32 %v4723_v36 }
 0x4b4   : > { %v4605_v10 = vpop.xlane.xlu0 %4604  ;;  %v4783_v21 = vsel %vm4584_vm3, %v13706_v40, 0.0 }
 0x4b5   : > { %v4687_v57 = vsub.f32 %v13610_v22, %v4605_v10  ;;  %4784 = vadd.xlane.f32.xlu0 %v4783_v21  ;;  %4661 = vmax.xlane.f32.xlu1 %v4660_v26  ;;  %v4669_v21 = vsel %vm4584_vm3, %v13582_v54, -inf }
 0x4b6   : > { %v4608_v53 = vpop.xlane.xlu1 %4607 }
 0x4b7   : > { %v13713_v4 = vpop.eup %11390  ;;  %v4725_v5 = vmul.f32 1.442695, %v4687_v57  ;;  %v4688_v17 = vsub.f32 %v13614_v13, %v4608_v53  ;;  %v4666_v13 = vsel %vm4584_vm3, %v13684_v38, -inf }
 0x4b8   : > { %v4786_v43 = vsel %vm4584_vm3, %v13713_v4, 0.0 }
 0x4b9   : > { %11396 = vpow2.f32 %v4725_v5  ;;  %v4727_v48 = vmul.f32 1.442695, %v4688_v17  ;;  %4787 = vadd.xlane.f32.xlu1 %v4786_v43  ;;  %4664 = vmax.xlane.f32.xlu0 %v4663_v25 }
 0x4bb   : > { %v13720_v45 = vpop.eup %11392  ;;  %11398 = vpow2.f32 %v4727_v48 }
 0x4bc   : > { %v4611_v22 = vpop.xlane.xlu0 %4610  ;;  %v4789_v27 = vsel %vm4584_vm3, %v13720_v45, 0.0 }
 0x4bd   : > { %v13726_v7 = vpop.eup %11394  ;;  %v4689_v23 = vsub.f32 %v13618_v9, %v4611_v22  ;;  %4790 = vadd.xlane.f32.xlu0 %v4789_v27  ;;  %4667 = vmax.xlane.f32.xlu1 %v4666_v13 }
 0x4be   : > { %v4614_v3 = vpop.xlane.xlu1 %4613  ;;  %v4792_v26 = vsel %vm4584_vm3, %v13726_v7, 0.0 }
 0x4bf   : > { %v4729_v36 = vmul.f32 1.442695, %v4689_v23  ;;  %v4690_v10 = vsub.f32 %v13622_v60, %v4614_v3  ;;  %v4672_v60 = vsel %vm4584_vm3, %v13584_v11, -inf }
 0x4c1   : > { %11400 = vpow2.f32 %v4729_v36  ;;  %v4731_v57 = vmul.f32 1.442695, %v4690_v10  ;;  %4670 = vmax.xlane.f32.xlu0 %v4669_v21  ;;  %4793 = vadd.xlane.f32.xlu1 %v4792_v26 }
 0x4c3   : > { %v13734_v53 = vpop.eup %11396  ;;  %11402 = vpow2.f32 %v4731_v57 }
 0x4c4   : > { %v4617_v9 = vpop.xlane.xlu0 %4616  ;;  %v4795_v5 = vsel %vm4584_vm3, %v13734_v53, 0.0 }
 0x4c5   : > { %v13740_v17 = vpop.eup %11398  ;;  %v4691_v43 = vsub.f32 %v13626_v59, %v4617_v9  ;;  %4796 = vadd.xlane.f32.xlu0 %v4795_v5  ;;  %4673 = vmax.xlane.f32.xlu1 %v4672_v60 }
 0x4c6   : > { %v4620_v25 = vpop.xlane.xlu1 %4619  ;;  %v4798_v27 = vsel %vm4584_vm3, %v13740_v17, 0.0 }
 0x4c7   : > { %v4733_v48 = vmul.f32 1.442695, %v4691_v43  ;;  %v4692_v22 = vsub.f32 %v13630_v51, %v4620_v25 }
 0x4c9   : > { %11404 = vpow2.f32 %v4733_v48  ;;  %v4735_v13 = vmul.f32 1.442695, %v4692_v22  ;;  %4799 = vadd.xlane.f32.xlu1 %v4798_v27 }
 0x4cb   : > { %v13746_v23 = vpop.eup %11400  ;;  %11406 = vpow2.f32 %v4735_v13 }
 0x4cc   : > { %v4623_v3 = vpop.xlane.xlu0 %4622  ;;  %v4801_v36 = vsel %vm4584_vm3, %v13746_v23, 0.0 }
 0x4cd   : > { %v13750_v59 = vpop.eup %11402  ;;  %v4693_v10 = vsub.f32 %v13634_v20, %v4623_v3  ;;  %4802 = vadd.xlane.f32.xlu0 %v4801_v36 }
 0x4ce   : > { %v4626_v21 = vpop.xlane.xlu1 %4625  ;;  %v4804_v51 = vsel %vm4584_vm3, %v13750_v59, 0.0 }
 0x4cf   : > { %v4737_v26 = vmul.f32 1.442695, %v4693_v10  ;;  %v4694_v57 = vsub.f32 %v13638_v16, %v4626_v21  ;;  %4805 = vadd.xlane.f32.xlu1 %v4804_v51 }
 0x4d1   : > { %11408 = vpow2.f32 %v4737_v26  ;;  %v4739_v9 = vmul.f32 1.442695, %v4694_v57 }
 0x4d3   : > { %v13756_v5 = vpop.eup %11404  ;;  %11410 = vpow2.f32 %v4739_v9 }
 0x4d4   : > { %v4629_v60 = vpop.xlane.xlu0 %4628  ;;  %v4807_v43 = vsel %vm4584_vm3, %v13756_v5, 0.0 }
 0x4d5   : > { %v13760_v25 = vpop.eup %11406  ;;  %v4695_v20 = vsub.f32 %v13642_v61, %v4629_v60  ;;  %4808 = vadd.xlane.f32.xlu0 %v4807_v43 }
 0x4d6   : > { %v4632_v48 = vpop.xlane.xlu1 %4631  ;;  %v4810_v22 = vsel %vm4584_vm3, %v13760_v25, 0.0 }
 0x4d7   : > { %v4741_v16 = vmul.f32 1.442695, %v4695_v20  ;;  %v4696_v27 = vsub.f32 %v13646_v33, %v4632_v48  ;;  %4811 = vadd.xlane.f32.xlu1 %v4810_v22 }
 0x4d9   : > { %11412 = vpow2.f32 %v4741_v16  ;;  %v4743_v13 = vmul.f32 1.442695, %v4696_v27 }
 0x4db   : > { %v13766_v3 = vpop.eup %11408  ;;  %11414 = vpow2.f32 %v4743_v13 }
 0x4dc   : > { %v4635_v36 = vpop.xlane.xlu0 %4634  ;;  %v4813_v10 = vsel %vm4584_vm3, %v13766_v3, 0.0 }
 0x4dd   : > { %v13770_v21 = vpop.eup %11410  ;;  %v4697_v61 = vsub.f32 %v13650_v15, %v4635_v36  ;;  %4814 = vadd.xlane.f32.xlu0 %v4813_v10 }
 0x4de   : > { %v4638_v51 = vpop.xlane.xlu1 %4637  ;;  %v4816_v26 = vsel %vm4584_vm3, %v13770_v21, 0.0 }
 0x4df   : > { %v4745_v33 = vmul.f32 1.442695, %v4697_v61  ;;  %v4698_v57 = vsub.f32 %v13654_v29, %v4638_v51  ;;  %4817 = vadd.xlane.f32.xlu1 %v4816_v26 }
 0x4e1   : > { %11416 = vpow2.f32 %v4745_v33  ;;  %v4747_v9 = vmul.f32 1.442695, %v4698_v57 }
 0x4e3   : > { %v13776_v60 = vpop.eup %11412  ;;  %11418 = vpow2.f32 %v4747_v9 }
 0x4e4   : > { %v4641_v43 = vpop.xlane.xlu0 %4640  ;;  %v4819_v20 = vsel %vm4584_vm3, %v13776_v60, 0.0 }
 0x4e5   : > { %v13780_v48 = vpop.eup %11414  ;;  %v4699_v15 = vsub.f32 %v13658_v24, %v4641_v43  ;;  %4820 = vadd.xlane.f32.xlu0 %v4819_v20 }
 0x4e6   : > { %v4644_v22 = vpop.xlane.xlu1 %4643  ;;  %v4822_v16 = vsel %vm4584_vm3, %v13780_v48, 0.0 }
 0x4e7   : > { %v4749_v29 = vmul.f32 1.442695, %v4699_v15  ;;  %v4700_v27 = vsub.f32 %v13662_v6, %v4644_v22  ;;  %4823 = vadd.xlane.f32.xlu1 %v4822_v16 }
 0x4e9   : > { %11420 = vpow2.f32 %v4749_v29  ;;  %v4751_v13 = vmul.f32 1.442695, %v4700_v27 }
 0x4eb   : > { %v13786_v36 = vpop.eup %11416  ;;  %11422 = vpow2.f32 %v4751_v13 }
 0x4ec   : > { %v4647_v10 = vpop.xlane.xlu0 %4646  ;;  %v4825_v61 = vsel %vm4584_vm3, %v13786_v36, 0.0 }
 0x4ed   : > { %v13790_v51 = vpop.eup %11418  ;;  %v4701_v24 = vsub.f32 %v13666_v50, %v4647_v10  ;;  %4826 = vadd.xlane.f32.xlu0 %v4825_v61 }
 0x4ee   : > { %v4650_v26 = vpop.xlane.xlu1 %4649  ;;  %v4828_v33 = vsel %vm4584_vm3, %v13790_v51, 0.0 }
 0x4ef   : > { %v4753_v6 = vmul.f32 1.442695, %v4701_v24  ;;  %v4702_v57 = vsub.f32 %v13670_v39, %v4650_v26  ;;  %4829 = vadd.xlane.f32.xlu1 %v4828_v33 }
 0x4f1   : > { %11424 = vpow2.f32 %v4753_v6  ;;  %v4755_v9 = vmul.f32 1.442695, %v4702_v57  ;;  %v4675_v57 = vsel %vm4584_vm3, %v13686_v0, -inf }
 0x4f3   : > { %v13796_v43 = vpop.eup %11420  ;;  %11426 = vpow2.f32 %v4755_v9  ;;  %v4678_v9 = vsel %vm4584_vm3, %v13688_v63, -inf }
 0x4f4   : > { %v4653_v20 = vpop.xlane.xlu0 %4652  ;;  %v4831_v15 = vsel %vm4584_vm3, %v13796_v43, 0.0 }
 0x4f5   : > { %v13800_v22 = vpop.eup %11422  ;;  %v4703_v50 = vsub.f32 %v13674_v46, %v4653_v20  ;;  %4832 = vadd.xlane.f32.xlu0 %v4831_v15 }
 0x4f6   : > { %v4656_v16 = vpop.xlane.xlu1 %4655  ;;  %v4834_v29 = vsel %vm4584_vm3, %v13800_v22, 0.0 }
 0x4f7   : > { %v4757_v39 = vmul.f32 1.442695, %v4703_v50  ;;  %v4704_v27 = vsub.f32 %v13678_v31, %v4656_v16  ;;  %4835 = vadd.xlane.f32.xlu1 %v4834_v29 }
 0x4f9   : > { %11428 = vpow2.f32 %v4757_v39  ;;  %v4759_v13 = vmul.f32 1.442695, %v4704_v27 }
 0x4fb   : > { %v13806_v10 = vpop.eup %11424  ;;  %11430 = vpow2.f32 %v4759_v13 }
 0x4fc   : > { %v4837_v61 = vsel %vm4584_vm3, %v13806_v10, 0.0 }
 0x4fd   : > { %v13810_v24 = vpop.eup %11426  ;;  %4838 = vadd.xlane.f32.xlu0 %v4837_v61 }
 0x4fe   : > { %v4840_v46 = vsel %vm4584_vm3, %v13810_v24, 0.0 }
 0x4ff   : > { %4841 = vadd.xlane.f32.xlu1 %v4840_v46 }
 0x503   : > { %v13814_v26 = vpop.eup %11428 }
 0x504   : > { %v4843_v31 = vsel %vm4584_vm3, %v13814_v26, 0.0 }
 0x505   : > { %v13818_v33 = vpop.eup %11430  ;;  %4844 = vadd.xlane.f32.xlu0 %v4843_v31 }
 0x506   : > { %v4846_v6 = vsel %vm4584_vm3, %v13818_v33, 0.0 }
 0x507   : > { %4847 = vadd.xlane.f32.xlu1 %v4846_v6 }
 0x509   : > { %4676 = vmax.xlane.f32.xlu0 %v4675_v57 }
 0x50b   : > { %4679 = vmax.xlane.f32.xlu1 %v4678_v9 }
 0x53a   : > { %v4779_v20 = vpop.xlane.xlu0 %4778 }
 0x53b   : > { %11432 = vrcp.f32 %v4779_v20 }
 0x53e   : > { %v4659_v15 = vpop.xlane.xlu0 %4658  ;;  %v4782_v50 = vpop.xlane.xlu1 %4781 }
 0x53f   : > { %v4705_v16 = vsub.f32 %v13578_v19, %v4659_v15  ;;  %11434 = vrcp.f32 %v4782_v50 }
 0x541   : > { %v4761_v29 = vmul.f32 1.442695, %v4705_v16 }
 0x542   : > { %v4785_v39 = vpop.xlane.xlu0 %4784  ;;  %v4662_v27 = vpop.xlane.xlu1 %4661 }
 0x543   : > { %11436 = vpow2.f32 %v4761_v29  ;;  %v4706_v13 = vsub.f32 %v13580_v35, %v4662_v27 }
 0x544   : > { %11438 = vrcp.f32 %v4785_v39 }
 0x545   : > { %v4763_v61 = vmul.f32 1.442695, %v4706_v13  ;;  %v11433_v6 = vpop.eup %11432 }
 0x546   : > { %v4788_v46 = vpop.xlane.xlu1 %4787  ;;  %v4665_v31 = vpop.xlane.xlu0 %4664  ;;  %v4905_v19 = vmul.f32 %v11433_v6, %v13694_v1  ;;  %v15729_v1 = vpack.c.bf16 %v13417_v30, %v13409_v34 }
 0x547   : > { %11440 = vpow2.f32 %v4763_v61  ;;  %v4707_v57 = vsub.f32 %v13682_v42, %v4665_v31 }
 0x548   : > { %11442 = vrcp.f32 %v4788_v46  ;;  %v15730_v46 = vmov 0.0  }
 0x549   : > { %v11435_v9 = vpop.eup %11434  ;;  %v4765_v20 = vmul.f32 1.442695, %v4707_v57 }
 0x54a   : > { %v4906_v15 = vmul.f32 %v11435_v9, %v13699_v37  ;;  %v4791_v50 = vpop.xlane.xlu0 %4790  ;;  %v4668_v16 = vpop.xlane.xlu1 %4667 }
 0x54b   : > { %11444 = vpow2.f32 %v4765_v20  ;;  %v4708_v35 = vsub.f32 %v13684_v38, %v4668_v16 }
 0x54c   : > { %v4937_v29 = vpack.c.bf16 %v4906_v15, %v4905_v19  ;;  %11446 = vrcp.f32 %v4791_v50 }
 0x54d   : > { %v13832_v39 = vpop.eup %11436  ;;  %v4767_v27 = vmul.f32 1.442695, %v4708_v35 }
 0x54e   : > { %10453 = vmatmul.mubr.msk.bf16.vlgmr.msra.gmra.mrb[72].mxu0 %vm4584_vm3, %v4937_v29  ;;  %v4671_v42 = vpop.xlane.xlu0 %4670  ;;  %v4794_v13 = vpop.xlane.xlu1 %4793  ;;  %v4849_v61 = vsel %vm4584_vm3, %v13832_v39, 0.0 }
 0x54f   : > { %11448 = vpow2.f32 %v4767_v27  ;;  %10463 = vmatpush3.bf16.msra.mxu0 %v15729_v1  ;;  %v4709_v37 = vsub.f32 %v13582_v54, %v4671_v42  ;;  %4850 = vadd.xlane.f32.xlu0 %v4849_v61  ;;  %v11439_v38 = vpop.eup %11438 }
 0x550   : > { %11450 = vrcp.f32 %v4794_v13  ;;  %10464 = vmatprep.mubr.msk.bf16.mxu0 %vm11586_vm2, %v15730_v46  ;;  %10474 = vmatprep.subr.bf16.mxu0 %v15730_v46  ;;  %v4907_v34 = vmul.f32 %v11439_v38, %v13706_v40 }
 0x551   : > { %v13844_v31 = vpop.eup %11440  ;;  %v4769_v6 = vmul.f32 1.442695, %v4709_v37 }
 0x552   : > { %v11443_v57 = vpop.eup %11442  ;;  %v4674_v9 = vpop.xlane.xlu1 %4673  ;;  %v4852_v20 = vsel %vm4584_vm3, %v13844_v31, 0.0 }
 0x553   : > { %v4908_v30 = vmul.f32 %v11443_v57, %v13713_v4  ;;  %11452 = vpow2.f32 %v4769_v6  ;;  %v4797_v54 = vpop.xlane.xlu0 %4796  ;;  %v4710_v19 = vsub.f32 %v13584_v11, %v4674_v9  ;;  %4853 = vadd.xlane.f32.xlu1 %v4852_v20  ;;  %v15731_v4 = vpack.c.bf16 %v13412_v12, %v13404_v2 }
 0x554   : > { %11454 = vrcp.f32 %v4797_v54  ;;  %v15732_v57 = vpack.c.bf16 %v13435_v14, %v13428_v56 }
 0x555   : > { %v13851_v15 = vpop.eup %11444  ;;  %v4938_v50 = vpack.c.bf16 %v4908_v30, %v4907_v34  ;;  %v4771_v16 = vmul.f32 1.442695, %v4710_v19 }
 0x556   : > { %v4800_v35 = vpop.xlane.xlu1 %4799  ;;  %v4855_v29 = vsel %vm4584_vm3, %v13851_v15, 0.0  ;;  %v11447_v40 = vpop.eup %11446 }
 0x557   : > { %11456 = vpow2.f32 %v4771_v16  ;;  %10459 = vmatmul.mubr.msk.bf16.vlgmr.msra.gmra.mrb[104].mxu1 %vm4584_vm3, %v4938_v50  ;;  %4856 = vadd.xlane.f32.xlu0 %v4855_v29  ;;  %v4909_v61 = vmul.f32 %v11447_v40, %v13720_v45 }
 0x558   : > { %10469 = vmatpush3.bf16.msra.mxu1 %v15731_v4  ;;  %11458 = vrcp.f32 %v4800_v35  ;;  %10470 = vmatprep.mubr.msk.bf16.mxu1 %vm11586_vm2, %v15730_v46  ;;  %v15733_v35 = vpack.c.bf16 %v13432_v41, %v13425_v62 }
 0x559   : > { %v13861_v11 = vpop.eup %11448  ;;  %10480 = vmatprep.subr.bf16.mxu1 %v15730_v46 }
 0x55a   : > { %v11451_v27 = vpop.eup %11450  ;;  %v4803_v42 = vpop.xlane.xlu0 %4802  ;;  %v4858_v13 = vsel %vm4584_vm3, %v13861_v11, 0.0 }
 0x55b   : > { %v4910_v1 = vmul.f32 %v11451_v27, %v13726_v7  ;;  %11460 = vrcp.f32 %v4803_v42  ;;  %4859 = vadd.xlane.f32.xlu1 %v4858_v13 }
 0x55c   : > { %v4806_v2 = vpop.xlane.xlu1 %4805 }
 0x55d   : > { %v13868_v12 = vpop.eup %11452  ;;  %11462 = vrcp.f32 %v4806_v2  ;;  %v4939_v37 = vpack.c.bf16 %v4910_v1, %v4909_v61 }
 0x55e   : > { %v4861_v38 = vsel %vm4584_vm3, %v13868_v12, 0.0  ;;  %v11455_v6 = vpop.eup %11454 }
 0x55f   : > { %10465 = vmatmul.mubr.msk.bf16.vlgmr.msra.gmra.mrb[76].mxu0 %vm4584_vm3, %v4939_v37  ;;  %4862 = vadd.xlane.f32.xlu0 %v4861_v38  ;;  %v4911_v34 = vmul.f32 %v11455_v6, %v13734_v53 }
 0x560   : > { %10475 = vmatpush3.bf16.msra.mxu0 %v15732_v57  ;;  %10476 = vmatprep.mubr.msk.bf16.mxu0 %vm11586_vm2, %v15730_v46 }
 0x561   : > { %v13878_v45 = vpop.eup %11456  ;;  %10486 = vmatprep.subr.bf16.mxu0 %v15730_v46 }
 0x562   : > { %v11459_v7 = vpop.eup %11458  ;;  %v4809_v9 = vpop.xlane.xlu0 %4808  ;;  %v4864_v20 = vsel %vm4584_vm3, %v13878_v45, 0.0 }
 0x563   : > { %v4912_v30 = vmul.f32 %v11459_v7, %v13740_v17  ;;  %11464 = vrcp.f32 %v4809_v9  ;;  %4865 = vadd.xlane.f32.xlu1 %v4864_v20 }
 0x564   : > { %v4812_v56 = vpop.xlane.xlu1 %4811 }
 0x565   : > { %v11461_v14 = vpop.eup %11460  ;;  %v4940_v54 = vpack.c.bf16 %v4912_v30, %v4911_v34  ;;  %11466 = vrcp.f32 %v4812_v56 }
 0x566   : > { %v4913_v50 = vmul.f32 %v11461_v14, %v13746_v23  ;;  %v15734_v23 = vpack.c.bf16 %v13454_v44, %v13447_v47  ;;  %v15735_v47 = vpack.c.bf16 %v13451_v55, %v13442_v28  ;;  %v15736_v28 = vpack.c.bf16 %v13473_v8, %v13466_v58 }
 0x567   : > { %v11463_v19 = vpop.eup %11462  ;;  %10471 = vmatmul.mubr.msk.bf16.vlgmr.msra.gmra.mrb[108].mxu1 %vm4584_vm3, %v4940_v54  ;;  %v15737_v58 = vpack.c.bf16 %v13470_v32, %v13461_v49  ;;  %v15738_v49 = vpack.c.bf16 %v13492_v52, %v13485_v18  ;;  %v15739_v18 = vld [vmem:[#allocation44_spill] sm:$0xff]  ;;  %v15740_v52 = vld [vmem:[#allocation43_spill] sm:$0xff] }
 0x568   : > { %v4914_v16 = vmul.f32 %v11463_v19, %v13750_v59  ;;  %10481 = vmatpush3.bf16.msra.mxu1 %v15733_v35  ;;  %10482 = vmatprep.mubr.msk.bf16.mxu1 %vm11586_vm2, %v15730_v46 }
 0x569   : > { %10492 = vmatprep.subr.bf16.mxu1 %v15730_v46 }
 0x56a   : > { %v4815_v53 = vpop.xlane.xlu0 %4814  ;;  %v4941_v17 = vpack.c.bf16 %v4914_v16, %v4913_v50  ;;  %v15741_v50 = vpack.c.bf16 %v15739_v18, %v15740_v52 }
 0x56b   : > { %11468 = vrcp.f32 %v4815_v53 }
 0x56c   : > { %10477 = vmatmul.mubr.msk.bf16.vlgmr.msra.gmra.mrb[80].mxu0 %vm4584_vm3, %v4941_v17  ;;  %v4818_v29 = vpop.xlane.xlu1 %4817 }
 0x56d   : > { %v11465_v40 = vpop.eup %11464  ;;  %10487 = vmatpush3.bf16.msra.mxu0 %v15734_v23  ;;  %11470 = vrcp.f32 %v4818_v29  ;;  %10488 = vmatprep.mubr.msk.bf16.mxu0 %vm11586_vm2, %v15730_v46 }
 0x56e   : > { %10498 = vmatprep.subr.bf16.mxu0 %v15730_v46  ;;  %v4915_v41 = vmul.f32 %v11465_v40, %v13756_v5 }
 0x56f   : > { %v11467_v62 = vpop.eup %11466 }
 0x570   : > { %v4916_v59 = vmul.f32 %v11467_v62, %v13760_v25 }
 0x572   : > { %v4942_v4 = vpack.c.bf16 %v4916_v59, %v4915_v41  ;;  %v4821_v27 = vpop.xlane.xlu0 %4820  ;;  %v15742_v59 = vld [vmem:[#allocation46_spill] sm:$0xff] }
 0x573   : > { %11472 = vrcp.f32 %v4821_v27 }
 0x574   : > { %10483 = vmatmul.mubr.msk.bf16.vlgmr.msra.gmra.mrb[112].mxu1 %vm4584_vm3, %v4942_v4  ;;  %v4824_v42 = vpop.xlane.xlu1 %4823  ;;  %v15743_v4 = vld [vmem:[#allocation45_spill] sm:$0xff] }
 0x575   : > { %v11469_v13 = vpop.eup %11468  ;;  %10493 = vmatpush3.bf16.msra.mxu1 %v15735_v47  ;;  %11474 = vrcp.f32 %v4824_v42  ;;  %10494 = vmatprep.mubr.msk.bf16.mxu1 %vm11586_vm2, %v15730_v46  ;;  %v15744_v27 = vpack.c.bf16 %v15742_v59, %v15743_v4  ;;  %v5689_v59 = vld [vmem:[#allocation2 + $0x60] sm:$0x1] }
 0x576   : > { %10504 = vmatprep.subr.bf16.mxu1 %v15730_v46  ;;  %v4917_v5 = vmul.f32 %v11469_v13, %v13766_v3  ;;  %v5690_v4 = vsel %vm13961_vm6, 0, %v5689_v59 }
 0x577   : > { %v11471_v44 = vpop.eup %11470  ;;  %5691 = vst [vmem:[#allocation2 + $0x60] sm:$0x1] %v5690_v4 }
 0x578   : > { %v4918_v25 = vmul.f32 %v11471_v44, %v13770_v21 }
 0x57a   : > { %v4827_v61 = vpop.xlane.xlu0 %4826  ;;  %v4943_v1 = vpack.c.bf16 %v4918_v25, %v4917_v5  ;;  %v15749_v5 = vld [vmem:[#allocation11_spill] sm:$0xff]  ;;  %v15750_v25 = vld [vmem:[#allocation10_spill] sm:$0xff] }
 0x57b   : > { %11476 = vrcp.f32 %v4827_v61  ;;  %v15751_v61 = vpack.c.bf16 %v15749_v5, %v15750_v25 }
 0x57c   : > { %10489 = vmatmul.mubr.msk.bf16.vlgmr.msra.gmra.mrb[84].mxu0 %vm4584_vm3, %v4943_v1  ;;  %v4830_v2 = vpop.xlane.xlu1 %4829 }
 0x57d   : > { %v11473_v37 = vpop.eup %11472  ;;  %10499 = vmatpush3.bf16.msra.mxu0 %v15736_v28  ;;  %11478 = vrcp.f32 %v4830_v2  ;;  %10500 = vmatprep.mubr.msk.bf16.mxu0 %vm11586_vm2, %v15730_v46 }
 0x57e   : > { %10510 = vmatprep.subr.bf16.mxu0 %v15730_v46  ;;  %v4919_v3 = vmul.f32 %v11473_v37, %v13776_v60 }
 0x57f   : > { %v11475_v55 = vpop.eup %11474 }
 0x580   : > { %v4920_v21 = vmul.f32 %v11475_v55, %v13780_v48  ;;  %v5671_v55 = vld [vmem:[#allocation2 + $0x18] sm:$0x1] }
 0x582   : > { %v4944_v38 = vpack.c.bf16 %v4920_v21, %v4919_v3  ;;  %v4833_v6 = vpop.xlane.xlu0 %4832  ;;  %v5672_v3 = vsel %vm13961_vm6, 0, %v5671_v55  ;;  %v5721_v21 = vld [vmem:[#allocation2 + $0x20] sm:$0x1] }
 0x583   : > { %11480 = vrcp.f32 %v4833_v6  ;;  %5673 = vst [vmem:[#allocation2 + $0x18] sm:$0x1] %v5672_v3  ;;  %v5674_v6 = vld [vmem:[#allocation2 + $0x24] sm:$0x1] }
 0x584   : > { %10495 = vmatmul.mubr.msk.bf16.vlgmr.msra.gmra.mrb[116].mxu1 %vm4584_vm3, %v4944_v38  ;;  %v4836_v57 = vpop.xlane.xlu1 %4835  ;;  %v5722_v38 = vsel %vm13969_vm8, 0, %v5721_v21  ;;  %v11166_v21 = vld [vmem:[%s15553_s2 + $0x40] sm:$0xff]  }
 0x585   : > { %v11477_v7 = vpop.eup %11476  ;;  %10505 = vmatpush3.bf16.msra.mxu1 %v15737_v58  ;;  %11482 = vrcp.f32 %v4836_v57  ;;  %10506 = vmatprep.mubr.msk.bf16.mxu1 %vm11586_vm2, %v15730_v46  ;;  %5723 = vst [vmem:[#allocation2 + $0x20] sm:$0x1] %v5722_v38  ;;  %v5675_v57 = vsel %vm13961_vm6, 0, %v5674_v6 }
 0x586   : > { %10516 = vmatprep.subr.bf16.mxu1 %v15730_v46  ;;  %v4921_v60 = vmul.f32 %v11477_v7, %v13786_v36  ;;  %5676 = vst [vmem:[#allocation2 + $0x24] sm:$0x1] %v5675_v57  ;;  %v5724_v7 = vld [vmem:[#allocation2 + $0x2c] sm:$0x1] }
 0x587   : > { %v11479_v8 = vpop.eup %11478  ;;  %v5725_v58 = vsel %vm13969_vm8, 0, %v5724_v7 }
 0x588   : > { %v4922_v48 = vmul.f32 %v11479_v8, %v13790_v51  ;;  %5726 = vst [vmem:[#allocation2 + $0x2c] sm:$0x1] %v5725_v58  ;;  %v5677_v8 = vld [vmem:[#allocation2 + $0x30] sm:$0x1]  ;;  %v15754_v58 = vld [vmem:[#allocation48_spill] sm:$0xff] }
 0x58a   : > { %v4839_v9 = vpop.xlane.xlu0 %4838  ;;  %v4945_v20 = vpack.c.bf16 %v4922_v48, %v4921_v60  ;;  %v5678_v60 = vsel %vm13961_vm6, 0, %v5677_v8  ;;  %v5727_v48 = vld [vmem:[#allocation2 + $0x38] sm:$0x1] }
 0x58b   : > { %11484 = vrcp.f32 %v4839_v9  ;;  %5679 = vst [vmem:[#allocation2 + $0x30] sm:$0x1] %v5678_v60  ;;  %v5728_v9 = vsel %vm13969_vm8, 0, %v5727_v48  ;;  %v15755_v8 = vld [vmem:[#allocation47_spill] sm:$0xff]  ;;  %v5692_v60 = vld [vmem:[#allocation2 + $0x6c] sm:$0x1] }
 0x58c   : > { %10501 = vmatmul.mubr.msk.bf16.vlgmr.msra.gmra.mrb[88].mxu0 %vm4584_vm3, %v4945_v20  ;;  %v4842_v34 = vpop.xlane.xlu1 %4841  ;;  %5729 = vst [vmem:[#allocation2 + $0x38] sm:$0x1] %v5728_v9  ;;  %v5680_v20 = vld [vmem:[#allocation2 + $0x3c] sm:$0x1]  ;;  %v5742_v48 = vld [vmem:[#allocation2 + $0x74] sm:$0x1] }
 0x58d   : > { %v11481_v30 = vpop.eup %11480  ;;  %10511 = vmatpush3.bf16.msra.mxu0 %v15738_v49  ;;  %11486 = vrcp.f32 %v4842_v34  ;;  %10512 = vmatprep.mubr.msk.bf16.mxu0 %vm11586_vm2, %v15730_v46  ;;  %v5681_v34 = vsel %vm13961_vm6, 0, %v5680_v20  ;;  %v14006_v49 = vld [vmem:[#allocation2 + $0x4] sm:$0xf] }
 0x58e   : > { %10522 = vmatprep.subr.bf16.mxu0 %v15730_v46  ;;  %v4923_v36 = vmul.f32 %v11481_v30, %v13796_v43  ;;  %5682 = vst [vmem:[#allocation2 + $0x3c] sm:$0x1] %v5681_v34  ;;  %v14004_v30 = vld [vmem:[#allocation2] sm:$0xf]  ;;  %v6369_v5 = vshrl.u32 %v14006_v49, 16  ;;  %v5693_v34 = vsel %vm13961_vm6, 0, %v5692_v60 }
 0x58f   : > { %v11483_v32 = vpop.eup %11482  ;;  %5694 = vst [vmem:[#allocation2 + $0x6c] sm:$0x1] %v5693_v34 }
 0x590   : > { %v4924_v51 = vmul.f32 %v11483_v32, %v13800_v22  ;;  %v14008_v32 = vld [vmem:[#allocation2 + $0x8] sm:$0x1]  ;;  %v6371_v6 = vrot.slane %v6369_v5, 4  ;;  %v11172_v5 = vld [vmem:[%s15553_s2 + $0x58] sm:$0xff]  }
 0x591   : > { %v6375_v20 = vshll.u32 %v14008_v32, 16 }
 0x592   : > { %v4946_v56 = vpack.c.bf16 %v4924_v51, %v4923_v36  ;;  %v4845_v14 = vpop.xlane.xlu0 %4844  ;;  %v9119_v36 = vrot.slane %v14004_v30, 9  ;;  %v6792_v51 = vrot.slane %v14006_v49, 5 }
 0x593   : > { %11488 = vrcp.f32 %v4845_v14 }
 0x594   : > { %10507 = vmatmul.mubr.msk.bf16.vlgmr.msra.gmra.mrb[120].mxu1 %vm4584_vm3, %v4946_v56  ;;  %v4848_v54 = vpop.xlane.xlu1 %4847  ;;  %v6795_v56 = vrot.slane %v14008_v32, 5  ;;  %v11184_v32 = vld [vmem:[%s15553_s2 + $0xc0] sm:$0xff]  }
 0x595   : > { %v11485_v19 = vpop.eup %11484  ;;  %10517 = vmatpush3.bf16.msra.mxu1 %v15741_v50  ;;  %11490 = vrcp.f32 %v4848_v54  ;;  %10518 = vmatprep.mubr.msk.bf16.mxu1 %vm11586_vm2, %v15730_v46  ;;  %v14019_v54 = vsel %vm14013_vm11, %v9119_v36, %v6792_v51  ;;  %v5730_v50 = vld [vmem:[#allocation2 + $0x44] sm:$0x1]  ;;  %v5743_v36 = vsel %vm13969_vm8, 0, %v5742_v48 }
 0x596   : > { %v4677_v16 = vpop.xlane.xlu0 %4676  ;;  %10528 = vmatprep.subr.bf16.mxu1 %v15730_v46  ;;  %v4925_v35 = vmul.f32 %v11485_v19, %v13806_v10  ;;  %v6794_v19 = vrot.slane %v6792_v51, 4  ;;  %5744 = vst [vmem:[#allocation2 + $0x74] sm:$0x1] %v5743_v36 }
 0x597   : > { %v11487_v43 = vpop.eup %11486  ;;  %v4711_v22 = vsub.f32 %v13686_v0, %v4677_v16  ;;  %v5731_v16 = vsel %vm13969_vm8, 0, %v5730_v50 }
 0x598   : > { %v4926_v53 = vmul.f32 %v11487_v43, %v13810_v24  ;;  %v4680_v17 = vpop.xlane.xlu1 %4679  ;;  %v5668_v24 = vld [vmem:[#allocation2 + $0xc] sm:$0x1]  ;;  %v14023_v18 = vsel %vm14013_vm11, %v6794_v19, %v6795_v56  ;;  %5732 = vst [vmem:[#allocation2 + $0x44] sm:$0x1] %v5731_v16  ;;  %v5683_v43 = vld [vmem:[#allocation2 + $0x48] sm:$0x1] }
 0x599   : > { %v4773_v29 = vmul.f32 1.442695, %v4711_v22  ;;  %v4712_v40 = vsub.f32 %v13688_v63, %v4680_v17  ;;  %v5669_v47 = vsel %vm13961_vm6, 0, %v5668_v24  ;;  %v9169_v52 = vcombine.low %v14019_v54, %v14023_v18  ;;  %v5686_v17 = vld [vmem:[#allocation2 + $0x54] sm:$0x1] }
 0x59a   : > { %v4947_v23 = vpack.c.bf16 %v4926_v53, %v4925_v35  ;;  %5670 = vst [vmem:[#allocation2 + $0xc] sm:$0x1] %v5669_v47  ;;  %v5684_v22 = vsel %vm13961_vm6, 0, %v5683_v43  ;;  %v5733_v35 = vld [vmem:[#allocation2 + $0x50] sm:$0x1]  ;;  %v6359_v47 = vshll.u32 %v14004_v30, 16 }
 0x59b   : > { %11492 = vpow2.f32 %v4773_v29  ;;  %v4775_v62 = vmul.f32 1.442695, %v4712_v40  ;;  %5685 = vst [vmem:[#allocation2 + $0x48] sm:$0x1] %v5684_v22  ;;  %v5734_v53 = vsel %vm13969_vm8, 0, %v5733_v35  ;;  %v5687_v29 = vsel %vm13961_vm6, 0, %v5686_v17 }
 0x59c   : > { %10513 = vmatmul.mubr.msk.bf16.vlgmr.msra.gmra.mrb[92].mxu0 %vm4584_vm3, %v4947_v23  ;;  %5735 = vst [vmem:[#allocation2 + $0x50] sm:$0x1] %v5734_v53  ;;  %5688 = vst [vmem:[#allocation2 + $0x54] sm:$0x1] %v5687_v29  ;;  %v5736_v23 = vld [vmem:[#allocation2 + $0x5c] sm:$0x1] }
 0x59d   : > { %v11489_v41 = vpop.eup %11488  ;;  %11494 = vpow2.f32 %v4775_v62  ;;  %10523 = vmatpush3.bf16.msra.mxu0 %v15744_v27  ;;  %10524 = vmatprep.mubr.msk.bf16.mxu0 %vm11586_vm2, %v15730_v46  ;;  %v5737_v62 = vsel %vm13969_vm8, 0, %v5736_v23  ;;  %v6361_v55 = vrot.slane %v6359_v47, 5  ;;  %v6377_v22 = vrot.slane %v6375_v20, 5  ;;  %v15760_v17 = vld [vmem:[#allocation12_spill] sm:$0xff]  ;;  %v5695_v23 = vld [vmem:[#allocation2 + $0x78] sm:$0x1] }
 0x59e   : > { %10534 = vmatprep.subr.bf16.mxu0 %v15730_v46  ;;  %v4927_v10 = vmul.f32 %v11489_v41, %v13814_v26  ;;  %5738 = vst [vmem:[#allocation2 + $0x5c] sm:$0x1] %v5737_v62  ;;  %v11171_v47 = vld [vmem:[%s15553_s2 + $0x10] sm:$0xff]  }
 0x59f   : > { %v11491_v0 = vpop.eup %11490 }
 0x5a0   : > { %v4928_v63 = vmul.f32 %v11491_v0, %v13818_v33  ;;  %v5718_v33 = vld [vmem:[#allocation2 + $0x14] sm:$0x1]  ;;  %v5739_v0 = vld [vmem:[#allocation2 + $0x68] sm:$0x1] }
 0x5a1   : > { %v5719_v1 = vsel %vm13969_vm8, 0, %v5718_v33  ;;  %v6365_v33 = vshll.u32 %v14006_v49, 16 }
 0x5a2   : > { %v4948_v42 = vpack.c.bf16 %v4928_v63, %v4927_v10  ;;  %5720 = vst [vmem:[#allocation2 + $0x14] sm:$0x1] %v5719_v1  ;;  %v5740_v63 = vsel %vm13969_vm8, 0, %v5739_v0 }
 0x5a3   : > { %5741 = vst [vmem:[#allocation2 + $0x68] sm:$0x1] %v5740_v63  ;;  %v6367_v38 = vrot.slane %v6365_v33, 5 }
 0x5a4   : > { %10519 = vmatmul.mubr.msk.bf16.vlgmr.msra.gmra.mrb[124].mxu1 %vm4584_vm3, %v4948_v42  ;;  %v6356_v42 = vshrl.u32 %v14004_v30, 16 }
 0x5a5   : > { %v13974_v44 = vpop.eup %11492  ;;  %10529 = vmatpush3.bf16.msra.mxu1 %v15751_v61  ;;  %10530 = vmatprep.mubr.msk.bf16.mxu1 %vm11586_vm2, %v15730_v46  ;;  %v6372_v9 = vor.u32 %v6371_v6, %v6367_v38  ;;  %v11177_v6 = vld [vmem:[%s15553_s2 + $0x28] sm:$0xff]  }
 0x5a6   : > { %v4867_v2 = vsel %vm4584_vm3, %v13974_v44, 0.0  ;;  %10540 = vmatprep.subr.bf16.mxu1 %v15730_v46 }
 0x5a7   : > { %v13986_v37 = vpop.eup %11494  ;;  %4868 = vadd.xlane.f32.xlu0 %v4867_v2  ;;  %v6373_v43 = vrot.slane %v6372_v9, 4 }
 0x5a8   : > { %v4870_v28 = vsel %vm4584_vm3, %v13986_v37, 0.0 }
 0x5a9   : > { %4871 = vadd.xlane.f32.xlu1 %v4870_v28  ;;  %v6358_v28 = vrot.slane %v6356_v42, 4  ;;  %v5698_v42 = vld [vmem:[#allocation2 + $0x84] sm:$0x1] }
 0x5aa   : > { %v5699_v33 = vsel %vm13961_vm6, 0, %v5698_v42 }
 0x5ab   : > { %5700 = vst [vmem:[#allocation2 + $0x84] sm:$0x1] %v5699_v33  ;;  %v11211_v33 = vld [vmem:[%s15553_s2 + $0x140] sm:$0xff]  }
 0x5dc   : > { %v4851_v40 = vpop.xlane.xlu0 %4850 }
 0x5dd   : > { %11496 = vrcp.f32 %v4851_v40  ;;  %v6378_v40 = vsel %vm14066_vm14, %v6373_v43, %v6377_v22 }
 0x5e0   : > { %v4854_v41 = vpop.xlane.xlu1 %4853 }
 0x5e1   : > { %11498 = vrcp.f32 %v4854_v41  ;;  %v5696_v41 = vsel %vm13961_vm6, 0, %v5695_v23 }
 0x5e2   : > { %5697 = vst [vmem:[#allocation2 + $0x78] sm:$0x1] %v5696_v41 }
 0x5e4   : > { %v4857_v27 = vpop.xlane.xlu0 %4856 }
 0x5e5   : > { %11500 = vrcp.f32 %v4857_v27  ;;  %v5745_v27 = vld [vmem:[#allocation2 + $0x80] sm:$0x1] }
 0x5e7   : > { %v11497_v24 = vpop.eup %11496 }
 0x5e8   : > { %v4860_v10 = vpop.xlane.xlu1 %4859  ;;  %v4929_v61 = vmul.f32 %v11497_v24, %v13832_v39  ;;  %v15756_v39 = vpack.c.bf16 %v15754_v58, %v15755_v8  ;;  %v11168_v24 = vld [vmem:[%s15553_s2 + $0x48] sm:$0xff]   ;;  %v11179_v58 = vld [vmem:[%s15553_s2 + $0x30] sm:$0xff]   ;;  %v11180_v8 = vld [vmem:[%s15553_s2 + $0x78] sm:$0xff]  }
 0x5e9   : > { %11502 = vrcp.f32 %v4860_v10  ;;  %v5746_v10 = vsel %vm13969_vm8, 0, %v5745_v27 }
 0x5ea   : > { %5747 = vst [vmem:[#allocation2 + $0x80] sm:$0x1] %v5746_v10 }
 0x5eb   : > { %v11499_v25 = vpop.eup %11498 }
 0x5ec   : > { %v4930_v1 = vmul.f32 %v11499_v25, %v13844_v31  ;;  %v4863_v2 = vpop.xlane.xlu0 %4862  ;;  %v6362_v31 = vor.u32 %v6361_v55, %v6358_v28  ;;  %v5748_v25 = vld [vmem:[#allocation2 + $0x8c] sm:$0x1]  ;;  %v11175_v28 = vld [vmem:[%s15553_s2 + $0x20] sm:$0xff]  }
 0x5ed   : > { %11504 = vrcp.f32 %v4863_v2  ;;  %v11174_v2 = vld [vmem:[%s15553_s2 + $0x60] sm:$0xff]   ;;  %v11176_v55 = vld [vmem:[%s15553_s2 + $0x68] sm:$0xff]  }
 0x5ee   : > { %v4949_v3 = vpack.c.bf16 %v4930_v1, %v4929_v61  ;;  %v6363_v16 = vrot.slane %v6362_v31, 4  ;;  %v5749_v61 = vsel %vm13969_vm8, 0, %v5748_v25  ;;  %v11173_v1 = vld [vmem:[%s15553_s2 + $0x18] sm:$0xff]   ;;  %v9137_v31 = vcombine.low %v14004_v30, %v14006_v49  ;;  %v6186_v30 = vld [vmem:[#allocation2 + $0xc] sm:$0xf] }
 0x5ef   : > { %v11501_v7 = vpop.eup %11500  ;;  %5750 = vst [vmem:[#allocation2 + $0x8c] sm:$0x1] %v5749_v61  ;;  %v6197_v25 = vld [vmem:[#allocation2 + $0x20] sm:$0x1] }
 0x5f0   : > { %10525 = vmatmul.mubr.msk.bf16.vlgmr.msra.gmra.mrb[96].mxu0 %vm4584_vm3, %v4949_v3  ;;  %v4866_v57 = vpop.xlane.xlu1 %4865  ;;  %v4931_v56 = vmul.f32 %v11501_v7, %v13851_v15  ;;  %v15759_v15 = vld [vmem:[#allocation13_spill] sm:$0xff]  ;;  %v6368_v29 = vsel %vm14066_vm14, %v6363_v16, %v6367_v38  ;;  %v5701_v3 = vld [vmem:[#allocation2 + $0x90] sm:$0x1]  ;;  %v5751_v38 = vld [vmem:[#allocation2 + $0x98] sm:$0x1] }
 0x5f1   : > { %10535 = vmatpush3.bf16.msra.mxu0 %v15756_v39  ;;  %11506 = vrcp.f32 %v4866_v57  ;;  %10536 = vmatprep.mubr.msk.bf16.mxu0 %vm11586_vm2, %v15730_v46  ;;  %v9153_v0 = vcombine.low %v6368_v29, %v6378_v40  ;;  %v5752_v57 = vsel %vm13969_vm8, 0, %v5751_v38  ;;  %v11178_v7 = vld [vmem:[%s15553_s2 + $0x70] sm:$0xff]   ;;  %v11181_v39 = vld [vmem:[%s15553_s2 + $0x38] sm:$0xff]  }
 0x5f2   : > { %9834 = vmatprep.subr.bf16.mxu0 %v11166_v21  ;;  %v5702_v21 = vsel %vm13961_vm6, 0, %v5701_v3  ;;  %5753 = vst [vmem:[#allocation2 + $0x98] sm:$0x1] %v5752_v57 }
 0x5f3   : > { %v11503_v51 = vpop.eup %11502  ;;  %5703 = vst [vmem:[#allocation2 + $0x90] sm:$0x1] %v5702_v21 }
 0x5f4   : > { %v4932_v19 = vmul.f32 %v11503_v51, %v13861_v11  ;;  %v15761_v11 = vpack.c.bf16 %v15759_v15, %v15760_v17 }
 0x5f6   : > { %v4950_v50 = vpack.c.bf16 %v4932_v19, %v4931_v56 }
 0x5f7   : > { %v11505_v53 = vpop.eup %11504 }
 0x5f8   : > { %10531 = vmatmul.mubr.msk.bf16.vlgmr.msra.gmra.mrb[128].mxu1 %vm4584_vm3, %v4950_v50  ;;  %v4933_v59 = vmul.f32 %v11505_v53, %v13868_v12  ;;  %v11169_v12 = vld [vmem:[%s15553_s2 + $0x8] sm:$0xff]   ;;  %v6190_v53 = vld [vmem:[#allocation2 + $0x14] sm:$0x1] }
 0x5f9   : > { %10541 = vmatpush3.bf16.msra.mxu1 %v15761_v11  ;;  %10542 = vmatprep.mubr.msk.bf16.mxu1 %vm11586_vm2, %v15730_v46  ;;  %v11167_v46 = vld [vmem:[%s15553_s2] sm:$0xff]   ;;  %vm14148_vm2 = vmor %vm5666_vm5, %vm5862_vm0 }
 0x5fa   : > { %9946 = vmatprep.subr.bf16.mxu1 %v11184_v32 }
 0x5fb   : > { %v11507_v62 = vpop.eup %11506 }
 0x5fc   : > { %v4934_v4 = vmul.f32 %v11507_v62, %v13878_v45  ;;  %v11170_v45 = vld [vmem:[%s15553_s2 + $0x50] sm:$0xff]  }
 0x5fe   : > { %v4951_v63 = vpack.c.bf16 %v4934_v4, %v4933_v59 }
 0x600   : > { %10537 = vmatmul.mubr.msk.bf16.vlgmr.msra.gmra.mrb[100].mxu0 %vm4584_vm3, %v4951_v63 }
 0x601   : > { %9835 = vmatpush3.bf16.msra.mxu0 %v11167_v46  ;;  %7794 = vmatprep.mubr.bf16.mxu0 %v9153_v0 }
 0x602   : > { %9836 = vmatprep.subr.bf16.mxu0 %v11168_v24 }
 0x605   : > { %9837 = vmatpush3.bf16.msra.mxu0 %v11169_v12  ;;  %v6193_v12 = vld [vmem:[#allocation2 + $0x18] sm:$0xf] }
 0x606   : > { %9838 = vmatprep.subr.bf16.mxu0 %v11170_v45 }
 0x609   : > { %9839 = vmatpush3.bf16.msra.mxu0 %v11171_v47 }
 0x60a   : > { %9840 = vmatprep.subr.bf16.mxu0 %v11172_v5 }
 0x60d   : > { %9841 = vmatpush3.bf16.msra.mxu0 %v11173_v1 }
 0x60e   : > { %9842 = vmatprep.subr.bf16.mxu0 %v11174_v2 }
 0x611   : > { %9843 = vmatpush3.bf16.msra.mxu0 %v11175_v28 }
 0x612   : > { %9844 = vmatprep.subr.bf16.mxu0 %v11176_v55 }
 0x615   : > { %9845 = vmatpush3.bf16.msra.mxu0 %v11177_v6 }
 0x616   : > { %9846 = vmatprep.subr.bf16.mxu0 %v11178_v7 }
 0x619   : > { %9847 = vmatpush3.bf16.msra.mxu0 %v11179_v58 }
 0x61a   : > { %9848 = vmatprep.subr.bf16.mxu0 %v11180_v8 }
 0x61d   : > { %9849 = vmatpush3.bf16.msra.mxu0 %v11181_v39 }
 0x61e   : > { %10058 = vmatprep.subr.bf16.mxu0 %v11211_v33 }
 0x620   : > { %7795 = vmatmul.mubr.bf16.vlgmr.msra.gmra.mrb[104].mxu0 %v9137_v31 }
 0x621   : > { %v4990_v60 = vpop.f32.mrb[72].mxu0 }
 0x622   : > { %v9266_v48 = vpack.c.bf16 %v4990_v60, %v4990_v60  ;;  %v10454_v9 = vpop.f32.mrb[73].mxu0 }
 0x623   : > { %v4993_v20 = vpop.f32.mrb[74].mxu0 }
 0x624   : > { %v5865_v34 = vshrl.u32 %v9266_v48, 16  ;;  %v9267_v36 = vpack.c.bf16 %v4993_v20, %v4993_v20  ;;  %v10455_v51 = vpop.f32.mrb[75].mxu0  ;;  %v5868_v19 = vshll.u32 %v9266_v48, 16 }
 0x625   : > { %v11212_v51 = vld [vmem:[%s15553_s2 + $0x100] sm:$0xff]  }
 0x626   : > { %v5867_v56 = vrot.slane %v5865_v34, 7  ;;  %v5873_v50 = vshrl.u32 %v9267_v36, 16  ;;  %v5876_v22 = vshll.u32 %v9267_v36, 16  ;;  %10059 = vmatpush3.bf16.msra.mxu0 %v11212_v51 }
 0x628   : > { %v5870_v49 = vor.u32 %v5868_v19, %v5867_v56  ;;  %v5875_v43 = vrot.slane %v5873_v50, 7  ;;  %v5871_v15 = vrot.slane %v5867_v56, 4 }
 0x62a   : > { %v6187_v17 = vsel %vm14143_vm1, %v5870_v49, %v6186_v30  ;;  %v5878_v11 = vor.u32 %v5876_v22, %v5875_v43  ;;  %v5880_v29 = vrot.slane %v5875_v43, 4  ;;  %v5034_v40 = vpop.f32.mrb[104].mxu1  ;;  %v6200_v30 = vld [vmem:[#allocation2 + $0x24] sm:$0xf] }
 0x62b   : > { %6188 = vst [vmem:[#allocation2 + $0xc] sm:$0xf] %v6187_v17  ;;  %v9268_v23 = vpack.c.bf16 %v5034_v40, %v5034_v40  ;;  %v10460_v62 = vpop.f32.mrb[105].mxu1 }
 0x62c   : > { %v5879_v41 = vsel %vm14148_vm2, %v5871_v15, %v5878_v11  ;;  %v6191_v59 = vsel %vm13961_vm6, %v5880_v29, %v6190_v53  ;;  %v5037_v4 = vpop.f32.mrb[106].mxu1 }
 0x62d   : > { %6189 = vst [vmem:[#allocation2 + $0x10] sm:$0xf] %v5879_v41  ;;  %6192 = vst [vmem:[#allocation2 + $0x14] sm:$0x1] %v6191_v59  ;;  %v5882_v27 = vshrl.u32 %v9268_v23, 16  ;;  %v9269_v46 = vpack.c.bf16 %v5037_v4, %v5037_v4  ;;  %v10461_v0 = vpop.f32.mrb[107].mxu1 }
 0x62e   : > { %v5885_v63 = vshll.u32 %v9268_v23, 16  ;;  %v6204_v41 = vld [vmem:[#allocation2 + $0x2c] sm:$0x1] }
 0x62f   : > { %v5884_v10 = vrot.slane %v5882_v27, 7  ;;  %v5890_v24 = vshrl.u32 %v9269_v46, 16  ;;  %v5893_v47 = vshll.u32 %v9269_v46, 16 }
 0x631   : > { %v5887_v45 = vor.u32 %v5885_v63, %v5884_v10  ;;  %v5892_v42 = vrot.slane %v5890_v24, 7  ;;  %v5888_v5 = vrot.slane %v5884_v10, 4 }
 0x632   : > { %v5078_v61 = vpop.f32.mrb[76].mxu0  ;;  %v14161_v1 = vld [vmem:[#allocation2 + $0xc] sm:$0xf] }
 0x633   : > { %v6194_v2 = vsel %vm14143_vm1, %v5887_v45, %v6193_v12  ;;  %v5895_v28 = vor.u32 %v5893_v47, %v5892_v42  ;;  %v5897_v55 = vrot.slane %v5892_v42, 4  ;;  %v9270_v3 = vpack.c.bf16 %v5078_v61, %v5078_v61  ;;  %v10466_v21 = vpop.f32.mrb[77].mxu0 }
 0x634   : > { %6195 = vst [vmem:[#allocation2 + $0x18] sm:$0xf] %v6194_v2  ;;  %v5081_v38 = vpop.f32.mrb[78].mxu0  ;;  %v4869_v6 = vpop.xlane.xlu0 %4868  ;;  %v14165_v57 = vld [vmem:[#allocation2 + $0x10] sm:$0xf]  ;;  %v6380_v7 = vshrl.u32 %v14161_v1, 16 }
 0x635   : > { %v5896_v58 = vsel %vm14148_vm2, %v5888_v5, %v5895_v28  ;;  %v6198_v8 = vsel %vm13961_vm6, %v5897_v55, %v6197_v25  ;;  %v5899_v39 = vshrl.u32 %v9270_v3, 16  ;;  %v5902_v31 = vshll.u32 %v9270_v3, 16  ;;  %v10467_v60 = vpop.f32.mrb[79].mxu0  ;;  %v14172_v20 = vld [vmem:[#allocation2 + $0x14] sm:$0x1] }
 0x636   : > { %6196 = vst [vmem:[#allocation2 + $0x1c] sm:$0xf] %v5896_v58  ;;  %6199 = vst [vmem:[#allocation2 + $0x20] sm:$0x1] %v6198_v8  ;;  %v9271_v48 = vpack.c.bf16 %v5081_v38, %v5081_v38  ;;  %11508 = vrcp.f32 %v4869_v6  ;;  %v4872_v9 = vpop.xlane.xlu1 %4871  ;;  %v6382_v34 = vrot.slane %v6380_v7, 4  ;;  %v6383_v36 = vshll.u32 %v14161_v1, 16 }
 0x637   : > { %v5901_v56 = vrot.slane %v5899_v39, 7  ;;  %11510 = vrcp.f32 %v4872_v9  ;;  %v6389_v19 = vshll.u32 %v14165_v57, 16  ;;  %v6393_v50 = vshrl.u32 %v14165_v57, 16  ;;  %v6207_v6 = vld [vmem:[#allocation2 + $0x30] sm:$0xf] }
 0x638   : > { %v5907_v49 = vshrl.u32 %v9271_v48, 16  ;;  %v6385_v43 = vrot.slane %v6383_v36, 5  ;;  %v6399_v17 = vshll.u32 %v14172_v20, 16  ;;  %v5910_v29 = vshll.u32 %v9271_v48, 16  ;;  %v6211_v7 = vld [vmem:[#allocation2 + $0x38] sm:$0x1] }
 0x639   : > { %v5904_v22 = vor.u32 %v5902_v31, %v5901_v56  ;;  %v6391_v53 = vrot.slane %v6389_v19, 5  ;;  %v6395_v15 = vrot.slane %v6393_v50, 4  ;;  %v5905_v46 = vrot.slane %v5901_v56, 4 }
 0x63a   : > { %v5909_v11 = vrot.slane %v5907_v49, 7  ;;  %v5122_v40 = vpop.f32.mrb[108].mxu1  ;;  %v6386_v23 = vor.u32 %v6385_v43, %v6382_v34  ;;  %v6401_v33 = vrot.slane %v6399_v17, 5  ;;  %v9138_v36 = vcombine.low %v14161_v1, %v14165_v57 }
 0x63b   : > { %v6201_v62 = vsel %vm14143_vm1, %v5904_v22, %v6200_v30  ;;  %v9272_v59 = vpack.c.bf16 %v5122_v40, %v5122_v40  ;;  %v10472_v4 = vpop.f32.mrb[109].mxu1  ;;  %v6396_v27 = vor.u32 %v6395_v15, %v6391_v53  ;;  %v14195_v51 = vld [vmem:[#allocation2 + $0x18] sm:$0xf] }
 0x63c   : > { %6202 = vst [vmem:[#allocation2 + $0x24] sm:$0xf] %v6201_v62  ;;  %v5912_v0 = vor.u32 %v5910_v29, %v5909_v11  ;;  %v5914_v10 = vrot.slane %v5909_v11, 4  ;;  %v5125_v63 = vpop.f32.mrb[110].mxu1  ;;  %v6387_v24 = vrot.slane %v6386_v23, 4  ;;  %v6404_v40 = vshrl.u32 %v14195_v51, 16 }
 0x63d   : > { %v5916_v12 = vshrl.u32 %v9272_v59, 16  ;;  %v9273_v45 = vpack.c.bf16 %v5125_v63, %v5125_v63  ;;  %v10473_v42 = vpop.f32.mrb[111].mxu1  ;;  %v6397_v47 = vrot.slane %v6396_v27, 4  ;;  %v5919_v61 = vshll.u32 %v9272_v59, 16  ;;  %v14200_v43 = vld [vmem:[#allocation2 + $0x1c] sm:$0xf] }
 0x63e   : > { %v5913_v5 = vsel %vm14148_vm2, %v5905_v46, %v5912_v0  ;;  %v6205_v25 = vsel %vm13961_vm6, %v5914_v10, %v6204_v41  ;;  %v6392_v3 = vsel %vm14066_vm14, %v6387_v24, %v6391_v53  ;;  %v11187_v23 = vld [vmem:[%s15553_s2 + $0xc8] sm:$0xff]   ;;  %v6214_v59 = vld [vmem:[#allocation2 + $0x3c] sm:$0xf]  ;;  %v6407_v4 = vshll.u32 %v14195_v51, 16  ;;  %v14218_v10 = vld [vmem:[#allocation2 + $0x20] sm:$0x1] }
 0x63f   : > { %6203 = vst [vmem:[#allocation2 + $0x28] sm:$0xf] %v5913_v5  ;;  %6206 = vst [vmem:[#allocation2 + $0x2c] sm:$0x1] %v6205_v25  ;;  %v5918_v2 = vrot.slane %v5916_v12, 7  ;;  %v5924_v28 = vshrl.u32 %v9273_v45, 16  ;;  %v6402_v21 = vsel %vm14066_vm14, %v6397_v47, %v6401_v33 }
 0x640   : > { %v5166_v55 = vpop.f32.mrb[80].mxu0  ;;  %v11509_v38 = vpop.eup %11508  ;;  %v14191_v39 = vcombine.low %v6392_v3, %v6402_v21  ;;  %v5927_v9 = vshll.u32 %v9273_v45, 16  ;;  %v6413_v27 = vshll.u32 %v14200_v43, 16  ;;  %v6406_v24 = vrot.slane %v6404_v40, 4  ;;  %v11188_v47 = vld [vmem:[%s15553_s2 + $0x88] sm:$0xff]  }
 0x641   : > { %v9274_v58 = vpack.c.bf16 %v5166_v55, %v5166_v55  ;;  %v10478_v8 = vpop.f32.mrb[81].mxu0  ;;  %v11511_v31 = vpop.eup %11510  ;;  %v5921_v60 = vor.u32 %v5919_v61, %v5918_v2  ;;  %v5926_v48 = vrot.slane %v5924_v28, 7  ;;  %v4935_v56 = vmul.f32 %v11509_v38, %v13974_v44  ;;  %v11185_v44 = vld [vmem:[%s15553_s2 + $0x80] sm:$0xff]   ;;  %v11189_v28 = vld [vmem:[%s15553_s2 + $0xd0] sm:$0xff]  }
 0x642   : > { %v5169_v34 = vpop.f32.mrb[82].mxu0  ;;  %v4936_v19 = vmul.f32 %v11511_v31, %v13986_v37  ;;  %v5922_v50 = vrot.slane %v5918_v2, 4  ;;  %7802 = vmatprep.mubr.bf16.mxu0 %v14191_v39  ;;  %v6409_v12 = vrot.slane %v6407_v4, 5  ;;  %v6415_v45 = vrot.slane %v6413_v27, 5  ;;  %v6218_v55 = vld [vmem:[#allocation2 + $0x44] sm:$0x1] }
 0x643   : > { %v5933_v30 = vshrl.u32 %v9274_v58, 16  ;;  %v10479_v49 = vpop.f32.mrb[83].mxu0  ;;  %v6208_v22 = vsel %vm14143_vm1, %v5921_v60, %v6207_v6  ;;  %v5929_v53 = vor.u32 %v5927_v9, %v5926_v48  ;;  %v5931_v15 = vrot.slane %v5926_v48, 4  ;;  %7803 = vmatmul.mubr.bf16.gmra.mrb[108].mxu0 %v9138_v36  ;;  %v11193_v27 = vld [vmem:[%s15553_s2 + $0x98] sm:$0xff]  }
 0x644   : > { %v5936_v17 = vshll.u32 %v9274_v58, 16  ;;  %v4952_v11 = vpack.c.bf16 %v4936_v19, %v4935_v56  ;;  %6209 = vst [vmem:[#allocation2 + $0x30] sm:$0xf] %v6208_v22  ;;  %v9275_v29 = vpack.c.bf16 %v5169_v34, %v5169_v34  ;;  %v6417_v42 = vshrl.u32 %v14200_v43, 16  ;;  %v11190_v34 = vld [vmem:[%s15553_s2 + $0x90] sm:$0xff]   ;;  %v11192_v49 = vld [vmem:[%s15553_s2 + $0xd8] sm:$0xff]  }
 0x645   : > { %v5935_v37 = vrot.slane %v5933_v30, 7  ;;  %v5930_v62 = vsel %vm14148_vm2, %v5922_v50, %v5929_v53  ;;  %v6212_v41 = vsel %vm13961_vm6, %v5931_v15, %v6211_v7  ;;  %v6410_v3 = vor.u32 %v6409_v12, %v6406_v24  ;;  %v6221_v22 = vld [vmem:[#allocation2 + $0x48] sm:$0xf]  ;;  %v6225_v12 = vld [vmem:[#allocation2 + $0x50] sm:$0x1] }
 0x646   : > { %6210 = vst [vmem:[#allocation2 + $0x34] sm:$0xf] %v5930_v62  ;;  %6213 = vst [vmem:[#allocation2 + $0x38] sm:$0x1] %v6212_v41  ;;  %v5941_v0 = vshrl.u32 %v9275_v29, 16  ;;  %10543 = vmatmul.mubr.msk.bf16.vlgmr.msra.gmra.mrb[132].mxu1 %vm4584_vm3, %v4952_v11  ;;  %v5944_v25 = vshll.u32 %v9275_v29, 16 }
 0x647   : > { %v5938_v46 = vor.u32 %v5936_v17, %v5935_v37  ;;  %9947 = vmatpush3.bf16.msra.mxu1 %v11185_v44  ;;  %v5210_v63 = vpop.f32.mrb[112].mxu1  ;;  %7955 = vmatprep.mubr.bf16.mxu1 %v9138_v36  ;;  %v6419_v21 = vrot.slane %v6417_v42, 4  ;;  %v6423_v38 = vshll.u32 %v14218_v10, 16  ;;  %v5939_v7 = vrot.slane %v5935_v37, 4  ;;  %v14233_v36 = vld [vmem:[#allocation2 + $0x24] sm:$0xf] }
 0x648   : > { %v5943_v5 = vrot.slane %v5941_v0, 7  ;;  %v9276_v61 = vpack.c.bf16 %v5210_v63, %v5210_v63  ;;  %v10484_v2 = vpop.f32.mrb[113].mxu1  ;;  %9948 = vmatprep.subr.bf16.mxu1 %v11187_v23  ;;  %v6411_v48 = vrot.slane %v6410_v3, 4  ;;  %v6799_v44 = vrot.slane %v14165_v57, 5  ;;  %v14247_v29 = vld [vmem:[#allocation2 + $0x28] sm:$0xf] }
 0x649   : > { %v6215_v33 = vsel %vm14143_vm1, %v5938_v46, %v6214_v59  ;;  %v5213_v6 = vpop.f32.mrb[114].mxu1  ;;  %v6420_v9 = vor.u32 %v6419_v21, %v6415_v45  ;;  %v6425_v15 = vrot.slane %v6423_v38, 5  ;;  %v6802_v11 = vrot.slane %v14172_v20, 5  ;;  %v11213_v23 = vld [vmem:[%s15553_s2 + $0x148] sm:$0xff]  }
 0x64a   : > { %6216 = vst [vmem:[#allocation2 + $0x3c] sm:$0xf] %v6215_v33  ;;  %v5946_v58 = vor.u32 %v5944_v25, %v5943_v5  ;;  %v5948_v8 = vrot.slane %v5943_v5, 4  ;;  %v5950_v31 = vshrl.u32 %v9276_v61, 16  ;;  %v10485_v60 = vpop.f32.mrb[115].mxu1  ;;  %v5953_v30 = vshll.u32 %v9276_v61, 16  ;;  %10060 = vmatprep.subr.bf16.mxu0 %v11213_v23 }
 0x64b   : > { %9949 = vmatpush3.bf16.msra.mxu1 %v11188_v47  ;;  %v6421_v53 = vrot.slane %v6420_v9, 4  ;;  %v9277_v17 = vpack.c.bf16 %v5213_v6, %v5213_v6  ;;  %v6428_v40 = vshrl.u32 %v14233_v36, 16  ;;  %v6416_v62 = vsel %vm14066_vm14, %v6411_v48, %v6415_v45  ;;  %v11214_v46 = vld [vmem:[%s15553_s2 + $0x108] sm:$0xff]   ;;  %v11194_v33 = vld [vmem:[%s15553_s2 + $0xe0] sm:$0xff]  }
 0x64c   : > { %v5947_v56 = vsel %vm14148_vm2, %v5939_v7, %v5946_v58  ;;  %v6219_v19 = vsel %vm13961_vm6, %v5948_v8, %v6218_v55  ;;  %v14239_v50 = vrot.slane %v5950_v31, 7  ;;  %9950 = vmatprep.subr.bf16.mxu1 %v11189_v28  ;;  %v14259_v20 = vcombine.low %v14195_v51, %v14200_v43  ;;  %v14271_v47 = vld [vmem:[#allocation2 + $0x2c] sm:$0x1]  ;;  %10061 = vmatpush3.bf16.msra.mxu0 %v11214_v46  ;;  %v11195_v60 = vld [vmem:[%s15553_s2 + $0xa0] sm:$0xff]  }
 0x64d   : > { %6217 = vst [vmem:[#allocation2 + $0x40] sm:$0xf] %v5947_v56  ;;  %6220 = vst [vmem:[#allocation2 + $0x44] sm:$0x1] %v6219_v19  ;;  %v6426_v41 = vsel %vm14066_vm14, %v6421_v53, %v6425_v15  ;;  %v5958_v59 = vshrl.u32 %v9277_v17, 16  ;;  %v5961_v24 = vshll.u32 %v9277_v17, 16 }
 0x64e   : > { %v5955_v37 = vor.u32 %v5953_v30, %v14239_v50  ;;  %v14269_v63 = vcombine.low %v6416_v62, %v6426_v41  ;;  %v6430_v25 = vrot.slane %v6428_v40, 4  ;;  %v6431_v61 = vshll.u32 %v14233_v36, 16  ;;  %v11197_v19 = vld [vmem:[%s15553_s2 + $0xe8] sm:$0xff]  }
 0x64f   : > { %9951 = vmatpush3.bf16.msra.mxu1 %v11190_v34  ;;  %v5254_v4 = vpop.f32.mrb[84].mxu0  ;;  %v5960_v5 = vrot.slane %v5958_v59, 7  ;;  %v6437_v2 = vshll.u32 %v14247_v29, 16  ;;  %v6801_v55 = vrot.slane %v6799_v44, 4  ;;  %v5956_v3 = vrot.slane %v14239_v50, 4  ;;  %v11198_v59 = vld [vmem:[%s15553_s2 + $0xa8] sm:$0xff]  }
 0x650   : > { %v6222_v0 = vsel %vm14143_vm1, %v5955_v37, %v6221_v22  ;;  %v9278_v45 = vpack.c.bf16 %v5254_v4, %v5254_v4  ;;  %v10490_v42 = vpop.f32.mrb[85].mxu0  ;;  %9952 = vmatprep.subr.bf16.mxu1 %v11192_v49  ;;  %7810 = vmatprep.mubr.bf16.mxu0 %v14269_v63  ;;  %v6441_v38 = vshrl.u32 %v14247_v29, 16  ;;  %v6433_v8 = vrot.slane %v6431_v61, 5  ;;  %v6228_v22 = vld [vmem:[#allocation2 + $0x54] sm:$0xf] }
 0x651   : > { %6223 = vst [vmem:[#allocation2 + $0x48] sm:$0xf] %v6222_v0  ;;  %v5257_v28 = vpop.f32.mrb[86].mxu0  ;;  %v5963_v7 = vor.u32 %v5961_v24, %v5960_v5  ;;  %v5965_v58 = vrot.slane %v5960_v5, 4  ;;  %7811 = vmatmul.mubr.bf16.gmra.mrb[112].mxu0 %v14259_v20  ;;  %v6439_v31 = vrot.slane %v6437_v2, 5  ;;  %v6447_v56 = vshll.u32 %v14271_v47, 16 }
 0x652   : > { %v5967_v21 = vshrl.u32 %v9278_v45, 16  ;;  %v10491_v6 = vpop.f32.mrb[87].mxu0  ;;  %v5970_v9 = vshll.u32 %v9278_v45, 16  ;;  %v6443_v34 = vrot.slane %v6441_v38, 4  ;;  %v6806_v50 = vrot.slane %v14200_v43, 5 }
 0x653   : > { %9953 = vmatpush3.bf16.msra.mxu1 %v11193_v27  ;;  %v5964_v30 = vsel %vm14148_vm2, %v5956_v3, %v5963_v7  ;;  %v6226_v49 = vsel %vm13961_vm6, %v5965_v58, %v6225_v12  ;;  %v6434_v53 = vor.u32 %v6433_v8, %v6430_v25  ;;  %v9120_v37 = vrot.slane %v14161_v1, 9  ;;  %v14309_v12 = vld [vmem:[#allocation2 + $0x30] sm:$0xf]  ;;  %v14323_v25 = vld [vmem:[#allocation2 + $0x34] sm:$0xf] }
 0x654   : > { %v14287_v48 = vrot.slane %v5967_v21, 7  ;;  %9954 = vmatprep.subr.bf16.mxu1 %v11194_v33  ;;  %6224 = vst [vmem:[#allocation2 + $0x4c] sm:$0xf] %v5964_v30  ;;  %6227 = vst [vmem:[#allocation2 + $0x50] sm:$0x1] %v6226_v49  ;;  %v6444_v17 = vor.u32 %v6443_v34, %v6439_v31  ;;  %v14302_v40 = vsel %vm14013_vm11, %v6801_v55, %v6802_v11  ;;  %v6449_v46 = vrot.slane %v6447_v56, 5 }
 0x655   : > { %v6435_v23 = vrot.slane %v6434_v53, 4  ;;  %v9279_v62 = vpack.c.bf16 %v5257_v28, %v5257_v28  ;;  %v11199_v11 = vld [vmem:[%s15553_s2 + $0xf0] sm:$0xff]   ;;  %v14316_v45 = vrot.slane %v6806_v50, 4  ;;  %v14321_v5 = vcombine.low %v14233_v36, %v14247_v29  ;;  %v6232_v3 = vld [vmem:[#allocation2 + $0x5c] sm:$0x1] }
 0x656   : > { %v5972_v15 = vor.u32 %v5970_v9, %v14287_v48  ;;  %v6445_v27 = vrot.slane %v6444_v17, 4  ;;  %v5973_v42 = vrot.slane %v14287_v48, 4  ;;  %v14331_v58 = vld [vmem:[#allocation2 + $0x38] sm:$0x1]  ;;  %v6452_v8 = vshrl.u32 %v14309_v12, 16  ;;  %v11215_v17 = vld [vmem:[%s15553_s2 + $0x150] sm:$0xff]  }
 0x657   : > { %9955 = vmatpush3.bf16.msra.mxu1 %v11195_v60  ;;  %v5298_v41 = vpop.f32.mrb[116].mxu1  ;;  %v5975_v33 = vshrl.u32 %v9279_v62, 16  ;;  %v6440_v2 = vsel %vm14066_vm14, %v6435_v23, %v6439_v31  ;;  %v5978_v55 = vshll.u32 %v9279_v62, 16  ;;  %v6455_v60 = vshll.u32 %v14309_v12, 16  ;;  %v11200_v31 = vld [vmem:[%s15553_s2 + $0xb0] sm:$0xff]   ;;  %10062 = vmatprep.subr.bf16.mxu0 %v11215_v17 }
 0x658   : > { %v6229_v4 = vsel %vm14143_vm1, %v5972_v15, %v6228_v22  ;;  %v9280_v0 = vpack.c.bf16 %v5298_v41, %v5298_v41  ;;  %v10496_v24 = vpop.f32.mrb[117].mxu1  ;;  %9956 = vmatprep.subr.bf16.mxu1 %v11197_v19  ;;  %v6450_v28 = vsel %vm14066_vm14, %v6445_v27, %v6449_v46  ;;  %v6461_v34 = vshll.u32 %v14323_v25, 16  ;;  %v11202_v19 = vld [vmem:[%s15553_s2 + $0xf8] sm:$0xff]   ;;  %v6235_v22 = vld [vmem:[#allocation2 + $0x60] sm:$0xf] }
 0x659   : > { %6230 = vst [vmem:[#allocation2 + $0x54] sm:$0xf] %v6229_v4  ;;  %v5301_v61 = vpop.f32.mrb[118].mxu1  ;;  %v14329_v6 = vcombine.low %v6440_v2, %v6450_v28  ;;  %v5977_v7 = vrot.slane %v5975_v33, 7  ;;  %v6465_v56 = vshrl.u32 %v14323_v25, 16  ;;  %v6454_v53 = vrot.slane %v6452_v8, 4 }
 0x65a   : > { %v5984_v21 = vshrl.u32 %v9280_v0, 16  ;;  %v10497_v38 = vpop.f32.mrb[119].mxu1  ;;  %v5987_v9 = vshll.u32 %v9280_v0, 16  ;;  %v6457_v15 = vrot.slane %v6455_v60, 5  ;;  %v6463_v62 = vrot.slane %v6461_v34, 5  ;;  %v11203_v33 = vld [vmem:[%s15553_s2 + $0xb8] sm:$0xff]  }
 0x65b   : > { %9957 = vmatpush3.bf16.msra.mxu1 %v11198_v59  ;;  %7818 = vmatprep.mubr.bf16.mxu0 %v14329_v6  ;;  %v5980_v30 = vor.u32 %v5978_v55, %v5977_v7  ;;  %v5982_v49 = vrot.slane %v5977_v7, 4  ;;  %v6467_v41 = vrot.slane %v6465_v56, 4  ;;  %v6471_v59 = vshll.u32 %v14331_v58, 16  ;;  %v14357_v24 = vld [vmem:[#allocation2 + $0x3c] sm:$0xf] }
 0x65c   : > { %v14338_v48 = vrot.slane %v5984_v21, 7  ;;  %9958 = vmatprep.subr.bf16.mxu1 %v11199_v11  ;;  %7819 = vmatmul.mubr.bf16.gmra.mrb[116].mxu0 %v14321_v5  ;;  %v9121_v4 = vrot.slane %v14195_v51, 9  ;;  %v6458_v0 = vor.u32 %v6457_v15, %v6454_v53  ;;  %v11216_v51 = vld [vmem:[%s15553_s2 + $0x110] sm:$0xff]   ;;  %v6809_v2 = vrot.slane %v14218_v10, 5  ;;  %v14381_v10 = vld [vmem:[#allocation2 + $0x40] sm:$0xf] }
 0x65d   : > { %v5981_v27 = vsel %vm14148_vm2, %v5973_v42, %v5980_v30  ;;  %v6233_v46 = vsel %vm13961_vm6, %v5982_v49, %v6232_v3  ;;  %v6800_v42 = vsel %vm14013_vm11, %v9120_v37, %v6799_v44  ;;  %v6468_v55 = vor.u32 %v6467_v41, %v6463_v62  ;;  %10063 = vmatpush3.bf16.msra.mxu0 %v11216_v51  ;;  %v11219_v41 = vld [vmem:[%s15553_s2 + $0x158] sm:$0xff]  }
 0x65e   : > { %v5989_v23 = vor.u32 %v5987_v9, %v14338_v48  ;;  %6231 = vst [vmem:[#allocation2 + $0x58] sm:$0xf] %v5981_v27  ;;  %6234 = vst [vmem:[#allocation2 + $0x5c] sm:$0x1] %v6233_v46  ;;  %v14375_v21 = vcombine.low %v6800_v42, %v14302_v40  ;;  %v6807_v1 = vsel %vm14013_vm11, %v9121_v4, %v6806_v50  ;;  %v6459_v57 = vrot.slane %v6458_v0, 4 }
 0x65f   : > { %9959 = vmatpush3.bf16.msra.mxu1 %v11200_v31  ;;  %v5342_v11 = vpop.f32.mrb[88].mxu0  ;;  %v9281_v44 = vpack.c.bf16 %v5301_v61, %v5301_v61  ;;  %v6810_v38 = vsel %vm14013_vm11, %v14316_v45, %v6809_v2  ;;  %v6469_v7 = vrot.slane %v6468_v55, 4  ;;  %v6473_v8 = vrot.slane %v6471_v59, 5  ;;  %v14394_v45 = vld [vmem:[#allocation2 + $0x44] sm:$0x1]  ;;  %v11220_v59 = vld [vmem:[%s15553_s2 + $0x118] sm:$0xff]   ;;  %10064 = vmatprep.subr.bf16.mxu0 %v11219_v41 }
 0x660   : > { %v6236_v28 = vsel %vm14143_vm1, %v5989_v23, %v6235_v22  ;;  %v10502_v3 = vpop.f32.mrb[89].mxu0  ;;  %9960 = vmatprep.subr.bf16.mxu1 %v11202_v19  ;;  %v6476_v40 = vshrl.u32 %v14357_v24, 16  ;;  %v6813_v43 = vrot.slane %v14247_v29, 5  ;;  %v5990_v50 = vrot.slane %v14338_v48, 4  ;;  %v6239_v48 = vld [vmem:[#allocation2 + $0x68] sm:$0x1] }
 0x661   : > { %6237 = vst [vmem:[#allocation2 + $0x60] sm:$0xf] %v6236_v28  ;;  %v5345_v37 = vpop.f32.mrb[90].mxu0  ;;  %v5992_v31 = vshrl.u32 %v9281_v44, 16  ;;  %v6479_v61 = vshll.u32 %v14357_v24, 16  ;;  %v6464_v9 = vsel %vm14066_vm14, %v6459_v57, %v6463_v62  ;;  %v6474_v34 = vsel %vm14066_vm14, %v6469_v7, %v6473_v8  ;;  %10065 = vmatpush3.bf16.msra.mxu0 %v11220_v59 }
 0x662   : > { %v10503_v60 = vpop.f32.mrb[91].mxu0  ;;  %v6478_v56 = vrot.slane %v6476_v40, 4  ;;  %v6485_v19 = vshll.u32 %v14381_v10, 16  ;;  %v14397_v30 = vcombine.low %v6464_v9, %v6474_v34  ;;  %v5995_v22 = vshll.u32 %v9281_v44, 16  ;;  %v14423_v42 = vld [vmem:[#allocation2 + $0x48] sm:$0xf] }
 0x663   : > { %9961 = vmatpush3.bf16.msra.mxu1 %v11203_v33  ;;  %v5994_v49 = vrot.slane %v5992_v31, 7  ;;  %v6481_v53 = vrot.slane %v6479_v61, 5  ;;  %v6820_v15 = vrot.slane %v14323_v25, 5  ;;  %v14402_v17 = vcombine.low %v14309_v12, %v14323_v25  ;;  %v14440_v34 = vld [vmem:[#allocation2 + $0x4c] sm:$0xf] }
 0x664   : > { %v6487_v23 = vrot.slane %v6485_v19, 5  ;;  %v6489_v62 = vshrl.u32 %v14381_v10, 16  ;;  %7826 = vmatprep.mubr.bf16.mxu0 %v14397_v30  ;;  %v6495_v0 = vshll.u32 %v14394_v45, 16  ;;  %v14419_v54 = vcombine.low %v6807_v1, %v6810_v38 }
 0x665   : > { %v5997_v4 = vor.u32 %v5995_v22, %v5994_v49  ;;  %v5999_v27 = vrot.slane %v5994_v49, 4  ;;  %v6482_v46 = vor.u32 %v6481_v53, %v6478_v56  ;;  %v9122_v18 = vrot.slane %v14233_v36, 9  ;;  %7827 = vmatmul.mubr.bf16.gmra.mrb[120].mxu0 %v14402_v17  ;;  %v6242_v49 = vld [vmem:[#allocation2 + $0x6c] sm:$0xf]  ;;  %v14449_v53 = vld [vmem:[#allocation2 + $0x50] sm:$0x1] }
 0x666   : > { %7956 = vmatmul.mubr.bf16.vlgmr.msra.gmra.mrb[136].mxu1 %v9169_v52  ;;  %v6491_v52 = vrot.slane %v6489_v62, 4  ;;  %v9282_v51 = vpack.c.bf16 %v5342_v11, %v5342_v11  ;;  %v6816_v28 = vrot.slane %v14271_v47, 5  ;;  %v6815_v44 = vrot.slane %v6813_v43, 4 }
 0x667   : > { %7963 = vmatprep.mubr.bf16.mxu1 %v14259_v20  ;;  %v14417_v33 = vpop.f32.mrb[120].mxu1  ;;  %v5998_v55 = vsel %vm14148_vm2, %v5990_v50, %v5997_v4  ;;  %v6240_v3 = vsel %vm13961_vm6, %v5999_v27, %v6239_v48  ;;  %v6483_v1 = vrot.slane %v6482_v46, 4  ;;  %v14436_v11 = vrot.slane %v6820_v15, 4  ;;  %v11223_v27 = vld [vmem:[%s15553_s2 + $0x120] sm:$0xff]   ;;  %v11224_v46 = vld [vmem:[%s15553_s2 + $0x168] sm:$0xff]  }
 0x668   : > { %v10508_v2 = vpop.f32.mrb[121].mxu1  ;;  %6238 = vst [vmem:[#allocation2 + $0x64] sm:$0xf] %v5998_v55  ;;  %6241 = vst [vmem:[#allocation2 + $0x68] sm:$0x1] %v6240_v3  ;;  %v6492_v47 = vor.u32 %v6491_v52, %v6487_v23  ;;  %v6001_v38 = vshrl.u32 %v9282_v51, 16  ;;  %v9283_v60 = vpack.c.bf16 %v5345_v37, %v5345_v37  ;;  %v14447_v48 = vcombine.low %v14357_v24, %v14381_v10 }
 0x669   : > { %v14430_v57 = vpop.f32.mrb[122].mxu1  ;;  %v6497_v8 = vrot.slane %v6495_v0, 5  ;;  %v6827_v40 = vrot.slane %v14381_v10, 5  ;;  %v6500_v50 = vshrl.u32 %v14423_v42, 16  ;;  %v6004_v9 = vshll.u32 %v9282_v51, 16  ;;  %v11226_v3 = vld [vmem:[%s15553_s2 + $0x1c0] sm:$0xff]  }
 0x66a   : > { %v10509_v7 = vpop.f32.mrb[123].mxu1  ;;  %v6493_v31 = vrot.slane %v6492_v47, 4  ;;  %v6003_v61 = vrot.slane %v6001_v38, 7  ;;  %v6503_v56 = vshll.u32 %v14423_v42, 16  ;;  %v6488_v19 = vsel %vm14066_vm14, %v6483_v1, %v6487_v23  ;;  %15766 = vst [vmem:[#allocation14_spill] sm:$0xff] %v14447_v48  ;;  %v11222_v23 = vld [vmem:[%s15553_s2 + $0x160] sm:$0xff]   ;;  %10170 = vmatprep.subr.bf16.mxu1 %v11226_v3 }
 0x66b   : > { %v6009_v22 = vshrl.u32 %v9283_v60, 16  ;;  %v6502_v37 = vrot.slane %v6500_v50, 4  ;;  %v6012_v59 = vshll.u32 %v9283_v60, 16  ;;  %v6509_v51 = vshll.u32 %v14440_v34, 16  ;;  %v6246_v38 = vld [vmem:[#allocation2 + $0x74] sm:$0x1]  ;;  %10066 = vmatprep.subr.bf16.mxu0 %v11222_v23 }
 0x66c   : > { %v6498_v62 = vsel %vm14066_vm14, %v6493_v31, %v6497_v8  ;;  %v6006_v41 = vor.u32 %v6004_v9, %v6003_v61  ;;  %v6505_v4 = vrot.slane %v6503_v56, 5  ;;  %v6513_v2 = vshrl.u32 %v14440_v34, 16  ;;  %v11227_v50 = vld [vmem:[%s15553_s2 + $0x180] sm:$0xff]   ;;  %10067 = vmatpush3.bf16.msra.mxu0 %v11223_v27 }
 0x66d   : > { %v14463_v0 = vcombine.low %v6488_v19, %v6498_v62  ;;  %v6011_v52 = vrot.slane %v6009_v22, 7  ;;  %v6007_v1 = vrot.slane %v6003_v61, 4  ;;  %v6519_v8 = vshll.u32 %v14449_v53, 16  ;;  %10068 = vmatprep.subr.bf16.mxu0 %v11224_v46  ;;  %10171 = vmatpush3.bf16.msra.mxu1 %v11227_v50 }
 0x66e   : > { %7964 = vmatmul.mubr.bf16.gmra.mrb[140].mxu1 %v14375_v21  ;;  %v6243_v47 = vsel %vm14143_vm1, %v6006_v41, %v6242_v49  ;;  %v6506_v7 = vor.u32 %v6505_v4, %v6502_v37  ;;  %v6511_v56 = vrot.slane %v6509_v51, 5  ;;  %v6515_v61 = vrot.slane %v6513_v2, 4  ;;  %v11225_v49 = vld [vmem:[%s15553_s2 + $0x128] sm:$0xff]   ;;  %v6249_v2 = vld [vmem:[#allocation2 + $0x78] sm:$0xf] }
 0x66f   : > { %7971 = vmatprep.mubr.bf16.mxu1 %v14321_v5  ;;  %v14468_v55 = vpop.f32.mrb[92].mxu0  ;;  %7834 = vmatprep.mubr.bf16.mxu0 %v14463_v0  ;;  %6244 = vst [vmem:[#allocation2 + $0x6c] sm:$0xf] %v6243_v47  ;;  %v6014_v31 = vor.u32 %v6012_v59, %v6011_v52  ;;  %v6016_v9 = vrot.slane %v6011_v52, 4  ;;  %v14491_v22 = vsel %vm14013_vm11, %v9122_v18, %v6813_v43  ;;  %v6823_v62 = vrot.slane %v14331_v58, 5  ;;  %v11229_v47 = vld [vmem:[%s15553_s2 + $0x130] sm:$0xff]  }
 0x670   : > { %v10514_v60 = vpop.f32.mrb[93].mxu0  ;;  %v14495_v37 = vsel %vm14013_vm11, %v6815_v44, %v6816_v28  ;;  %7835 = vmatmul.mubr.bf16.gmra.mrb[124].mxu0 %v14447_v48  ;;  %v6507_v41 = vrot.slane %v6506_v7, 4  ;;  %v6516_v4 = vor.u32 %v6515_v61, %v6511_v56  ;;  %v9284_v43 = vpack.c.bf16 %v14417_v33, %v14417_v33  ;;  %v14505_v18 = vld [vmem:[#allocation2 + $0x54] sm:$0xf]  ;;  %v14520_v52 = vld [vmem:[#allocation2 + $0x58] sm:$0xf] }
 0x671   : > { %v14480_v19 = vpop.f32.mrb[94].mxu0  ;;  %v6015_v29 = vsel %vm14148_vm2, %v6007_v1, %v6014_v31  ;;  %v6247_v36 = vsel %vm13961_vm6, %v6016_v9, %v6246_v38  ;;  %v9123_v58 = vrot.slane %v14309_v12, 9  ;;  %v14511_v28 = vsel %vm14013_vm11, %v14436_v11, %v6823_v62  ;;  %10069 = vmatpush3.bf16.msra.mxu0 %v11225_v49  ;;  %v11230_v31 = vld [vmem:[%s15553_s2 + $0x178] sm:$0xff]  }
 0x672   : > { %v10515_v59 = vpop.f32.mrb[95].mxu0  ;;  %v14515_v44 = vrot.slane %v6827_v40, 4  ;;  %6245 = vst [vmem:[#allocation2 + $0x70] sm:$0xf] %v6015_v29  ;;  %6248 = vst [vmem:[#allocation2 + $0x74] sm:$0x1] %v6247_v36  ;;  %v9285_v23 = vpack.c.bf16 %v14430_v57, %v14430_v57  ;;  %v6512_v11 = vsel %vm14066_vm14, %v6507_v41, %v6511_v56  ;;  %v14548_v36 = vcombine.low %v14423_v42, %v14440_v34 }
 0x673   : > { %v6517_v33 = vrot.slane %v6516_v4, 4  ;;  %v6521_v27 = vrot.slane %v6519_v8, 5  ;;  %v6834_v46 = vrot.slane %v14440_v34, 5  ;;  %v6018_v12 = vshrl.u32 %v9284_v43, 16  ;;  %v11228_v57 = vld [vmem:[%s15553_s2 + $0x170] sm:$0xff]  }
 0x674   : > { %v6021_v51 = vshll.u32 %v9284_v43, 16  ;;  %v6026_v3 = vshrl.u32 %v9285_v23, 16  ;;  %v6524_v1 = vshrl.u32 %v14505_v18, 16  ;;  %v6029_v8 = vshll.u32 %v9285_v23, 16  ;;  %v14543_v61 = vld [vmem:[#allocation2 + $0x5c] sm:$0x1]  ;;  %10070 = vmatprep.subr.bf16.mxu0 %v11228_v57 }
 0x675   : > { %v6522_v38 = vsel %vm14066_vm14, %v6517_v33, %v6521_v27  ;;  %v6020_v7 = vrot.slane %v6018_v12, 7  ;;  %v6527_v60 = vshll.u32 %v14505_v18, 16  ;;  %v6533_v62 = vshll.u32 %v14520_v52, 16  ;;  %v6253_v29 = vld [vmem:[#allocation2 + $0x80] sm:$0x1]  ;;  %15767 = vst [vmem:[#allocation3_spill] sm:$0xff] %v14548_v36  ;;  %10071 = vmatpush3.bf16.msra.mxu0 %v11229_v47 }
 0x676   : > { %7972 = vmatmul.mubr.bf16.gmra.mrb[144].mxu1 %v14419_v54  ;;  %v14541_v9 = vcombine.low %v6512_v11, %v6522_v38  ;;  %v6028_v56 = vrot.slane %v6026_v3, 7  ;;  %v6526_v49 = vrot.slane %v6524_v1, 4  ;;  %v6537_v43 = vshrl.u32 %v14520_v52, 16  ;;  %v11231_v33 = vld [vmem:[%s15553_s2 + $0x138] sm:$0xff]   ;;  %10072 = vmatprep.subr.bf16.mxu0 %v11230_v31 }
 0x677   : > { %7979 = vmatprep.mubr.bf16.mxu1 %v14402_v17  ;;  %v14536_v50 = vpop.f32.mrb[124].mxu1  ;;  %v6023_v59 = vor.u32 %v6021_v51, %v6020_v7  ;;  %v6529_v4 = vrot.slane %v6527_v60, 5  ;;  %v6024_v27 = vrot.slane %v6020_v7, 4  ;;  %v6535_v51 = vrot.slane %v6533_v62, 5 }
 0x678   : > { %v10520_v41 = vpop.f32.mrb[125].mxu1  ;;  %7842 = vmatprep.mubr.bf16.mxu0 %v14541_v9  ;;  %v6031_v12 = vor.u32 %v6029_v8, %v6028_v56  ;;  %v6033_v11 = vrot.slane %v6028_v56, 4  ;;  %v6539_v38 = vrot.slane %v6537_v43, 4  ;;  %v6543_v47 = vshll.u32 %v14543_v61, 16 }
 0x679   : > { %v14551_v23 = vpop.f32.mrb[126].mxu1  ;;  %v6250_v1 = vsel %vm14143_vm1, %v6023_v59, %v6249_v2  ;;  %7843 = vmatmul.mubr.bf16.gmra.mrb[128].mxu0 %v14548_v36  ;;  %v6530_v57 = vor.u32 %v6529_v4, %v6526_v49  ;;  %v14563_v60 = vcombine.low %v14491_v22, %v14495_v37  ;;  %v6830_v7 = vrot.slane %v14394_v45, 5  ;;  %v14576_v45 = vld [vmem:[#allocation2 + $0x60] sm:$0xf] }
 0x67a   : > { %v10521_v3 = vpop.f32.mrb[127].mxu1  ;;  %6251 = vst [vmem:[#allocation2 + $0x78] sm:$0xf] %v6250_v1  ;;  %v6032_v8 = vsel %vm14148_vm2, %v6024_v27, %v6031_v12  ;;  %v6254_v31 = vsel %vm13961_vm6, %v6033_v11, %v6253_v29  ;;  %v6821_v2 = vsel %vm14013_vm11, %v9123_v58, %v6820_v15  ;;  %v6540_v49 = vor.u32 %v6539_v38, %v6535_v51  ;;  %v14587_v58 = vld [vmem:[#allocation2 + $0x64] sm:$0xf] }
 0x67b   : > { %6252 = vst [vmem:[#allocation2 + $0x7c] sm:$0xf] %v6032_v8  ;;  %6255 = vst [vmem:[#allocation2 + $0x80] sm:$0x1] %v6254_v31  ;;  %v6531_v56 = vrot.slane %v6530_v57, 4  ;;  %v9286_v22 = vpack.c.bf16 %v14468_v55, %v14468_v55  ;;  %10073 = vmatpush3.bf16.msra.mxu0 %v11231_v33  ;;  %v14579_v37 = vcombine.low %v6821_v2, %v14511_v28  ;;  %v9124_v62 = vrot.slane %v14357_v24, 9 }
 0x67c   : > { %v6831_v25 = vsel %vm14013_vm11, %v14515_v44, %v6830_v7  ;;  %v9287_v15 = vpack.c.bf16 %v14480_v19, %v14480_v19  ;;  %v6836_v55 = vrot.slane %v6834_v46, 4  ;;  %v6541_v41 = vrot.slane %v6540_v49, 4  ;;  %v11232_v24 = vld [vmem:[%s15553_s2 + $0x1c8] sm:$0xff]   ;;  %v6256_v12 = vld [vmem:[#allocation2 + $0x84] sm:$0xf] }
 0x67d   : > { %v6545_v59 = vrot.slane %v6543_v47, 5  ;;  %v6035_v28 = vshrl.u32 %v9286_v22, 16  ;;  %v11233_v19 = vld [vmem:[%s15553_s2 + $0x188] sm:$0xff]   ;;  %v6536_v44 = vsel %vm14066_vm14, %v6531_v56, %v6535_v51  ;;  %v6038_v29 = vshll.u32 %v9286_v22, 16  ;;  %10172 = vmatprep.subr.bf16.mxu1 %v11232_v24 }
 0x67e   : > { %7980 = vmatmul.mubr.bf16.gmra.mrb[148].mxu1 %v14563_v60  ;;  %v6043_v4 = vshrl.u32 %v9287_v15, 16  ;;  %v6548_v43 = vshrl.u32 %v14576_v45, 16  ;;  %v6046_v11 = vshll.u32 %v9287_v15, 16  ;;  %v6551_v3 = vshll.u32 %v14576_v45, 16  ;;  %v14607_v38 = vld [vmem:[#allocation2 + $0x68] sm:$0x1] }
 0x67f   : > { %7987 = vmatprep.mubr.bf16.mxu1 %v14447_v48  ;;  %v6546_v33 = vsel %vm14066_vm14, %v6541_v41, %v6545_v59  ;;  %v6037_v27 = vrot.slane %v6035_v28, 7  ;;  %v6557_v51 = vshll.u32 %v14587_v58, 16  ;;  %10173 = vmatpush3.bf16.msra.mxu1 %v11233_v19  ;;  %v6260_v8 = vld [vmem:[#allocation2 + $0x8c] sm:$0x1]  ;;  %v14612_v31 = vcombine.low %v14505_v18, %v14520_v52  ;;  %v5760_v48 = vld [vmem:[#allocation2 + $0xbc] sm:$0x1] }
 0x680   : > { %v14605_v1 = vcombine.low %v6536_v44, %v6546_v33  ;;  %v6045_v57 = vrot.slane %v6043_v4, 7  ;;  %v6550_v47 = vrot.slane %v6548_v43, 4  ;;  %v6553_v2 = vrot.slane %v6551_v3, 5 }
 0x681   : > { %v6040_v7 = vor.u32 %v6038_v29, %v6037_v27  ;;  %15768 = vst [vmem:[#allocation7_spill] sm:$0xff] %v14612_v31  ;;  %v6561_v56 = vshrl.u32 %v14587_v58, 16  ;;  %v6041_v49 = vrot.slane %v6037_v27, 4  ;;  %v6559_v41 = vrot.slane %v6557_v51, 5  ;;  %v14642_v51 = vld [vmem:[#allocation2 + $0x70] sm:$0xf] }
 0x682   : > { %7850 = vmatprep.mubr.bf16.mxu0 %v14605_v1  ;;  %v6048_v22 = vor.u32 %v6046_v11, %v6045_v57  ;;  %v6050_v15 = vrot.slane %v6045_v57, 4  ;;  %v6554_v28 = vor.u32 %v6553_v2, %v6550_v47  ;;  %v6567_v19 = vshll.u32 %v14607_v38, 16 }
 0x683   : > { %v6257_v59 = vsel %vm14143_vm1, %v6040_v7, %v6256_v12  ;;  %7851 = vmatmul.mubr.bf16.gmra.mrb[132].mxu0 %v14612_v31  ;;  %v6563_v24 = vrot.slane %v6561_v56, 4  ;;  %v6828_v44 = vsel %vm14013_vm11, %v9124_v62, %v6827_v40  ;;  %v6837_v43 = vrot.slane %v14449_v53, 5  ;;  %v14632_v12 = vld [vmem:[#allocation2 + $0x6c] sm:$0xf] }
 0x684   : > { %6258 = vst [vmem:[#allocation2 + $0x84] sm:$0xf] %v6257_v59  ;;  %v6049_v29 = vsel %vm14148_vm2, %v6041_v49, %v6048_v22  ;;  %v6261_v4 = vsel %vm13961_vm6, %v6050_v15, %v6260_v8  ;;  %v6555_v33 = vrot.slane %v6554_v28, 4  ;;  %v9288_v10 = vpack.c.bf16 %v14536_v50, %v14536_v50  ;;  %v14652_v15 = vld [vmem:[#allocation2 + $0x74] sm:$0x1] }
 0x685   : > { %6259 = vst [vmem:[#allocation2 + $0x88] sm:$0xf] %v6049_v29  ;;  %6262 = vst [vmem:[#allocation2 + $0x8c] sm:$0x1] %v6261_v4  ;;  %v6564_v27 = vor.u32 %v6563_v24, %v6559_v41  ;;  %v14635_v40 = vcombine.low %v6828_v44, %v6831_v25  ;;  %v9125_v62 = vrot.slane %v14423_v42, 9  ;;  %v9289_v11 = vpack.c.bf16 %v14551_v23, %v14551_v23 }
 0x686   : > { %7988 = vmatmul.mubr.bf16.gmra.mrb[152].mxu1 %v14579_v37  ;;  %v6838_v53 = vsel %vm14013_vm11, %v6836_v55, %v6837_v43  ;;  %v6569_v57 = vrot.slane %v6567_v19, 5  ;;  %v6052_v47 = vshrl.u32 %v9288_v10, 16  ;;  %v6560_v50 = vsel %vm14066_vm14, %v6555_v33, %v6559_v41  ;;  %v6263_v23 = vld [vmem:[#allocation2 + $0x90] sm:$0xf]  ;;  %v6267_v24 = vld [vmem:[#allocation2 + $0x98] sm:$0x1] }
 0x687   : > { %7995 = vmatprep.mubr.bf16.mxu1 %v14548_v36  ;;  %v6565_v3 = vrot.slane %v6564_v27, 4  ;;  %v6055_v7 = vshll.u32 %v9288_v10, 16  ;;  %v6060_v8 = vshrl.u32 %v9289_v11, 16  ;;  %v6572_v25 = vshrl.u32 %v14632_v12, 16  ;;  %v5710_v36 = vld [vmem:[#allocation2 + $0xb4] sm:$0x1] }
 0x688   : > { %v6054_v2 = vrot.slane %v6052_v47, 7  ;;  %v6063_v56 = vshll.u32 %v9289_v11, 16  ;;  %v6575_v55 = vshll.u32 %v14632_v12, 16  ;;  %v6581_v41 = vshll.u32 %v14642_v51, 16  ;;  %v14666_v47 = vld [vmem:[#allocation2 + $0x78] sm:$0xf] }
 0x689   : > { %v6570_v42 = vsel %vm14066_vm14, %v6565_v3, %v6569_v57  ;;  %v6062_v22 = vrot.slane %v6060_v8, 7  ;;  %v6574_v59 = vrot.slane %v6572_v25, 4  ;;  %v14657_v19 = vcombine.low %v14576_v45, %v14587_v58 }
 0x68a   : > { %v14650_v49 = vcombine.low %v6560_v50, %v6570_v42  ;;  %v6057_v28 = vor.u32 %v6055_v7, %v6054_v2  ;;  %v6577_v44 = vrot.slane %v6575_v55, 5  ;;  %v6585_v29 = vshrl.u32 %v14642_v51, 16  ;;  %v11234_v50 = vld [vmem:[%s15553_s2 + $0x1d0] sm:$0xff]  }
 0x68b   : > { %15769 = vst [vmem:[#allocation8_spill] sm:$0xff] %v14657_v19  ;;  %v6058_v4 = vrot.slane %v6054_v2, 4  ;;  %v6065_v43 = vor.u32 %v6063_v56, %v6062_v22  ;;  %v6067_v33 = vrot.slane %v6062_v22, 4  ;;  %v6583_v27 = vrot.slane %v6581_v41, 5  ;;  %v11235_v7 = vld [vmem:[%s15553_s2 + $0x190] sm:$0xff]   ;;  %10174 = vmatprep.subr.bf16.mxu1 %v11234_v50 }
 0x68c   : > { %7858 = vmatprep.mubr.bf16.mxu0 %v14650_v49  ;;  %v6264_v10 = vsel %vm14143_vm1, %v6057_v28, %v6263_v23  ;;  %v6578_v11 = vor.u32 %v6577_v44, %v6574_v59  ;;  %v6587_v3 = vrot.slane %v6585_v29, 4  ;;  %v6591_v57 = vshll.u32 %v14652_v15, 16  ;;  %v14680_v2 = vld [vmem:[#allocation2 + $0x7c] sm:$0xf]  ;;  %v14688_v22 = vld [vmem:[#allocation2 + $0x80] sm:$0x1]  ;;  %10175 = vmatpush3.bf16.msra.mxu1 %v11235_v7 }
 0x68d   : > { %7859 = vmatmul.mubr.bf16.gmra.mrb[136].mxu0 %v14657_v19  ;;  %v6841_v8 = vrot.slane %v14520_v52, 5  ;;  %6265 = vst [vmem:[#allocation2 + $0x90] sm:$0xf] %v6264_v10  ;;  %v6066_v25 = vsel %vm14148_vm2, %v6058_v4, %v6065_v43  ;;  %v6268_v42 = vsel %vm13961_vm6, %v6067_v33, %v6267_v24  ;;  %v6835_v23 = vsel %vm14013_vm11, %v9125_v62, %v6834_v46  ;;  %v14696_v4 = vld [vmem:[#allocation2 + $0x84] sm:$0xf] }
 0x68e   : > { %7996 = vmatmul.mubr.bf16.gmra.mrb[156].mxu1 %v14635_v40  ;;  %6266 = vst [vmem:[#allocation2 + $0x94] sm:$0xf] %v6066_v25  ;;  %6269 = vst [vmem:[#allocation2 + $0x98] sm:$0x1] %v6268_v42  ;;  %v6579_v56 = vrot.slane %v6578_v11, 4  ;;  %v6588_v55 = vor.u32 %v6587_v3, %v6583_v27  ;;  %v14686_v52 = vcombine.low %v6835_v23, %v6838_v53  ;;  %v6596_v59 = vshrl.u32 %v14666_v47, 16 }
 0x68f   : > { %8003 = vmatprep.mubr.bf16.mxu1 %v14612_v31  ;;  %v6599_v41 = vshll.u32 %v14666_v47, 16  ;;  %v6593_v24 = vrot.slane %v6591_v57, 5  ;;  %v6605_v34 = vshll.u32 %v14680_v2, 16  ;;  %v6609_v46 = vshrl.u32 %v14680_v2, 16  ;;  %v14701_v3 = vld [vmem:[#allocation2 + $0x88] sm:$0xf] }
 0x690   : > { %v6589_v28 = vrot.slane %v6588_v55, 4  ;;  %v6843_v62 = vrot.slane %v6841_v8, 4  ;;  %v6584_v44 = vsel %vm14066_vm14, %v6579_v56, %v6583_v27  ;;  %v6598_v29 = vrot.slane %v6596_v59, 4  ;;  %v5757_v31 = vld [vmem:[#allocation2 + $0xb0] sm:$0x1] }
 0x691   : > { %v6601_v53 = vrot.slane %v6599_v41, 5  ;;  %v6607_v33 = vrot.slane %v6605_v34, 5  ;;  %v6611_v10 = vrot.slane %v6609_v46, 4  ;;  %v6615_v11 = vshll.u32 %v14688_v22, 16 }
 0x692   : > { %v6594_v43 = vsel %vm14066_vm14, %v6589_v28, %v6593_v24  ;;  %v9126_v57 = vrot.slane %v14505_v18, 9  ;;  %v6844_v27 = vrot.slane %v14543_v61, 5  ;;  %v6848_v25 = vrot.slane %v14587_v58, 5  ;;  %v14715_v18 = vld [vmem:[#allocation2 + $0x8c] sm:$0x1] }
 0x693   : > { %v14704_v50 = vcombine.low %v6584_v44, %v6594_v43  ;;  %v6602_v7 = vor.u32 %v6601_v53, %v6598_v29  ;;  %v14711_v42 = vcombine.low %v14632_v12, %v14642_v51  ;;  %v6612_v23 = vor.u32 %v6611_v10, %v6607_v33 }
 0x694   : > { %v6620_v55 = vshrl.u32 %v14696_v4, 16  ;;  %v6623_v59 = vshll.u32 %v14696_v4, 16  ;;  %v6629_v61 = vshll.u32 %v14701_v3, 16  ;;  %v6845_v58 = vsel %vm14013_vm11, %v6843_v62, %v6844_v27 }
 0x695   : > { %15770 = vst [vmem:[#allocation49_spill] sm:$0xff] %v14711_v42  ;;  %7866 = vmatprep.mubr.bf16.mxu0 %v14704_v50  ;;  %v6603_v56 = vrot.slane %v6602_v7, 4  ;;  %v6613_v41 = vrot.slane %v6612_v23, 4  ;;  %v6617_v28 = vrot.slane %v6615_v11, 5  ;;  %v6633_v24 = vshrl.u32 %v14701_v3, 16 }
 0x696   : > { %8004 = vmatmul.mubr.bf16.gmra.mrb[160].mxu1 %v14686_v52  ;;  %7867 = vmatmul.mubr.bf16.gmra.mrb[140].mxu0 %v14711_v42  ;;  %v6842_v34 = vsel %vm14013_vm11, %v9126_v57, %v6841_v8  ;;  %v6622_v46 = vrot.slane %v6620_v55, 4  ;;  %v6625_v44 = vrot.slane %v6623_v59, 5  ;;  %v6631_v29 = vrot.slane %v6629_v61, 5  ;;  %v14731_v7 = vld [vmem:[#allocation2 + $0x90] sm:$0xf] }
 0x697   : > { %8011 = vmatprep.mubr.bf16.mxu1 %v14657_v19  ;;  %v6608_v53 = vsel %vm14066_vm14, %v6603_v56, %v6607_v33  ;;  %v6618_v43 = vsel %vm14066_vm14, %v6613_v41, %v6617_v28  ;;  %v6635_v10 = vrot.slane %v6633_v24, 4  ;;  %v6639_v62 = vshll.u32 %v14715_v18, 16  ;;  %v14737_v57 = vld [vmem:[#allocation2 + $0x94] sm:$0xf] }
 0x698   : > { %v14733_v11 = vcombine.low %v6842_v34, %v6845_v58  ;;  %v6850_v27 = vrot.slane %v6848_v25, 4  ;;  %v14735_v23 = vcombine.low %v6608_v53, %v6618_v43  ;;  %v6626_v8 = vor.u32 %v6625_v44, %v6622_v46  ;;  %v14749_v34 = vld [vmem:[#allocation2 + $0x98] sm:$0x1] }
 0x699   : > { %v9127_v55 = vrot.slane %v14576_v45, 9  ;;  %v6636_v59 = vor.u32 %v6635_v10, %v6631_v29  ;;  %v6851_v33 = vrot.slane %v14607_v38, 5  ;;  %v6644_v61 = vshrl.u32 %v14731_v7, 16 }
 0x69a   : > { %7874 = vmatprep.mubr.bf16.mxu0 %v14735_v23  ;;  %v6627_v56 = vrot.slane %v6626_v8, 4  ;;  %v6647_v41 = vshll.u32 %v14731_v7, 16  ;;  %v14747_v58 = vcombine.low %v14666_v47, %v14680_v2  ;;  %v6641_v24 = vrot.slane %v6639_v62, 5 }
 0x69b   : > { %v6637_v28 = vrot.slane %v6636_v59, 4  ;;  %v6653_v45 = vshll.u32 %v14737_v57, 16  ;;  %v6852_v38 = vsel %vm14013_vm11, %v6850_v27, %v6851_v33  ;;  %v6646_v46 = vrot.slane %v6644_v61, 4  ;;  %v5704_v59 = vld [vmem:[#allocation2 + $0x9c] sm:$0x1] }
 0x69c   : > { %v6649_v44 = vrot.slane %v6647_v41, 5  ;;  %v6657_v53 = vshrl.u32 %v14737_v57, 16  ;;  %v6855_v43 = vrot.slane %v14642_v51, 5  ;;  %v6632_v10 = vsel %vm14066_vm14, %v6627_v56, %v6631_v29  ;;  %v5754_v61 = vld [vmem:[#allocation2 + $0xa4] sm:$0x1] }
 0x69d   : > { %v6642_v62 = vsel %vm14066_vm14, %v6637_v28, %v6641_v24  ;;  %v6655_v8 = vrot.slane %v6653_v45, 5  ;;  %v6663_v33 = vshll.u32 %v14749_v34, 16  ;;  %v5707_v41 = vld [vmem:[#allocation2 + $0xa8] sm:$0x1]  ;;  %v6849_v51 = vsel %vm14013_vm11, %v9127_v55, %v6848_v25  ;;  %v5713_v45 = vld [vmem:[#allocation2 + $0xc0] sm:$0x1] }
 0x69e   : > { %8012 = vmatmul.mubr.bf16.gmra.mrb[164].mxu1 %v14733_v11  ;;  %7875 = vmatmul.mubr.bf16.gmra.mrb[144].mxu0 %v14747_v58  ;;  %v6650_v19 = vor.u32 %v6649_v44, %v6646_v46  ;;  %v6659_v27 = vrot.slane %v6657_v53, 4  ;;  %v14767_v29 = vcombine.low %v6849_v51, %v6852_v38  ;;  %v5705_v24 = vsel %vm13961_vm6, 0, %v5704_v59  ;;  %v5763_v46 = vld [vmem:[#allocation2 + $0xc8] sm:$0x1]  ;;  %v11237_v51 = vld [vmem:[%s15553_s2 + $0x198] sm:$0xff]  }
 0x69f   : > { %8019 = vmatprep.mubr.bf16.mxu1 %v14711_v42  ;;  %v14762_v42 = vcombine.low %v6632_v10, %v6642_v62  ;;  %v6857_v44 = vrot.slane %v6855_v43, 4  ;;  %v6858_v53 = vrot.slane %v14652_v15, 5  ;;  %5706 = vst [vmem:[#allocation2 + $0x9c] sm:$0x1] %v5705_v24  ;;  %v5755_v25 = vsel %vm13969_vm8, 0, %v5754_v61 }
 0x6a0   : > { %v6651_v56 = vrot.slane %v6650_v19, 4  ;;  %v6660_v28 = vor.u32 %v6659_v27, %v6655_v8  ;;  %v5708_v55 = vsel %vm13961_vm6, 0, %v5707_v41  ;;  %v6665_v10 = vrot.slane %v6663_v33, 5  ;;  %5756 = vst [vmem:[#allocation2 + $0xa4] sm:$0x1] %v5755_v25  ;;  %v11238_v25 = vld [vmem:[%s15553_s2 + $0x1e0] sm:$0xff]  }
 0x6a1   : > { %7882 = vmatprep.mubr.bf16.mxu0 %v14762_v42  ;;  %5709 = vst [vmem:[#allocation2 + $0xa8] sm:$0x1] %v5708_v55  ;;  %v5758_v19 = vsel %vm13969_vm8, 0, %v5757_v31  ;;  %v5711_v62 = vsel %vm13961_vm6, 0, %v5710_v36  ;;  %v14784_v15 = vcombine.low %v14696_v4, %v14701_v3  ;;  %v5761_v59 = vsel %vm13969_vm8, 0, %v5760_v48 }
 0x6a2   : > { %v6661_v38 = vrot.slane %v6660_v28, 4  ;;  %5759 = vst [vmem:[#allocation2 + $0xb0] sm:$0x1] %v5758_v19  ;;  %5712 = vst [vmem:[#allocation2 + $0xb4] sm:$0x1] %v5711_v62  ;;  %v5714_v27 = vsel %vm13961_vm6, 0, %v5713_v45  ;;  %v6656_v36 = vsel %vm14066_vm14, %v6651_v56, %v6655_v8  ;;  %v6859_v48 = vsel %vm14013_vm11, %v6857_v44, %v6858_v53 }
 0x6a3   : > { %v5764_v31 = vsel %vm13969_vm8, 0, %v5763_v46  ;;  %5762 = vst [vmem:[#allocation2 + $0xbc] sm:$0x1] %v5761_v59  ;;  %5715 = vst [vmem:[#allocation2 + $0xc0] sm:$0x1] %v5714_v27  ;;  %v9128_v61 = vrot.slane %v14632_v12, 9  ;;  %v14819_v24 = vcombine.low %v14731_v7, %v14737_v57 }
 0x6a4   : > { %v6666_v33 = vsel %vm14066_vm14, %v6661_v38, %v6665_v10  ;;  %5765 = vst [vmem:[#allocation2 + $0xc8] sm:$0x1] %v5764_v31  ;;  %v6862_v41 = vrot.slane %v14680_v2, 5  ;;  %v11236_v8 = vld [vmem:[%s15553_s2 + $0x1d8] sm:$0xff]   ;;  %v6865_v28 = vrot.slane %v14688_v22, 5  ;;  %v9129_v45 = vrot.slane %v14666_v47, 9 }
 0x6a5   : > { %v14802_v26 = vcombine.low %v6656_v36, %v6666_v33  ;;  %v6856_v12 = vsel %vm14013_vm11, %v9128_v61, %v6855_v43  ;;  %10176 = vmatprep.subr.bf16.mxu1 %v11236_v8  ;;  %15771 = vst [vmem:[#allocation5_spill] sm:$0xff] %v14819_v24  ;;  %v6869_v46 = vrot.slane %v14701_v3, 5  ;;  %v11239_v47 = vld [vmem:[%s15553_s2 + $0x1a0] sm:$0xff]   ;;  %v6872_v3 = vrot.slane %v14715_v18, 5  ;;  %v11240_v19 = vld [vmem:[%s15553_s2 + $0x1e8] sm:$0xff]   ;;  %v11244_v59 = vld [vmem:[%s15553_s2 + $0x1b0] sm:$0xff]  }
 0x6a6   : > { %8020 = vmatmul.mubr.bf16.gmra.mrb[168].mxu1 %v14767_v29  ;;  %7883 = vmatmul.mubr.bf16.gmra.mrb[148].mxu0 %v14784_v15  ;;  %v14813_v56 = vcombine.low %v6856_v12, %v6859_v48  ;;  %v6864_v2 = vrot.slane %v6862_v41, 4  ;;  %v6863_v44 = vsel %vm14013_vm11, %v9129_v45, %v6862_v41  ;;  %v9130_v55 = vrot.slane %v14696_v4, 9  ;;  %v11241_v18 = vld [vmem:[%s15553_s2 + $0x1a8] sm:$0xff]   ;;  %v11243_v4 = vld [vmem:[%s15553_s2 + $0x1f0] sm:$0xff]   ;;  %v11245_v61 = vld [vmem:[%s15553_s2 + $0x1f8] sm:$0xff]  }
 0x6a7   : > { %8027 = vmatprep.mubr.bf16.mxu1 %v14747_v58  ;;  %7890 = vmatprep.mubr.bf16.mxu0 %v14802_v26  ;;  %v6871_v22 = vrot.slane %v6869_v46, 4  ;;  %v14866_v48 = vld [vmem:[%s15553_s2 + $0x200] sm:$0xff]   ;;  %v11247_v12 = vld [vmem:[%s15553_s2 + $0x1b8] sm:$0xff]  }
 0x6a8   : > { %10177 = vmatpush3.bf16.msra.mxu1 %v11237_v51  ;;  %v6866_v43 = vsel %vm14013_vm11, %v6864_v2, %v6865_v28  ;;  %v6870_v10 = vsel %vm14013_vm11, %v9130_v55, %v6869_v46  ;;  %10546 = vmatprep.subr.bf16.mxu0 %v14866_v48 }
 0x6a9   : > { %v14829_v53 = vcombine.low %v6863_v44, %v6866_v43  ;;  %10178 = vmatprep.subr.bf16.mxu1 %v11238_v25  ;;  %v6873_v38 = vsel %vm14013_vm11, %v6871_v22, %v6872_v3  ;;  %v6270_v43 = vld [vmem:[#allocation2 + $0x9c] sm:$0xf]  ;;  %v6876_v25 = vrot.slane %v14737_v57, 5  ;;  %v6274_v3 = vld [vmem:[#allocation2 + $0xa4] sm:$0x1] }
 0x6aa   : > { %v14848_v62 = vcombine.low %v6870_v10, %v6873_v38 }
 0x6ac   : > { %10179 = vmatpush3.bf16.msra.mxu1 %v11239_v47 }
 0x6ad   : > { %10180 = vmatprep.subr.bf16.mxu1 %v11240_v19 }
 0x6ae   : > { %8028 = vmatmul.mubr.bf16.gmra.mrb[172].mxu1 %v14813_v56  ;;  %7891 = vmatmul.mubr.bf16.gmra.mrb[152].mxu0 %v14819_v24 }
 0x6af   : > { %8035 = vmatprep.mubr.bf16.mxu1 %v14784_v15 }
 0x6b0   : > { %10181 = vmatpush3.bf16.msra.mxu1 %v11241_v18 }
 0x6b1   : > { %10182 = vmatprep.subr.bf16.mxu1 %v11243_v4 }
 0x6b4   : > { %10183 = vmatpush3.bf16.msra.mxu1 %v11244_v59 }
 0x6b5   : > { %10184 = vmatprep.subr.bf16.mxu1 %v11245_v61 }
 0x6b6   : > { %8036 = vmatmul.mubr.bf16.gmra.mrb[176].mxu1 %v14829_v53 }
 0x6b7   : > { %8043 = vmatprep.mubr.bf16.mxu1 %v14819_v24 }
 0x6b8   : > { %10185 = vmatpush3.bf16.msra.mxu1 %v11247_v12  ;;  %v6277_v12 = vld [vmem:[#allocation2 + $0xa8] sm:$0xf] }
 0x6be   : > { %8044 = vmatmul.mubr.bf16.gmra.mrb[180].mxu1 %v14848_v62 }
 0x6c3   : > { %v5518_v27 = vpop.f32.mrb[96].mxu0 }
 0x6c4   : > { %v9290_v31 = vpack.c.bf16 %v5518_v27, %v5518_v27  ;;  %v10526_v36 = vpop.f32.mrb[97].mxu0 }
 0x6c5   : > { %v5521_v33 = vpop.f32.mrb[98].mxu0 }
 0x6c6   : > { %v6069_v41 = vshrl.u32 %v9290_v31, 16  ;;  %v9291_v8 = vpack.c.bf16 %v5521_v33, %v5521_v33  ;;  %v10527_v51 = vpop.f32.mrb[99].mxu0  ;;  %v6072_v28 = vshll.u32 %v9290_v31, 16  ;;  %v6878_v33 = vrot.slane %v6876_v25, 4 }
 0x6c7   : > { %v6879_v51 = vrot.slane %v14749_v34, 5 }
 0x6c8   : > { %v6071_v2 = vrot.slane %v6069_v41, 7  ;;  %v6077_v45 = vshrl.u32 %v9291_v8, 16  ;;  %v6080_v22 = vshll.u32 %v9291_v8, 16 }
 0x6ca   : > { %v6074_v46 = vor.u32 %v6072_v28, %v6071_v2  ;;  %v6079_v44 = vrot.slane %v6077_v45, 7  ;;  %v6075_v47 = vrot.slane %v6071_v2, 4  ;;  %v9131_v28 = vrot.slane %v14731_v7, 9 }
 0x6cb   : > { %v5562_v55 = vpop.f32.mrb[128].mxu1 }
 0x6cc   : > { %v6271_v38 = vsel %vm14143_vm1, %v6074_v46, %v6270_v43  ;;  %v6082_v10 = vor.u32 %v6080_v22, %v6079_v44  ;;  %v6084_v19 = vrot.slane %v6079_v44, 4  ;;  %v9292_v18 = vpack.c.bf16 %v5562_v55, %v5562_v55  ;;  %v10532_v4 = vpop.f32.mrb[129].mxu1 }
 0x6cd   : > { %6272 = vst [vmem:[#allocation2 + $0x9c] sm:$0xf] %v6271_v38  ;;  %v5565_v59 = vpop.f32.mrb[130].mxu1  ;;  %v6880_v43 = vsel %vm14013_vm11, %v6878_v33, %v6879_v51  ;;  %v6281_v38 = vld [vmem:[#allocation2 + $0xb0] sm:$0x1] }
 0x6ce   : > { %v6083_v27 = vsel %vm14148_vm2, %v6075_v47, %v6082_v10  ;;  %v6275_v31 = vsel %vm13961_vm6, %v6084_v19, %v6274_v3  ;;  %v6086_v36 = vshrl.u32 %v9292_v18, 16  ;;  %v10533_v57 = vpop.f32.mrb[131].mxu1  ;;  %v9293_v61 = vpack.c.bf16 %v5565_v59, %v5565_v59 }
 0x6cf   : > { %6273 = vst [vmem:[#allocation2 + $0xa0] sm:$0xf] %v6083_v27  ;;  %6276 = vst [vmem:[#allocation2 + $0xa4] sm:$0x1] %v6275_v31  ;;  %v6089_v8 = vshll.u32 %v9292_v18, 16  ;;  %v6877_v47 = vsel %vm14013_vm11, %v9131_v28, %v6876_v25 }
 0x6d0   : > { %v6088_v41 = vrot.slane %v6086_v36, 7  ;;  %v6094_v2 = vshrl.u32 %v9293_v61, 16  ;;  %v6097_v44 = vshll.u32 %v9293_v61, 16  ;;  %v14887_v31 = vcombine.low %v6877_v47, %v6880_v43 }
 0x6d2   : > { %v6091_v45 = vor.u32 %v6089_v8, %v6088_v41  ;;  %v6096_v46 = vrot.slane %v6094_v2, 7  ;;  %v6092_v3 = vrot.slane %v6088_v41, 4 }
 0x6d3   : > { %v5606_v22 = vpop.f32.mrb[100].mxu0 }
 0x6d4   : > { %v6278_v55 = vsel %vm14143_vm1, %v6091_v45, %v6277_v12  ;;  %v9294_v34 = vpack.c.bf16 %v5606_v22, %v5606_v22  ;;  %v10538_v10 = vpop.f32.mrb[101].mxu0  ;;  %v6337_v19 = vld [vmem:[#allocation2 + $0x9c] sm:$0xf]  ;;  %v6099_v7 = vor.u32 %v6097_v44, %v6096_v46  ;;  %v6101_v18 = vrot.slane %v6096_v46, 4  ;;  %v6284_v46 = vld [vmem:[#allocation2 + $0xb4] sm:$0xf] }
 0x6d5   : > { %6279 = vst [vmem:[#allocation2 + $0xa8] sm:$0xf] %v6278_v55  ;;  %v5609_v4 = vpop.f32.mrb[102].mxu0  ;;  %v6668_v59 = vshrl.u32 %v6337_v19, 16  ;;  %v6671_v27 = vshll.u32 %v6337_v19, 16  ;;  %v9132_v22 = vrot.slane %v6337_v19, 9 }
 0x6d6   : > { %v6103_v36 = vshrl.u32 %v9294_v34, 16  ;;  %v9295_v57 = vpack.c.bf16 %v5609_v4, %v5609_v4  ;;  %v10539_v33 = vpop.f32.mrb[103].mxu0  ;;  %v6338_v25 = vld [vmem:[#allocation2 + $0xa0] sm:$0xf]  ;;  %v6100_v61 = vsel %vm14148_vm2, %v6092_v3, %v6099_v7  ;;  %v6282_v41 = vsel %vm13961_vm6, %v6101_v18, %v6281_v38  ;;  %v6339_v43 = vld [vmem:[#allocation2 + $0xa4] sm:$0x1] }
 0x6d7   : > { %v6681_v8 = vshrl.u32 %v6338_v25, 16  ;;  %v6883_v51 = vrot.slane %v6338_v25, 5  ;;  %6280 = vst [vmem:[#allocation2 + $0xac] sm:$0xf] %v6100_v61  ;;  %6283 = vst [vmem:[#allocation2 + $0xb0] sm:$0x1] %v6282_v41  ;;  %v14893_v45 = vcombine.low %v6337_v19, %v6338_v25 }
 0x6d8   : > { %v6105_v12 = vrot.slane %v6103_v36, 7  ;;  %v6106_v2 = vshll.u32 %v9294_v34, 16  ;;  %v6111_v28 = vshrl.u32 %v9295_v57, 16  ;;  %v6114_v44 = vshll.u32 %v9295_v57, 16  ;;  %v6288_v4 = vld [vmem:[#allocation2 + $0xbc] sm:$0x1] }
 0x6d9   : > { %15772 = vst [vmem:[#allocation15_spill] sm:$0xff] %v14893_v45  ;;  %v6670_v47 = vrot.slane %v6668_v59, 4  ;;  %v6673_v55 = vrot.slane %v6671_v27, 5  ;;  %v6885_v7 = vrot.slane %v6883_v51, 4  ;;  %8051 = vmatprep.mubr.bf16.mxu1 %v14893_v45  ;;  %v6677_v38 = vshll.u32 %v6338_v25, 16 }
 0x6da   : > { %v6108_v10 = vor.u32 %v6106_v2, %v6105_v12  ;;  %v6113_v3 = vrot.slane %v6111_v28, 7  ;;  %v6109_v18 = vrot.slane %v6105_v12, 4  ;;  %8052 = vmatmul.mubr.bf16.gmra.mrb[184].mxu1 %v14887_v31  ;;  %v6683_v36 = vrot.slane %v6681_v8, 4 }
 0x6db   : > { %v6674_v34 = vor.u32 %v6673_v55, %v6670_v47  ;;  %v6687_v33 = vshll.u32 %v6339_v43, 16  ;;  %v6679_v27 = vrot.slane %v6677_v38, 5  ;;  %v6886_v24 = vrot.slane %v6339_v43, 5 }
 0x6dc   : > { %v6285_v61 = vsel %vm14143_vm1, %v6108_v10, %v6284_v46  ;;  %v6116_v57 = vor.u32 %v6114_v44, %v6113_v3  ;;  %v6118_v19 = vrot.slane %v6113_v3, 4  ;;  %v6340_v59 = vld [vmem:[#allocation2 + $0xa8] sm:$0xf]  ;;  %v6884_v46 = vsel %vm14013_vm11, %v9132_v22, %v6883_v51 }
 0x6dd   : > { %6286 = vst [vmem:[#allocation2 + $0xb4] sm:$0xf] %v6285_v61  ;;  %v6692_v41 = vshrl.u32 %v6340_v59, 16  ;;  %v6695_v2 = vshll.u32 %v6340_v59, 16  ;;  %v6675_v28 = vrot.slane %v6674_v34, 4  ;;  %v6684_v8 = vor.u32 %v6683_v36, %v6679_v27 }
 0x6de   : > { %v6117_v25 = vsel %vm14148_vm2, %v6109_v18, %v6116_v57  ;;  %v6289_v12 = vsel %vm13961_vm6, %v6118_v19, %v6288_v4  ;;  %v6689_v47 = vrot.slane %v6687_v33, 5  ;;  %v6341_v44 = vld [vmem:[#allocation2 + $0xac] sm:$0xf]  ;;  %v6887_v55 = vsel %vm14013_vm11, %v6885_v7, %v6886_v24  ;;  %v6342_v10 = vld [vmem:[#allocation2 + $0xb0] sm:$0x1] }
 0x6df   : > { %6287 = vst [vmem:[#allocation2 + $0xb8] sm:$0xf] %v6117_v25  ;;  %6290 = vst [vmem:[#allocation2 + $0xbc] sm:$0x1] %v6289_v12  ;;  %v6694_v3 = vrot.slane %v6692_v41, 4  ;;  %v6697_v43 = vrot.slane %v6695_v2, 5  ;;  %v14907_v18 = vcombine.low %v6340_v59, %v6341_v44  ;;  %v14909_v4 = vcombine.low %v6884_v46, %v6887_v55 }
 0x6e0   : > { %v6705_v38 = vshrl.u32 %v6341_v44, 16  ;;  %v6890_v34 = vrot.slane %v6341_v44, 5  ;;  %v6685_v61 = vrot.slane %v6684_v8, 4  ;;  %v6701_v33 = vshll.u32 %v6341_v44, 16 }
 0x6e1   : > { %v6698_v36 = vor.u32 %v6697_v43, %v6694_v3  ;;  %v6711_v57 = vshll.u32 %v6342_v10, 16  ;;  %8059 = vmatprep.mubr.bf16.mxu1 %v14907_v18  ;;  %v6680_v51 = vsel %vm14066_vm14, %v6675_v28, %v6679_v27  ;;  %v9133_v7 = vrot.slane %v6340_v59, 9 }
 0x6e2   : > { %v6892_v19 = vrot.slane %v6890_v34, 4  ;;  %v6690_v24 = vsel %vm14066_vm14, %v6685_v61, %v6689_v47  ;;  %v6707_v22 = vrot.slane %v6705_v38, 4  ;;  %8060 = vmatmul.mubr.bf16.gmra.mrb[188].mxu1 %v14909_v4  ;;  %v6703_v25 = vrot.slane %v6701_v33, 5 }
 0x6e3   : > { %v14916_v41 = vcombine.low %v6680_v51, %v6690_v24  ;;  %v6699_v2 = vrot.slane %v6698_v36, 4  ;;  %v6893_v8 = vrot.slane %v6342_v10, 5  ;;  %v6891_v46 = vsel %vm14013_vm11, %v9133_v7, %v6890_v34 }
 0x6e4   : > { %v6343_v12 = vld [vmem:[#allocation2 + $0xb4] sm:$0xf]  ;;  %v6713_v28 = vrot.slane %v6711_v57, 5  ;;  %v6708_v3 = vor.u32 %v6707_v22, %v6703_v25 }
 0x6e5   : > { %7898 = vmatprep.mubr.bf16.mxu0 %v14916_v41  ;;  %v6716_v44 = vshrl.u32 %v6343_v12, 16  ;;  %v6719_v27 = vshll.u32 %v6343_v12, 16  ;;  %v9134_v59 = vrot.slane %v6343_v12, 9  ;;  %v6704_v55 = vsel %vm14066_vm14, %v6699_v2, %v6703_v25 }
 0x6e6   : > { %7899 = vmatmul.mubr.bf16.gmra.mrb[156].mxu0 %v14893_v45  ;;  %v6344_v47 = vld [vmem:[#allocation2 + $0xb8] sm:$0xf]  ;;  %v6894_v43 = vsel %vm14013_vm11, %v6892_v19, %v6893_v8  ;;  %v6345_v10 = vld [vmem:[#allocation2 + $0xbc] sm:$0x1]  ;;  %v6709_v33 = vrot.slane %v6708_v3, 4 }
 0x6e7   : > { %v6729_v38 = vshrl.u32 %v6344_v47, 16  ;;  %v6897_v61 = vrot.slane %v6344_v47, 5  ;;  %v14927_v34 = vcombine.low %v6343_v12, %v6344_v47  ;;  %v14929_v36 = vcombine.low %v6891_v46, %v6894_v43 }
 0x6e8   : > { %v6718_v57 = vrot.slane %v6716_v44, 4  ;;  %v6721_v51 = vrot.slane %v6719_v27, 5  ;;  %v6725_v24 = vshll.u32 %v6344_v47, 16  ;;  %v6735_v2 = vshll.u32 %v6345_v10, 16 }
 0x6e9   : > { %v6898_v7 = vsel %vm14013_vm11, %v9134_v59, %v6897_v61  ;;  %v6899_v45 = vrot.slane %v6897_v61, 4  ;;  %8067 = vmatprep.mubr.bf16.mxu1 %v14927_v34  ;;  %v6731_v22 = vrot.slane %v6729_v38, 4  ;;  %v6714_v19 = vsel %vm14066_vm14, %v6709_v33, %v6713_v28 }
 0x6ea   : > { %v6722_v25 = vor.u32 %v6721_v51, %v6718_v57  ;;  %v6727_v12 = vrot.slane %v6725_v24, 5  ;;  %v6900_v8 = vrot.slane %v6345_v10, 5  ;;  %v14936_v46 = vcombine.low %v6704_v55, %v6714_v19  ;;  %8068 = vmatmul.mubr.bf16.gmra.mrb[192].mxu1 %v14929_v36  ;;  %v11248_v24 = vld [vmem:[%s15553_s2 + $0x208] sm:$0xff]  }
 0x6eb   : > { %v6737_v28 = vrot.slane %v6735_v2, 5  ;;  %v11254_v2 = vld [vmem:[%s15553_s2 + $0x238] sm:$0xff]  }
 0x6ec   : > { %v6723_v44 = vrot.slane %v6722_v25, 4  ;;  %v6732_v27 = vor.u32 %v6731_v22, %v6727_v12  ;;  %v6901_v47 = vsel %vm14013_vm11, %v6899_v45, %v6900_v8  ;;  %7906 = vmatprep.mubr.bf16.mxu0 %v14936_v46  ;;  %v11253_v22 = vld [vmem:[%s15553_s2 + $0x230] sm:$0xff]  }
 0x6ed   : > { %v14942_v59 = vcombine.low %v6898_v7, %v6901_v47  ;;  %v11249_v7 = vld [vmem:[%s15553_s2 + $0x210] sm:$0xff]  }
 0x6ee   : > { %7907 = vmatmul.mubr.bf16.gmra.mrb[160].mxu0 %v14907_v18  ;;  %v6733_v3 = vrot.slane %v6732_v27, 4  ;;  %v6728_v43 = vsel %vm14066_vm14, %v6723_v44, %v6727_v12 }
 0x6f0   : > { %v6738_v55 = vsel %vm14066_vm14, %v6733_v3, %v6737_v28 }
 0x6f1   : > { %v14949_v10 = vcombine.low %v6728_v43, %v6738_v55 }
 0x6f3   : > { %7914 = vmatprep.mubr.bf16.mxu0 %v14949_v10  ;;  %v9850_v38 = vpop.f32.mrb[104].mxu0 }
 0x6f4   : > { %v9851_v45 = vpop.f32.mrb[105].mxu0 }
 0x6f5   : > { %v14952_v61 = vadd.f32 %v9851_v45, %v9850_v38  ;;  %v9853_v33 = vpop.f32.mrb[106].mxu0 }
 0x6f6   : > { %7915 = vmatmul.mubr.bf16.gmra.mrb[164].mxu0 %v14927_v34  ;;  %v9854_v57 = vpop.f32.mrb[107].mxu0 }
 0x6f7   : > { %8116 = vmatprep.mubr.bf16.mxu0 %v14375_v21  ;;  %v14956_v51 = vadd.f32 %v9854_v57, %v9853_v33  ;;  %v11250_v21 = vld [vmem:[%s15553_s2 + $0x218] sm:$0xff]  }
 0x6fe   : > { %8117 = vmatmul.mubr.bf16.vlgmr.msra.gmra.mrb[168].mxu0 %v14191_v39  ;;  %v11251_v39 = vld [vmem:[%s15553_s2 + $0x220] sm:$0xff]  }
 0x6ff   : > { %8124 = vmatprep.mubr.bf16.mxu0 %v14419_v54  ;;  %10547 = vmatpush3.bf16.msra.mxu0 %v14866_v48  ;;  %v11252_v48 = vld [vmem:[%s15553_s2 + $0x228] sm:$0xff]  }
 0x700   : > { %10548 = vmatprep.subr.bf16.mxu0 %v11248_v24 }
 0x703   : > { %10549 = vmatpush3.bf16.msra.mxu0 %v11248_v24 }
 0x704   : > { %10550 = vmatprep.subr.bf16.mxu0 %v11249_v7 }
 0x706   : > { %8125 = vmatmul.mubr.bf16.gmra.mrb[172].mxu0 %v14269_v63 }
 0x707   : > { %8132 = vmatprep.mubr.bf16.mxu0 %v14563_v60  ;;  %10551 = vmatpush3.bf16.msra.mxu0 %v11249_v7  ;;  %v6291_v7 = vld [vmem:[#allocation2 + $0xc0] sm:$0xf] }
 0x708   : > { %10552 = vmatprep.subr.bf16.mxu0 %v11250_v21 }
 0x70b   : > { %10553 = vmatpush3.bf16.msra.mxu0 %v11250_v21 }
 0x70c   : > { %10554 = vmatprep.subr.bf16.mxu0 %v11251_v39 }
 0x70e   : > { %8133 = vmatmul.mubr.bf16.gmra.mrb[176].mxu0 %v14329_v6 }
 0x70f   : > { %8140 = vmatprep.mubr.bf16.mxu0 %v14579_v37  ;;  %10555 = vmatpush3.bf16.msra.mxu0 %v11251_v39 }
 0x710   : > { %10556 = vmatprep.subr.bf16.mxu0 %v11252_v48 }
 0x713   : > { %10557 = vmatpush3.bf16.msra.mxu0 %v11252_v48 }
 0x714   : > { %10558 = vmatprep.subr.bf16.mxu0 %v11253_v22 }
 0x716   : > { %8141 = vmatmul.mubr.bf16.gmra.mrb[180].mxu0 %v14397_v30  ;;  %v9856_v19 = vpop.f32.mrb[108].mxu0 }
 0x717   : > { %8148 = vmatprep.mubr.bf16.mxu0 %v14635_v40  ;;  %v9857_v25 = vpop.f32.mrb[109].mxu0  ;;  %10559 = vmatpush3.bf16.msra.mxu0 %v11253_v22  ;;  %v6295_v22 = vld [vmem:[#allocation2 + $0xc8] sm:$0x1] }
 0x718   : > { %v14988_v12 = vadd.f32 %v9857_v25, %v9856_v19  ;;  %v9859_v8 = vpop.f32.mrb[110].mxu0  ;;  %10560 = vmatprep.subr.bf16.mxu0 %v11254_v2 }
 0x719   : > { %v9860_v44 = vpop.f32.mrb[111].mxu0  ;;  %v5650_v27 = vpop.f32.mrb[132].mxu1 }
 0x71a   : > { %v14990_v47 = vadd.f32 %v9860_v44, %v9859_v8  ;;  %v9296_v3 = vpack.c.bf16 %v5650_v27, %v5650_v27  ;;  %v10544_v28 = vpop.f32.mrb[133].mxu1 }
 0x71b   : > { %v5653_v43 = vpop.f32.mrb[134].mxu1  ;;  %10561 = vmatpush3.bf16.msra.mxu0 %v11254_v2 }
 0x71c   : > { %v6120_v55 = vshrl.u32 %v9296_v3, 16  ;;  %v9297_v38 = vpack.c.bf16 %v5653_v43, %v5653_v43  ;;  %v10545_v45 = vpop.f32.mrb[135].mxu1  ;;  %v6123_v57 = vshll.u32 %v9296_v3, 16 }
 0x71e   : > { %v6122_v33 = vrot.slane %v6120_v55, 7  ;;  %v6128_v24 = vshrl.u32 %v9297_v38, 16  ;;  %8149 = vmatmul.mubr.bf16.gmra.mrb[184].mxu0 %v14463_v0  ;;  %v6131_v48 = vshll.u32 %v9297_v38, 16 }
 0x71f   : > { %8156 = vmatprep.mubr.bf16.mxu0 %v14686_v52 }
 0x720   : > { %v6125_v21 = vor.u32 %v6123_v57, %v6122_v33  ;;  %v6130_v39 = vrot.slane %v6128_v24, 7  ;;  %v6126_v19 = vrot.slane %v6122_v33, 4 }
 0x722   : > { %v6292_v25 = vsel %vm14143_vm1, %v6125_v21, %v6291_v7  ;;  %v6133_v2 = vor.u32 %v6131_v48, %v6130_v39  ;;  %v6135_v8 = vrot.slane %v6130_v39, 4 }
 0x723   : > { %6293 = vst [vmem:[#allocation2 + $0xc0] sm:$0xf] %v6292_v25 }
 0x724   : > { %v6134_v44 = vsel %vm14148_vm2, %v6126_v19, %v6133_v2  ;;  %v6296_v27 = vsel %vm13961_vm6, %v6135_v8, %v6295_v22  ;;  %v9862_v3 = vpop.f32.mrb[112].mxu0 }
 0x725   : > { %6294 = vst [vmem:[#allocation2 + $0xc4] sm:$0xf] %v6134_v44  ;;  %6297 = vst [vmem:[#allocation2 + $0xc8] sm:$0x1] %v6296_v27  ;;  %v9863_v28 = vpop.f32.mrb[113].mxu0 }
 0x726   : > { %8157 = vmatmul.mubr.bf16.gmra.mrb[188].mxu0 %v14541_v9  ;;  %v15002_v43 = vadd.f32 %v9863_v28, %v9862_v3  ;;  %v9865_v16 = vpop.f32.mrb[114].mxu0 }
 0x727   : > { %8164 = vmatprep.mubr.bf16.mxu0 %v14733_v11  ;;  %v9866_v55 = vpop.f32.mrb[115].mxu0 }
 0x728   : > { %v15004_v38 = vadd.f32 %v9866_v55, %v9865_v16 }
 0x72a   : > { %v15006_v45 = vld [vmem:[#allocation2 + $0xc0] sm:$0xf] }
 0x72c   : > { %v15008_v32 = vld [vmem:[#allocation2 + $0xc4] sm:$0xf] }
 0x72d   : > { %v15012_v13 = vcombine.low %v15006_v45, %v15008_v32 }
 0x72e   : > { %8165 = vmatmul.mubr.bf16.gmra.mrb[192].mxu0 %v14605_v1 }
 0x72f   : > { %8172 = vmatprep.mubr.bf16.mxu0 %v14767_v29  ;;  %8075 = vmatprep.mubr.bf16.mxu1 %v15012_v13  ;;  %v9868_v33 = vpop.f32.mrb[116].mxu0 }
 0x730   : > { %8076 = vmatmul.mubr.bf16.gmra.mrb[196].mxu1 %v14942_v59  ;;  %v9869_v57 = vpop.f32.mrb[117].mxu0 }
 0x731   : > { %8277 = vmatprep.mubr.bf16.mxu1 %v14269_v63  ;;  %v15019_v24 = vadd.f32 %v9869_v57, %v9868_v33  ;;  %v9871_v7 = vpop.f32.mrb[118].mxu0 }
 0x732   : > { %v9872_v21 = vpop.f32.mrb[119].mxu0 }
 0x733   : > { %v15021_v39 = vadd.f32 %v9872_v21, %v9871_v7 }
 0x736   : > { %8173 = vmatmul.mubr.bf16.gmra.mrb[196].mxu0 %v14650_v49 }
 0x737   : > { %8180 = vmatprep.mubr.bf16.mxu0 %v14813_v56 }
 0x738   : > { %8278 = vmatmul.mubr.bf16.vlgmr.msra.gmra.mrb[200].mxu1 %v14259_v20  ;;  %v9874_v19 = vpop.f32.mrb[120].mxu0 }
 0x739   : > { %8285 = vmatprep.mubr.bf16.mxu1 %v14329_v6  ;;  %v9962_v48 = vpop.f32.mrb[136].mxu1  ;;  %v9875_v2 = vpop.f32.mrb[121].mxu0 }
 0x73a   : > { %v9963_v22 = vpop.f32.mrb[137].mxu1  ;;  %v15027_v44 = vadd.f32 %v9875_v2, %v9874_v19  ;;  %v9877_v27 = vpop.f32.mrb[122].mxu0 }
 0x73b   : > { %v9964_v25 = vadd.f32 %v9963_v22, %v9962_v48  ;;  %v9965_v63 = vpop.f32.mrb[138].mxu1  ;;  %v9878_v16 = vpop.f32.mrb[123].mxu0 }
 0x73c   : > { %v9966_v8 = vpop.f32.mrb[139].mxu1  ;;  %v15033_v20 = vadd.f32 %v9878_v16, %v9877_v27 }
 0x73d   : > { %v15030_v3 = vadd.f32 %v9964_v25, %v14952_v61  ;;  %v9967_v28 = vadd.f32 %v9966_v8, %v9965_v63 }
 0x73e   : > { %8181 = vmatmul.mubr.bf16.gmra.mrb[200].mxu0 %v14704_v50 }
 0x73f   : > { %8188 = vmatprep.mubr.bf16.mxu0 %v14829_v53  ;;  %v15037_v6 = vadd.f32 %v9967_v28, %v14956_v51 }
 0x740   : > { %8286 = vmatmul.mubr.bf16.gmra.mrb[204].mxu1 %v14321_v5 }
 0x741   : > { %v9968_v55 = vpop.f32.mrb[140].mxu1  ;;  %8293 = vmatprep.mubr.bf16.mxu1 %v14397_v30 }
 0x742   : > { %v9969_v33 = vpop.f32.mrb[141].mxu1 }
 0x743   : > { %v9970_v57 = vadd.f32 %v9969_v33, %v9968_v55  ;;  %v9971_v61 = vpop.f32.mrb[142].mxu1  ;;  %v9880_v21 = vpop.f32.mrb[124].mxu0 }
 0x744   : > { %v9972_v7 = vpop.f32.mrb[143].mxu1  ;;  %v9881_v19 = vpop.f32.mrb[125].mxu0 }
 0x745   : > { %v15042_v48 = vadd.f32 %v9970_v57, %v14988_v12  ;;  %v9973_v22 = vadd.f32 %v9972_v7, %v9971_v61  ;;  %v15045_v25 = vadd.f32 %v9881_v19, %v9880_v21  ;;  %v9883_v51 = vpop.f32.mrb[126].mxu0  ;;  %v15774_v61 = vld [vmem:[#allocation14_spill] sm:$0xff] }
 0x746   : > { %8189 = vmatmul.mubr.bf16.gmra.mrb[204].mxu0 %v14735_v23  ;;  %v9884_v30 = vpop.f32.mrb[127].mxu0 }
 0x747   : > { %v15048_v5 = vadd.f32 %v9973_v22, %v14990_v47  ;;  %8196 = vmatprep.mubr.bf16.mxu0 %v14848_v62  ;;  %v15052_v63 = vadd.f32 %v9884_v30, %v9883_v51 }
 0x748   : > { %8294 = vmatmul.mubr.bf16.gmra.mrb[208].mxu1 %v14402_v17 }
 0x749   : > { %v9974_v2 = vpop.f32.mrb[144].mxu1  ;;  %8301 = vmatprep.mubr.bf16.mxu1 %v14463_v0 }
 0x74a   : > { %v9975_v12 = vpop.f32.mrb[145].mxu1 }
 0x74b   : > { %v9976_v8 = vadd.f32 %v9975_v12, %v9974_v2  ;;  %v9977_v27 = vpop.f32.mrb[146].mxu1 }
 0x74c   : > { %v9978_v28 = vpop.f32.mrb[147].mxu1  ;;  %v9886_v47 = vpop.f32.mrb[128].mxu0 }
 0x74d   : > { %v15056_v16 = vadd.f32 %v9976_v8, %v15002_v43  ;;  %v9979_v55 = vadd.f32 %v9978_v28, %v9977_v27  ;;  %v9887_v33 = vpop.f32.mrb[129].mxu0  ;;  %v15777_v27 = vld [vmem:[#allocation3_spill] sm:$0xff] }
 0x74e   : > { %8197 = vmatmul.mubr.bf16.gmra.mrb[208].mxu0 %v14762_v42  ;;  %v15063_v17 = vadd.f32 %v9887_v33, %v9886_v47  ;;  %v9889_v0 = vpop.f32.mrb[130].mxu0 }
 0x74f   : > { %v15060_v57 = vadd.f32 %v9979_v55, %v15004_v38  ;;  %8204 = vmatprep.mubr.bf16.mxu0 %v14887_v31  ;;  %v9890_v7 = vpop.f32.mrb[131].mxu0 }
 0x750   : > { %8302 = vmatmul.mubr.bf16.gmra.mrb[212].mxu1 %v15774_v61  ;;  %v15067_v43 = vadd.f32 %v9890_v7, %v9889_v0 }
 0x751   : > { %15773 = vst [vmem:[#allocation16_spill] sm:$0xff] %v15060_v57  ;;  %v9980_v21 = vpop.f32.mrb[148].mxu1  ;;  %8309 = vmatprep.mubr.bf16.mxu1 %v14541_v9 }
 0x752   : > { %v9981_v22 = vpop.f32.mrb[149].mxu1 }
 0x753   : > { %v9982_v19 = vadd.f32 %v9981_v22, %v9980_v21  ;;  %v9983_v51 = vpop.f32.mrb[150].mxu1 }
 0x754   : > { %v9984_v30 = vpop.f32.mrb[151].mxu1 }
 0x755   : > { %v15070_v38 = vadd.f32 %v9982_v19, %v15019_v24  ;;  %v9985_v2 = vadd.f32 %v9984_v30, %v9983_v51  ;;  %v6916_v51 = vshrl.u32 %v15008_v32, 16 }
 0x756   : > { %8205 = vmatmul.mubr.bf16.gmra.mrb[212].mxu0 %v14802_v26  ;;  %v9892_v8 = vpop.f32.mrb[132].mxu0 }
 0x757   : > { %15775 = vst [vmem:[#allocation17_spill] sm:$0xff] %v15070_v38  ;;  %v15074_v12 = vadd.f32 %v9985_v2, %v15021_v39  ;;  %8212 = vmatprep.mubr.bf16.mxu0 %v14909_v4  ;;  %v9893_v9 = vpop.f32.mrb[133].mxu0  ;;  %v6912_v2 = vshll.u32 %v15008_v32, 16 }
 0x758   : > { %8310 = vmatmul.mubr.bf16.gmra.mrb[216].mxu1 %v15777_v27  ;;  %v15079_v55 = vadd.f32 %v9893_v9, %v9892_v8  ;;  %v9895_v47 = vpop.f32.mrb[134].mxu0  ;;  %v6931_v27 = vrot.slane %v15008_v32, 5  ;;  %v6903_v9 = vshrl.u32 %v15006_v45, 16 }
 0x759   : > { %15776 = vst [vmem:[#allocation18_spill] sm:$0xff] %v15074_v12  ;;  %v9986_v28 = vpop.f32.mrb[152].mxu1  ;;  %8317 = vmatprep.mubr.bf16.mxu1 %v14605_v1  ;;  %v9896_v33 = vpop.f32.mrb[135].mxu0  ;;  %v15780_v1 = vld [vmem:[#allocation7_spill] sm:$0xff] }
 0x75a   : > { %v9987_v24 = vpop.f32.mrb[153].mxu1  ;;  %v15081_v7 = vadd.f32 %v9896_v33, %v9895_v47  ;;  %v6933_v12 = vrot.slane %v6931_v27, 4 }
 0x75b   : > { %v9988_v0 = vadd.f32 %v9987_v24, %v9986_v28  ;;  %v9989_v61 = vpop.f32.mrb[154].mxu1 }
 0x75c   : > { %v9990_v39 = vpop.f32.mrb[155].mxu1 }
 0x75d   : > { %v15084_v21 = vadd.f32 %v9988_v0, %v15027_v44  ;;  %v9991_v22 = vadd.f32 %v9990_v39, %v9989_v61 }
 0x75e   : > { %8213 = vmatmul.mubr.bf16.gmra.mrb[216].mxu0 %v14916_v41 }
 0x75f   : > { %15778 = vst [vmem:[#allocation19_spill] sm:$0xff] %v15084_v21  ;;  %v15088_v19 = vadd.f32 %v9991_v22, %v15033_v20  ;;  %8220 = vmatprep.mubr.bf16.mxu0 %v14929_v36  ;;  %v6906_v20 = vshll.u32 %v15006_v45, 16  ;;  %v6918_v21 = vrot.slane %v6916_v51, 4 }
 0x760   : > { %8318 = vmatmul.mubr.bf16.gmra.mrb[220].mxu1 %v15780_v1  ;;  %v9898_v8 = vpop.f32.mrb[136].mxu0  ;;  %v6348_v1 = vld [vmem:[#allocation2 + $0xc8] sm:$0x1] }
 0x761   : > { %15779 = vst [vmem:[#allocation22_spill] sm:$0xff] %v15088_v19  ;;  %v9992_v30 = vpop.f32.mrb[156].mxu1  ;;  %8325 = vmatprep.mubr.bf16.mxu1 %v14650_v49  ;;  %v9899_v28 = vpop.f32.mrb[137].mxu0  ;;  %v6914_v19 = vrot.slane %v6912_v2, 5 }
 0x762   : > { %v9993_v44 = vpop.f32.mrb[157].mxu1  ;;  %v15098_v33 = vadd.f32 %v9899_v28, %v9898_v8  ;;  %v9901_v0 = vpop.f32.mrb[138].mxu0  ;;  %v6905_v8 = vrot.slane %v6903_v9, 4  ;;  %v15783_v28 = vld [vmem:[#allocation8_spill] sm:$0xff] }
 0x763   : > { %v9994_v47 = vadd.f32 %v9993_v44, %v9992_v30  ;;  %v9995_v24 = vpop.f32.mrb[158].mxu1  ;;  %v9902_v39 = vpop.f32.mrb[139].mxu0  ;;  %v6908_v44 = vrot.slane %v6906_v20, 5  ;;  %v6919_v2 = vor.u32 %v6918_v21, %v6914_v19 }
 0x764   : > { %v9996_v61 = vpop.f32.mrb[159].mxu1  ;;  %v15103_v32 = vadd.f32 %v9902_v39, %v9901_v0 }
 0x765   : > { %v15101_v49 = vadd.f32 %v9994_v47, %v15045_v25  ;;  %v9997_v22 = vadd.f32 %v9996_v61, %v9995_v24  ;;  %v6934_v25 = vrot.slane %v6348_v1, 5  ;;  %v9135_v24 = vrot.slane %v15006_v45, 9 }
 0x766   : > { %8221 = vmatmul.mubr.bf16.gmra.mrb[220].mxu0 %v14936_v46  ;;  %v6909_v39 = vor.u32 %v6908_v44, %v6905_v8  ;;  %v6920_v45 = vrot.slane %v6919_v2, 4 }
 0x767   : > { %15781 = vst [vmem:[#allocation27_spill] sm:$0xff] %v15101_v49  ;;  %v15107_v30 = vadd.f32 %v9997_v22, %v15052_v63  ;;  %8228 = vmatprep.mubr.bf16.mxu0 %v14942_v59  ;;  %v6935_v0 = vsel %vm14013_vm11, %v6933_v12, %v6934_v25  ;;  %v6922_v22 = vshll.u32 %v6348_v1, 16  ;;  %v6932_v20 = vsel %vm14013_vm11, %v9135_v24, %v6931_v27  ;;  %v15784_v25 = vld [vmem:[#allocation49_spill] sm:$0xff] }
 0x768   : > { %8326 = vmatmul.mubr.bf16.gmra.mrb[224].mxu1 %v15783_v28  ;;  %v15120_v21 = vcombine.low %v6932_v20, %v6935_v0  ;;  %v6910_v8 = vrot.slane %v6909_v39, 4 }
 0x769   : > { %15782 = vst [vmem:[#allocation32_spill] sm:$0xff] %v15107_v30  ;;  %v9998_v47 = vpop.f32.mrb[160].mxu1  ;;  %8333 = vmatprep.mubr.bf16.mxu1 %v14704_v50  ;;  %v9904_v30 = vpop.f32.mrb[140].mxu0  ;;  %v6924_v27 = vrot.slane %v6922_v22, 5 }
 0x76a   : > { %v9999_v51 = vpop.f32.mrb[161].mxu1  ;;  %v9905_v28 = vpop.f32.mrb[141].mxu0 }
 0x76b   : > { %v10000_v61 = vadd.f32 %v9999_v51, %v9998_v47  ;;  %v10001_v63 = vpop.f32.mrb[162].mxu1  ;;  %v9906_v38 = vadd.f32 %v9905_v28, %v9904_v30  ;;  %v9907_v57 = vpop.f32.mrb[142].mxu0  ;;  %v6925_v30 = vsel %vm14066_vm14, %v6920_v45, %v6924_v27 }
 0x76c   : > { %v10002_v9 = vpop.f32.mrb[163].mxu1  ;;  %v9908_v12 = vpop.f32.mrb[143].mxu0 }
 0x76d   : > { %v15118_v49 = vadd.f32 %v10000_v61, %v15063_v17  ;;  %v10003_v50 = vadd.f32 %v10002_v9, %v10001_v63  ;;  %v9909_v44 = vadd.f32 %v9908_v12, %v9907_v57 }
 0x76e   : > { %8229 = vmatmul.mubr.bf16.gmra.mrb[224].mxu0 %v14949_v10 }
 0x76f   : > { %v15124_v1 = vadd.f32 %v10003_v50, %v15067_v43  ;;  %8236 = vmatprep.mubr.bf16.mxu0 %v15120_v21  ;;  %v6915_v43 = vsel %vm14066_vm14, %v6910_v8, %v6914_v19 }
 0x770   : > { %8334 = vmatmul.mubr.bf16.gmra.mrb[228].mxu1 %v15784_v25  ;;  %v15133_v61 = vcombine.low %v6915_v43, %v6925_v30 }
 0x771   : > { %v10004_v17 = vpop.f32.mrb[164].mxu1  ;;  %8341 = vmatprep.mubr.bf16.mxu1 %v14735_v23  ;;  %v9910_v24 = vpop.f32.mrb[144].mxu0 }
 0x772   : > { %v10005_v47 = vpop.f32.mrb[165].mxu1  ;;  %v9911_v63 = vpop.f32.mrb[145].mxu0 }
 0x773   : > { %v10006_v2 = vadd.f32 %v10005_v47, %v10004_v17  ;;  %v10007_v51 = vpop.f32.mrb[166].mxu1  ;;  %v9912_v22 = vadd.f32 %v9911_v63, %v9910_v24  ;;  %v9913_v23 = vpop.f32.mrb[146].mxu0 }
 0x774   : > { %v10008_v0 = vpop.f32.mrb[167].mxu1  ;;  %v9914_v9 = vpop.f32.mrb[147].mxu0 }
 0x775   : > { %v15136_v57 = vadd.f32 %v10006_v2, %v15079_v55  ;;  %v10009_v39 = vadd.f32 %v10008_v0, %v10007_v51  ;;  %v9915_v19 = vadd.f32 %v9914_v9, %v9913_v23 }
 0x776   : > { %8237 = vmatmul.mubr.bf16.gmra.mrb[228].mxu0 %v15133_v61 }
 0x777   : > { %v15140_v20 = vadd.f32 %v10009_v39, %v15081_v7  ;;  %10562 = vmatprep.mubr.bf16.mxu0 %v14419_v54 }
 0x778   : > { %8342 = vmatmul.mubr.bf16.gmra.mrb[232].mxu1 %v14747_v58 }
 0x779   : > { %v10010_v28 = vpop.f32.mrb[168].mxu1  ;;  %8349 = vmatprep.mubr.bf16.mxu1 %v14762_v42  ;;  %v9916_v12 = vpop.f32.mrb[148].mxu0 }
 0x77a   : > { %v10011_v50 = vpop.f32.mrb[169].mxu1  ;;  %v9917_v27 = vpop.f32.mrb[149].mxu0 }
 0x77b   : > { %v10012_v55 = vadd.f32 %v10011_v50, %v10010_v28  ;;  %v10013_v45 = vpop.f32.mrb[170].mxu1  ;;  %v9918_v7 = vadd.f32 %v9917_v27, %v9916_v12  ;;  %v9919_v30 = vpop.f32.mrb[150].mxu0 }
 0x77c   : > { %v10014_v8 = vpop.f32.mrb[171].mxu1  ;;  %v9920_v54 = vpop.f32.mrb[151].mxu0 }
 0x77d   : > { %v15146_v25 = vadd.f32 %v10012_v55, %v15098_v33  ;;  %v10015_v17 = vadd.f32 %v10014_v8, %v10013_v45  ;;  %v9921_v42 = vadd.f32 %v9920_v54, %v9919_v30  ;;  %v15786_v8 = vld [vmem:[#allocation15_spill] sm:$0xff] }
 0x77e   : > { %10563 = vmatmul.mubr.bf16.vlgmr.msra.gmra.mrb[232].mxu0 %v14563_v60 }
 0x77f   : > { %v15150_v58 = vadd.f32 %v10015_v17, %v15103_v32  ;;  %10566 = vmatprep.mubr.bf16.mxu0 %v14579_v37 }
 0x780   : > { %8350 = vmatmul.mubr.bf16.gmra.mrb[236].mxu1 %v14784_v15 }
 0x781   : > { %v10016_v47 = vpop.f32.mrb[172].mxu1  ;;  %8357 = vmatprep.mubr.bf16.mxu1 %v14802_v26  ;;  %v9922_v43 = vpop.f32.mrb[152].mxu0  ;;  %v15785_v26 = vld [vmem:[#allocation5_spill] sm:$0xff] }
 0x782   : > { %v10017_v2 = vpop.f32.mrb[173].mxu1  ;;  %v9923_v0 = vpop.f32.mrb[153].mxu0 }
 0x783   : > { %v10018_v33 = vadd.f32 %v10017_v2, %v10016_v47  ;;  %v10019_v51 = vpop.f32.mrb[174].mxu1  ;;  %v15157_v39 = vadd.f32 %v9923_v0, %v9922_v43  ;;  %v9925_v32 = vpop.f32.mrb[154].mxu0 }
 0x784   : > { %v10020_v24 = vpop.f32.mrb[175].mxu1  ;;  %v9926_v37 = vpop.f32.mrb[155].mxu0 }
 0x785   : > { %v15155_v63 = vadd.f32 %v10018_v33, %v9906_v38  ;;  %v10021_v60 = vadd.f32 %v10020_v24, %v10019_v51  ;;  %v15163_v15 = vadd.f32 %v9926_v37, %v9925_v32 }
 0x786   : > { %10567 = vmatmul.mubr.bf16.gmra.mrb[236].mxu0 %v14635_v40 }
 0x787   : > { %v15160_v23 = vadd.f32 %v10021_v60, %v9909_v44  ;;  %10570 = vmatprep.mubr.bf16.mxu0 %v14686_v52  ;;  %v6349_v52 = vld [vmem:[#allocation2 + $0xcc] sm:$0xf]  ;;  %v6350_v44 = vld [vmem:[#allocation2 + $0xd0] sm:$0xf] }
 0x788   : > { %8358 = vmatmul.mubr.bf16.gmra.mrb[240].mxu1 %v15785_v26  ;;  %v6937_v17 = vshrl.u32 %v6349_v52, 16  ;;  %v6940_v30 = vshll.u32 %v6349_v52, 16  ;;  %v6946_v54 = vshll.u32 %v6350_v44, 16 }
 0x789   : > { %v10022_v9 = vpop.f32.mrb[176].mxu1  ;;  %8365 = vmatprep.mubr.bf16.mxu1 %v14916_v41 }
 0x78a   : > { %v10023_v38 = vpop.f32.mrb[177].mxu1  ;;  %v6942_v51 = vrot.slane %v6940_v30, 5  ;;  %v6948_v43 = vrot.slane %v6946_v54, 5 }
 0x78b   : > { %v10024_v28 = vadd.f32 %v10023_v38, %v10022_v9  ;;  %v10025_v50 = vpop.f32.mrb[178].mxu1  ;;  %v9188_v9 = vcombine.low %v6349_v52, %v6350_v44 }
 0x78c   : > { %v10026_v55 = vpop.f32.mrb[179].mxu1 }
 0x78d   : > { %v15167_v45 = vadd.f32 %v10024_v28, %v9912_v22  ;;  %v10027_v12 = vadd.f32 %v10026_v55, %v10025_v50  ;;  %v6950_v22 = vshrl.u32 %v6350_v44, 16 }
 0x78e   : > { %10571 = vmatmul.mubr.bf16.gmra.mrb[240].mxu0 %v14733_v11 }
 0x78f   : > { %v15170_v40 = vadd.f32 %v10027_v12, %v9915_v19  ;;  %10574 = vmatprep.mubr.bf16.mxu0 %v14767_v29  ;;  %v6939_v29 = vrot.slane %v6937_v17, 4  ;;  %v6952_v24 = vrot.slane %v6950_v22, 4 }
 0x790   : > { %8366 = vmatmul.mubr.bf16.gmra.mrb[244].mxu1 %v15786_v8 }
 0x791   : > { %v10028_v27 = vpop.f32.mrb[180].mxu1  ;;  %8373 = vmatprep.mubr.bf16.mxu1 %v14936_v46  ;;  %v6351_v46 = vld [vmem:[#allocation2 + $0xd4] sm:$0x1]  ;;  %v6943_v60 = vor.u32 %v6942_v51, %v6939_v29  ;;  %v6953_v32 = vor.u32 %v6952_v24, %v6948_v43 }
 0x792   : > { %v10029_v41 = vpop.f32.mrb[181].mxu1 }
 0x793   : > { %v10030_v47 = vadd.f32 %v10029_v41, %v10028_v27  ;;  %v10031_v2 = vpop.f32.mrb[182].mxu1  ;;  %v6944_v37 = vrot.slane %v6943_v60, 4 }
 0x794   : > { %v10032_v33 = vpop.f32.mrb[183].mxu1 }
 0x795   : > { %v15175_v11 = vadd.f32 %v10030_v47, %v9918_v7  ;;  %v10033_v19 = vadd.f32 %v10032_v33, %v10031_v2  ;;  %v6956_v7 = vshll.u32 %v6351_v46, 16 }
 0x796   : > { %10575 = vmatmul.mubr.bf16.gmra.mrb[244].mxu0 %v14813_v56  ;;  %v6954_v56 = vrot.slane %v6953_v32, 4 }
 0x797   : > { %v15178_v0 = vadd.f32 %v10033_v19, %v9921_v42  ;;  %10578 = vmatprep.mubr.bf16.mxu0 %v14829_v53  ;;  %v6958_v26 = vrot.slane %v6956_v7, 5  ;;  %v6949_v53 = vsel %vm14066_vm14, %v6944_v37, %v6948_v43 }
 0x798   : > { %8374 = vmatmul.mubr.bf16.gmra.mrb[248].mxu1 %v14907_v18 }
 0x799   : > { %8381 = vmatprep.mubr.bf16.mxu1 %v14949_v10  ;;  %v6959_v18 = vsel %vm14066_vm14, %v6954_v56, %v6958_v26 }
 0x79a   : > { %v9189_v10 = vcombine.low %v6949_v53, %v6959_v18 }
 0x79e   : > { %10579 = vmatmul.mubr.bf16.gmra.mrb[248].mxu0 %v14848_v62  ;;  %v6965_v62 = vrot.slane %v6350_v44, 5 }
 0x79f   : > { %10582 = vmatprep.mubr.bf16.mxu0 %v14887_v31  ;;  %v9136_v31 = vrot.slane %v6349_v52, 9 }
 0x7a0   : > { %8382 = vmatmul.mubr.bf16.gmra.mrb[252].mxu1 %v14927_v34  ;;  %v6967_v42 = vrot.slane %v6965_v62, 4  ;;  %v6968_v34 = vrot.slane %v6351_v46, 5 }
 0x7a1   : > { %8389 = vmatprep.mubr.bf16.mxu1 %v15133_v61  ;;  %v6966_v38 = vsel %vm14013_vm11, %v9136_v31, %v6965_v62 }
 0x7a6   : > { %10583 = vmatmul.mubr.bf16.gmra.mrb[252].mxu0 %v14909_v4  ;;  %v6969_v4 = vsel %vm14013_vm11, %v6967_v42, %v6968_v34 }
 0x7a7   : > { %10586 = vmatprep.mubr.bf16.mxu0 %v14929_v36  ;;  %v9190_v55 = vcombine.low %v6966_v38, %v6969_v4 }
 0x7a8   : > { %8390 = vmatmul.mubr.bf16.gmra.mrb[0].mxu1 %v15012_v13 }
 0x7a9   : > { %8397 = vmatprep.mubr.bf16.mxu1 %v9189_v10 }
 0x7ad   : > { %v10034_v61 = vpop.f32.mrb[184].mxu1 }
 0x7ae   : > { %10587 = vmatmul.mubr.bf16.gmra.mrb[0].mxu0 %v14942_v59  ;;  %v10035_v35 = vpop.f32.mrb[185].mxu1 }
 0x7af   : > { %10590 = vmatprep.mubr.bf16.mxu0 %v15120_v21  ;;  %v10036_v36 = vadd.f32 %v10035_v35, %v10034_v61  ;;  %v10037_v28 = vpop.f32.mrb[186].mxu1 }
 0x7b0   : > { %8398 = vmatmul.mubr.bf16.gmra.mrb[4].mxu1 %v9188_v9  ;;  %v10038_v13 = vpop.f32.mrb[187].mxu1 }
 0x7b1   : > { %v15201_v50 = vadd.f32 %v10036_v36, %v15157_v39  ;;  %v10039_v12 = vadd.f32 %v10038_v13, %v10037_v28 }
 0x7b3   : > { %v15204_v59 = vadd.f32 %v10039_v12, %v15163_v15 }
 0x7b5   : > { %v10040_v21 = vpop.f32.mrb[188].mxu1 }
 0x7b6   : > { %10591 = vmatmul.mubr.bf16.gmra.mrb[4].mxu0 %v9190_v55  ;;  %v10041_v52 = vpop.f32.mrb[189].mxu1 }
 0x7b7   : > { %v10042_v44 = vadd.f32 %v10041_v52, %v10040_v21  ;;  %v10043_v8 = vpop.f32.mrb[190].mxu1 }
 0x7b8   : > { %v10044_v14 = vpop.f32.mrb[191].mxu1 }
 0x7b9   : > { %v9928_v27 = vpop.f32.mrb[156].mxu0  ;;  %v10045_v17 = vadd.f32 %v10044_v14, %v10043_v8 }
 0x7ba   : > { %v9929_v41 = vpop.f32.mrb[157].mxu0 }
 0x7bb   : > { %v9930_v30 = vadd.f32 %v9929_v41, %v9928_v27  ;;  %v9931_v54 = vpop.f32.mrb[158].mxu0 }
 0x7bc   : > { %v9932_v22 = vpop.f32.mrb[159].mxu0 }
 0x7bd   : > { %v15206_v47 = vadd.f32 %v10042_v44, %v9930_v30  ;;  %v9933_v39 = vadd.f32 %v9932_v22, %v9931_v54  ;;  %v10046_v2 = vpop.f32.mrb[192].mxu1  ;;  %v15787_v22 = vld [vmem:[#allocation16_spill] sm:$0xff] }
 0x7be   : > { %v10047_v15 = vpop.f32.mrb[193].mxu1 }
 0x7bf   : > { %v15208_v33 = vadd.f32 %v10045_v17, %v9933_v39  ;;  %v10048_v19 = vadd.f32 %v10047_v15, %v10046_v2  ;;  %v10049_v29 = vpop.f32.mrb[194].mxu1 }
 0x7c0   : > { %v10050_v43 = vpop.f32.mrb[195].mxu1 }
 0x7c1   : > { %v9934_v51 = vpop.f32.mrb[160].mxu0  ;;  %v10051_v46 = vadd.f32 %v10050_v43, %v10049_v29 }
 0x7c2   : > { %v9935_v24 = vpop.f32.mrb[161].mxu0 }
 0x7c3   : > { %v9936_v60 = vadd.f32 %v9935_v24, %v9934_v51  ;;  %v9937_v32 = vpop.f32.mrb[162].mxu0  ;;  %v15788_v51 = vld [vmem:[#allocation17_spill] sm:$0xff]  ;;  %v15789_v24 = vld [vmem:[#allocation18_spill] sm:$0xff] }
 0x7c4   : > { %v9938_v7 = vpop.f32.mrb[163].mxu0 }
 0x7c5   : > { %v15210_v37 = vadd.f32 %v10048_v19, %v9936_v60  ;;  %v9939_v56 = vadd.f32 %v9938_v7, %v9937_v32 }
 0x7c7   : > { %v15212_v26 = vadd.f32 %v10051_v46, %v9939_v56 }
 0x7c9   : > { %v9940_v53 = vpop.f32.mrb[164].mxu0 }
 0x7ca   : > { %v9941_v18 = vpop.f32.mrb[165].mxu0 }
 0x7cb   : > { %v15214_v10 = vadd.f32 %v9941_v18, %v9940_v53  ;;  %v9943_v62 = vpop.f32.mrb[166].mxu0  ;;  %v15790_v53 = vld [vmem:[#allocation19_spill] sm:$0xff] }
 0x7cc   : > { %v9944_v31 = vpop.f32.mrb[167].mxu0 }
 0x7cd   : > { %v15216_v42 = vadd.f32 %v9944_v31, %v9943_v62  ;;  %v15791_v31 = vld [vmem:[#allocation22_spill] sm:$0xff] }
 0x7d1   : > { %v10074_v34 = vpop.f32.mrb[168].mxu0 }
 0x7d2   : > { %v10075_v9 = vpop.f32.mrb[169].mxu0 }
 0x7d3   : > { %v10076_v61 = vadd.f32 %v10075_v9, %v10074_v34  ;;  %v10077_v35 = vpop.f32.mrb[170].mxu0 }
 0x7d4   : > { %v10078_v38 = vpop.f32.mrb[171].mxu0 }
 0x7d5   : > { %v15219_v4 = vadd.f32 %v10076_v61, %v15030_v3  ;;  %v10079_v36 = vadd.f32 %v10078_v38, %v10077_v35 }
 0x7d7   : > { %v15222_v28 = vadd.f32 %v10079_v36, %v15037_v6 }
 0x7d9   : > { %v10080_v13 = vpop.f32.mrb[172].mxu0 }
 0x7da   : > { %v10081_v55 = vpop.f32.mrb[173].mxu0 }
 0x7db   : > { %v10082_v12 = vadd.f32 %v10081_v55, %v10080_v13  ;;  %v10083_v21 = vpop.f32.mrb[174].mxu0  ;;  %v15792_v13 = vld [vmem:[#allocation27_spill] sm:$0xff] }
 0x7dc   : > { %v10084_v52 = vpop.f32.mrb[175].mxu0 }
 0x7dd   : > { %v15225_v44 = vadd.f32 %v10082_v12, %v15042_v48  ;;  %v10085_v8 = vadd.f32 %v10084_v52, %v10083_v21  ;;  %v15793_v21 = vld [vmem:[#allocation32_spill] sm:$0xff] }
 0x7df   : > { %v15228_v27 = vadd.f32 %v10085_v8, %v15048_v5 }
 0x7e1   : > { %v10086_v14 = vpop.f32.mrb[176].mxu0 }
 0x7e2   : > { %v10087_v41 = vpop.f32.mrb[177].mxu0 }
 0x7e3   : > { %v10088_v3 = vadd.f32 %v10087_v41, %v10086_v14  ;;  %v10089_v17 = vpop.f32.mrb[178].mxu0 }
 0x7e4   : > { %v10090_v30 = vpop.f32.mrb[179].mxu0 }
 0x7e5   : > { %v15231_v6 = vadd.f32 %v10088_v3, %v15056_v16  ;;  %v10091_v54 = vadd.f32 %v10090_v30, %v10089_v17 }
 0x7e7   : > { %v15234_v39 = vadd.f32 %v10091_v54, %v15787_v22 }
 0x7e9   : > { %v10092_v2 = vpop.f32.mrb[180].mxu0 }
 0x7ea   : > { %v10093_v15 = vpop.f32.mrb[181].mxu0 }
 0x7eb   : > { %v10094_v48 = vadd.f32 %v10093_v15, %v10092_v2  ;;  %v10095_v19 = vpop.f32.mrb[182].mxu0 }
 0x7ec   : > { %v10096_v29 = vpop.f32.mrb[183].mxu0 }
 0x7ed   : > { %v15237_v5 = vadd.f32 %v10094_v48, %v15788_v51  ;;  %v10097_v43 = vadd.f32 %v10096_v29, %v10095_v19 }
 0x7ef   : > { %v15240_v46 = vadd.f32 %v10097_v43, %v15789_v24 }
 0x7f1   : > { %v10098_v60 = vpop.f32.mrb[184].mxu0 }
 0x7f2   : > { %v10099_v32 = vpop.f32.mrb[185].mxu0 }
 0x7f3   : > { %v10100_v16 = vadd.f32 %v10099_v32, %v10098_v60  ;;  %v10101_v7 = vpop.f32.mrb[186].mxu0 }
 0x7f4   : > { %v10102_v56 = vpop.f32.mrb[187].mxu0 }
 0x7f5   : > { %v15243_v18 = vadd.f32 %v10100_v16, %v15790_v53  ;;  %v10103_v62 = vadd.f32 %v10102_v56, %v10101_v7 }
 0x7f7   : > { %v15246_v34 = vadd.f32 %v10103_v62, %v15791_v31 }
 0x7f9   : > { %v10104_v9 = vpop.f32.mrb[188].mxu0 }
 0x7fa   : > { %v10105_v61 = vpop.f32.mrb[189].mxu0 }
 0x7fb   : > { %v10106_v35 = vadd.f32 %v10105_v61, %v10104_v9  ;;  %v10107_v38 = vpop.f32.mrb[190].mxu0 }
 0x7fc   : > { %v10108_v36 = vpop.f32.mrb[191].mxu0 }
 0x7fd   : > { %v15249_v55 = vadd.f32 %v10106_v35, %v15792_v13  ;;  %v10109_v12 = vadd.f32 %v10108_v36, %v10107_v38 }
 0x7ff   : > { %v15252_v52 = vadd.f32 %v10109_v12, %v15793_v21 }
 0x801   : > { %v10110_v8 = vpop.f32.mrb[192].mxu0 }
 0x802   : > { %v10111_v14 = vpop.f32.mrb[193].mxu0 }
 0x803   : > { %v10112_v41 = vadd.f32 %v10111_v14, %v10110_v8  ;;  %v10113_v3 = vpop.f32.mrb[194].mxu0  ;;  %v10052_v17 = vpop.f32.mrb[196].mxu1 }
 0x804   : > { %v10114_v30 = vpop.f32.mrb[195].mxu0  ;;  %v10053_v54 = vpop.f32.mrb[197].mxu1 }
 0x805   : > { %v15255_v22 = vadd.f32 %v10112_v41, %v15118_v49  ;;  %v10115_v2 = vadd.f32 %v10114_v30, %v10113_v3  ;;  %v10054_v15 = vadd.f32 %v10053_v54, %v10052_v17  ;;  %v10055_v48 = vpop.f32.mrb[198].mxu1 }
 0x806   : > { %v10056_v19 = vpop.f32.mrb[199].mxu1 }
 0x807   : > { %v15258_v29 = vadd.f32 %v10115_v2, %v15124_v1  ;;  %v15261_v51 = vadd.f32 %v10054_v15, %v15214_v10  ;;  %v10057_v43 = vadd.f32 %v10056_v19, %v10055_v48 }
 0x809   : > { %v15264_v24 = vadd.f32 %v10057_v43, %v15216_v42  ;;  %v10116_v60 = vpop.f32.mrb[196].mxu0 }
 0x80a   : > { %v10117_v32 = vpop.f32.mrb[197].mxu0 }
 0x80b   : > { %v10118_v16 = vadd.f32 %v10117_v32, %v10116_v60  ;;  %v10119_v7 = vpop.f32.mrb[198].mxu0  ;;  %v10186_v49 = vpop.f32.mrb[200].mxu1 }
 0x80c   : > { %v10120_v56 = vpop.f32.mrb[199].mxu0  ;;  %v10187_v53 = vpop.f32.mrb[201].mxu1 }
 0x80d   : > { %v15267_v62 = vadd.f32 %v10118_v16, %v15136_v57  ;;  %v10121_v31 = vadd.f32 %v10120_v56, %v10119_v7  ;;  %v10188_v1 = vadd.f32 %v10187_v53, %v10186_v49  ;;  %v10189_v9 = vpop.f32.mrb[202].mxu1 }
 0x80e   : > { %v10190_v61 = vpop.f32.mrb[203].mxu1 }
 0x80f   : > { %v15270_v10 = vadd.f32 %v10121_v31, %v15140_v20  ;;  %v10191_v35 = vadd.f32 %v10190_v61, %v10189_v9  ;;  %v15273_v42 = vadd.f32 %v10188_v1, %v15219_v4 }
 0x811   : > { %v10122_v38 = vpop.f32.mrb[200].mxu0  ;;  %v15276_v36 = vadd.f32 %v10191_v35, %v15222_v28 }
 0x812   : > { %v10123_v13 = vpop.f32.mrb[201].mxu0 }
 0x813   : > { %v10124_v12 = vadd.f32 %v10123_v13, %v10122_v38  ;;  %v10125_v21 = vpop.f32.mrb[202].mxu0  ;;  %v10192_v57 = vpop.f32.mrb[204].mxu1 }
 0x814   : > { %v10126_v8 = vpop.f32.mrb[203].mxu0  ;;  %v10193_v14 = vpop.f32.mrb[205].mxu1 }
 0x815   : > { %v15279_v41 = vadd.f32 %v10124_v12, %v15146_v25  ;;  %v10127_v3 = vadd.f32 %v10126_v8, %v10125_v21  ;;  %v10194_v20 = vadd.f32 %v10193_v14, %v10192_v57  ;;  %v10195_v17 = vpop.f32.mrb[206].mxu1 }
 0x816   : > { %v10196_v30 = vpop.f32.mrb[207].mxu1 }
 0x817   : > { %v15282_v4 = vadd.f32 %v10127_v3, %v15150_v58  ;;  %v10197_v54 = vadd.f32 %v10196_v30, %v10195_v17  ;;  %v15285_v28 = vadd.f32 %v10194_v20, %v15225_v44 }
 0x819   : > { %v10128_v2 = vpop.f32.mrb[204].mxu0  ;;  %v15288_v15 = vadd.f32 %v10197_v54, %v15228_v27 }
 0x81a   : > { %v10129_v48 = vpop.f32.mrb[205].mxu0 }
 0x81b   : > { %v10130_v19 = vadd.f32 %v10129_v48, %v10128_v2  ;;  %v10131_v43 = vpop.f32.mrb[206].mxu0  ;;  %v10198_v25 = vpop.f32.mrb[208].mxu1 }
 0x81c   : > { %v10132_v60 = vpop.f32.mrb[207].mxu0  ;;  %v10199_v32 = vpop.f32.mrb[209].mxu1 }
 0x81d   : > { %v15291_v16 = vadd.f32 %v10130_v19, %v15155_v63  ;;  %v10133_v7 = vadd.f32 %v10132_v60, %v10131_v43  ;;  %v10200_v58 = vadd.f32 %v10199_v32, %v10198_v25  ;;  %v10201_v49 = vpop.f32.mrb[210].mxu1 }
 0x81e   : > { %v10202_v56 = vpop.f32.mrb[211].mxu1 }
 0x81f   : > { %v15294_v44 = vadd.f32 %v10133_v7, %v15160_v23  ;;  %v10203_v53 = vadd.f32 %v10202_v56, %v10201_v49  ;;  %v15297_v27 = vadd.f32 %v10200_v58, %v15231_v6 }
 0x821   : > { %v10134_v31 = vpop.f32.mrb[208].mxu0  ;;  %v15300_v1 = vadd.f32 %v10203_v53, %v15234_v39 }
 0x822   : > { %v10135_v9 = vpop.f32.mrb[209].mxu0 }
 0x823   : > { %v10136_v61 = vadd.f32 %v10135_v9, %v10134_v31  ;;  %v10137_v35 = vpop.f32.mrb[210].mxu0  ;;  %v10204_v63 = vpop.f32.mrb[212].mxu1 }
 0x824   : > { %v10138_v38 = vpop.f32.mrb[211].mxu0  ;;  %v10205_v13 = vpop.f32.mrb[213].mxu1 }
 0x825   : > { %v15303_v12 = vadd.f32 %v10136_v61, %v15167_v45  ;;  %v10139_v21 = vadd.f32 %v10138_v38, %v10137_v35  ;;  %v10206_v23 = vadd.f32 %v10205_v13, %v10204_v63  ;;  %v10207_v57 = vpop.f32.mrb[214].mxu1 }
 0x826   : > { %v10208_v8 = vpop.f32.mrb[215].mxu1 }
 0x827   : > { %v15306_v6 = vadd.f32 %v10139_v21, %v15170_v40  ;;  %v10209_v14 = vadd.f32 %v10208_v8, %v10207_v57  ;;  %v15309_v39 = vadd.f32 %v10206_v23, %v15237_v5 }
 0x829   : > { %v10140_v3 = vpop.f32.mrb[212].mxu0  ;;  %v15312_v20 = vadd.f32 %v10209_v14, %v15240_v46 }
 0x82a   : > { %v10141_v17 = vpop.f32.mrb[213].mxu0 }
 0x82b   : > { %v10142_v30 = vadd.f32 %v10141_v17, %v10140_v3  ;;  %v10143_v54 = vpop.f32.mrb[214].mxu0  ;;  %v10210_v45 = vpop.f32.mrb[216].mxu1 }
 0x82c   : > { %v10144_v2 = vpop.f32.mrb[215].mxu0  ;;  %v10211_v48 = vpop.f32.mrb[217].mxu1 }
 0x82d   : > { %v15315_v19 = vadd.f32 %v10142_v30, %v15175_v11  ;;  %v10145_v43 = vadd.f32 %v10144_v2, %v10143_v54  ;;  %v10212_v40 = vadd.f32 %v10211_v48, %v10210_v45  ;;  %v10213_v25 = vpop.f32.mrb[218].mxu1 }
 0x82e   : > { %v10214_v60 = vpop.f32.mrb[219].mxu1 }
 0x82f   : > { %v15318_v5 = vadd.f32 %v10145_v43, %v15178_v0  ;;  %v10215_v32 = vadd.f32 %v10214_v60, %v10213_v25  ;;  %v15321_v46 = vadd.f32 %v10212_v40, %v15243_v18 }
 0x831   : > { %v10146_v7 = vpop.f32.mrb[216].mxu0  ;;  %v15324_v58 = vadd.f32 %v10215_v32, %v15246_v34 }
 0x832   : > { %v10147_v49 = vpop.f32.mrb[217].mxu0 }
 0x833   : > { %v10148_v56 = vadd.f32 %v10147_v49, %v10146_v7  ;;  %v10149_v53 = vpop.f32.mrb[218].mxu0  ;;  %v10216_v11 = vpop.f32.mrb[220].mxu1 }
 0x834   : > { %v10150_v31 = vpop.f32.mrb[219].mxu0  ;;  %v10217_v9 = vpop.f32.mrb[221].mxu1 }
 0x835   : > { %v15327_v61 = vadd.f32 %v10148_v56, %v15201_v50  ;;  %v10151_v35 = vadd.f32 %v10150_v31, %v10149_v53  ;;  %v10218_v0 = vadd.f32 %v10217_v9, %v10216_v11  ;;  %v10219_v63 = vpop.f32.mrb[222].mxu1 }
 0x836   : > { %v10220_v38 = vpop.f32.mrb[223].mxu1 }
 0x837   : > { %v15330_v18 = vadd.f32 %v10151_v35, %v15204_v59  ;;  %v10221_v13 = vadd.f32 %v10220_v38, %v10219_v63  ;;  %v15333_v34 = vadd.f32 %v10218_v0, %v15249_v55 }
 0x839   : > { %v10152_v21 = vpop.f32.mrb[220].mxu0  ;;  %v15336_v23 = vadd.f32 %v10221_v13, %v15252_v52 }
 0x83a   : > { %v10153_v57 = vpop.f32.mrb[221].mxu0 }
 0x83b   : > { %v10154_v8 = vadd.f32 %v10153_v57, %v10152_v21  ;;  %v10155_v14 = vpop.f32.mrb[222].mxu0  ;;  %v10222_v50 = vpop.f32.mrb[224].mxu1 }
 0x83c   : > { %v10156_v3 = vpop.f32.mrb[223].mxu0  ;;  %v10223_v17 = vpop.f32.mrb[225].mxu1 }
 0x83d   : > { %v15339_v30 = vadd.f32 %v10154_v8, %v15206_v47  ;;  %v10157_v54 = vadd.f32 %v10156_v3, %v10155_v14  ;;  %v10224_v59 = vadd.f32 %v10223_v17, %v10222_v50  ;;  %v10225_v45 = vpop.f32.mrb[226].mxu1 }
 0x83e   : > { %v10226_v2 = vpop.f32.mrb[227].mxu1 }
 0x83f   : > { %v15342_v55 = vadd.f32 %v10157_v54, %v15208_v33  ;;  %v10227_v48 = vadd.f32 %v10226_v2, %v10225_v45  ;;  %v15345_v52 = vadd.f32 %v10224_v59, %v15255_v22 }
 0x841   : > { %v10158_v43 = vpop.f32.mrb[224].mxu0  ;;  %v15348_v40 = vadd.f32 %v10227_v48, %v15258_v29 }
 0x842   : > { %v10159_v25 = vpop.f32.mrb[225].mxu0 }
 0x843   : > { %v10160_v60 = vadd.f32 %v10159_v25, %v10158_v43  ;;  %v10161_v32 = vpop.f32.mrb[226].mxu0  ;;  %v10228_v47 = vpop.f32.mrb[228].mxu1 }
 0x844   : > { %v10162_v7 = vpop.f32.mrb[227].mxu0  ;;  %v10229_v49 = vpop.f32.mrb[229].mxu1 }
 0x845   : > { %v15351_v56 = vadd.f32 %v10160_v60, %v15210_v37  ;;  %v10163_v53 = vadd.f32 %v10162_v7, %v10161_v32  ;;  %v10230_v33 = vadd.f32 %v10229_v49, %v10228_v47  ;;  %v10231_v11 = vpop.f32.mrb[230].mxu1  ;;  %v11528_v47 = vld [vmem:[%s11701_s11 + $0x30] sm:$0xff] }
 0x846   : > { %v10232_v31 = vpop.f32.mrb[231].mxu1 }
 0x847   : > { %v15354_v22 = vadd.f32 %v10163_v53, %v15212_v26  ;;  %v10233_v9 = vadd.f32 %v10232_v31, %v10231_v11  ;;  %v15357_v29 = vadd.f32 %v10230_v33, %v15267_v62  ;;  %v11529_v53 = vld [vmem:[%s11701_s11 + $0x18] sm:$0xff] }
 0x849   : > { %v10164_v35 = vpop.f32.mrb[228].mxu0  ;;  %v15360_v0 = vadd.f32 %v10233_v9, %v15270_v10 }
 0x84a   : > { %v10165_v63 = vpop.f32.mrb[229].mxu0 }
 0x84b   : > { %v10166_v38 = vadd.f32 %v10165_v63, %v10164_v35  ;;  %v10167_v37 = vpop.f32.mrb[230].mxu0  ;;  %v10234_v13 = vpop.f32.mrb[232].mxu1  ;;  %v11530_v35 = vld [vmem:[%s11701_s11 + $0x40] sm:$0x3] }
 0x84c   : > { %v10168_v21 = vpop.f32.mrb[231].mxu0  ;;  %v10235_v57 = vpop.f32.mrb[233].mxu1 }
 0x84d   : > { %v15363_v8 = vadd.f32 %v10166_v38, %v15261_v51  ;;  %v10169_v26 = vadd.f32 %v10168_v21, %v10167_v37  ;;  %v10236_v14 = vadd.f32 %v10235_v57, %v10234_v13  ;;  %v10237_v50 = vpop.f32.mrb[234].mxu1  ;;  %v11531_v38 = vld [vmem:[%s11701_s11 + $0x38] sm:$0xff]  ;;  %v11532_v21 = vld [vmem:[%s11701_s11 + $0x28] sm:$0x3] }
 0x84e   : > { %v10238_v3 = vpop.f32.mrb[235].mxu1 }
 0x84f   : > { %v15366_v62 = vadd.f32 %v10169_v26, %v15264_v24  ;;  %v10239_v17 = vadd.f32 %v10238_v3, %v10237_v50  ;;  %v15369_v10 = vadd.f32 %v10236_v14, %v15279_v41 }
 0x851   : > { %v10564_v54 = vpop.f32.mrb[232].mxu0  ;;  %v15372_v59 = vadd.f32 %v10239_v17, %v15282_v4 }
 0x852   : > { %v8449_v51 = vadd.f32 %v10564_v54, %v15285_v28  ;;  %v8440_v45 = vpop.f32.mrb[233].mxu0 }
 0x853   : > { %v8441_v2 = vadd.f32 %v8440_v45, %v15273_v42  ;;  %v10565_v48 = vpop.f32.mrb[234].mxu0  ;;  %v10240_v43 = vpop.f32.mrb[236].mxu1 }
 0x854   : > { %v8603_v24 = vrot.slane %v8449_v51, 7  ;;  %v8452_v25 = vadd.f32 %v10565_v48, %v15288_v15  ;;  %v8443_v60 = vpop.f32.mrb[235].mxu0  ;;  %v10241_v41 = vpop.f32.mrb[237].mxu1 }
 0x855   : > { %v8600_v4 = vrot.slane %v8441_v2, 7  ;;  %v8444_v28 = vadd.f32 %v8443_v60, %v15276_v36  ;;  %v10242_v42 = vadd.f32 %v10241_v41, %v10240_v43  ;;  %v10243_v32 = vpop.f32.mrb[238].mxu1  ;;  %v11534_v41 = vld [vmem:[%s11701_s11 + $0x60] sm:$0xff] }
 0x856   : > { %v8699_v7 = vadd.f32 %v11528_v47, %v8603_v24  ;;  %v8604_v15 = vrot.slane %v8452_v25, 7  ;;  %v10244_v49 = vpop.f32.mrb[239].mxu1 }
 0x857   : > { %v8696_v33 = vadd.f32 %v11529_v53, %v8600_v4  ;;  %v8601_v11 = vrot.slane %v8444_v28, 7  ;;  %v10245_v31 = vadd.f32 %v10244_v49, %v10243_v32  ;;  %v15387_v9 = vadd.f32 %v10242_v42, %v15291_v16  ;;  %v11533_v16 = vld [vmem:[%s11701_s11 + $0x20] sm:$0xff]  ;;  %v11535_v42 = vld [vmem:[%s11701_s11 + $0x48] sm:$0xff] }
 0x858   : > { %8747 = vst [vmem:[%s15381_s27 + $0xf] sm:$0xfe] %v8699_v7  ;;  %v8605_v36 = vsel %vm5665_vm4, %v8603_v24, %v8604_v15  ;;  %v8701_v63 = vadd.f32 %v11530_v35, %v8604_v15  ;;  %v11536_v15 = vld [vmem:[%s11701_s11 + $0x70] sm:$0x3]  ;;  %v11537_v53 = vld [vmem:[%s11701_s11 + $0x68] sm:$0xff] }
 0x859   : > { %8744 = vst [vmem:[%s15381_s27 - $0x1] sm:$0xfe] %v8696_v33  ;;  %v8700_v37 = vadd.f32 %v11531_v38, %v8605_v36  ;;  %v8602_v13 = vsel %vm5665_vm4, %v8600_v4, %v8601_v11  ;;  %v8698_v57 = vadd.f32 %v11532_v21, %v8601_v11  ;;  %v10568_v26 = vpop.f32.mrb[236].mxu0  ;;  %v15397_v14 = vadd.f32 %v10245_v31, %v15294_v44  ;;  %v11538_v31 = vld [vmem:[%s11701_s11 + $0x58] sm:$0x3] }
 0x85a   : > { %8749 = vst [vmem:[%s15381_s27 + $0x1f] sm:$0x1] %v8701_v63  ;;  %v8697_v50 = vadd.f32 %v11533_v16, %v8602_v13  ;;  %v8465_v3 = vadd.f32 %v10568_v26, %v15309_v39  ;;  %v8456_v17 = vpop.f32.mrb[237].mxu0 }
 0x85b   : > { %8748 = vst [vmem:[%s15381_s27 + $0x17] sm:$0xff] %v8700_v37  ;;  %8746 = vst [vmem:[%s15381_s27 + $0xf] sm:$0x1] %v8698_v57  ;;  %v8457_v54 = vadd.f32 %v8456_v17, %v15297_v27  ;;  %v10569_v51 = vpop.f32.mrb[238].mxu0  ;;  %v10246_v45 = vpop.f32.mrb[240].mxu1 }
 0x85c   : > { %8745 = vst [vmem:[%s15381_s27 + $0x7] sm:$0xff] %v8697_v50  ;;  %v8609_v2 = vrot.slane %v8465_v3, 7  ;;  %v8468_v48 = vadd.f32 %v10569_v51, %v15312_v20  ;;  %v8459_v44 = vpop.f32.mrb[239].mxu0  ;;  %v10247_v43 = vpop.f32.mrb[241].mxu1 }
 0x85d   : > { %v8606_v24 = vrot.slane %v8457_v54, 7  ;;  %v8460_v39 = vadd.f32 %v8459_v44, %v15300_v1  ;;  %v10248_v25 = vadd.f32 %v10247_v43, %v10246_v45  ;;  %v10249_v60 = vpop.f32.mrb[242].mxu1  ;;  %v11540_v45 = vld [vmem:[%s11701_s11 + $0x90] sm:$0xff]  ;;  %v11541_v44 = vld [vmem:[%s11701_s11 + $0x78] sm:$0xff] }
 0x85e   : > { %v8705_v27 = vadd.f32 %v11534_v41, %v8609_v2  ;;  %v8610_v4 = vrot.slane %v8468_v48, 7  ;;  %v10250_v28 = vpop.f32.mrb[243].mxu1  ;;  %v11543_v41 = vld [vmem:[%s11701_s11 + $0x98] sm:$0xff] }
 0x85f   : > { %v8702_v32 = vadd.f32 %v11535_v42, %v8606_v24  ;;  %v8607_v20 = vrot.slane %v8460_v39, 7  ;;  %v10251_v47 = vadd.f32 %v10250_v28, %v10249_v60  ;;  %v15411_v7 = vadd.f32 %v10248_v25, %v15303_v12  ;;  %v11539_v12 = vld [vmem:[%s11701_s11 + $0x50] sm:$0xff]  ;;  %v11542_v25 = vld [vmem:[%s11701_s11 + $0xa0] sm:$0x3]  ;;  %v11544_v28 = vld [vmem:[%s11701_s11 + $0x88] sm:$0x3] }
 0x860   : > { %8753 = vst [vmem:[%s15381_s27 + $0x2f] sm:$0xfe] %v8705_v27  ;;  %v8611_v1 = vsel %vm5665_vm4, %v8609_v2, %v8610_v4  ;;  %v8707_v49 = vadd.f32 %v11536_v15, %v8610_v4 }
 0x861   : > { %8750 = vst [vmem:[%s15381_s27 + $0x1f] sm:$0xfe] %v8702_v32  ;;  %v8706_v33 = vadd.f32 %v11537_v53, %v8611_v1  ;;  %v8608_v11 = vsel %vm5665_vm4, %v8606_v24, %v8607_v20  ;;  %v8704_v36 = vadd.f32 %v11538_v31, %v8607_v20  ;;  %v10572_v35 = vpop.f32.mrb[240].mxu0  ;;  %v15421_v63 = vadd.f32 %v10251_v47, %v15306_v6 }
 0x862   : > { %8755 = vst [vmem:[%s15381_s27 + $0x3f] sm:$0x1] %v8707_v49  ;;  %v8703_v38 = vadd.f32 %v11539_v12, %v8608_v11  ;;  %v8481_v37 = vadd.f32 %v10572_v35, %v15333_v34  ;;  %v8472_v13 = vpop.f32.mrb[241].mxu0 }
 0x863   : > { %8754 = vst [vmem:[%s15381_s27 + $0x37] sm:$0xff] %v8706_v33  ;;  %8752 = vst [vmem:[%s15381_s27 + $0x2f] sm:$0x1] %v8704_v36  ;;  %v8473_v21 = vadd.f32 %v8472_v13, %v15321_v46  ;;  %v10573_v57 = vpop.f32.mrb[242].mxu0  ;;  %v10252_v26 = vpop.f32.mrb[244].mxu1 }
 0x864   : > { %8751 = vst [vmem:[%s15381_s27 + $0x27] sm:$0xff] %v8703_v38  ;;  %v8615_v16 = vrot.slane %v8481_v37, 7  ;;  %v8484_v50 = vadd.f32 %v10573_v57, %v15336_v23  ;;  %v8475_v6 = vpop.f32.mrb[243].mxu0  ;;  %v10253_v3 = vpop.f32.mrb[245].mxu1  ;;  %v11546_v37 = vld [vmem:[%s11701_s11 + $0xc0] sm:$0xff]  ;;  %v11547_v57 = vld [vmem:[%s11701_s11 + $0xa8] sm:$0xff] }
 0x865   : > { %v8612_v17 = vrot.slane %v8473_v21, 7  ;;  %v8476_v34 = vadd.f32 %v8475_v6, %v15324_v58  ;;  %v10254_v54 = vadd.f32 %v10253_v3, %v10252_v26  ;;  %v10255_v51 = vpop.f32.mrb[246].mxu1  ;;  %v11548_v6 = vld [vmem:[%s11701_s11 + $0xd0] sm:$0x3] }
 0x866   : > { %v8711_v46 = vadd.f32 %v11540_v45, %v8615_v16  ;;  %v8616_v2 = vrot.slane %v8484_v50, 7  ;;  %v10256_v48 = vpop.f32.mrb[247].mxu1 }
 0x867   : > { %v8708_v43 = vadd.f32 %v11541_v44, %v8612_v17  ;;  %v8613_v23 = vrot.slane %v8476_v34, 7  ;;  %v10257_v24 = vadd.f32 %v10256_v48, %v10255_v51  ;;  %v15435_v39 = vadd.f32 %v10254_v54, %v15315_v19  ;;  %v11545_v19 = vld [vmem:[%s11701_s11 + $0x80] sm:$0xff]  ;;  %v11550_v51 = vld [vmem:[%s11701_s11 + $0xb8] sm:$0x3] }
 0x868   : > { %8759 = vst [vmem:[%s15381_s27 + $0x4f] sm:$0xfe] %v8711_v46  ;;  %v8617_v58 = vsel %vm5665_vm4, %v8615_v16, %v8616_v2  ;;  %v8713_v60 = vadd.f32 %v11542_v25, %v8616_v2 }
 0x869   : > { %8756 = vst [vmem:[%s15381_s27 + $0x3f] sm:$0xfe] %v8708_v43  ;;  %v8712_v27 = vadd.f32 %v11543_v41, %v8617_v58  ;;  %v8614_v4 = vsel %vm5665_vm4, %v8612_v17, %v8613_v23  ;;  %v8710_v42 = vadd.f32 %v11544_v28, %v8613_v23  ;;  %v10576_v32 = vpop.f32.mrb[244].mxu0  ;;  %v15445_v20 = vadd.f32 %v10257_v24, %v15318_v5  ;;  %v11549_v17 = vld [vmem:[%s11701_s11 + $0xc8] sm:$0xff] }
 0x86a   : > { %8761 = vst [vmem:[%s15381_s27 + $0x5f] sm:$0x1] %v8713_v60  ;;  %v8709_v47 = vadd.f32 %v11545_v19, %v8614_v4  ;;  %v8497_v1 = vadd.f32 %v10576_v32, %v15357_v29  ;;  %v8488_v15 = vpop.f32.mrb[245].mxu0 }
 0x86b   : > { %8760 = vst [vmem:[%s15381_s27 + $0x57] sm:$0xff] %v8712_v27  ;;  %8758 = vst [vmem:[%s15381_s27 + $0x4f] sm:$0x1] %v8710_v42  ;;  %v8489_v49 = vadd.f32 %v8488_v15, %v15345_v52  ;;  %v10577_v53 = vpop.f32.mrb[246].mxu0  ;;  %v10258_v33 = vpop.f32.mrb[248].mxu1  ;;  %v11552_v42 = vld [vmem:[%s11701_s11 + $0xf0] sm:$0xff] }
 0x86c   : > { %8757 = vst [vmem:[%s15381_s27 + $0x47] sm:$0xff] %v8709_v47  ;;  %v8621_v11 = vrot.slane %v8497_v1, 7  ;;  %v8500_v31 = vadd.f32 %v10577_v53, %v15360_v0  ;;  %v8491_v5 = vpop.f32.mrb[247].mxu0  ;;  %v10259_v36 = vpop.f32.mrb[249].mxu1  ;;  %v11553_v47 = vld [vmem:[%s11701_s11 + $0xd8] sm:$0xff] }
 0x86d   : > { %v8618_v35 = vrot.slane %v8489_v49, 7  ;;  %v8492_v29 = vadd.f32 %v8491_v5, %v15348_v40  ;;  %v10260_v12 = vadd.f32 %v10259_v36, %v10258_v33  ;;  %v10261_v38 = vpop.f32.mrb[250].mxu1  ;;  %v11554_v53 = vld [vmem:[%s11701_s11 + $0x100] sm:$0x3]  ;;  %v11556_v36 = vld [vmem:[%s11701_s11 + $0xe8] sm:$0x3] }
 0x86e   : > { %v8717_v52 = vadd.f32 %v11546_v37, %v8621_v11  ;;  %v8622_v13 = vrot.slane %v8500_v31, 7  ;;  %v10262_v21 = vpop.f32.mrb[251].mxu1 }
 0x86f   : > { %v8714_v26 = vadd.f32 %v11547_v57, %v8618_v35  ;;  %v8619_v0 = vrot.slane %v8492_v29, 7  ;;  %v10263_v16 = vadd.f32 %v10262_v21, %v10261_v38  ;;  %v15459_v50 = vadd.f32 %v10260_v12, %v15327_v61  ;;  %v11551_v61 = vld [vmem:[%s11701_s11 + $0xb0] sm:$0xff] }
 0x870   : > { %8765 = vst [vmem:[%s15381_s27 + $0x6f] sm:$0xfe] %v8717_v52  ;;  %v8623_v40 = vsel %vm5665_vm4, %v8621_v11, %v8622_v13  ;;  %v8719_v3 = vadd.f32 %v11548_v6, %v8622_v13  ;;  %v11555_v11 = vld [vmem:[%s11701_s11 + $0xf8] sm:$0xff] }
 0x871   : > { %8762 = vst [vmem:[%s15381_s27 + $0x5f] sm:$0xfe] %v8714_v26  ;;  %v8718_v34 = vadd.f32 %v11549_v17, %v8623_v40  ;;  %v8620_v54 = vsel %vm5665_vm4, %v8618_v35, %v8619_v0  ;;  %v8716_v45 = vadd.f32 %v11550_v51, %v8619_v0  ;;  %v10580_v46 = vpop.f32.mrb[248].mxu0  ;;  %v15469_v2 = vadd.f32 %v10263_v16, %v15330_v18  ;;  %v11558_v17 = vld [vmem:[%s11701_s11 + $0x120] sm:$0xff]  ;;  %v11559_v51 = vld [vmem:[%s11701_s11 + $0x108] sm:$0xff] }
 0x872   : > { %8767 = vst [vmem:[%s15381_s27 + $0x7f] sm:$0x1] %v8719_v3  ;;  %v8715_v48 = vadd.f32 %v11551_v61, %v8620_v54  ;;  %v8513_v44 = vadd.f32 %v10580_v46, %v15387_v9  ;;  %v8504_v43 = vpop.f32.mrb[249].mxu0 }
 0x873   : > { %8766 = vst [vmem:[%s15381_s27 + $0x77] sm:$0xff] %v8718_v34  ;;  %8764 = vst [vmem:[%s15381_s27 + $0x6f] sm:$0x1] %v8716_v45  ;;  %v8505_v23 = vadd.f32 %v8504_v43, %v15369_v10  ;;  %v10581_v24 = vpop.f32.mrb[250].mxu0  ;;  %v10264_v58 = vpop.f32.mrb[252].mxu1  ;;  %v11561_v43 = vld [vmem:[%s11701_s11 + $0x128] sm:$0xff] }
 0x874   : > { %8763 = vst [vmem:[%s15381_s27 + $0x67] sm:$0xff] %v8715_v48  ;;  %v8627_v25 = vrot.slane %v8513_v44, 7  ;;  %v8516_v60 = vadd.f32 %v10581_v24, %v15397_v14  ;;  %v8507_v18 = vpop.f32.mrb[251].mxu0  ;;  %v10265_v41 = vpop.f32.mrb[253].mxu1  ;;  %v11560_v48 = vld [vmem:[%s11701_s11 + $0x130] sm:$0x3] }
 0x875   : > { %v8624_v27 = vrot.slane %v8505_v23, 7  ;;  %v8508_v9 = vadd.f32 %v8507_v18, %v15372_v59  ;;  %v10266_v4 = vadd.f32 %v10265_v41, %v10264_v58  ;;  %v10267_v28 = vpop.f32.mrb[254].mxu1  ;;  %v11562_v58 = vld [vmem:[%s11701_s11 + $0x118] sm:$0x3] }
 0x876   : > { %v8723_v10 = vadd.f32 %v11552_v42, %v8627_v25  ;;  %v8628_v32 = vrot.slane %v8516_v60, 7  ;;  %v10268_v19 = vpop.f32.mrb[255].mxu1 }
 0x877   : > { %v8720_v1 = vadd.f32 %v11553_v47, %v8624_v27  ;;  %v8625_v14 = vrot.slane %v8508_v9, 7  ;;  %v10269_v15 = vadd.f32 %v10268_v19, %v10267_v28  ;;  %v8384_v49 = vadd.f32 %v10266_v4, %v15339_v30  ;;  %v11557_v30 = vld [vmem:[%s11701_s11 + $0xe0] sm:$0xff] }
 0x878   : > { %8771 = vst [vmem:[%s15381_s27 + $0x8f] sm:$0xfe] %v8723_v10  ;;  %v8629_v59 = vsel %vm5665_vm4, %v8627_v25, %v8628_v32  ;;  %v8725_v33 = vadd.f32 %v11554_v53, %v8628_v32 }
 0x879   : > { %8768 = vst [vmem:[%s15381_s27 + $0x7f] sm:$0xfe] %v8720_v1  ;;  %v8724_v31 = vadd.f32 %v11555_v11, %v8629_v59  ;;  %v8626_v5 = vsel %vm5665_vm4, %v8624_v27, %v8625_v14  ;;  %v8722_v35 = vadd.f32 %v11556_v36, %v8625_v14  ;;  %v10584_v29 = vpop.f32.mrb[252].mxu0  ;;  %v8387_v12 = vadd.f32 %v10269_v15, %v15342_v55 }
 0x87a   : > { %8773 = vst [vmem:[%s15381_s27 + $0x9f] sm:$0x1] %v8725_v33  ;;  %v8721_v38 = vadd.f32 %v11557_v30, %v8626_v5  ;;  %v8529_v37 = vadd.f32 %v10584_v29, %v15435_v39  ;;  %v8520_v52 = vpop.f32.mrb[253].mxu0  ;;  %v11565_v33 = vld [vmem:[%s11701_s11 + $0x138] sm:$0xff] }
 0x87b   : > { %8772 = vst [vmem:[%s15381_s27 + $0x97] sm:$0xff] %v8724_v31  ;;  %8770 = vst [vmem:[%s15381_s27 + $0x8f] sm:$0x1] %v8722_v35  ;;  %v8521_v13 = vadd.f32 %v8520_v52, %v15411_v7  ;;  %v10585_v21 = vpop.f32.mrb[254].mxu0  ;;  %v10270_v57 = vpop.f32.mrb[0].mxu1 }
 0x87c   : > { %8769 = vst [vmem:[%s15381_s27 + $0x87] sm:$0xff] %v8721_v38  ;;  %v8633_v26 = vrot.slane %v8529_v37, 7  ;;  %v8532_v0 = vadd.f32 %v10585_v21, %v15445_v20  ;;  %v8523_v55 = vpop.f32.mrb[255].mxu0  ;;  %v10271_v16 = vpop.f32.mrb[1].mxu1  ;;  %v11566_v35 = vld [vmem:[%s11701_s11 + $0x160] sm:$0x3] }
 0x87d   : > { %v8630_v40 = vrot.slane %v8521_v13, 7  ;;  %v8524_v39 = vadd.f32 %v8523_v55, %v15421_v63  ;;  %v10272_v6 = vadd.f32 %v10271_v16, %v10270_v57  ;;  %v10273_v3 = vpop.f32.mrb[2].mxu1  ;;  %v11568_v37 = vld [vmem:[%s11701_s11 + $0x148] sm:$0x3] }
 0x87e   : > { %v8729_v7 = vadd.f32 %v11558_v17, %v8633_v26  ;;  %v8634_v34 = vrot.slane %v8532_v0, 7  ;;  %v10274_v54 = vpop.f32.mrb[3].mxu1  ;;  %v11570_v17 = vld [vmem:[%s11701_s11 + $0x180] sm:$0xff] }
 0x87f   : > { %v8726_v45 = vadd.f32 %v11559_v51, %v8630_v40  ;;  %v8631_v20 = vrot.slane %v8524_v39, 7  ;;  %v10275_v46 = vadd.f32 %v10274_v54, %v10273_v3  ;;  %v8392_v61 = vadd.f32 %v10272_v6, %v15351_v56  ;;  %v11563_v56 = vld [vmem:[%s11701_s11 + $0x110] sm:$0xff]  ;;  %v11571_v54 = vld [vmem:[%s11701_s11 + $0x168] sm:$0xff] }
 0x880   : > { %8777 = vst [vmem:[%s15381_s27 + $0xaf] sm:$0xfe] %v8729_v7  ;;  %v8635_v63 = vsel %vm5665_vm4, %v8633_v26, %v8634_v34  ;;  %v8731_v44 = vadd.f32 %v11560_v48, %v8634_v34 }
 0x881   : > { %8774 = vst [vmem:[%s15381_s27 + $0x9f] sm:$0xfe] %v8726_v45  ;;  %v8730_v23 = vadd.f32 %v11561_v43, %v8635_v63  ;;  %v8632_v24 = vsel %vm5665_vm4, %v8630_v40, %v8631_v20  ;;  %v8728_v25 = vadd.f32 %v11562_v58, %v8631_v20  ;;  %v10588_v60 = vpop.f32.mrb[0].mxu0  ;;  %v8395_v18 = vadd.f32 %v10275_v46, %v15354_v22  ;;  %v11572_v46 = vld [vmem:[%s11701_s11 + $0x190] sm:$0x3]  ;;  %v11573_v63 = vld [vmem:[%s11701_s11 + $0x188] sm:$0xff] }
 0x882   : > { %8779 = vst [vmem:[%s15381_s27 + $0xbf] sm:$0x1] %v8731_v44  ;;  %v8727_v41 = vadd.f32 %v11563_v56, %v8632_v24  ;;  %v8545_v27 = vadd.f32 %v10588_v60, %v8384_v49  ;;  %v8536_v9 = vpop.f32.mrb[1].mxu0  ;;  %v11564_v49 = vld [vmem:[%s11701_s11 + $0x150] sm:$0xff]  ;;  %v11574_v43 = vld [vmem:[%s11701_s11 + $0x178] sm:$0x3] }
 0x883   : > { %8778 = vst [vmem:[%s15381_s27 + $0xb7] sm:$0xff] %v8730_v23  ;;  %8776 = vst [vmem:[%s15381_s27 + $0xaf] sm:$0x1] %v8728_v25  ;;  %v8537_v4 = vadd.f32 %v8536_v9, %v15459_v50  ;;  %v10589_v28 = vpop.f32.mrb[2].mxu0  ;;  %v10276_v42 = vpop.f32.mrb[4].mxu1  ;;  %v11575_v24 = vld [vmem:[%s11701_s11 + $0x170] sm:$0xff] }
 0x884   : > { %8775 = vst [vmem:[%s15381_s27 + $0xa7] sm:$0xff] %v8727_v41  ;;  %v8639_v10 = vrot.slane %v8545_v27, 7  ;;  %v8548_v32 = vadd.f32 %v10589_v28, %v8387_v12  ;;  %v8539_v19 = vpop.f32.mrb[3].mxu0  ;;  %v10277_v47 = vpop.f32.mrb[5].mxu1  ;;  %v11567_v12 = vld [vmem:[%s11701_s11 + $0x158] sm:$0xff] }
 0x885   : > { %v8636_v22 = vrot.slane %v8537_v4, 7  ;;  %v8540_v1 = vadd.f32 %v8539_v19, %v15469_v2  ;;  %v10278_v14 = vadd.f32 %v10277_v47, %v10276_v42  ;;  %v10279_v15 = vpop.f32.mrb[6].mxu1 }
 0x886   : > { %v8735_v59 = vadd.f32 %v11564_v49, %v8639_v10  ;;  %v8640_v50 = vrot.slane %v8548_v32, 7  ;;  %v10280_v53 = vpop.f32.mrb[7].mxu1 }
 0x887   : > { %v8732_v11 = vadd.f32 %v11565_v33, %v8636_v22  ;;  %v8637_v31 = vrot.slane %v8540_v1, 7  ;;  %v10281_v5 = vadd.f32 %v10280_v53, %v10279_v15  ;;  %v8400_v36 = vadd.f32 %v10278_v14, %v15363_v8  ;;  %v11569_v8 = vld [vmem:[%s11701_s11 + $0x140] sm:$0xff] }
 0x888   : > { %8783 = vst [vmem:[%s15381_s27 + $0xcf] sm:$0xfe] %v8735_v59  ;;  %v8641_v2 = vsel %vm5665_vm4, %v8639_v10, %v8640_v50  ;;  %v8737_v29 = vadd.f32 %v11566_v35, %v8640_v50 }
 0x889   : > { %8780 = vst [vmem:[%s15381_s27 + $0xbf] sm:$0xfe] %v8732_v11  ;;  %v8736_v30 = vadd.f32 %v11567_v12, %v8641_v2  ;;  %v8638_v38 = vsel %vm5665_vm4, %v8636_v22, %v8637_v31  ;;  %v8734_v52 = vadd.f32 %v11568_v37, %v8637_v31  ;;  %v10592_v13 = vpop.f32.mrb[4].mxu0  ;;  %v8403_v21 = vadd.f32 %v10281_v5, %v15366_v62 }
 0x88a   : > { %8785 = vst [vmem:[%s15381_s27 + $0xdf] sm:$0x1] %v8737_v29  ;;  %v8733_v57 = vadd.f32 %v11569_v8, %v8638_v38  ;;  %v8561_v26 = vadd.f32 %v10592_v13, %v8400_v36  ;;  %v8552_v0 = vpop.f32.mrb[5].mxu0 }
 0x88b   : > { %8784 = vst [vmem:[%s15381_s27 + $0xd7] sm:$0xff] %v8736_v30  ;;  %8782 = vst [vmem:[%s15381_s27 + $0xcf] sm:$0x1] %v8734_v52  ;;  %v8553_v55 = vadd.f32 %v8552_v0, %v8392_v61  ;;  %v10593_v16 = vpop.f32.mrb[6].mxu0 }
 0x88c   : > { %8781 = vst [vmem:[%s15381_s27 + $0xc7] sm:$0xff] %v8733_v57  ;;  %v8645_v40 = vrot.slane %v8561_v26, 7  ;;  %v8564_v39 = vadd.f32 %v10593_v16, %v8403_v21  ;;  %v8555_v6 = vpop.f32.mrb[7].mxu0 }
 0x88d   : > { %v8642_v62 = vrot.slane %v8553_v55, 7  ;;  %v8556_v3 = vadd.f32 %v8555_v6, %v8395_v18 }
 0x88e   : > { %v8741_v7 = vadd.f32 %v11570_v17, %v8645_v40  ;;  %v8646_v34 = vrot.slane %v8564_v39, 7 }
 0x88f   : > { %v8738_v51 = vadd.f32 %v11571_v54, %v8642_v62  ;;  %v8643_v45 = vrot.slane %v8556_v3, 7 }
 0x890   : > { %8789 = vst [vmem:[%s15381_s27 + $0xef] sm:$0xfe] %v8741_v7  ;;  %v8647_v20 = vsel %vm5665_vm4, %v8645_v40, %v8646_v34  ;;  %v8743_v61 = vadd.f32 %v11572_v46, %v8646_v34 }
 0x891   : > { %8786 = vst [vmem:[%s15381_s27 + $0xdf] sm:$0xfe] %v8738_v51  ;;  %v8742_v48 = vadd.f32 %v11573_v63, %v8647_v20  ;;  %v8644_v44 = vsel %vm5665_vm4, %v8642_v62, %v8643_v45  ;;  %v8740_v23 = vadd.f32 %v11574_v43, %v8643_v45 }
 0x892   : > { %8791 = vst [vmem:[%s15381_s27 + $0xff] sm:$0x1] %v8743_v61  ;;  %v8739_v58 = vadd.f32 %v11575_v24, %v8644_v44 }
 0x893   : > { %8790 = vst [vmem:[%s15381_s27 + $0xf7] sm:$0xff] %v8742_v48  ;;  %8788 = vst [vmem:[%s15381_s27 + $0xef] sm:$0x1] %v8740_v23 }
 0x894   : > { %8787 = vst [vmem:[%s15381_s27 + $0xe7] sm:$0xff] %v8739_v58 }
 0x895 PF: > { %s13_s12 = sadd.s32 1, %s11582_s12  }
 0x896   : > { %p10_p4 = scmp.ge.s32.totalorder %s13_s12, 4  }
 0x898   :  { %12 = sbr.rel (!%p10_p4) target bundleno = 1 (0x1), region = 64 }

</bundles_post_ra>
